<compile_context>
chip_gen: v7x
topology: tpu7x:2x2x1
jax: 0.10.0
libtpu: 0.0.40
codegen_flags: <defaults>
</compile_context>

<pallas_src>
import functools

import jax
import jax.numpy as jnp
from jax.experimental import pallas as pl
from jax.experimental.pallas import tpu as pltpu


# ----------------------------------------------------------------------------
# Fused Pallas kernel: entire MLP generator in one invocation.
# Weights arrive as HBM refs; each is DMA'd into a dedicated VMEM scratch
# buffer. Intermediate activations never touch HBM.
# ----------------------------------------------------------------------------
def _fused_generator_kernel(x_ref,
                            w1_hbm, b1_ref,
                            w2_hbm, b2_ref,
                            w3_hbm, b3_ref,
                            w4_hbm, b4_ref,
                            o_ref,
                            w1_buf, w2_buf, w3_buf, w4_buf,
                            sems):
    # Issue all four weight DMAs up front; wait per layer right before the dot
    # so later-layer weight streaming overlaps earlier-layer compute.
    copies = []
    for i, (hbm, buf) in enumerate(((w1_hbm, w1_buf), (w2_hbm, w2_buf),
                                    (w3_hbm, w3_buf), (w4_hbm, w4_buf))):
        cp = pltpu.make_async_copy(hbm, buf, sems.at[i])
        cp.start()
        copies.append(cp)

    def layer(h, cp, w_buf, b_ref, act):
        cp.wait()                                    # weight now in VMEM
        # bf16 x bf16 matmul on the MXU, fp32 accumulation.
        y = jnp.dot(h.astype(w_buf.dtype), w_buf[...],
                    preferred_element_type=jnp.float32)
        y = y + b_ref[...]                           # (B, N) + (1, N), fp32
        if act == "relu":
            return jnp.maximum(y, 0.0)
        return jnp.tanh(y)                           # fp32 tanh (EUP slot)

    h = x_ref[...]                                   # (B_pad, K0) fp32
    h = layer(h, copies[0], w1_buf, b1_ref, "relu")
    h = layer(h, copies[1], w2_buf, b2_ref, "relu")
    h = layer(h, copies[2], w3_buf, b3_ref, "relu")
    h = layer(h, copies[3], w4_buf, b4_ref, "tanh")
    o_ref[...] = h.astype(o_ref.dtype)


def fused_generator_pallas(x, params):
    """Run the full 4-layer generator MLP in a single fused Pallas call.

    x:      (B, input_dim) float32
    params: list of 4 (w, b) pairs, w: (K, N) bfloat16, b: (1, N) float32
    returns (B, output_size) float32
    """
    B, _ = x.shape
    # Pad batch to a multiple of 16 sublanes: the matmul LHS is cast to bf16,
    # which packs 16 rows per vreg -> full, unmasked vregs and stores.
    B_pad = ((B + 15) // 16) * 16
    if B_pad != B:
        x = jnp.pad(x, ((0, B_pad - B), (0, 0)))

    n_out = params[-1][0].shape[1]

    flat_args = [x]
    in_specs = [pl.BlockSpec(memory_space=pltpu.MemorySpace.VMEM)]  # x: tiny
    scratch_shapes = []
    for w, b in params:
        flat_args.extend((w, b))
        # Weights: leave in HBM, DMA manually inside the kernel.
        in_specs.append(pl.BlockSpec(memory_space=pl.ANY))
        # Biases: tiny, let Pallas place them in VMEM.
        in_specs.append(pl.BlockSpec(memory_space=pltpu.MemorySpace.VMEM))
        scratch_shapes.append(pltpu.VMEM(w.shape, w.dtype))
    scratch_shapes.append(pltpu.SemaphoreType.DMA((4,)))

    weight_bytes = sum(int(w.size) * w.dtype.itemsize for w, _ in params)
    bias_bytes = sum(int(b.size) * b.dtype.itemsize for _, b in params)
    io_bytes = int(x.size) * 4 + B_pad * n_out * 4
    # Single-buffered residency (weights in scratch, biases/x/out) + headroom
    # for activation temporaries and compiler-internal scratch.
    vmem_limit = int(weight_bytes + bias_bytes + io_bytes + (8 << 20))

    flops = 2 * B_pad * sum(int(w.shape[0]) * int(w.shape[1]) for w, _ in params)
    cost = pl.CostEstimate(flops=flops,
                           transcendentals=B_pad * n_out,
                           bytes_accessed=weight_bytes + bias_bytes + io_bytes)

    out = pl.pallas_call(
        _fused_generator_kernel,
        out_shape=jax.ShapeDtypeStruct((B_pad, n_out), jnp.float32),
        in_specs=in_specs,
        out_specs=pl.BlockSpec(memory_space=pltpu.MemorySpace.VMEM),
        scratch_shapes=scratch_shapes,
        compiler_params=pltpu.CompilerParams(vmem_limit_bytes=vmem_limit),
        cost_estimate=cost,
    )(*flat_args)

    # Padded rows carry bias+tanh garbage; always slice back to the real batch.
    return out[:B]


# ----------------------------------------------------------------------------
# Parameter construction + forward
# ----------------------------------------------------------------------------
def init_simple_generator_params(key, input_dim, output_shape):
    """nn.Linear-style init U(-1/sqrt(fan_in), 1/sqrt(fan_in)).

    Weights stored (in_features, out_features) in bfloat16; biases fp32.
    """
    output_size = int(output_shape[0] * output_shape[1] * output_shape[2])
    dims = [input_dim, 512, 1024, 2048, output_size]
    params = []
    for i in range(4):
        key, kw, kb = jax.random.split(key, 3)
        fan_in, fan_out = dims[i], dims[i + 1]
        bound = 1.0 / float(fan_in) ** 0.5
        w = jax.random.uniform(kw, (fan_in, fan_out), jnp.float32, -bound, bound)
        b = jax.random.uniform(kb, (1, fan_out), jnp.float32, -bound, bound)
        params.append((w.astype(jnp.bfloat16), b))
    return params


@functools.partial(jax.jit, static_argnums=2)
def simple_generator_forward(params, x, output_shape):
    """x (B, input_dim) -> (B, C, H, W), matching
    `self.main(input).view(-1, *output_shape)` of the PyTorch module."""
    h = fused_generator_pallas(x, params)
    return h.reshape(h.shape[0], *output_shape)


# Pure-JAX reference with identical numerics (bf16 weights, fp32 accumulate).
# NOTE: this matches the kernel's bf16 weight path, not a true fp32 torch
# reference; tanh saturation + fp32 accumulation keep the drift small.
def _reference_forward(params, x, output_shape):
    acts = ("relu", "relu", "relu", "tanh")
    h = x
    for (w, b), act in zip(params, acts):
        y = jnp.dot(h.astype(w.dtype), w, preferred_element_type=jnp.float32) + b
        h = jnp.maximum(y, 0.0) if act == "relu" else jnp.tanh(y)
    return h.reshape(h.shape[0], *output_shape)


if __name__ == "__main__":
    key = jax.random.PRNGKey(0)
    key_params, key_x = jax.random.split(key)

    # Small, forward-consistent shapes: latent z of dim 64, output (3, 16, 16).
    batch = 2
    input_dim = 64
    output_shape = (3, 16, 16)

    params = init_simple_generator_params(key_params, input_dim, output_shape)
    z = jax.random.normal(key_x, (batch, input_dim), jnp.float32)

    out = simple_generator_forward(params, z, output_shape)
    out = jax.block_until_ready(out)

    ref = _reference_forward(params, z, output_shape)
    assert out.shape == (batch, *output_shape), out.shape
    assert jnp.allclose(out, ref, atol=1e-3, rtol=1e-3), "mismatch vs reference"

    print("KERNEL_OK")
</pallas_src>

<mosaic_0001>
module attributes {stable_mosaic.version = 11 : i64} {
  func.func @_fused_generator_kernel(%arg0: memref<16x64xf32, #tpu.memory_space<vmem>>, %arg1: memref<64x512xbf16, #tpu.memory_space<any>>, %arg2: memref<1x512xf32, #tpu.memory_space<vmem>>, %arg3: memref<512x1024xbf16, #tpu.memory_space<any>>, %arg4: memref<1x1024xf32, #tpu.memory_space<vmem>>, %arg5: memref<1024x2048xbf16, #tpu.memory_space<any>>, %arg6: memref<1x2048xf32, #tpu.memory_space<vmem>>, %arg7: memref<2048x768xbf16, #tpu.memory_space<any>>, %arg8: memref<1x768xf32, #tpu.memory_space<vmem>>, %arg9: memref<16x768xf32, #tpu.memory_space<vmem>>, %arg10: memref<64x512xbf16, #tpu.memory_space<vmem>>, %arg11: memref<512x1024xbf16, #tpu.memory_space<vmem>>, %arg12: memref<1024x2048xbf16, #tpu.memory_space<vmem>>, %arg13: memref<2048x768xbf16, #tpu.memory_space<vmem>>, %arg14: memref<4x!tpu.dma_semaphore, #tpu.memory_space<semaphore_mem>>) attributes {dimension_semantics = [], scalar_prefetch = 0 : i64, scratch_operands = 5 : i64, tpu.core_type = #tpu.core_type<tc>} {
    %c0_i32 = arith.constant 0 : i32
    %0 = tpu.memref_slice %arg14[%c0_i32] : memref<4x!tpu.dma_semaphore, #tpu.memory_space<semaphore_mem>> -> memref<1x!tpu.dma_semaphore, #tpu.memory_space<semaphore_mem>>
    %1 = tpu.memref_squeeze %0 : memref<1x!tpu.dma_semaphore, #tpu.memory_space<semaphore_mem>> -> memref<!tpu.dma_semaphore, #tpu.memory_space<semaphore_mem>>
    tpu.enqueue_dma source(%arg1 : memref<64x512xbf16, #tpu.memory_space<any>>) target(%arg10 : memref<64x512xbf16, #tpu.memory_space<vmem>>) target_semaphore(%1 : memref<!tpu.dma_semaphore, #tpu.memory_space<semaphore_mem>>)
    %c1_i32 = arith.constant 1 : i32
    %2 = tpu.memref_slice %arg14[%c1_i32] : memref<4x!tpu.dma_semaphore, #tpu.memory_space<semaphore_mem>> -> memref<1x!tpu.dma_semaphore, #tpu.memory_space<semaphore_mem>>
    %3 = tpu.memref_squeeze %2 : memref<1x!tpu.dma_semaphore, #tpu.memory_space<semaphore_mem>> -> memref<!tpu.dma_semaphore, #tpu.memory_space<semaphore_mem>>
    tpu.enqueue_dma source(%arg3 : memref<512x1024xbf16, #tpu.memory_space<any>>) target(%arg11 : memref<512x1024xbf16, #tpu.memory_space<vmem>>) target_semaphore(%3 : memref<!tpu.dma_semaphore, #tpu.memory_space<semaphore_mem>>)
    %c2_i32 = arith.constant 2 : i32
    %4 = tpu.memref_slice %arg14[%c2_i32] : memref<4x!tpu.dma_semaphore, #tpu.memory_space<semaphore_mem>> -> memref<1x!tpu.dma_semaphore, #tpu.memory_space<semaphore_mem>>
    %5 = tpu.memref_squeeze %4 : memref<1x!tpu.dma_semaphore, #tpu.memory_space<semaphore_mem>> -> memref<!tpu.dma_semaphore, #tpu.memory_space<semaphore_mem>>
    tpu.enqueue_dma source(%arg5 : memref<1024x2048xbf16, #tpu.memory_space<any>>) target(%arg12 : memref<1024x2048xbf16, #tpu.memory_space<vmem>>) target_semaphore(%5 : memref<!tpu.dma_semaphore, #tpu.memory_space<semaphore_mem>>)
    %c3_i32 = arith.constant 3 : i32
    %6 = tpu.memref_slice %arg14[%c3_i32] : memref<4x!tpu.dma_semaphore, #tpu.memory_space<semaphore_mem>> -> memref<1x!tpu.dma_semaphore, #tpu.memory_space<semaphore_mem>>
    %7 = tpu.memref_squeeze %6 : memref<1x!tpu.dma_semaphore, #tpu.memory_space<semaphore_mem>> -> memref<!tpu.dma_semaphore, #tpu.memory_space<semaphore_mem>>
    tpu.enqueue_dma source(%arg7 : memref<2048x768xbf16, #tpu.memory_space<any>>) target(%arg13 : memref<2048x768xbf16, #tpu.memory_space<vmem>>) target_semaphore(%7 : memref<!tpu.dma_semaphore, #tpu.memory_space<semaphore_mem>>)
    %c0 = arith.constant 0 : index
    %c0_0 = arith.constant 0 : index
    %8 = vector.load %arg0[%c0, %c0_0] : memref<16x64xf32, #tpu.memory_space<vmem>>, vector<16x64xf32>
    %c0_i32_1 = arith.constant 0 : i32
    %9 = tpu.memref_slice %arg14[%c0_i32_1] : memref<4x!tpu.dma_semaphore, #tpu.memory_space<semaphore_mem>> -> memref<1x!tpu.dma_semaphore, #tpu.memory_space<semaphore_mem>>
    %10 = tpu.memref_squeeze %9 : memref<1x!tpu.dma_semaphore, #tpu.memory_space<semaphore_mem>> -> memref<!tpu.dma_semaphore, #tpu.memory_space<semaphore_mem>>
    tpu.wait_dma2 semaphore(%10 : memref<!tpu.dma_semaphore, #tpu.memory_space<semaphore_mem>>) src(%arg1 : memref<64x512xbf16, #tpu.memory_space<any>>) dst(%arg10 : memref<64x512xbf16, #tpu.memory_space<vmem>>)
    %11 = arith.truncf %8 : vector<16x64xf32> to vector<16x64xbf16>
    %c0_2 = arith.constant 0 : index
    %c0_3 = arith.constant 0 : index
    %12 = vector.load %arg10[%c0_2, %c0_3] : memref<64x512xbf16, #tpu.memory_space<vmem>>, vector<64x512xbf16>
    %cst = arith.constant dense<0.000000e+00> : vector<16x512xf32>
    %13 = tpu.matmul %11, %12, %cst {dimension_numbers = #tpu.dot_dimension_numbers<[1], [0], [0], [1], [0, 0, 1, 1], [], []>} : vector<16x64xbf16>, vector<64x512xbf16>, vector<16x512xf32> -> vector<16x512xf32>
    %c0_4 = arith.constant 0 : index
    %c0_5 = arith.constant 0 : index
    %14 = vector.load %arg2[%c0_4, %c0_5] : memref<1x512xf32, #tpu.memory_space<vmem>>, vector<1x512xf32>
    %15 = vector.broadcast %14 : vector<1x512xf32> to vector<16x512xf32>
    %16 = arith.addf %13, %15 : vector<16x512xf32>
    %cst_6 = arith.constant 0.000000e+00 : f32
    %17 = vector.broadcast %cst_6 : f32 to vector<16x512xf32>
    %18 = arith.maximumf %16, %17 : vector<16x512xf32>
    %c1_i32_7 = arith.constant 1 : i32
    %19 = tpu.memref_slice %arg14[%c1_i32_7] : memref<4x!tpu.dma_semaphore, #tpu.memory_space<semaphore_mem>> -> memref<1x!tpu.dma_semaphore, #tpu.memory_space<semaphore_mem>>
    %20 = tpu.memref_squeeze %19 : memref<1x!tpu.dma_semaphore, #tpu.memory_space<semaphore_mem>> -> memref<!tpu.dma_semaphore, #tpu.memory_space<semaphore_mem>>
    tpu.wait_dma2 semaphore(%20 : memref<!tpu.dma_semaphore, #tpu.memory_space<semaphore_mem>>) src(%arg3 : memref<512x1024xbf16, #tpu.memory_space<any>>) dst(%arg11 : memref<512x1024xbf16, #tpu.memory_space<vmem>>)
    %21 = arith.truncf %18 : vector<16x512xf32> to vector<16x512xbf16>
    %c0_8 = arith.constant 0 : index
    %c0_9 = arith.constant 0 : index
    %22 = vector.load %arg11[%c0_8, %c0_9] : memref<512x1024xbf16, #tpu.memory_space<vmem>>, vector<512x1024xbf16>
    %cst_10 = arith.constant dense<0.000000e+00> : vector<16x1024xf32>
    %23 = tpu.matmul %21, %22, %cst_10 {dimension_numbers = #tpu.dot_dimension_numbers<[1], [0], [0], [1], [0, 0, 1, 1], [], []>} : vector<16x512xbf16>, vector<512x1024xbf16>, vector<16x1024xf32> -> vector<16x1024xf32>
    %c0_11 = arith.constant 0 : index
    %c0_12 = arith.constant 0 : index
    %24 = vector.load %arg4[%c0_11, %c0_12] : memref<1x1024xf32, #tpu.memory_space<vmem>>, vector<1x1024xf32>
    %25 = vector.broadcast %24 : vector<1x1024xf32> to vector<16x1024xf32>
    %26 = arith.addf %23, %25 : vector<16x1024xf32>
    %cst_13 = arith.constant 0.000000e+00 : f32
    %27 = vector.broadcast %cst_13 : f32 to vector<16x1024xf32>
    %28 = arith.maximumf %26, %27 : vector<16x1024xf32>
    %c2_i32_14 = arith.constant 2 : i32
    %29 = tpu.memref_slice %arg14[%c2_i32_14] : memref<4x!tpu.dma_semaphore, #tpu.memory_space<semaphore_mem>> -> memref<1x!tpu.dma_semaphore, #tpu.memory_space<semaphore_mem>>
    %30 = tpu.memref_squeeze %29 : memref<1x!tpu.dma_semaphore, #tpu.memory_space<semaphore_mem>> -> memref<!tpu.dma_semaphore, #tpu.memory_space<semaphore_mem>>
    tpu.wait_dma2 semaphore(%30 : memref<!tpu.dma_semaphore, #tpu.memory_space<semaphore_mem>>) src(%arg5 : memref<1024x2048xbf16, #tpu.memory_space<any>>) dst(%arg12 : memref<1024x2048xbf16, #tpu.memory_space<vmem>>)
    %31 = arith.truncf %28 : vector<16x1024xf32> to vector<16x1024xbf16>
    %c0_15 = arith.constant 0 : index
    %c0_16 = arith.constant 0 : index
    %32 = vector.load %arg12[%c0_15, %c0_16] : memref<1024x2048xbf16, #tpu.memory_space<vmem>>, vector<1024x2048xbf16>
    %cst_17 = arith.constant dense<0.000000e+00> : vector<16x2048xf32>
    %33 = tpu.matmul %31, %32, %cst_17 {dimension_numbers = #tpu.dot_dimension_numbers<[1], [0], [0], [1], [0, 0, 1, 1], [], []>} : vector<16x1024xbf16>, vector<1024x2048xbf16>, vector<16x2048xf32> -> vector<16x2048xf32>
    %c0_18 = arith.constant 0 : index
    %c0_19 = arith.constant 0 : index
    %34 = vector.load %arg6[%c0_18, %c0_19] : memref<1x2048xf32, #tpu.memory_space<vmem>>, vector<1x2048xf32>
    %35 = vector.broadcast %34 : vector<1x2048xf32> to vector<16x2048xf32>
    %36 = arith.addf %33, %35 : vector<16x2048xf32>
    %cst_20 = arith.constant 0.000000e+00 : f32
    %37 = vector.broadcast %cst_20 : f32 to vector<16x2048xf32>
    %38 = arith.maximumf %36, %37 : vector<16x2048xf32>
    %c3_i32_21 = arith.constant 3 : i32
    %39 = tpu.memref_slice %arg14[%c3_i32_21] : memref<4x!tpu.dma_semaphore, #tpu.memory_space<semaphore_mem>> -> memref<1x!tpu.dma_semaphore, #tpu.memory_space<semaphore_mem>>
    %40 = tpu.memref_squeeze %39 : memref<1x!tpu.dma_semaphore, #tpu.memory_space<semaphore_mem>> -> memref<!tpu.dma_semaphore, #tpu.memory_space<semaphore_mem>>
    tpu.wait_dma2 semaphore(%40 : memref<!tpu.dma_semaphore, #tpu.memory_space<semaphore_mem>>) src(%arg7 : memref<2048x768xbf16, #tpu.memory_space<any>>) dst(%arg13 : memref<2048x768xbf16, #tpu.memory_space<vmem>>)
    %41 = arith.truncf %38 : vector<16x2048xf32> to vector<16x2048xbf16>
    %c0_22 = arith.constant 0 : index
    %c0_23 = arith.constant 0 : index
    %42 = vector.load %arg13[%c0_22, %c0_23] : memref<2048x768xbf16, #tpu.memory_space<vmem>>, vector<2048x768xbf16>
    %cst_24 = arith.constant dense<0.000000e+00> : vector<16x768xf32>
    %43 = tpu.matmul %41, %42, %cst_24 {dimension_numbers = #tpu.dot_dimension_numbers<[1], [0], [0], [1], [0, 0, 1, 1], [], []>} : vector<16x2048xbf16>, vector<2048x768xbf16>, vector<16x768xf32> -> vector<16x768xf32>
    %c0_25 = arith.constant 0 : index
    %c0_26 = arith.constant 0 : index
    %44 = vector.load %arg8[%c0_25, %c0_26] : memref<1x768xf32, #tpu.memory_space<vmem>>, vector<1x768xf32>
    %45 = vector.broadcast %44 : vector<1x768xf32> to vector<16x768xf32>
    %46 = arith.addf %43, %45 : vector<16x768xf32>
    %47 = math.tanh %46 : vector<16x768xf32>
    %c0_27 = arith.constant 0 : index
    %c0_28 = arith.constant 0 : index
    %48 = vector.load %arg9[%c0_27, %c0_28] : memref<16x768xf32, #tpu.memory_space<vmem>>, vector<16x768xf32>
    tpu.vector_store %arg9[%c0_27, %c0_28], %47 {strides = array<i32>} : memref<16x768xf32, #tpu.memory_space<vmem>>, vector<16x768xf32>,
    return
  }
}

</mosaic_0001>

<bundles_post_ra>
// kernel: simple_generator_forward.1
= control target key start
LH: loop header
LB: loop body
LE: loop exit
PB: predicated region body
PF: predicated region fallthrough
CT: control target
= control target key end

     0   :  { %14 = vsyncpa [#allocation8], 0  ;;  %s6637_s0 = inlined_call_operand.vmem [shape: f32[16,64], index: 0, kind: input, shape index: {}]   ;;  %s6638_s1 = inlined_call_operand.hbm [shape: bf16[64,512], index: 1, kind: input, shape index: {}]   ;;  %s6639_s2 = inlined_call_operand.hbm [shape: f32[1,512], index: 2, kind: input, shape index: {}]   ;;  %s6640_s3 = inlined_call_operand.hbm [shape: bf16[512,1024], index: 3, kind: input, shape index: {}]   ;;  %s6641_s4 = inlined_call_operand.hbm [shape: f32[1,1024], index: 4, kind: input, shape index: {}]   ;;  %s6642_s5 = inlined_call_operand.hbm [shape: bf16[1024,2048], index: 5, kind: input, shape index: {}]   ;;  %s6643_s6 = inlined_call_operand.hbm [shape: f32[1,2048], index: 6, kind: input, shape index: {}]   ;;  %s6644_s7 = inlined_call_operand.hbm [shape: bf16[2048,768], index: 7, kind: input, shape index: {}]   ;;  %s6645_s8 = inlined_call_operand.hbm [shape: f32[1,768], index: 8, kind: input, shape index: {}]   ;;  %s6646_s9 = inlined_call_operand.vmem [shape: f32[16,768], index: 9, kind: output, shape index: {}]  }
   0x1   :  { %15 = vsyncpa [#allocation10], 0 }
   0x2   :  { %16 = vsyncpa [#allocation13], 0  ;;  %s5886_s30 = smov [#allocation9]   ;;  %s5887_s11 = smov [#allocation7]  }
   0x3   :  { %s35_s10 = sshll.u32 %s5886_s30, 4  ;;  %s25_s12 = sshll.u32 %s5887_s11, 4  ;;  %s36_s10 = int_to_ptr.vmem [resolvable:$true] %s35_s10  ;;  %s26_s12 = int_to_ptr.vmem [resolvable:$true] %s25_s12 }
   0x4   :  { %s5784_s15 = scalar_lea.hbm %s6641_s4, 128 }
   0x5   :  { %p5785_p0 = scmp.ne.s32.totalorder %s6641_s4, %s5784_s15  ;;  %p5788_p1 = scmp.lt.u32.totalorder %s5784_s15, %s6641_s4 }
   0x7   :  { %p5790_p2 = pnand %p5788_p1, %p5785_p0 }
   0x9   :  { %5793 = shalt.err (!%p5790_p2)
}
   0xa   :  { %s5794_s20 = scalar_lea.vmem %s36_s10, 128  ;;  %p5799_p4 = scmp.lt.s32.totalorder %s36_s10, %s36_s10 }
   0xb   :  { %p5795_p3 = scmp.ne.s32.totalorder %s36_s10, %s5794_s20  ;;  %p5800_p5 = scmp.lt.s32.totalorder %s5794_s20, %s5794_s20 }
   0xd   :  { %p5801_p6 = por %p5800_p5, %p5799_p4 }
   0xf   :  { %p5802_p7 = pnand %p5801_p6, %p5795_p3 }
  0x11   :  { %5805 = shalt.err (!%p5802_p7)
}
  0x12   :  { %38 = dma.hbm_to_vmem [thread:$0]  %s6641_s4, 128, %s36_s10, [#allocation10]  }
  0x13   :  { %s5806_s25 = scalar_lea.hbm %s6639_s2, 64 }
  0x14   :  { %p5807_p8 = scmp.ne.s32.totalorder %s6639_s2, %s5806_s25  ;;  %p5810_p9 = scmp.lt.u32.totalorder %s5806_s25, %s6639_s2 }
  0x16   :  { %p5812_p10 = pnand %p5810_p9, %p5807_p8 }
  0x18   :  { %5815 = shalt.err (!%p5812_p10)
}
  0x19   :  { %s5816_s30 = scalar_lea.vmem %s26_s12, 64  ;;  %p5821_p12 = scmp.lt.s32.totalorder %s26_s12, %s26_s12 }
  0x1a   :  { %p5817_p11 = scmp.ne.s32.totalorder %s26_s12, %s5816_s30  ;;  %p5822_p13 = scmp.lt.s32.totalorder %s5816_s30, %s5816_s30 }
  0x1c   :  { %p5823_p0 = por %p5822_p13, %p5821_p12 }
  0x1e   :  { %p5824_p1 = pnand %p5823_p0, %p5817_p11 }
  0x20   :  { %5827 = shalt.err (!%p5824_p1)
}
  0x21   :  { %28 = dma.hbm_to_vmem [thread:$0]  %s6639_s2, 64, %s26_s12, [#allocation8]  }
  0x22   :  { %s5888_s11 = smov [#allocation11]   ;;  %s5889_s14 = smov [#allocation12]  }
  0x23   :  { %s45_s13 = sshll.u32 %s5888_s11, 4  ;;  %s55_s15 = sshll.u32 %s5889_s14, 4  ;;  %s46_s13 = int_to_ptr.vmem [resolvable:$true] %s45_s13  ;;  %s56_s15 = int_to_ptr.vmem [resolvable:$true] %s55_s15 }
  0x24   :  { %s5828_s18 = scalar_lea.hbm %s6643_s6, 256 }
  0x25   :  { %p5829_p2 = scmp.ne.s32.totalorder %s6643_s6, %s5828_s18  ;;  %p5832_p3 = scmp.lt.u32.totalorder %s5828_s18, %s6643_s6 }
  0x27   :  { %p5834_p4 = pnand %p5832_p3, %p5829_p2 }
  0x29   :  { %5837 = shalt.err (!%p5834_p4)
}
  0x2a   :  { %s5838_s2 = scalar_lea.vmem %s46_s13, 256  ;;  %p5843_p6 = scmp.lt.s32.totalorder %s46_s13, %s46_s13 }
  0x2b   :  { %p5839_p5 = scmp.ne.s32.totalorder %s46_s13, %s5838_s2  ;;  %p5844_p7 = scmp.lt.s32.totalorder %s5838_s2, %s5838_s2 }
  0x2d   :  { %p5845_p8 = por %p5844_p7, %p5843_p6 }
  0x2f   :  { %p5846_p9 = pnand %p5845_p8, %p5839_p5 }
  0x31   :  { %5849 = shalt.err (!%p5846_p9)
}
  0x32   :  { %48 = dma.hbm_to_vmem [thread:$0]  %s6643_s6, 256, %s46_s13, [#allocation10]  }
  0x33   :  { %s5850_s26 = scalar_lea.hbm %s6645_s8, 96 }
  0x34   :  { %p5851_p10 = scmp.ne.s32.totalorder %s6645_s8, %s5850_s26  ;;  %p5854_p11 = scmp.lt.u32.totalorder %s5850_s26, %s6645_s8 }
  0x36   :  { %p5856_p12 = pnand %p5854_p11, %p5851_p10 }
  0x38   :  { %5859 = shalt.err (!%p5856_p12)
}
  0x39   :  { %s5860_s4 = scalar_lea.vmem %s56_s15, 96  ;;  %p5865_p0 = scmp.lt.s32.totalorder %s56_s15, %s56_s15 }
  0x3a   :  { %p5861_p13 = scmp.ne.s32.totalorder %s56_s15, %s5860_s4  ;;  %p5866_p1 = scmp.lt.s32.totalorder %s5860_s4, %s5860_s4 }
  0x3c   :  { %p5867_p2 = por %p5866_p1, %p5865_p0 }
  0x3e   :  { %p5868_p3 = pnand %p5867_p2, %p5861_p13 }
  0x40   :  { %5871 = shalt.err (!%p5868_p3)
}
  0x41   :  { %58 = dma.hbm_to_vmem [thread:$0]  %s6645_s8, 96, %s56_s15, [#allocation13]  }
  0x42   :  { %5872 = dma.done.wait [#allocation8], 64  }
  0x43   :  { %5873 = vsyncadd [#allocation8], 4294967232 }
  0x44   :  { %5874 = dma.done.wait [#allocation10], 384  }
  0x45   :  { %5875 = vsyncadd [#allocation10], 4294966912 }
  0x46   :  { %5876 = dma.done.wait [#allocation13], 96  }
  0x47   :  { %5877 = vsyncadd [#allocation13], 4294967200  ;;  %s76_s11 = sld [smem:[#allocation0]]   ;;  %s5890_s13 = smov 4  }
  0x48   :  { %92 = sst [smem:[#allocation15 + $0x2]] %s5890_s13  ;;  %s5891_s14 = smov 64  }
  0x49   :  { %94 = sst [smem:[#allocation15 + $0x3]] %s5891_s14  ;;  %s5892_s16 = smov 256  }
  0x4a   :  { %100 = sst [smem:[#allocation15 + $0x6]] %s5892_s16  ;;  %s5893_s17 = smov [#allocation2]  }
  0x4b   :  { %102 = sst [smem:[#allocation15 + $0x7]] %s5891_s14  ;;  %s84_s18 = sshll.u32 %s5893_s17, 4  ;;  %s85_s18 = int_to_ptr.vmem [resolvable:$true] %s84_s18 }
  0x4c   :  { %104 = sst [smem:[#allocation15 + $0x8]] %s5890_s13  ;;  %s5894_s15 = smov 512  }
  0x4d   :  { %s5459_s8 = sshll.u32 %s76_s11, 26  ;;  %88 = sst [smem:[#allocation15]] %s5894_s15 }
  0x4e   :  { %s6018_s19 = sadd.s32 134217728, %s5459_s8  ;;  %90 = sst [smem:[#allocation15 + $0x1]] %s5894_s15 }
  0x4f   :  { %s5895_s20 = smov 128   ;;  %s5896_s21 = smov 2  }
  0x50   :  { %96 = sst [smem:[#allocation15 + $0x4]] %s5895_s20  ;;  %s5897_s22 = smov [#allocation6]  }
  0x51   :  { %98 = sst [smem:[#allocation15 + $0x5]] %s5896_s21  ;;  %s5898_s2 = smov [#allocation14]  }
  0x52   :  { %106 = dma.general %s6638_s1, 2048, %s85_s18, %s5897_s22, %s5898_s2, [#allocation15], %s6018_s19, 0  }
  0x53   :  { %s5899_s24 = smov 1024   ;;  %s5900_s25 = smov 8  }
  0x54   :  { %123 = sst [smem:[#allocation17]] %s5899_s24  ;;  %s5901_s26 = smov [#allocation3]  }
  0x55   :  { %125 = sst [smem:[#allocation17 + $0x1]] %s5899_s24  ;;  %s119_s27 = sshll.u32 %s5901_s26, 4  ;;  %s120_s27 = int_to_ptr.vmem [resolvable:$true] %s119_s27 }
  0x56   :  { %127 = sst [smem:[#allocation17 + $0x2]] %s5900_s25  ;;  %s5902_s1 = smov [#allocation6 + $0x1]  }
  0x57   :  { %129 = sst [smem:[#allocation17 + $0x3]] %s5891_s14  ;;  %s5903_s28 = smov [#allocation16]  }
  0x58   :  { %131 = sst [smem:[#allocation17 + $0x4]] %s5895_s20  ;;  %s5904_s4 = smov 2048  }
  0x59   :  { %133 = sst [smem:[#allocation17 + $0x5]] %s5896_s21  ;;  %s5905_s6 = smov [#allocation4]  }
  0x5a   :  { %135 = sst [smem:[#allocation17 + $0x6]] %s5894_s15  ;;  %s154_s10 = sshll.u32 %s5905_s6, 4  ;;  %s155_s10 = int_to_ptr.vmem [resolvable:$true] %s154_s10 }
  0x5b   :  { %137 = sst [smem:[#allocation17 + $0x7]] %s5891_s14  ;;  %s5906_s11 = smov 16  }
  0x5c   :  { %139 = sst [smem:[#allocation17 + $0x8]] %s5890_s13  ;;  %s5908_s16 = smov [#allocation18]  }
  0x5d   :  { %141 = dma.general %s6640_s3, 32768, %s120_s27, %s5902_s1, %s5903_s28, [#allocation17], %s6018_s19, 0  }
  0x5e   :  { %158 = sst [smem:[#allocation19]] %s5904_s4  ;;  %s5907_s3 = smov [#allocation6 + $0x2]  }
  0x5f   :  { %160 = sst [smem:[#allocation19 + $0x1]] %s5904_s4  ;;  %s5909_s8 = smov 768  }
  0x60   :  { %162 = sst [smem:[#allocation19 + $0x2]] %s5906_s11  ;;  %s5910_s15 = smov [#allocation5]  }
  0x61   :  { %164 = sst [smem:[#allocation19 + $0x3]] %s5891_s14  ;;  %s189_s22 = sshll.u32 %s5910_s15, 4  ;;  %s190_s22 = int_to_ptr.vmem [resolvable:$true] %s189_s22 }
  0x62   :  { %166 = sst [smem:[#allocation19 + $0x4]] %s5895_s20  ;;  %s5911_s2 = smov 6  }
  0x63   :  { %168 = sst [smem:[#allocation19 + $0x5]] %s5896_s21  ;;  %s5912_s12 = smov 384  }
  0x64   :  { %170 = sst [smem:[#allocation19 + $0x6]] %s5899_s24  ;;  %s5914_s23 = smov [#allocation20]  }
  0x65   :  { %172 = sst [smem:[#allocation19 + $0x7]] %s5891_s14 }
  0x66   :  { %174 = sst [smem:[#allocation19 + $0x8]] %s5890_s13 }
  0x67   :  { %176 = dma.general %s6642_s5, 131072, %s155_s10, %s5907_s3, %s5908_s16, [#allocation19], %s6018_s19, 0  }
  0x68   :  { %193 = sst [smem:[#allocation21]] %s5909_s8  ;;  %s5913_s5 = smov [#allocation6 + $0x3]  }
  0x69   :  { %195 = sst [smem:[#allocation21 + $0x1]] %s5909_s8 }
  0x6a   :  { %197 = sst [smem:[#allocation21 + $0x2]] %s5911_s2 }
  0x6b   :  { %199 = sst [smem:[#allocation21 + $0x3]] %s5891_s14 }
  0x6c   :  { %201 = sst [smem:[#allocation21 + $0x4]] %s5895_s20 }
  0x6d   :  { %203 = sst [smem:[#allocation21 + $0x5]] %s5896_s21 }
  0x6e   :  { %205 = sst [smem:[#allocation21 + $0x6]] %s5912_s12 }
  0x6f   :  { %207 = sst [smem:[#allocation21 + $0x7]] %s5891_s14 }
  0x70   :  { %209 = sst [smem:[#allocation21 + $0x8]] %s5890_s13 }
  0x71   :  { %211 = dma.general %s6644_s7, 98304, %s190_s22, %s5913_s5, %s5914_s23, [#allocation21], %s6018_s19, 0  }
  0x72   :  { %v212_v0 = vld [vmem:[%s6637_s0] sm:$0xff]  ;;  %v213_v1 = vld [vmem:[%s6637_s0 + $0x8] sm:$0xff] }
  0x73   :  { %5878 = dma.done.wait [#allocation6], 2048 }
  0x74   :  { %5879 = vsyncadd [#allocation6], 4294965248  ;;  %v5915_v2 = vmov 0   ;;  %v220_v3 = vld [vmem:[#allocation2 + $0x8] sm:$0xff]  ;;  %v222_v4 = vld [vmem:[#allocation2 + $0x18] sm:$0xff]  ;;  %v218_v19 = vpack.c.bf16 %v213_v1, %v212_v0  ;;  %vm257_vm0 = vcmask 523264   ;;  %v237_v20 = vlaneseq }
  0x75   :  { %293 = vmatprep.mubr.bf16.mxu0 %v5915_v2  ;;  %336 = vmatprep.mubr.bf16.mxu1 %v5915_v2  ;;  %v219_v5 = vld [vmem:[#allocation2] sm:$0xff]  ;;  %v221_v6 = vld [vmem:[#allocation2 + $0x10] sm:$0xff]  ;;  %v224_v7 = vld [vmem:[#allocation2 + $0x28] sm:$0xff] }
  0x76   :  { %261 = vmatprep.subr.bf16.mxu0 %v220_v3  ;;  %304 = vmatprep.subr.bf16.mxu1 %v222_v4  ;;  %v226_v8 = vld [vmem:[#allocation2 + $0x38] sm:$0xff]  ;;  %v223_v9 = vld [vmem:[#allocation2 + $0x20] sm:$0xff]  ;;  %v225_v10 = vld [vmem:[#allocation2 + $0x30] sm:$0xff]  ;;  %v6059_v21 = vshrl.u32 %v237_v20, 7 }
  0x77   :  { %262 = vmatpush1.bf16.msra.mxu0 %v219_v5  ;;  %305 = vmatpush1.bf16.msra.mxu1 %v221_v6  ;;  %v228_v11 = vld [vmem:[#allocation2 + $0x48] sm:$0xff]  ;;  %v230_v12 = vld [vmem:[#allocation2 + $0x58] sm:$0xff]  ;;  %v227_v13 = vld [vmem:[#allocation2 + $0x40] sm:$0xff] }
  0x78   :  { %263 = vmatprep.subr.bf16.mxu0 %v224_v7  ;;  %306 = vmatprep.subr.bf16.mxu1 %v226_v8  ;;  %v229_v14 = vld [vmem:[#allocation2 + $0x50] sm:$0xff]  ;;  %v232_v15 = vld [vmem:[#allocation2 + $0x68] sm:$0xff]  ;;  %v234_v16 = vld [vmem:[#allocation2 + $0x78] sm:$0xff]  ;;  %v6062_v22 = vsub.s32 0, %v6059_v21  ;;  %v6065_v23 = vsub.s32 2, %v6059_v21  ;;  %v6068_v25 = vsub.s32 1, %v6059_v21 }
  0x79   :  { %v231_v17 = vld [vmem:[#allocation2 + $0x60] sm:$0xff]  ;;  %v233_v18 = vld [vmem:[#allocation2 + $0x70] sm:$0xff]  ;;  %v6071_v26 = vsub.s32 3, %v6059_v21 }
  0x7a   :  { %v235_v24 = vld [vmem:[#allocation7] sm:$0xf] }
  0x7b   :  { %264 = vmatpush1.bf16.msra.mxu0 %v223_v9  ;;  %307 = vmatpush1.bf16.msra.mxu1 %v225_v10  ;;  %v240_v27 = vrot.slane %v235_v24, %v6062_v22  ;;  %v248_v28 = vrot.slane %v235_v24, %v6065_v23  ;;  %v244_v29 = vrot.slane %v235_v24, %v6068_v25 }
  0x7c   :  { %265 = vmatprep.subr.bf16.mxu0 %v228_v11  ;;  %308 = vmatprep.subr.bf16.mxu1 %v230_v12  ;;  %v252_v30 = vrot.slane %v235_v24, %v6071_v26 }
  0x7f   :  { %266 = vmatpush1.bf16.msra.mxu0 %v227_v13  ;;  %309 = vmatpush1.bf16.msra.mxu1 %v229_v14 }
  0x80   :  { %267 = vmatprep.subr.bf16.mxu0 %v232_v15  ;;  %310 = vmatprep.subr.bf16.mxu1 %v234_v16 }
  0x83   :  { %268 = vmatpush1.bf16.msra.mxu0 %v231_v17  ;;  %311 = vmatpush1.bf16.msra.mxu1 %v233_v18 }
  0x86   :  { %5467 = vmatmul.mubr.msk.bf16.vlgmr.msra.gmra.mrb[0].mxu0 %vm257_vm0, %v218_v19  ;;  %5468 = vmatmul.mubr.msk.bf16.vlgmr.msra.gmra.mrb[0].mxu1 %vm257_vm0, %v218_v19 }
 0x159   :  { %v295_v31 = vpop.f32.mrb[0].mxu0  ;;  %v338_v32 = vpop.f32.mrb[0].mxu1 }
 0x15a   :  { %v6077_v33 = vadd.f32 %v295_v31, %v240_v27  ;;  %v6079_v34 = vadd.f32 %v338_v32, %v248_v28  ;;  %v297_v35 = vpop.f32.mrb[1].mxu0  ;;  %v340_v36 = vpop.f32.mrb[1].mxu1 }
 0x15b   :  { %v298_v37 = vadd.f32 %v297_v35, %v244_v29  ;;  %v6081_v38 = vadd.f32 %v340_v36, %v252_v30  ;;  %v299_v39 = vpop.f32.mrb[2].mxu0  ;;  %v342_v40 = vpop.f32.mrb[2].mxu1 }
 0x15c   :  { %v347_v41 = vmax.f32 %v6077_v33, 0.0  ;;  %v349_v42 = vmax.f32 %v6079_v34, 0.0  ;;  %v6085_v43 = vadd.f32 %v299_v39, %v240_v27  ;;  %v6087_v44 = vadd.f32 %v342_v40, %v248_v28  ;;  %v301_v45 = vpop.f32.mrb[3].mxu0  ;;  %v344_v46 = vpop.f32.mrb[3].mxu1 }
 0x15d   :  { %v348_v47 = vmax.f32 %v298_v37, 0.0  ;;  %v350_v48 = vmax.f32 %v6081_v38, 0.0  ;;  %v302_v49 = vadd.f32 %v301_v45, %v244_v29  ;;  %v6090_v50 = vadd.f32 %v344_v46, %v252_v30 }
 0x15e   :  { %v351_v51 = vmax.f32 %v6085_v43, 0.0  ;;  %v353_v52 = vmax.f32 %v6087_v44, 0.0 }
 0x15f   :  { %v352_v53 = vmax.f32 %v302_v49, 0.0  ;;  %v354_v54 = vmax.f32 %v6090_v50, 0.0 }
 0x160   :  { %5880 = dma.done.wait [#allocation6 + $0x1], 32768 }
 0x161   :  { %5881 = vsyncadd [#allocation6 + $0x1], 4294934528  ;;  %v6095_v55 = vpack.c.bf16 %v352_v53, %v348_v47  ;;  %v364_v56 = vld [vmem:[#allocation3 + $0x8] sm:$0xff]  ;;  %v363_v57 = vld [vmem:[#allocation3] sm:$0xff]  ;;  %v6102_v30 = vpack.c.bf16 %v351_v51, %v347_v41  ;;  %v6108_v31 = vpack.c.bf16 %v354_v54, %v350_v48 }
 0x162   :  { %v372_v58 = vld [vmem:[#allocation3 + $0x48] sm:$0xff]  ;;  %661 = vmatprep.subr.bf16.mxu1 %v364_v56  ;;  %v371_v59 = vld [vmem:[#allocation3 + $0x40] sm:$0xff]  ;;  %v390_v34 = vld [vmem:[#allocation3 + $0xd8] sm:$0xff] }
 0x163   :  { %693 = vmatprep.mubr.bf16.mxu1 %v6095_v55  ;;  %662 = vmatpush1.bf16.msra.mxu1 %v363_v57  ;;  %v380_v60 = vld [vmem:[#allocation3 + $0x88] sm:$0xff]  ;;  %v379_v61 = vld [vmem:[#allocation3 + $0x80] sm:$0xff]  ;;  %v398_v44 = vld [vmem:[#allocation3 + $0x118] sm:$0xff] }
 0x164   :  { %663 = vmatprep.subr.bf16.mxu1 %v372_v58  ;;  %v388_v62 = vld [vmem:[#allocation3 + $0xc8] sm:$0xff]  ;;  %v387_v63 = vld [vmem:[#allocation3 + $0xc0] sm:$0xff] }
 0x165   :  { %v396_v0 = vld [vmem:[#allocation3 + $0x108] sm:$0xff]  ;;  %v395_v1 = vld [vmem:[#allocation3 + $0x100] sm:$0xff] }
 0x166   :  { %v404_v2 = vld [vmem:[#allocation3 + $0x148] sm:$0xff]  ;;  %v403_v3 = vld [vmem:[#allocation3 + $0x140] sm:$0xff] }
 0x167   :  { %664 = vmatpush1.bf16.msra.mxu1 %v371_v59  ;;  %v412_v4 = vld [vmem:[#allocation3 + $0x188] sm:$0xff]  ;;  %v411_v5 = vld [vmem:[#allocation3 + $0x180] sm:$0xff] }
 0x168   :  { %665 = vmatprep.subr.bf16.mxu1 %v380_v60  ;;  %v420_v6 = vld [vmem:[#allocation3 + $0x1c8] sm:$0xff]  ;;  %v419_v7 = vld [vmem:[#allocation3 + $0x1c0] sm:$0xff] }
 0x169   :  { %v428_v8 = vld [vmem:[#allocation3 + $0x208] sm:$0xff]  ;;  %v427_v9 = vld [vmem:[#allocation3 + $0x200] sm:$0xff] }
 0x16a   :  { %v436_v10 = vld [vmem:[#allocation3 + $0x248] sm:$0xff]  ;;  %v435_v11 = vld [vmem:[#allocation3 + $0x240] sm:$0xff] }
 0x16b   :  { %666 = vmatpush1.bf16.msra.mxu1 %v379_v61  ;;  %v444_v12 = vld [vmem:[#allocation3 + $0x288] sm:$0xff]  ;;  %v443_v13 = vld [vmem:[#allocation3 + $0x280] sm:$0xff] }
 0x16c   :  { %667 = vmatprep.subr.bf16.mxu1 %v388_v62  ;;  %v452_v14 = vld [vmem:[#allocation3 + $0x2c8] sm:$0xff]  ;;  %v451_v15 = vld [vmem:[#allocation3 + $0x2c0] sm:$0xff] }
 0x16d   :  { %v460_v16 = vld [vmem:[#allocation3 + $0x308] sm:$0xff]  ;;  %v459_v17 = vld [vmem:[#allocation3 + $0x300] sm:$0xff] }
 0x16e   :  { %v468_v18 = vld [vmem:[#allocation3 + $0x348] sm:$0xff]  ;;  %v467_v19 = vld [vmem:[#allocation3 + $0x340] sm:$0xff] }
 0x16f   :  { %668 = vmatpush1.bf16.msra.mxu1 %v387_v63  ;;  %v476_v20 = vld [vmem:[#allocation3 + $0x388] sm:$0xff]  ;;  %v475_v24 = vld [vmem:[#allocation3 + $0x380] sm:$0xff] }
 0x170   :  { %669 = vmatprep.subr.bf16.mxu1 %v396_v0  ;;  %v484_v27 = vld [vmem:[#allocation3 + $0x3c8] sm:$0xff]  ;;  %v483_v28 = vld [vmem:[#allocation3 + $0x3c0] sm:$0xff] }
 0x171   :  { %v492_v29 = vld [vmem:[#allocation3 + $0x408] sm:$0xff]  ;;  %v491_v32 = vld [vmem:[#allocation3 + $0x400] sm:$0xff] }
 0x172   :  { %v500_v35 = vld [vmem:[#allocation3 + $0x448] sm:$0xff]  ;;  %v499_v33 = vld [vmem:[#allocation3 + $0x440] sm:$0xff] }
 0x173   :  { %670 = vmatpush1.bf16.msra.mxu1 %v395_v1  ;;  %v508_v36 = vld [vmem:[#allocation3 + $0x488] sm:$0xff]  ;;  %v507_v37 = vld [vmem:[#allocation3 + $0x480] sm:$0xff] }
 0x174   :  { %671 = vmatprep.subr.bf16.mxu1 %v404_v2  ;;  %v516_v39 = vld [vmem:[#allocation3 + $0x4c8] sm:$0xff]  ;;  %v515_v38 = vld [vmem:[#allocation3 + $0x4c0] sm:$0xff] }
 0x175   :  { %v524_v40 = vld [vmem:[#allocation3 + $0x508] sm:$0xff]  ;;  %v523_v41 = vld [vmem:[#allocation3 + $0x500] sm:$0xff] }
 0x176   :  { %v532_v43 = vld [vmem:[#allocation3 + $0x548] sm:$0xff]  ;;  %v531_v45 = vld [vmem:[#allocation3 + $0x540] sm:$0xff] }
 0x177   :  { %672 = vmatpush1.bf16.msra.mxu1 %v403_v3  ;;  %v540_v46 = vld [vmem:[#allocation3 + $0x588] sm:$0xff]  ;;  %v539_v47 = vld [vmem:[#allocation3 + $0x580] sm:$0xff] }
 0x178   :  { %673 = vmatprep.subr.bf16.mxu1 %v412_v4  ;;  %v548_v48 = vld [vmem:[#allocation3 + $0x5c8] sm:$0xff]  ;;  %v547_v49 = vld [vmem:[#allocation3 + $0x5c0] sm:$0xff]  ;;  %v366_v4 = vld [vmem:[#allocation3 + $0x18] sm:$0xff] }
 0x179   :  { %v556_v50 = vld [vmem:[#allocation3 + $0x608] sm:$0xff]  ;;  %v555_v51 = vld [vmem:[#allocation3 + $0x600] sm:$0xff] }
 0x17a   :  { %v564_v53 = vld [vmem:[#allocation3 + $0x648] sm:$0xff]  ;;  %v563_v54 = vld [vmem:[#allocation3 + $0x640] sm:$0xff] }
 0x17b   :  { %674 = vmatpush1.bf16.msra.mxu1 %v411_v5  ;;  %v572_v56 = vld [vmem:[#allocation3 + $0x688] sm:$0xff]  ;;  %v571_v57 = vld [vmem:[#allocation3 + $0x680] sm:$0xff]  ;;  %v6116_v5 = vpack.c.bf16 %v353_v52, %v349_v42  ;;  %v389_v42 = vld [vmem:[#allocation3 + $0xd0] sm:$0xff] }
 0x17c   :  { %675 = vmatprep.subr.bf16.mxu1 %v420_v6  ;;  %v580_v58 = vld [vmem:[#allocation3 + $0x6c8] sm:$0xff]  ;;  %v579_v59 = vld [vmem:[#allocation3 + $0x6c0] sm:$0xff]  ;;  %v365_v6 = vld [vmem:[#allocation3 + $0x10] sm:$0xff] }
 0x17d   :  { %v588_v60 = vld [vmem:[#allocation3 + $0x708] sm:$0xff]  ;;  %v587_v61 = vld [vmem:[#allocation3 + $0x700] sm:$0xff]  ;;  %v397_v52 = vld [vmem:[#allocation3 + $0x110] sm:$0xff] }
 0x17e   :  { %v596_v62 = vld [vmem:[#allocation3 + $0x748] sm:$0xff]  ;;  %v595_v63 = vld [vmem:[#allocation3 + $0x740] sm:$0xff] }
 0x17f   :  { %676 = vmatpush1.bf16.msra.mxu1 %v419_v7  ;;  %v604_v0 = vld [vmem:[#allocation3 + $0x788] sm:$0xff]  ;;  %v603_v1 = vld [vmem:[#allocation3 + $0x780] sm:$0xff]  ;;  %v374_v7 = vld [vmem:[#allocation3 + $0x58] sm:$0xff] }
 0x180   :  { %677 = vmatprep.subr.bf16.mxu1 %v428_v8  ;;  %v612_v2 = vld [vmem:[#allocation3 + $0x7c8] sm:$0xff]  ;;  %v611_v3 = vld [vmem:[#allocation3 + $0x7c0] sm:$0xff]  ;;  %v373_v8 = vld [vmem:[#allocation3 + $0x50] sm:$0xff] }
 0x183   :  { %678 = vmatpush1.bf16.msra.mxu1 %v427_v9  ;;  %v382_v9 = vld [vmem:[#allocation3 + $0x98] sm:$0xff] }
 0x184   :  { %679 = vmatprep.subr.bf16.mxu1 %v436_v10  ;;  %v381_v10 = vld [vmem:[#allocation3 + $0x90] sm:$0xff] }
 0x187   :  { %680 = vmatpush1.bf16.msra.mxu1 %v435_v11  ;;  %v406_v11 = vld [vmem:[#allocation3 + $0x158] sm:$0xff] }
 0x188   :  { %681 = vmatprep.subr.bf16.mxu1 %v444_v12  ;;  %v405_v12 = vld [vmem:[#allocation3 + $0x150] sm:$0xff] }
 0x18b   :  { %682 = vmatpush1.bf16.msra.mxu1 %v443_v13  ;;  %v414_v13 = vld [vmem:[#allocation3 + $0x198] sm:$0xff] }
 0x18c   :  { %683 = vmatprep.subr.bf16.mxu1 %v452_v14  ;;  %v413_v14 = vld [vmem:[#allocation3 + $0x190] sm:$0xff] }
 0x18f   :  { %684 = vmatpush1.bf16.msra.mxu1 %v451_v15  ;;  %v422_v15 = vld [vmem:[#allocation3 + $0x1d8] sm:$0xff] }
 0x190   :  { %685 = vmatprep.subr.bf16.mxu1 %v460_v16  ;;  %v421_v16 = vld [vmem:[#allocation3 + $0x1d0] sm:$0xff] }
 0x193   :  { %686 = vmatpush1.bf16.msra.mxu1 %v459_v17  ;;  %v430_v17 = vld [vmem:[#allocation3 + $0x218] sm:$0xff] }
 0x194   :  { %687 = vmatprep.subr.bf16.mxu1 %v468_v18  ;;  %v429_v18 = vld [vmem:[#allocation3 + $0x210] sm:$0xff] }
 0x197   :  { %688 = vmatpush1.bf16.msra.mxu1 %v467_v19  ;;  %v438_v19 = vld [vmem:[#allocation3 + $0x258] sm:$0xff] }
 0x198   :  { %689 = vmatprep.subr.bf16.mxu1 %v476_v20  ;;  %v437_v20 = vld [vmem:[#allocation3 + $0x250] sm:$0xff] }
 0x19b   :  { %690 = vmatpush1.bf16.msra.mxu1 %v475_v24  ;;  %v446_v24 = vld [vmem:[#allocation3 + $0x298] sm:$0xff] }
 0x19c   :  { %691 = vmatprep.subr.bf16.mxu1 %v484_v27  ;;  %v445_v27 = vld [vmem:[#allocation3 + $0x290] sm:$0xff] }
 0x19f   :  { %692 = vmatpush1.bf16.msra.mxu1 %v483_v28  ;;  %v454_v28 = vld [vmem:[#allocation3 + $0x2d8] sm:$0xff] }
 0x1a0   :  { %704 = vmatprep.subr.bf16.mxu1 %v492_v29  ;;  %v453_v29 = vld [vmem:[#allocation3 + $0x2d0] sm:$0xff] }
 0x1a2   :  { %694 = vmatmul.mubr.bf16.vlgmr.msra.gmra.mrb[4].mxu1 %v6102_v30 }
 0x1a3   :  { %705 = vmatpush1.bf16.msra.mxu1 %v491_v32  ;;  %736 = vmatprep.mubr.bf16.mxu1 %v6108_v31  ;;  %v462_v32 = vld [vmem:[#allocation3 + $0x318] sm:$0xff] }
 0x1a4   :  { %706 = vmatprep.subr.bf16.mxu1 %v500_v35  ;;  %v461_v35 = vld [vmem:[#allocation3 + $0x310] sm:$0xff] }
 0x1a7   :  { %707 = vmatpush1.bf16.msra.mxu1 %v499_v33  ;;  %v470_v33 = vld [vmem:[#allocation3 + $0x358] sm:$0xff] }
 0x1a8   :  { %708 = vmatprep.subr.bf16.mxu1 %v508_v36  ;;  %v469_v36 = vld [vmem:[#allocation3 + $0x350] sm:$0xff] }
 0x1ab   :  { %709 = vmatpush1.bf16.msra.mxu1 %v507_v37  ;;  %v478_v37 = vld [vmem:[#allocation3 + $0x398] sm:$0xff] }
 0x1ac   :  { %710 = vmatprep.subr.bf16.mxu1 %v516_v39  ;;  %v477_v39 = vld [vmem:[#allocation3 + $0x390] sm:$0xff] }
 0x1af   :  { %711 = vmatpush1.bf16.msra.mxu1 %v515_v38  ;;  %v486_v38 = vld [vmem:[#allocation3 + $0x3d8] sm:$0xff] }
 0x1b0   :  { %712 = vmatprep.subr.bf16.mxu1 %v524_v40  ;;  %v485_v40 = vld [vmem:[#allocation3 + $0x3d0] sm:$0xff] }
 0x1b3   :  { %713 = vmatpush1.bf16.msra.mxu1 %v523_v41  ;;  %v494_v41 = vld [vmem:[#allocation3 + $0x418] sm:$0xff] }
 0x1b4   :  { %714 = vmatprep.subr.bf16.mxu1 %v532_v43  ;;  %v493_v43 = vld [vmem:[#allocation3 + $0x410] sm:$0xff] }
 0x1b7   :  { %715 = vmatpush1.bf16.msra.mxu1 %v531_v45  ;;  %v502_v45 = vld [vmem:[#allocation3 + $0x458] sm:$0xff] }
 0x1b8   :  { %716 = vmatprep.subr.bf16.mxu1 %v540_v46  ;;  %v501_v46 = vld [vmem:[#allocation3 + $0x450] sm:$0xff] }
 0x1bb   :  { %717 = vmatpush1.bf16.msra.mxu1 %v539_v47  ;;  %v510_v47 = vld [vmem:[#allocation3 + $0x498] sm:$0xff] }
 0x1bc   :  { %718 = vmatprep.subr.bf16.mxu1 %v548_v48  ;;  %v509_v48 = vld [vmem:[#allocation3 + $0x490] sm:$0xff] }
 0x1bf   :  { %719 = vmatpush1.bf16.msra.mxu1 %v547_v49  ;;  %v518_v49 = vld [vmem:[#allocation3 + $0x4d8] sm:$0xff] }
 0x1c0   :  { %720 = vmatprep.subr.bf16.mxu1 %v556_v50  ;;  %v517_v50 = vld [vmem:[#allocation3 + $0x4d0] sm:$0xff] }
 0x1c3   :  { %721 = vmatpush1.bf16.msra.mxu1 %v555_v51  ;;  %v526_v51 = vld [vmem:[#allocation3 + $0x518] sm:$0xff] }
 0x1c4   :  { %722 = vmatprep.subr.bf16.mxu1 %v564_v53  ;;  %v525_v53 = vld [vmem:[#allocation3 + $0x510] sm:$0xff] }
 0x1c7   :  { %723 = vmatpush1.bf16.msra.mxu1 %v563_v54  ;;  %v534_v54 = vld [vmem:[#allocation3 + $0x558] sm:$0xff] }
 0x1c8   :  { %724 = vmatprep.subr.bf16.mxu1 %v572_v56  ;;  %v533_v56 = vld [vmem:[#allocation3 + $0x550] sm:$0xff] }
 0x1cb   :  { %725 = vmatpush1.bf16.msra.mxu1 %v571_v57  ;;  %v542_v57 = vld [vmem:[#allocation3 + $0x598] sm:$0xff] }
 0x1cc   :  { %726 = vmatprep.subr.bf16.mxu1 %v580_v58  ;;  %v541_v58 = vld [vmem:[#allocation3 + $0x590] sm:$0xff] }
 0x1cf   :  { %727 = vmatpush1.bf16.msra.mxu1 %v579_v59  ;;  %v550_v59 = vld [vmem:[#allocation3 + $0x5d8] sm:$0xff] }
 0x1d0   :  { %728 = vmatprep.subr.bf16.mxu1 %v588_v60  ;;  %v549_v60 = vld [vmem:[#allocation3 + $0x5d0] sm:$0xff] }
 0x1d3   :  { %729 = vmatpush1.bf16.msra.mxu1 %v587_v61  ;;  %v558_v61 = vld [vmem:[#allocation3 + $0x618] sm:$0xff] }
 0x1d4   :  { %730 = vmatprep.subr.bf16.mxu1 %v596_v62  ;;  %v557_v62 = vld [vmem:[#allocation3 + $0x610] sm:$0xff] }
 0x1d7   :  { %731 = vmatpush1.bf16.msra.mxu1 %v595_v63  ;;  %v566_v63 = vld [vmem:[#allocation3 + $0x658] sm:$0xff] }
 0x1d8   :  { %732 = vmatprep.subr.bf16.mxu1 %v604_v0  ;;  %v565_v0 = vld [vmem:[#allocation3 + $0x650] sm:$0xff] }
 0x1db   :  { %733 = vmatpush1.bf16.msra.mxu1 %v603_v1  ;;  %v574_v1 = vld [vmem:[#allocation3 + $0x698] sm:$0xff] }
 0x1dc   :  { %734 = vmatprep.subr.bf16.mxu1 %v612_v2  ;;  %v573_v2 = vld [vmem:[#allocation3 + $0x690] sm:$0xff] }
 0x1df   :  { %735 = vmatpush1.bf16.msra.mxu1 %v611_v3  ;;  %v582_v3 = vld [vmem:[#allocation3 + $0x6d8] sm:$0xff] }
 0x1e0   :  { %747 = vmatprep.subr.bf16.mxu1 %v366_v4  ;;  %v581_v4 = vld [vmem:[#allocation3 + $0x6d0] sm:$0xff] }
 0x1e2   :  { %737 = vmatmul.mubr.bf16.vlgmr.msra.gmra.mrb[4].mxu1 %v6116_v5 }
 0x1e3   :  { %748 = vmatpush1.bf16.msra.mxu1 %v365_v6  ;;  %779 = vmatprep.mubr.bf16.mxu1 %v6095_v55  ;;  %v590_v6 = vld [vmem:[#allocation3 + $0x718] sm:$0xff] }
 0x1e4   :  { %749 = vmatprep.subr.bf16.mxu1 %v374_v7  ;;  %v589_v7 = vld [vmem:[#allocation3 + $0x710] sm:$0xff] }
 0x1e7   :  { %750 = vmatpush1.bf16.msra.mxu1 %v373_v8  ;;  %v598_v8 = vld [vmem:[#allocation3 + $0x758] sm:$0xff] }
 0x1e8   :  { %751 = vmatprep.subr.bf16.mxu1 %v382_v9  ;;  %v597_v9 = vld [vmem:[#allocation3 + $0x750] sm:$0xff] }
 0x1eb   :  { %752 = vmatpush1.bf16.msra.mxu1 %v381_v10  ;;  %v606_v10 = vld [vmem:[#allocation3 + $0x798] sm:$0xff] }
 0x1ec   :  { %753 = vmatprep.subr.bf16.mxu1 %v390_v34  ;;  %v605_v34 = vld [vmem:[#allocation3 + $0x790] sm:$0xff] }
 0x1ef   :  { %754 = vmatpush1.bf16.msra.mxu1 %v389_v42  ;;  %v614_v42 = vld [vmem:[#allocation3 + $0x7d8] sm:$0xff] }
 0x1f0   :  { %755 = vmatprep.subr.bf16.mxu1 %v398_v44  ;;  %v613_v44 = vld [vmem:[#allocation3 + $0x7d0] sm:$0xff] }
 0x1f3   :  { %756 = vmatpush1.bf16.msra.mxu1 %v397_v52  ;;  %v368_v52 = vld [vmem:[#allocation3 + $0x28] sm:$0xff] }
 0x1f4   :  { %757 = vmatprep.subr.bf16.mxu1 %v406_v11  ;;  %v367_v11 = vld [vmem:[#allocation3 + $0x20] sm:$0xff] }
 0x1f7   :  { %758 = vmatpush1.bf16.msra.mxu1 %v405_v12  ;;  %v376_v12 = vld [vmem:[#allocation3 + $0x68] sm:$0xff] }
 0x1f8   :  { %759 = vmatprep.subr.bf16.mxu1 %v414_v13  ;;  %v375_v13 = vld [vmem:[#allocation3 + $0x60] sm:$0xff] }
 0x1fb   :  { %760 = vmatpush1.bf16.msra.mxu1 %v413_v14  ;;  %v384_v14 = vld [vmem:[#allocation3 + $0xa8] sm:$0xff] }
 0x1fc   :  { %761 = vmatprep.subr.bf16.mxu1 %v422_v15  ;;  %v383_v15 = vld [vmem:[#allocation3 + $0xa0] sm:$0xff] }
 0x1ff   :  { %762 = vmatpush1.bf16.msra.mxu1 %v421_v16  ;;  %v392_v16 = vld [vmem:[#allocation3 + $0xe8] sm:$0xff] }
 0x200   :  { %763 = vmatprep.subr.bf16.mxu1 %v430_v17  ;;  %v391_v17 = vld [vmem:[#allocation3 + $0xe0] sm:$0xff] }
 0x203   :  { %764 = vmatpush1.bf16.msra.mxu1 %v429_v18  ;;  %v400_v18 = vld [vmem:[#allocation3 + $0x128] sm:$0xff] }
 0x204   :  { %765 = vmatprep.subr.bf16.mxu1 %v438_v19  ;;  %v399_v19 = vld [vmem:[#allocation3 + $0x120] sm:$0xff] }
 0x207   :  { %766 = vmatpush1.bf16.msra.mxu1 %v437_v20  ;;  %v408_v20 = vld [vmem:[#allocation3 + $0x168] sm:$0xff] }
 0x208   :  { %767 = vmatprep.subr.bf16.mxu1 %v446_v24  ;;  %v407_v24 = vld [vmem:[#allocation3 + $0x160] sm:$0xff] }
 0x20b   :  { %768 = vmatpush1.bf16.msra.mxu1 %v445_v27  ;;  %v416_v27 = vld [vmem:[#allocation3 + $0x1a8] sm:$0xff] }
 0x20c   :  { %769 = vmatprep.subr.bf16.mxu1 %v454_v28  ;;  %v415_v28 = vld [vmem:[#allocation3 + $0x1a0] sm:$0xff] }
 0x20f   :  { %770 = vmatpush1.bf16.msra.mxu1 %v453_v29  ;;  %v424_v29 = vld [vmem:[#allocation3 + $0x1e8] sm:$0xff] }
 0x210   :  { %771 = vmatprep.subr.bf16.mxu1 %v462_v32  ;;  %v423_v32 = vld [vmem:[#allocation3 + $0x1e0] sm:$0xff] }
 0x213   :  { %772 = vmatpush1.bf16.msra.mxu1 %v461_v35  ;;  %v432_v35 = vld [vmem:[#allocation3 + $0x228] sm:$0xff] }
 0x214   :  { %773 = vmatprep.subr.bf16.mxu1 %v470_v33  ;;  %v431_v33 = vld [vmem:[#allocation3 + $0x220] sm:$0xff] }
 0x217   :  { %774 = vmatpush1.bf16.msra.mxu1 %v469_v36  ;;  %v440_v36 = vld [vmem:[#allocation3 + $0x268] sm:$0xff] }
 0x218   :  { %775 = vmatprep.subr.bf16.mxu1 %v478_v37  ;;  %v439_v37 = vld [vmem:[#allocation3 + $0x260] sm:$0xff] }
 0x21b   :  { %776 = vmatpush1.bf16.msra.mxu1 %v477_v39  ;;  %v448_v39 = vld [vmem:[#allocation3 + $0x2a8] sm:$0xff] }
 0x21c   :  { %777 = vmatprep.subr.bf16.mxu1 %v486_v38  ;;  %v447_v38 = vld [vmem:[#allocation3 + $0x2a0] sm:$0xff] }
 0x21f   :  { %778 = vmatpush1.bf16.msra.mxu1 %v485_v40  ;;  %v456_v40 = vld [vmem:[#allocation3 + $0x2e8] sm:$0xff] }
 0x220   :  { %790 = vmatprep.subr.bf16.mxu1 %v494_v41  ;;  %v455_v41 = vld [vmem:[#allocation3 + $0x2e0] sm:$0xff] }
 0x222   :  { %780 = vmatmul.mubr.bf16.vlgmr.msra.gmra.mrb[8].mxu1 %v6102_v30 }
 0x223   :  { %791 = vmatpush1.bf16.msra.mxu1 %v493_v43  ;;  %822 = vmatprep.mubr.bf16.mxu1 %v6108_v31  ;;  %v464_v43 = vld [vmem:[#allocation3 + $0x328] sm:$0xff] }
 0x224   :  { %792 = vmatprep.subr.bf16.mxu1 %v502_v45  ;;  %v463_v45 = vld [vmem:[#allocation3 + $0x320] sm:$0xff] }
 0x227   :  { %793 = vmatpush1.bf16.msra.mxu1 %v501_v46  ;;  %v472_v46 = vld [vmem:[#allocation3 + $0x368] sm:$0xff] }
 0x228   :  { %794 = vmatprep.subr.bf16.mxu1 %v510_v47  ;;  %v471_v47 = vld [vmem:[#allocation3 + $0x360] sm:$0xff] }
 0x22b   :  { %795 = vmatpush1.bf16.msra.mxu1 %v509_v48  ;;  %v480_v48 = vld [vmem:[#allocation3 + $0x3a8] sm:$0xff] }
 0x22c   :  { %796 = vmatprep.subr.bf16.mxu1 %v518_v49  ;;  %v479_v49 = vld [vmem:[#allocation3 + $0x3a0] sm:$0xff] }
 0x22f   :  { %797 = vmatpush1.bf16.msra.mxu1 %v517_v50  ;;  %v488_v50 = vld [vmem:[#allocation3 + $0x3e8] sm:$0xff] }
 0x230   :  { %798 = vmatprep.subr.bf16.mxu1 %v526_v51  ;;  %v487_v51 = vld [vmem:[#allocation3 + $0x3e0] sm:$0xff] }
 0x233   :  { %799 = vmatpush1.bf16.msra.mxu1 %v525_v53  ;;  %v496_v53 = vld [vmem:[#allocation3 + $0x428] sm:$0xff] }
 0x234   :  { %800 = vmatprep.subr.bf16.mxu1 %v534_v54  ;;  %v495_v54 = vld [vmem:[#allocation3 + $0x420] sm:$0xff] }
 0x237   :  { %801 = vmatpush1.bf16.msra.mxu1 %v533_v56  ;;  %v504_v56 = vld [vmem:[#allocation3 + $0x468] sm:$0xff] }
 0x238   :  { %802 = vmatprep.subr.bf16.mxu1 %v542_v57  ;;  %v503_v57 = vld [vmem:[#allocation3 + $0x460] sm:$0xff] }
 0x23b   :  { %803 = vmatpush1.bf16.msra.mxu1 %v541_v58  ;;  %v512_v58 = vld [vmem:[#allocation3 + $0x4a8] sm:$0xff] }
 0x23c   :  { %804 = vmatprep.subr.bf16.mxu1 %v550_v59  ;;  %v511_v59 = vld [vmem:[#allocation3 + $0x4a0] sm:$0xff] }
 0x23f   :  { %805 = vmatpush1.bf16.msra.mxu1 %v549_v60  ;;  %v520_v60 = vld [vmem:[#allocation3 + $0x4e8] sm:$0xff] }
 0x240   :  { %806 = vmatprep.subr.bf16.mxu1 %v558_v61  ;;  %v519_v61 = vld [vmem:[#allocation3 + $0x4e0] sm:$0xff] }
 0x243   :  { %807 = vmatpush1.bf16.msra.mxu1 %v557_v62  ;;  %v528_v62 = vld [vmem:[#allocation3 + $0x528] sm:$0xff] }
 0x244   :  { %808 = vmatprep.subr.bf16.mxu1 %v566_v63  ;;  %v6126_v63 = vld [vmem:[#allocation9] sm:$0xff] }
 0x247   :  { %809 = vmatpush1.bf16.msra.mxu1 %v565_v0  ;;  %v527_v0 = vld [vmem:[#allocation3 + $0x520] sm:$0xff] }
 0x248   :  { %810 = vmatprep.subr.bf16.mxu1 %v574_v1  ;;  %v536_v1 = vld [vmem:[#allocation3 + $0x568] sm:$0xff] }
 0x24b   :  { %811 = vmatpush1.bf16.msra.mxu1 %v573_v2  ;;  %v624_v2 = vrot.slane %v6126_v63, %v6062_v22 }
 0x24c   :  { %812 = vmatprep.subr.bf16.mxu1 %v582_v3  ;;  %v628_v3 = vrot.slane %v6126_v63, %v6068_v25 }
 0x24f   :  { %813 = vmatpush1.bf16.msra.mxu1 %v581_v4  ;;  %v535_v4 = vld [vmem:[#allocation3 + $0x560] sm:$0xff] }
 0x250   :  { %814 = vmatprep.subr.bf16.mxu1 %v590_v6 }
 0x253   :  { %815 = vmatpush1.bf16.msra.mxu1 %v589_v7  ;;  %v544_v7 = vld [vmem:[#allocation3 + $0x5a8] sm:$0xff] }
 0x254   :  { %816 = vmatprep.subr.bf16.mxu1 %v598_v8 }
 0x257   :  { %817 = vmatpush1.bf16.msra.mxu1 %v597_v9 }
 0x258   :  { %818 = vmatprep.subr.bf16.mxu1 %v606_v10 }
 0x25b   :  { %819 = vmatpush1.bf16.msra.mxu1 %v605_v34 }
 0x25c   :  { %820 = vmatprep.subr.bf16.mxu1 %v614_v42 }
 0x25f   :  { %821 = vmatpush1.bf16.msra.mxu1 %v613_v44 }
 0x260   :  { %833 = vmatprep.subr.bf16.mxu1 %v368_v52 }
 0x262   :  { %823 = vmatmul.mubr.bf16.vlgmr.msra.gmra.mrb[8].mxu1 %v6116_v5 }
 0x263   :  { %834 = vmatpush1.bf16.msra.mxu1 %v367_v11  ;;  %865 = vmatprep.mubr.bf16.mxu1 %v6095_v55  ;;  %v543_v11 = vld [vmem:[#allocation3 + $0x5a0] sm:$0xff] }
 0x264   :  { %835 = vmatprep.subr.bf16.mxu1 %v376_v12 }
 0x267   :  { %836 = vmatpush1.bf16.msra.mxu1 %v375_v13 }
 0x268   :  { %837 = vmatprep.subr.bf16.mxu1 %v384_v14  ;;  %v552_v14 = vld [vmem:[#allocation3 + $0x5e8] sm:$0xff] }
 0x26b   :  { %838 = vmatpush1.bf16.msra.mxu1 %v383_v15 }
 0x26c   :  { %839 = vmatprep.subr.bf16.mxu1 %v392_v16 }
 0x26f   :  { %840 = vmatpush1.bf16.msra.mxu1 %v391_v17  ;;  %v551_v17 = vld [vmem:[#allocation3 + $0x5e0] sm:$0xff] }
 0x270   :  { %841 = vmatprep.subr.bf16.mxu1 %v400_v18  ;;  %v560_v18 = vld [vmem:[#allocation3 + $0x628] sm:$0xff] }
 0x273   :  { %842 = vmatpush1.bf16.msra.mxu1 %v399_v19  ;;  %v559_v19 = vld [vmem:[#allocation3 + $0x620] sm:$0xff] }
 0x274   :  { %843 = vmatprep.subr.bf16.mxu1 %v408_v20  ;;  %v568_v20 = vld [vmem:[#allocation3 + $0x668] sm:$0xff] }
 0x277   :  { %844 = vmatpush1.bf16.msra.mxu1 %v407_v24  ;;  %v567_v24 = vld [vmem:[#allocation3 + $0x660] sm:$0xff] }
 0x278   :  { %845 = vmatprep.subr.bf16.mxu1 %v416_v27  ;;  %v576_v27 = vld [vmem:[#allocation3 + $0x6a8] sm:$0xff] }
 0x27b   :  { %846 = vmatpush1.bf16.msra.mxu1 %v415_v28  ;;  %v575_v28 = vld [vmem:[#allocation3 + $0x6a0] sm:$0xff] }
 0x27c   :  { %847 = vmatprep.subr.bf16.mxu1 %v424_v29  ;;  %v584_v29 = vld [vmem:[#allocation3 + $0x6e8] sm:$0xff] }
 0x27f   :  { %848 = vmatpush1.bf16.msra.mxu1 %v423_v32  ;;  %v583_v32 = vld [vmem:[#allocation3 + $0x6e0] sm:$0xff] }
 0x280   :  { %849 = vmatprep.subr.bf16.mxu1 %v432_v35  ;;  %v592_v35 = vld [vmem:[#allocation3 + $0x728] sm:$0xff] }
 0x283   :  { %850 = vmatpush1.bf16.msra.mxu1 %v431_v33  ;;  %v591_v33 = vld [vmem:[#allocation3 + $0x720] sm:$0xff] }
 0x284   :  { %851 = vmatprep.subr.bf16.mxu1 %v440_v36  ;;  %v600_v36 = vld [vmem:[#allocation3 + $0x768] sm:$0xff] }
 0x287   :  { %852 = vmatpush1.bf16.msra.mxu1 %v439_v37  ;;  %v599_v37 = vld [vmem:[#allocation3 + $0x760] sm:$0xff] }
 0x288   :  { %853 = vmatprep.subr.bf16.mxu1 %v448_v39  ;;  %v608_v39 = vld [vmem:[#allocation3 + $0x7a8] sm:$0xff] }
 0x28b   :  { %854 = vmatpush1.bf16.msra.mxu1 %v447_v38  ;;  %v607_v38 = vld [vmem:[#allocation3 + $0x7a0] sm:$0xff] }
 0x28c   :  { %855 = vmatprep.subr.bf16.mxu1 %v456_v40  ;;  %v616_v40 = vld [vmem:[#allocation3 + $0x7e8] sm:$0xff] }
 0x28f   :  { %856 = vmatpush1.bf16.msra.mxu1 %v455_v41  ;;  %v615_v41 = vld [vmem:[#allocation3 + $0x7e0] sm:$0xff] }
 0x290   :  { %857 = vmatprep.subr.bf16.mxu1 %v464_v43  ;;  %v370_v43 = vld [vmem:[#allocation3 + $0x38] sm:$0xff] }
 0x293   :  { %858 = vmatpush1.bf16.msra.mxu1 %v463_v45  ;;  %v369_v45 = vld [vmem:[#allocation3 + $0x30] sm:$0xff] }
 0x294   :  { %859 = vmatprep.subr.bf16.mxu1 %v472_v46  ;;  %v378_v46 = vld [vmem:[#allocation3 + $0x78] sm:$0xff] }
 0x297   :  { %860 = vmatpush1.bf16.msra.mxu1 %v471_v47  ;;  %v377_v47 = vld [vmem:[#allocation3 + $0x70] sm:$0xff] }
 0x298   :  { %861 = vmatprep.subr.bf16.mxu1 %v480_v48  ;;  %v386_v48 = vld [vmem:[#allocation3 + $0xb8] sm:$0xff] }
 0x29b   :  { %862 = vmatpush1.bf16.msra.mxu1 %v479_v49  ;;  %v385_v49 = vld [vmem:[#allocation3 + $0xb0] sm:$0xff] }
 0x29c   :  { %863 = vmatprep.subr.bf16.mxu1 %v488_v50  ;;  %v394_v50 = vld [vmem:[#allocation3 + $0xf8] sm:$0xff] }
 0x29f   :  { %864 = vmatpush1.bf16.msra.mxu1 %v487_v51  ;;  %v393_v51 = vld [vmem:[#allocation3 + $0xf0] sm:$0xff] }
 0x2a0   :  { %876 = vmatprep.subr.bf16.mxu1 %v496_v53  ;;  %v402_v53 = vld [vmem:[#allocation3 + $0x138] sm:$0xff] }
 0x2a2   :  { %866 = vmatmul.mubr.bf16.vlgmr.msra.gmra.mrb[12].mxu1 %v6102_v30 }
 0x2a3   :  { %877 = vmatpush1.bf16.msra.mxu1 %v495_v54  ;;  %908 = vmatprep.mubr.bf16.mxu1 %v6108_v31  ;;  %v401_v54 = vld [vmem:[#allocation3 + $0x130] sm:$0xff] }
 0x2a4   :  { %878 = vmatprep.subr.bf16.mxu1 %v504_v56  ;;  %v410_v56 = vld [vmem:[#allocation3 + $0x178] sm:$0xff] }
 0x2a7   :  { %879 = vmatpush1.bf16.msra.mxu1 %v503_v57  ;;  %v409_v57 = vld [vmem:[#allocation3 + $0x170] sm:$0xff] }
 0x2a8   :  { %880 = vmatprep.subr.bf16.mxu1 %v512_v58  ;;  %v418_v58 = vld [vmem:[#allocation3 + $0x1b8] sm:$0xff] }
 0x2ab   :  { %881 = vmatpush1.bf16.msra.mxu1 %v511_v59  ;;  %v426_v59 = vld [vmem:[#allocation3 + $0x1f8] sm:$0xff] }
 0x2ac   :  { %882 = vmatprep.subr.bf16.mxu1 %v520_v60  ;;  %v425_v60 = vld [vmem:[#allocation3 + $0x1f0] sm:$0xff] }
 0x2af   :  { %883 = vmatpush1.bf16.msra.mxu1 %v519_v61  ;;  %v434_v61 = vld [vmem:[#allocation3 + $0x238] sm:$0xff] }
 0x2b0   :  { %884 = vmatprep.subr.bf16.mxu1 %v528_v62  ;;  %v433_v62 = vld [vmem:[#allocation3 + $0x230] sm:$0xff] }
 0x2b3   :  { %885 = vmatpush1.bf16.msra.mxu1 %v527_v0  ;;  %v442_v0 = vld [vmem:[#allocation3 + $0x278] sm:$0xff] }
 0x2b4   :  { %886 = vmatprep.subr.bf16.mxu1 %v536_v1  ;;  %v441_v1 = vld [vmem:[#allocation3 + $0x270] sm:$0xff] }
 0x2b5   :  { %v738_v6 = vpop.f32.mrb[4].mxu1 }
 0x2b6   :  { %v6132_v8 = vadd.f32 %v738_v6, %v624_v2  ;;  %v740_v9 = vpop.f32.mrb[5].mxu1  ;;  %v457_v6 = vld [vmem:[#allocation3 + $0x2f0] sm:$0xff] }
 0x2b7   :  { %v6134_v10 = vadd.f32 %v740_v9, %v628_v3  ;;  %v742_v34 = vpop.f32.mrb[6].mxu1  ;;  %887 = vmatpush1.bf16.msra.mxu1 %v535_v4  ;;  %v458_v4 = vld [vmem:[#allocation3 + $0x2f8] sm:$0xff]  ;;  %v465_v9 = vld [vmem:[#allocation3 + $0x330] sm:$0xff] }
 0x2b8   :  { %v1005_v42 = vmax.f32 %v6132_v8, 0.0  ;;  %v6137_v44 = vadd.f32 %v742_v34, %v624_v2  ;;  %v744_v52 = vpop.f32.mrb[7].mxu1  ;;  %888 = vmatprep.subr.bf16.mxu1 %v544_v7  ;;  %v450_v2 = vld [vmem:[#allocation3 + $0x2b8] sm:$0xff] }
 0x2b9   :  { %v1006_v12 = vmax.f32 %v6134_v10, 0.0  ;;  %v6140_v13 = vadd.f32 %v744_v52, %v628_v3  ;;  %v449_v3 = vld [vmem:[#allocation3 + $0x2b0] sm:$0xff]  ;;  %v466_v7 = vld [vmem:[#allocation3 + $0x338] sm:$0xff] }
 0x2ba   :  { %v1013_v15 = vmax.f32 %v6137_v44, 0.0  ;;  %v474_v34 = vld [vmem:[#allocation3 + $0x378] sm:$0xff]  ;;  %v473_v52 = vld [vmem:[#allocation3 + $0x370] sm:$0xff] }
 0x2bb   :  { %v1014_v16 = vmax.f32 %v6140_v13, 0.0  ;;  %889 = vmatpush1.bf16.msra.mxu1 %v543_v11  ;;  %v482_v11 = vld [vmem:[#allocation3 + $0x3b8] sm:$0xff] }
 0x2bc   :  { %890 = vmatprep.subr.bf16.mxu1 %v552_v14  ;;  %v481_v14 = vld [vmem:[#allocation3 + $0x3b0] sm:$0xff] }
 0x2bf   :  { %891 = vmatpush1.bf16.msra.mxu1 %v551_v17  ;;  %v490_v17 = vld [vmem:[#allocation3 + $0x3f8] sm:$0xff] }
 0x2c0   :  { %892 = vmatprep.subr.bf16.mxu1 %v560_v18  ;;  %v489_v18 = vld [vmem:[#allocation3 + $0x3f0] sm:$0xff] }
 0x2c3   :  { %893 = vmatpush1.bf16.msra.mxu1 %v559_v19  ;;  %v498_v19 = vld [vmem:[#allocation3 + $0x438] sm:$0xff] }
 0x2c4   :  { %894 = vmatprep.subr.bf16.mxu1 %v568_v20  ;;  %v497_v20 = vld [vmem:[#allocation3 + $0x430] sm:$0xff] }
 0x2c7   :  { %895 = vmatpush1.bf16.msra.mxu1 %v567_v24  ;;  %v506_v24 = vld [vmem:[#allocation3 + $0x478] sm:$0xff] }
 0x2c8   :  { %896 = vmatprep.subr.bf16.mxu1 %v576_v27  ;;  %v505_v27 = vld [vmem:[#allocation3 + $0x470] sm:$0xff] }
 0x2cb   :  { %897 = vmatpush1.bf16.msra.mxu1 %v575_v28  ;;  %v514_v28 = vld [vmem:[#allocation3 + $0x4b8] sm:$0xff] }
 0x2cc   :  { %898 = vmatprep.subr.bf16.mxu1 %v584_v29  ;;  %v513_v29 = vld [vmem:[#allocation3 + $0x4b0] sm:$0xff] }
 0x2cf   :  { %899 = vmatpush1.bf16.msra.mxu1 %v583_v32  ;;  %v522_v32 = vld [vmem:[#allocation3 + $0x4f8] sm:$0xff] }
 0x2d0   :  { %900 = vmatprep.subr.bf16.mxu1 %v592_v35  ;;  %v521_v35 = vld [vmem:[#allocation3 + $0x4f0] sm:$0xff] }
 0x2d3   :  { %901 = vmatpush1.bf16.msra.mxu1 %v591_v33  ;;  %v530_v33 = vld [vmem:[#allocation3 + $0x538] sm:$0xff] }
 0x2d4   :  { %902 = vmatprep.subr.bf16.mxu1 %v600_v36  ;;  %v529_v36 = vld [vmem:[#allocation3 + $0x530] sm:$0xff] }
 0x2d7   :  { %903 = vmatpush1.bf16.msra.mxu1 %v599_v37  ;;  %v538_v37 = vld [vmem:[#allocation3 + $0x578] sm:$0xff] }
 0x2d8   :  { %904 = vmatprep.subr.bf16.mxu1 %v608_v39  ;;  %v537_v39 = vld [vmem:[#allocation3 + $0x570] sm:$0xff] }
 0x2db   :  { %905 = vmatpush1.bf16.msra.mxu1 %v607_v38 }
 0x2dc   :  { %906 = vmatprep.subr.bf16.mxu1 %v616_v40  ;;  %v546_v40 = vld [vmem:[#allocation3 + $0x5b8] sm:$0xff] }
 0x2df   :  { %907 = vmatpush1.bf16.msra.mxu1 %v615_v41 }
 0x2e0   :  { %919 = vmatprep.subr.bf16.mxu1 %v370_v43 }
 0x2e2   :  { %909 = vmatmul.mubr.bf16.vlgmr.msra.gmra.mrb[12].mxu1 %v6116_v5 }
 0x2e3   :  { %920 = vmatpush1.bf16.msra.mxu1 %v369_v45  ;;  %951 = vmatprep.mubr.bf16.mxu1 %v6095_v55  ;;  %v417_v55 = vld [vmem:[#allocation3 + $0x1b0] sm:$0xff] }
 0x2e4   :  { %921 = vmatprep.subr.bf16.mxu1 %v378_v46 }
 0x2e7   :  { %922 = vmatpush1.bf16.msra.mxu1 %v377_v47 }
 0x2e8   :  { %923 = vmatprep.subr.bf16.mxu1 %v386_v48 }
 0x2eb   :  { %924 = vmatpush1.bf16.msra.mxu1 %v385_v49 }
 0x2ec   :  { %925 = vmatprep.subr.bf16.mxu1 %v394_v50  ;;  %v545_v50 = vld [vmem:[#allocation3 + $0x5b0] sm:$0xff] }
 0x2ef   :  { %926 = vmatpush1.bf16.msra.mxu1 %v393_v51 }
 0x2f0   :  { %927 = vmatprep.subr.bf16.mxu1 %v402_v53 }
 0x2f3   :  { %928 = vmatpush1.bf16.msra.mxu1 %v401_v54  ;;  %v554_v54 = vld [vmem:[#allocation3 + $0x5f8] sm:$0xff] }
 0x2f4   :  { %929 = vmatprep.subr.bf16.mxu1 %v410_v56 }
 0x2f7   :  { %930 = vmatpush1.bf16.msra.mxu1 %v409_v57 }
 0x2f8   :  { %931 = vmatprep.subr.bf16.mxu1 %v418_v58  ;;  %v553_v58 = vld [vmem:[#allocation3 + $0x5f0] sm:$0xff] }
 0x2fb   :  { %932 = vmatpush1.bf16.msra.mxu1 %v417_v55  ;;  %v562_v55 = vld [vmem:[#allocation3 + $0x638] sm:$0xff] }
 0x2fc   :  { %933 = vmatprep.subr.bf16.mxu1 %v426_v59  ;;  %v561_v59 = vld [vmem:[#allocation3 + $0x630] sm:$0xff] }
 0x2ff   :  { %934 = vmatpush1.bf16.msra.mxu1 %v425_v60  ;;  %v570_v60 = vld [vmem:[#allocation3 + $0x678] sm:$0xff] }
 0x300   :  { %935 = vmatprep.subr.bf16.mxu1 %v434_v61  ;;  %v569_v61 = vld [vmem:[#allocation3 + $0x670] sm:$0xff] }
 0x303   :  { %936 = vmatpush1.bf16.msra.mxu1 %v433_v62  ;;  %v578_v62 = vld [vmem:[#allocation3 + $0x6b8] sm:$0xff] }
 0x304   :  { %937 = vmatprep.subr.bf16.mxu1 %v442_v0  ;;  %v577_v0 = vld [vmem:[#allocation3 + $0x6b0] sm:$0xff] }
 0x307   :  { %938 = vmatpush1.bf16.msra.mxu1 %v441_v1  ;;  %v586_v1 = vld [vmem:[#allocation3 + $0x6f8] sm:$0xff] }
 0x308   :  { %939 = vmatprep.subr.bf16.mxu1 %v450_v2  ;;  %v585_v2 = vld [vmem:[#allocation3 + $0x6f0] sm:$0xff] }
 0x30b   :  { %940 = vmatpush1.bf16.msra.mxu1 %v449_v3  ;;  %v594_v3 = vld [vmem:[#allocation3 + $0x738] sm:$0xff] }
 0x30c   :  { %941 = vmatprep.subr.bf16.mxu1 %v458_v4  ;;  %v593_v4 = vld [vmem:[#allocation3 + $0x730] sm:$0xff] }
 0x30f   :  { %942 = vmatpush1.bf16.msra.mxu1 %v457_v6  ;;  %v602_v6 = vld [vmem:[#allocation3 + $0x778] sm:$0xff] }
 0x310   :  { %943 = vmatprep.subr.bf16.mxu1 %v466_v7  ;;  %v601_v7 = vld [vmem:[#allocation3 + $0x770] sm:$0xff] }
 0x313   :  { %944 = vmatpush1.bf16.msra.mxu1 %v465_v9  ;;  %v610_v9 = vld [vmem:[#allocation3 + $0x7b8] sm:$0xff] }
 0x314   :  { %945 = vmatprep.subr.bf16.mxu1 %v474_v34  ;;  %v609_v34 = vld [vmem:[#allocation3 + $0x7b0] sm:$0xff] }
 0x317   :  { %946 = vmatpush1.bf16.msra.mxu1 %v473_v52  ;;  %v618_v52 = vld [vmem:[#allocation3 + $0x7f8] sm:$0xff] }
 0x318   :  { %947 = vmatprep.subr.bf16.mxu1 %v482_v11  ;;  %v617_v11 = vld [vmem:[#allocation3 + $0x7f0] sm:$0xff] }
 0x31b   :  { %948 = vmatpush1.bf16.msra.mxu1 %v481_v14  ;;  %v6166_v14 = vsub.s32 4, %v6059_v21 }
 0x31c   :  { %949 = vmatprep.subr.bf16.mxu1 %v490_v17  ;;  %v6169_v17 = vsub.s32 5, %v6059_v21 }
 0x31f   :  { %950 = vmatpush1.bf16.msra.mxu1 %v489_v18  ;;  %v640_v18 = vrot.slane %v6126_v63, %v6166_v14 }
 0x320   :  { %962 = vmatprep.subr.bf16.mxu1 %v498_v19  ;;  %v644_v19 = vrot.slane %v6126_v63, %v6169_v17 }
 0x322   :  { %952 = vmatmul.mubr.bf16.vlgmr.msra.gmra.mrb[16].mxu1 %v6102_v30  ;;  %v632_v30 = vrot.slane %v6126_v63, %v6065_v23 }
 0x323   :  { %963 = vmatpush1.bf16.msra.mxu1 %v497_v20  ;;  %994 = vmatprep.mubr.bf16.mxu1 %v6108_v31  ;;  %v636_v31 = vrot.slane %v6126_v63, %v6071_v26 }
 0x324   :  { %964 = vmatprep.subr.bf16.mxu1 %v506_v24 }
 0x327   :  { %965 = vmatpush1.bf16.msra.mxu1 %v505_v27 }
 0x328   :  { %966 = vmatprep.subr.bf16.mxu1 %v514_v28 }
 0x32b   :  { %967 = vmatpush1.bf16.msra.mxu1 %v513_v29 }
 0x32c   :  { %968 = vmatprep.subr.bf16.mxu1 %v522_v32 }
 0x32f   :  { %969 = vmatpush1.bf16.msra.mxu1 %v521_v35 }
 0x330   :  { %970 = vmatprep.subr.bf16.mxu1 %v530_v33 }
 0x333   :  { %971 = vmatpush1.bf16.msra.mxu1 %v529_v36 }
 0x334   :  { %972 = vmatprep.subr.bf16.mxu1 %v538_v37 }
 0x335   :  { %v824_v38 = vpop.f32.mrb[8].mxu1 }
 0x336   :  { %v6152_v41 = vadd.f32 %v824_v38, %v632_v30  ;;  %v826_v43 = vpop.f32.mrb[9].mxu1 }
 0x337   :  { %v6154_v45 = vadd.f32 %v826_v43, %v636_v31  ;;  %v828_v46 = vpop.f32.mrb[10].mxu1  ;;  %973 = vmatpush1.bf16.msra.mxu1 %v537_v39  ;;  %v6191_v39 = vsub.s32 7, %v6059_v21 }
 0x338   :  { %v1007_v47 = vmax.f32 %v6152_v41, 0.0  ;;  %v6157_v48 = vadd.f32 %v828_v46, %v632_v30  ;;  %v830_v49 = vpop.f32.mrb[11].mxu1  ;;  %974 = vmatprep.subr.bf16.mxu1 %v546_v40 }
 0x339   :  { %v1008_v51 = vmax.f32 %v6154_v45, 0.0  ;;  %v6160_v53 = vadd.f32 %v830_v49, %v636_v31  ;;  %v6188_v31 = vsub.s32 6, %v6059_v21  ;;  %v652_v40 = vrot.slane %v6126_v63, %v6191_v39 }
 0x33a   :  { %v1015_v56 = vmax.f32 %v6157_v48, 0.0 }
 0x33b   :  { %v1016_v57 = vmax.f32 %v6160_v53, 0.0  ;;  %975 = vmatpush1.bf16.msra.mxu1 %v545_v50  ;;  %v648_v38 = vrot.slane %v6126_v63, %v6188_v31 }
 0x33c   :  { %976 = vmatprep.subr.bf16.mxu1 %v554_v54 }
 0x33f   :  { %977 = vmatpush1.bf16.msra.mxu1 %v553_v58 }
 0x340   :  { %978 = vmatprep.subr.bf16.mxu1 %v562_v55 }
 0x343   :  { %979 = vmatpush1.bf16.msra.mxu1 %v561_v59 }
 0x344   :  { %980 = vmatprep.subr.bf16.mxu1 %v570_v60 }
 0x347   :  { %981 = vmatpush1.bf16.msra.mxu1 %v569_v61 }
 0x348   :  { %982 = vmatprep.subr.bf16.mxu1 %v578_v62 }
 0x34b   :  { %983 = vmatpush1.bf16.msra.mxu1 %v577_v0 }
 0x34c   :  { %984 = vmatprep.subr.bf16.mxu1 %v586_v1 }
 0x34f   :  { %985 = vmatpush1.bf16.msra.mxu1 %v585_v2 }
 0x350   :  { %986 = vmatprep.subr.bf16.mxu1 %v594_v3 }
 0x353   :  { %987 = vmatpush1.bf16.msra.mxu1 %v593_v4 }
 0x354   :  { %988 = vmatprep.subr.bf16.mxu1 %v602_v6 }
 0x357   :  { %989 = vmatpush1.bf16.msra.mxu1 %v601_v7 }
 0x358   :  { %990 = vmatprep.subr.bf16.mxu1 %v610_v9 }
 0x35b   :  { %991 = vmatpush1.bf16.msra.mxu1 %v609_v34 }
 0x35c   :  { %992 = vmatprep.subr.bf16.mxu1 %v618_v52 }
 0x35f   :  { %993 = vmatpush1.bf16.msra.mxu1 %v617_v11 }
 0x362   :  { %995 = vmatmul.mubr.bf16.vlgmr.msra.gmra.mrb[16].mxu1 %v6116_v5 }
 0x3b5   :  { %v910_v20 = vpop.f32.mrb[12].mxu1 }
 0x3b6   :  { %v6175_v24 = vadd.f32 %v910_v20, %v640_v18  ;;  %v912_v27 = vpop.f32.mrb[13].mxu1 }
 0x3b7   :  { %v6177_v28 = vadd.f32 %v912_v27, %v644_v19  ;;  %v914_v29 = vpop.f32.mrb[14].mxu1 }
 0x3b8   :  { %v1009_v5 = vmax.f32 %v6175_v24, 0.0  ;;  %v6180_v32 = vadd.f32 %v914_v29, %v640_v18  ;;  %v916_v35 = vpop.f32.mrb[15].mxu1 }
 0x3b9   :  { %v1010_v33 = vmax.f32 %v6177_v28, 0.0  ;;  %v6183_v36 = vadd.f32 %v916_v35, %v644_v19 }
 0x3ba   :  { %v1017_v37 = vmax.f32 %v6180_v32, 0.0 }
 0x3bb   :  { %v1018_v30 = vmax.f32 %v6183_v36, 0.0 }
 0x435   :  { %v996_v43 = vpop.f32.mrb[16].mxu1 }
 0x436   :  { %v6197_v46 = vadd.f32 %v996_v43, %v648_v38  ;;  %v998_v49 = vpop.f32.mrb[17].mxu1 }
 0x437   :  { %v6199_v50 = vadd.f32 %v998_v49, %v652_v40  ;;  %v1000_v54 = vpop.f32.mrb[18].mxu1 }
 0x438   :  { %v1011_v58 = vmax.f32 %v6197_v46, 0.0  ;;  %v6202_v55 = vadd.f32 %v1000_v54, %v648_v38  ;;  %v1002_v59 = vpop.f32.mrb[19].mxu1 }
 0x439   :  { %v1012_v21 = vmax.f32 %v6199_v50, 0.0  ;;  %v6205_v60 = vadd.f32 %v1002_v59, %v652_v40 }
 0x43a   :  { %v1019_v61 = vmax.f32 %v6202_v55, 0.0 }
 0x43b   :  { %v1020_v63 = vmax.f32 %v6205_v60, 0.0 }
 0x43c   :  { %5882 = dma.done.wait [#allocation6 + $0x2], 131072 }
 0x43d   :  { %5883 = vsyncadd [#allocation6 + $0x2], 4294836224  ;;  %v6213_v62 = vpack.c.bf16 %v1014_v16, %v1006_v12  ;;  %v1034_v0 = vld [vmem:[#allocation4 + $0x8] sm:$0xff]  ;;  %v1036_v1 = vld [vmem:[#allocation4 + $0x18] sm:$0xff] }
 0x43e   :  { %v1033_v2 = vld [vmem:[#allocation4] sm:$0xff]  ;;  %2141 = vmatprep.subr.bf16.mxu0 %v1034_v0  ;;  %2313 = vmatprep.subr.bf16.mxu1 %v1036_v1  ;;  %v1035_v3 = vld [vmem:[#allocation4 + $0x10] sm:$0xff]  ;;  %v1050_v4 = vld [vmem:[#allocation4 + $0x88] sm:$0xff] }
 0x43f   :  { %2173 = vmatprep.mubr.bf16.mxu0 %v6213_v62  ;;  %2345 = vmatprep.mubr.bf16.mxu1 %v6213_v62  ;;  %v1052_v6 = vld [vmem:[#allocation4 + $0x98] sm:$0xff]  ;;  %v1049_v10 = vld [vmem:[#allocation4 + $0x80] sm:$0xff]  ;;  %v1051_v13 = vld [vmem:[#allocation4 + $0x90] sm:$0xff] }
 0x440   :  { %2142 = vmatpush1.bf16.msra.mxu0 %v1033_v2  ;;  %2314 = vmatpush1.bf16.msra.mxu1 %v1035_v3  ;;  %v1066_v12 = vld [vmem:[#allocation4 + $0x108] sm:$0xff]  ;;  %v1068_v16 = vld [vmem:[#allocation4 + $0x118] sm:$0xff]  ;;  %v1065_v7 = vld [vmem:[#allocation4 + $0x100] sm:$0xff] }
 0x441   :  { %2143 = vmatprep.subr.bf16.mxu0 %v1050_v4  ;;  %2315 = vmatprep.subr.bf16.mxu1 %v1052_v6  ;;  %v1067_v9 = vld [vmem:[#allocation4 + $0x110] sm:$0xff]  ;;  %v1082_v34 = vld [vmem:[#allocation4 + $0x188] sm:$0xff]  ;;  %v1084_v52 = vld [vmem:[#allocation4 + $0x198] sm:$0xff] }
 0x442   :  { %v1081_v11 = vld [vmem:[#allocation4 + $0x180] sm:$0xff]  ;;  %v1083_v18 = vld [vmem:[#allocation4 + $0x190] sm:$0xff]  ;;  %v1098_v19 = vld [vmem:[#allocation4 + $0x208] sm:$0xff] }
 0x443   :  { %v1100_v20 = vld [vmem:[#allocation4 + $0x218] sm:$0xff]  ;;  %v1097_v27 = vld [vmem:[#allocation4 + $0x200] sm:$0xff]  ;;  %v1099_v29 = vld [vmem:[#allocation4 + $0x210] sm:$0xff] }
 0x444   :  { %2144 = vmatpush1.bf16.msra.mxu0 %v1049_v10  ;;  %2316 = vmatpush1.bf16.msra.mxu1 %v1051_v13  ;;  %v1114_v35 = vld [vmem:[#allocation4 + $0x288] sm:$0xff]  ;;  %v1116_v38 = vld [vmem:[#allocation4 + $0x298] sm:$0xff]  ;;  %v1113_v40 = vld [vmem:[#allocation4 + $0x280] sm:$0xff] }
 0x445   :  { %2145 = vmatprep.subr.bf16.mxu0 %v1066_v12  ;;  %2317 = vmatprep.subr.bf16.mxu1 %v1068_v16  ;;  %v1115_v43 = vld [vmem:[#allocation4 + $0x290] sm:$0xff]  ;;  %v1130_v49 = vld [vmem:[#allocation4 + $0x308] sm:$0xff]  ;;  %v1132_v54 = vld [vmem:[#allocation4 + $0x318] sm:$0xff] }
 0x446   :  { %v1129_v59 = vld [vmem:[#allocation4 + $0x300] sm:$0xff]  ;;  %v1131_v0 = vld [vmem:[#allocation4 + $0x310] sm:$0xff]  ;;  %v1146_v1 = vld [vmem:[#allocation4 + $0x388] sm:$0xff] }
 0x447   :  { %v1148_v2 = vld [vmem:[#allocation4 + $0x398] sm:$0xff]  ;;  %v1145_v3 = vld [vmem:[#allocation4 + $0x380] sm:$0xff]  ;;  %v1147_v4 = vld [vmem:[#allocation4 + $0x390] sm:$0xff] }
 0x448   :  { %2146 = vmatpush1.bf16.msra.mxu0 %v1065_v7  ;;  %2318 = vmatpush1.bf16.msra.mxu1 %v1067_v9  ;;  %v1162_v6 = vld [vmem:[#allocation4 + $0x408] sm:$0xff]  ;;  %v1164_v10 = vld [vmem:[#allocation4 + $0x418] sm:$0xff]  ;;  %v1161_v13 = vld [vmem:[#allocation4 + $0x400] sm:$0xff] }
 0x449   :  { %2147 = vmatprep.subr.bf16.mxu0 %v1082_v34  ;;  %2319 = vmatprep.subr.bf16.mxu1 %v1084_v52  ;;  %v1163_v12 = vld [vmem:[#allocation4 + $0x410] sm:$0xff]  ;;  %v1178_v16 = vld [vmem:[#allocation4 + $0x488] sm:$0xff]  ;;  %v1180_v7 = vld [vmem:[#allocation4 + $0x498] sm:$0xff] }
 0x44a   :  { %v1177_v9 = vld [vmem:[#allocation4 + $0x480] sm:$0xff]  ;;  %v1179_v34 = vld [vmem:[#allocation4 + $0x490] sm:$0xff]  ;;  %v1194_v52 = vld [vmem:[#allocation4 + $0x508] sm:$0xff] }
 0x44b   :  { %v1305_v8 = vld [vmem:[#allocation4 + $0x880] sm:$0xff]  ;;  %v1322_v44 = vld [vmem:[#allocation4 + $0x908] sm:$0xff]  ;;  %v1055_v55 = vld [vmem:[#allocation4 + $0xb0] sm:$0xff] }
 0x44c   :  { %2148 = vmatpush1.bf16.msra.mxu0 %v1081_v11  ;;  %2320 = vmatpush1.bf16.msra.mxu1 %v1083_v18  ;;  %v1196_v11 = vld [vmem:[#allocation4 + $0x518] sm:$0xff]  ;;  %v1193_v18 = vld [vmem:[#allocation4 + $0x500] sm:$0xff]  ;;  %v1338_v53 = vld [vmem:[#allocation4 + $0x988] sm:$0xff] }
 0x44d   :  { %2149 = vmatprep.subr.bf16.mxu0 %v1098_v19  ;;  %2321 = vmatprep.subr.bf16.mxu1 %v1100_v20  ;;  %v1195_v19 = vld [vmem:[#allocation4 + $0x510] sm:$0xff]  ;;  %v1210_v20 = vld [vmem:[#allocation4 + $0x588] sm:$0xff]  ;;  %v1321_v45 = vld [vmem:[#allocation4 + $0x900] sm:$0xff] }
 0x44e   :  { %v1561_v41 = vld [vmem:[#allocation4 + $0x1080] sm:$0xff]  ;;  %v1578_v48 = vld [vmem:[#allocation4 + $0x1108] sm:$0xff] }
 0x44f   :  { %v1577_v28 = vld [vmem:[#allocation4 + $0x1100] sm:$0xff]  ;;  %v1594_v36 = vld [vmem:[#allocation4 + $0x1188] sm:$0xff] }
 0x450   :  { %2150 = vmatpush1.bf16.msra.mxu0 %v1097_v27  ;;  %2322 = vmatpush1.bf16.msra.mxu1 %v1099_v29  ;;  %v1212_v27 = vld [vmem:[#allocation4 + $0x598] sm:$0xff]  ;;  %v1209_v29 = vld [vmem:[#allocation4 + $0x580] sm:$0xff]  ;;  %v1834_v32 = vld [vmem:[#allocation4 + $0x1908] sm:$0xff] }
 0x451   :  { %2151 = vmatprep.subr.bf16.mxu0 %v1114_v35  ;;  %2323 = vmatprep.subr.bf16.mxu1 %v1116_v38  ;;  %v1211_v35 = vld [vmem:[#allocation4 + $0x590] sm:$0xff]  ;;  %v1226_v38 = vld [vmem:[#allocation4 + $0x608] sm:$0xff]  ;;  %v1817_v24 = vld [vmem:[#allocation4 + $0x1880] sm:$0xff] }
 0x452   :  { %v1833_v50 = vld [vmem:[#allocation4 + $0x1900] sm:$0xff]  ;;  %v1850_v60 = vld [vmem:[#allocation4 + $0x1988] sm:$0xff] }
 0x453   :  { %v1053_v46 = vld [vmem:[#allocation4 + $0xa0] sm:$0xff] }
 0x454   :  { %2152 = vmatpush1.bf16.msra.mxu0 %v1113_v40  ;;  %2324 = vmatpush1.bf16.msra.mxu1 %v1115_v43  ;;  %v1228_v40 = vld [vmem:[#allocation4 + $0x618] sm:$0xff]  ;;  %v1225_v43 = vld [vmem:[#allocation4 + $0x600] sm:$0xff] }
 0x455   :  { %2153 = vmatprep.subr.bf16.mxu0 %v1130_v49  ;;  %2325 = vmatprep.subr.bf16.mxu1 %v1132_v54  ;;  %v1227_v49 = vld [vmem:[#allocation4 + $0x610] sm:$0xff]  ;;  %v1242_v54 = vld [vmem:[#allocation4 + $0x688] sm:$0xff] }
 0x458   :  { %2154 = vmatpush1.bf16.msra.mxu0 %v1129_v59  ;;  %2326 = vmatpush1.bf16.msra.mxu1 %v1131_v0  ;;  %v1244_v59 = vld [vmem:[#allocation4 + $0x698] sm:$0xff]  ;;  %v1241_v0 = vld [vmem:[#allocation4 + $0x680] sm:$0xff] }
 0x459   :  { %2155 = vmatprep.subr.bf16.mxu0 %v1146_v1  ;;  %2327 = vmatprep.subr.bf16.mxu1 %v1148_v2  ;;  %v1243_v1 = vld [vmem:[#allocation4 + $0x690] sm:$0xff]  ;;  %v1258_v2 = vld [vmem:[#allocation4 + $0x708] sm:$0xff] }
 0x45c   :  { %2156 = vmatpush1.bf16.msra.mxu0 %v1145_v3  ;;  %2328 = vmatpush1.bf16.msra.mxu1 %v1147_v4  ;;  %v1260_v3 = vld [vmem:[#allocation4 + $0x718] sm:$0xff]  ;;  %v1257_v4 = vld [vmem:[#allocation4 + $0x700] sm:$0xff] }
 0x45d   :  { %2157 = vmatprep.subr.bf16.mxu0 %v1162_v6  ;;  %2329 = vmatprep.subr.bf16.mxu1 %v1164_v10  ;;  %v1259_v6 = vld [vmem:[#allocation4 + $0x710] sm:$0xff]  ;;  %v1274_v10 = vld [vmem:[#allocation4 + $0x788] sm:$0xff] }
 0x460   :  { %2158 = vmatpush1.bf16.msra.mxu0 %v1161_v13  ;;  %2330 = vmatpush1.bf16.msra.mxu1 %v1163_v12  ;;  %v1276_v13 = vld [vmem:[#allocation4 + $0x798] sm:$0xff]  ;;  %v1273_v12 = vld [vmem:[#allocation4 + $0x780] sm:$0xff] }
 0x461   :  { %2159 = vmatprep.subr.bf16.mxu0 %v1178_v16  ;;  %2331 = vmatprep.subr.bf16.mxu1 %v1180_v7  ;;  %v1275_v16 = vld [vmem:[#allocation4 + $0x790] sm:$0xff]  ;;  %v1290_v7 = vld [vmem:[#allocation4 + $0x808] sm:$0xff] }
 0x464   :  { %2160 = vmatpush1.bf16.msra.mxu0 %v1177_v9  ;;  %2332 = vmatpush1.bf16.msra.mxu1 %v1179_v34  ;;  %v1292_v9 = vld [vmem:[#allocation4 + $0x818] sm:$0xff]  ;;  %v6221_v34 = vpack.c.bf16 %v1013_v15, %v1005_v42  ;;  %v1307_v42 = vld [vmem:[#allocation4 + $0x890] sm:$0xff] }
 0x465   :  { %2161 = vmatprep.subr.bf16.mxu0 %v1194_v52  ;;  %2333 = vmatprep.subr.bf16.mxu1 %v1196_v11  ;;  %v1289_v52 = vld [vmem:[#allocation4 + $0x800] sm:$0xff]  ;;  %v1291_v11 = vld [vmem:[#allocation4 + $0x810] sm:$0xff]  ;;  %v1324_v15 = vld [vmem:[#allocation4 + $0x918] sm:$0xff] }
 0x468   :  { %2162 = vmatpush1.bf16.msra.mxu0 %v1193_v18  ;;  %2334 = vmatpush1.bf16.msra.mxu1 %v1195_v19  ;;  %v1306_v18 = vld [vmem:[#allocation4 + $0x888] sm:$0xff]  ;;  %v1308_v19 = vld [vmem:[#allocation4 + $0x898] sm:$0xff] }
 0x469   :  { %2163 = vmatprep.subr.bf16.mxu0 %v1210_v20  ;;  %2335 = vmatprep.subr.bf16.mxu1 %v1212_v27  ;;  %v6227_v20 = vpack.c.bf16 %v1016_v57, %v1008_v51  ;;  %v1323_v51 = vld [vmem:[#allocation4 + $0x910] sm:$0xff]  ;;  %v1340_v57 = vld [vmem:[#allocation4 + $0x998] sm:$0xff]  ;;  %v1337_v27 = vld [vmem:[#allocation4 + $0x980] sm:$0xff] }
 0x46c   :  { %2164 = vmatpush1.bf16.msra.mxu0 %v1209_v29  ;;  %2336 = vmatpush1.bf16.msra.mxu1 %v1211_v35  ;;  %v1339_v29 = vld [vmem:[#allocation4 + $0x990] sm:$0xff]  ;;  %v1354_v35 = vld [vmem:[#allocation4 + $0xa08] sm:$0xff] }
 0x46d   :  { %2165 = vmatprep.subr.bf16.mxu0 %v1226_v38  ;;  %2337 = vmatprep.subr.bf16.mxu1 %v1228_v40  ;;  %v1356_v38 = vld [vmem:[#allocation4 + $0xa18] sm:$0xff]  ;;  %v1353_v40 = vld [vmem:[#allocation4 + $0xa00] sm:$0xff] }
 0x470   :  { %2166 = vmatpush1.bf16.msra.mxu0 %v1225_v43  ;;  %2338 = vmatpush1.bf16.msra.mxu1 %v1227_v49  ;;  %v1355_v43 = vld [vmem:[#allocation4 + $0xa10] sm:$0xff]  ;;  %v1370_v49 = vld [vmem:[#allocation4 + $0xa88] sm:$0xff] }
 0x471   :  { %2167 = vmatprep.subr.bf16.mxu0 %v1242_v54  ;;  %2339 = vmatprep.subr.bf16.mxu1 %v1244_v59  ;;  %v1372_v54 = vld [vmem:[#allocation4 + $0xa98] sm:$0xff]  ;;  %v1369_v59 = vld [vmem:[#allocation4 + $0xa80] sm:$0xff] }
 0x474   :  { %2168 = vmatpush1.bf16.msra.mxu0 %v1241_v0  ;;  %2340 = vmatpush1.bf16.msra.mxu1 %v1243_v1  ;;  %v1371_v0 = vld [vmem:[#allocation4 + $0xa90] sm:$0xff]  ;;  %v1386_v1 = vld [vmem:[#allocation4 + $0xb08] sm:$0xff] }
 0x475   :  { %2169 = vmatprep.subr.bf16.mxu0 %v1258_v2  ;;  %2341 = vmatprep.subr.bf16.mxu1 %v1260_v3  ;;  %v1388_v2 = vld [vmem:[#allocation4 + $0xb18] sm:$0xff]  ;;  %v1385_v3 = vld [vmem:[#allocation4 + $0xb00] sm:$0xff] }
 0x478   :  { %2170 = vmatpush1.bf16.msra.mxu0 %v1257_v4  ;;  %2342 = vmatpush1.bf16.msra.mxu1 %v1259_v6  ;;  %v1387_v4 = vld [vmem:[#allocation4 + $0xb10] sm:$0xff]  ;;  %v1402_v6 = vld [vmem:[#allocation4 + $0xb88] sm:$0xff] }
 0x479   :  { %2171 = vmatprep.subr.bf16.mxu0 %v1274_v10  ;;  %2343 = vmatprep.subr.bf16.mxu1 %v1276_v13  ;;  %v1404_v10 = vld [vmem:[#allocation4 + $0xb98] sm:$0xff]  ;;  %v1401_v13 = vld [vmem:[#allocation4 + $0xb80] sm:$0xff] }
 0x47c   :  { %2172 = vmatpush1.bf16.msra.mxu0 %v1273_v12  ;;  %2344 = vmatpush1.bf16.msra.mxu1 %v1275_v16  ;;  %v1403_v12 = vld [vmem:[#allocation4 + $0xb90] sm:$0xff]  ;;  %v1418_v16 = vld [vmem:[#allocation4 + $0xc08] sm:$0xff] }
 0x47d   :  { %2184 = vmatprep.subr.bf16.mxu0 %v1290_v7  ;;  %2356 = vmatprep.subr.bf16.mxu1 %v1292_v9  ;;  %v1420_v7 = vld [vmem:[#allocation4 + $0xc18] sm:$0xff]  ;;  %v1417_v9 = vld [vmem:[#allocation4 + $0xc00] sm:$0xff] }
 0x47f   :  { %2174 = vmatmul.mubr.bf16.vlgmr.msra.gmra.mrb[4].mxu0 %v6221_v34  ;;  %2346 = vmatmul.mubr.bf16.vlgmr.msra.gmra.mrb[20].mxu1 %v6221_v34 }
 0x480   :  { %2185 = vmatpush1.bf16.msra.mxu0 %v1289_v52  ;;  %2357 = vmatpush1.bf16.msra.mxu1 %v1291_v11  ;;  %v1419_v52 = vld [vmem:[#allocation4 + $0xc10] sm:$0xff]  ;;  %v1434_v11 = vld [vmem:[#allocation4 + $0xc88] sm:$0xff] }
 0x481   :  { %2186 = vmatprep.subr.bf16.mxu0 %v1306_v18  ;;  %2358 = vmatprep.subr.bf16.mxu1 %v1308_v19  ;;  %v1436_v18 = vld [vmem:[#allocation4 + $0xc98] sm:$0xff]  ;;  %v1433_v19 = vld [vmem:[#allocation4 + $0xc80] sm:$0xff] }
 0x482   :  { %2216 = vmatprep.mubr.bf16.mxu0 %v6227_v20  ;;  %2388 = vmatprep.mubr.bf16.mxu1 %v6227_v20 }
 0x484   :  { %2187 = vmatpush1.bf16.msra.mxu0 %v1305_v8  ;;  %2359 = vmatpush1.bf16.msra.mxu1 %v1307_v42  ;;  %v1435_v8 = vld [vmem:[#allocation4 + $0xc90] sm:$0xff]  ;;  %v1450_v42 = vld [vmem:[#allocation4 + $0xd08] sm:$0xff] }
 0x485   :  { %2188 = vmatprep.subr.bf16.mxu0 %v1322_v44  ;;  %2360 = vmatprep.subr.bf16.mxu1 %v1324_v15  ;;  %v1452_v44 = vld [vmem:[#allocation4 + $0xd18] sm:$0xff]  ;;  %v1449_v15 = vld [vmem:[#allocation4 + $0xd00] sm:$0xff] }
 0x488   :  { %2189 = vmatpush1.bf16.msra.mxu0 %v1321_v45  ;;  %2361 = vmatpush1.bf16.msra.mxu1 %v1323_v51  ;;  %v1451_v45 = vld [vmem:[#allocation4 + $0xd10] sm:$0xff]  ;;  %v1466_v51 = vld [vmem:[#allocation4 + $0xd88] sm:$0xff] }
 0x489   :  { %2190 = vmatprep.subr.bf16.mxu0 %v1338_v53  ;;  %2362 = vmatprep.subr.bf16.mxu1 %v1340_v57  ;;  %v1468_v53 = vld [vmem:[#allocation4 + $0xd98] sm:$0xff]  ;;  %v1465_v57 = vld [vmem:[#allocation4 + $0xd80] sm:$0xff] }
 0x48c   :  { %2191 = vmatpush1.bf16.msra.mxu0 %v1337_v27  ;;  %2363 = vmatpush1.bf16.msra.mxu1 %v1339_v29  ;;  %v1467_v27 = vld [vmem:[#allocation4 + $0xd90] sm:$0xff]  ;;  %v1482_v29 = vld [vmem:[#allocation4 + $0xe08] sm:$0xff] }
 0x48d   :  { %2192 = vmatprep.subr.bf16.mxu0 %v1354_v35  ;;  %2364 = vmatprep.subr.bf16.mxu1 %v1356_v38  ;;  %v1484_v35 = vld [vmem:[#allocation4 + $0xe18] sm:$0xff]  ;;  %v1481_v38 = vld [vmem:[#allocation4 + $0xe00] sm:$0xff] }
 0x490   :  { %2193 = vmatpush1.bf16.msra.mxu0 %v1353_v40  ;;  %2365 = vmatpush1.bf16.msra.mxu1 %v1355_v43  ;;  %v1483_v40 = vld [vmem:[#allocation4 + $0xe10] sm:$0xff]  ;;  %v1498_v43 = vld [vmem:[#allocation4 + $0xe88] sm:$0xff] }
 0x491   :  { %2194 = vmatprep.subr.bf16.mxu0 %v1370_v49  ;;  %2366 = vmatprep.subr.bf16.mxu1 %v1372_v54  ;;  %v1500_v49 = vld [vmem:[#allocation4 + $0xe98] sm:$0xff]  ;;  %v1497_v54 = vld [vmem:[#allocation4 + $0xe80] sm:$0xff] }
 0x494   :  { %2195 = vmatpush1.bf16.msra.mxu0 %v1369_v59  ;;  %2367 = vmatpush1.bf16.msra.mxu1 %v1371_v0  ;;  %v1499_v59 = vld [vmem:[#allocation4 + $0xe90] sm:$0xff]  ;;  %v1514_v0 = vld [vmem:[#allocation4 + $0xf08] sm:$0xff] }
 0x495   :  { %2196 = vmatprep.subr.bf16.mxu0 %v1386_v1  ;;  %2368 = vmatprep.subr.bf16.mxu1 %v1388_v2  ;;  %v1516_v1 = vld [vmem:[#allocation4 + $0xf18] sm:$0xff]  ;;  %v1513_v2 = vld [vmem:[#allocation4 + $0xf00] sm:$0xff] }
 0x498   :  { %2197 = vmatpush1.bf16.msra.mxu0 %v1385_v3  ;;  %2369 = vmatpush1.bf16.msra.mxu1 %v1387_v4  ;;  %v1515_v3 = vld [vmem:[#allocation4 + $0xf10] sm:$0xff]  ;;  %v1530_v4 = vld [vmem:[#allocation4 + $0xf88] sm:$0xff] }
 0x499   :  { %2198 = vmatprep.subr.bf16.mxu0 %v1402_v6  ;;  %2370 = vmatprep.subr.bf16.mxu1 %v1404_v10  ;;  %v1532_v6 = vld [vmem:[#allocation4 + $0xf98] sm:$0xff]  ;;  %v1529_v10 = vld [vmem:[#allocation4 + $0xf80] sm:$0xff] }
 0x49c   :  { %2199 = vmatpush1.bf16.msra.mxu0 %v1401_v13  ;;  %2371 = vmatpush1.bf16.msra.mxu1 %v1403_v12  ;;  %v1531_v13 = vld [vmem:[#allocation4 + $0xf90] sm:$0xff]  ;;  %v1546_v12 = vld [vmem:[#allocation4 + $0x1008] sm:$0xff] }
 0x49d   :  { %2200 = vmatprep.subr.bf16.mxu0 %v1418_v16  ;;  %2372 = vmatprep.subr.bf16.mxu1 %v1420_v7  ;;  %v1548_v16 = vld [vmem:[#allocation4 + $0x1018] sm:$0xff]  ;;  %v6237_v7 = vpack.c.bf16 %v1015_v56, %v1007_v47  ;;  %v1563_v47 = vld [vmem:[#allocation4 + $0x1090] sm:$0xff] }
 0x49e   :  { %v1580_v56 = vld [vmem:[#allocation4 + $0x1118] sm:$0xff] }
 0x4a0   :  { %2201 = vmatpush1.bf16.msra.mxu0 %v1417_v9  ;;  %2373 = vmatpush1.bf16.msra.mxu1 %v1419_v52  ;;  %v1545_v9 = vld [vmem:[#allocation4 + $0x1000] sm:$0xff]  ;;  %v1547_v52 = vld [vmem:[#allocation4 + $0x1010] sm:$0xff] }
 0x4a1   :  { %2202 = vmatprep.subr.bf16.mxu0 %v1434_v11  ;;  %2374 = vmatprep.subr.bf16.mxu1 %v1436_v18  ;;  %v1562_v11 = vld [vmem:[#allocation4 + $0x1088] sm:$0xff]  ;;  %v1564_v18 = vld [vmem:[#allocation4 + $0x1098] sm:$0xff] }
 0x4a4   :  { %2203 = vmatpush1.bf16.msra.mxu0 %v1433_v19  ;;  %2375 = vmatpush1.bf16.msra.mxu1 %v1435_v8  ;;  %v6243_v19 = vpack.c.bf16 %v1018_v30, %v1010_v33  ;;  %v1579_v33 = vld [vmem:[#allocation4 + $0x1110] sm:$0xff]  ;;  %v1596_v30 = vld [vmem:[#allocation4 + $0x1198] sm:$0xff]  ;;  %v1593_v8 = vld [vmem:[#allocation4 + $0x1180] sm:$0xff] }
 0x4a5   :  { %2204 = vmatprep.subr.bf16.mxu0 %v1450_v42  ;;  %2376 = vmatprep.subr.bf16.mxu1 %v1452_v44  ;;  %v1595_v42 = vld [vmem:[#allocation4 + $0x1190] sm:$0xff]  ;;  %v1610_v44 = vld [vmem:[#allocation4 + $0x1208] sm:$0xff] }
 0x4a8   :  { %2205 = vmatpush1.bf16.msra.mxu0 %v1449_v15  ;;  %2377 = vmatpush1.bf16.msra.mxu1 %v1451_v45  ;;  %v1612_v15 = vld [vmem:[#allocation4 + $0x1218] sm:$0xff]  ;;  %v1609_v45 = vld [vmem:[#allocation4 + $0x1200] sm:$0xff] }
 0x4a9   :  { %2206 = vmatprep.subr.bf16.mxu0 %v1466_v51  ;;  %2378 = vmatprep.subr.bf16.mxu1 %v1468_v53  ;;  %v1611_v51 = vld [vmem:[#allocation4 + $0x1210] sm:$0xff]  ;;  %v1626_v53 = vld [vmem:[#allocation4 + $0x1288] sm:$0xff] }
 0x4ac   :  { %2207 = vmatpush1.bf16.msra.mxu0 %v1465_v57  ;;  %2379 = vmatpush1.bf16.msra.mxu1 %v1467_v27  ;;  %v1628_v57 = vld [vmem:[#allocation4 + $0x1298] sm:$0xff]  ;;  %v1625_v27 = vld [vmem:[#allocation4 + $0x1280] sm:$0xff] }
 0x4ad   :  { %2208 = vmatprep.subr.bf16.mxu0 %v1482_v29  ;;  %2380 = vmatprep.subr.bf16.mxu1 %v1484_v35  ;;  %v1627_v29 = vld [vmem:[#allocation4 + $0x1290] sm:$0xff]  ;;  %v1642_v35 = vld [vmem:[#allocation4 + $0x1308] sm:$0xff] }
 0x4b0   :  { %2209 = vmatpush1.bf16.msra.mxu0 %v1481_v38  ;;  %2381 = vmatpush1.bf16.msra.mxu1 %v1483_v40  ;;  %v1644_v38 = vld [vmem:[#allocation4 + $0x1318] sm:$0xff]  ;;  %v1641_v40 = vld [vmem:[#allocation4 + $0x1300] sm:$0xff] }
 0x4b1   :  { %2210 = vmatprep.subr.bf16.mxu0 %v1498_v43  ;;  %2382 = vmatprep.subr.bf16.mxu1 %v1500_v49  ;;  %v1643_v43 = vld [vmem:[#allocation4 + $0x1310] sm:$0xff]  ;;  %v1658_v49 = vld [vmem:[#allocation4 + $0x1388] sm:$0xff] }
 0x4b4   :  { %2211 = vmatpush1.bf16.msra.mxu0 %v1497_v54  ;;  %2383 = vmatpush1.bf16.msra.mxu1 %v1499_v59  ;;  %v1660_v54 = vld [vmem:[#allocation4 + $0x1398] sm:$0xff]  ;;  %v1657_v59 = vld [vmem:[#allocation4 + $0x1380] sm:$0xff] }
 0x4b5   :  { %2212 = vmatprep.subr.bf16.mxu0 %v1514_v0  ;;  %2384 = vmatprep.subr.bf16.mxu1 %v1516_v1  ;;  %v1659_v0 = vld [vmem:[#allocation4 + $0x1390] sm:$0xff]  ;;  %v1674_v1 = vld [vmem:[#allocation4 + $0x1408] sm:$0xff] }
 0x4b8   :  { %2213 = vmatpush1.bf16.msra.mxu0 %v1513_v2  ;;  %2385 = vmatpush1.bf16.msra.mxu1 %v1515_v3  ;;  %v1676_v2 = vld [vmem:[#allocation4 + $0x1418] sm:$0xff]  ;;  %v1673_v3 = vld [vmem:[#allocation4 + $0x1400] sm:$0xff] }
 0x4b9   :  { %2214 = vmatprep.subr.bf16.mxu0 %v1530_v4  ;;  %2386 = vmatprep.subr.bf16.mxu1 %v1532_v6  ;;  %v1675_v4 = vld [vmem:[#allocation4 + $0x1410] sm:$0xff]  ;;  %v1690_v6 = vld [vmem:[#allocation4 + $0x1488] sm:$0xff] }
 0x4bc   :  { %2215 = vmatpush1.bf16.msra.mxu0 %v1529_v10  ;;  %2387 = vmatpush1.bf16.msra.mxu1 %v1531_v13  ;;  %v1692_v10 = vld [vmem:[#allocation4 + $0x1498] sm:$0xff]  ;;  %v1689_v13 = vld [vmem:[#allocation4 + $0x1480] sm:$0xff] }
 0x4bd   :  { %2227 = vmatprep.subr.bf16.mxu0 %v1546_v12  ;;  %2399 = vmatprep.subr.bf16.mxu1 %v1548_v16  ;;  %v1691_v12 = vld [vmem:[#allocation4 + $0x1490] sm:$0xff]  ;;  %v1706_v16 = vld [vmem:[#allocation4 + $0x1508] sm:$0xff] }
 0x4bf   :  { %2217 = vmatmul.mubr.bf16.vlgmr.msra.gmra.mrb[4].mxu0 %v6237_v7  ;;  %2389 = vmatmul.mubr.bf16.vlgmr.msra.gmra.mrb[20].mxu1 %v6237_v7 }
 0x4c0   :  { %2228 = vmatpush1.bf16.msra.mxu0 %v1545_v9  ;;  %2400 = vmatpush1.bf16.msra.mxu1 %v1547_v52  ;;  %v1708_v9 = vld [vmem:[#allocation4 + $0x1518] sm:$0xff]  ;;  %v1705_v52 = vld [vmem:[#allocation4 + $0x1500] sm:$0xff] }
 0x4c1   :  { %2229 = vmatprep.subr.bf16.mxu0 %v1562_v11  ;;  %2401 = vmatprep.subr.bf16.mxu1 %v1564_v18  ;;  %v1707_v11 = vld [vmem:[#allocation4 + $0x1510] sm:$0xff]  ;;  %v1722_v18 = vld [vmem:[#allocation4 + $0x1588] sm:$0xff] }
 0x4c2   :  { %2259 = vmatprep.mubr.bf16.mxu0 %v6243_v19  ;;  %2431 = vmatprep.mubr.bf16.mxu1 %v6243_v19 }
 0x4c4   :  { %2230 = vmatpush1.bf16.msra.mxu0 %v1561_v41  ;;  %2402 = vmatpush1.bf16.msra.mxu1 %v1563_v47  ;;  %v1724_v41 = vld [vmem:[#allocation4 + $0x1598] sm:$0xff]  ;;  %v1721_v47 = vld [vmem:[#allocation4 + $0x1580] sm:$0xff] }
 0x4c5   :  { %2231 = vmatprep.subr.bf16.mxu0 %v1578_v48  ;;  %2403 = vmatprep.subr.bf16.mxu1 %v1580_v56  ;;  %v1723_v48 = vld [vmem:[#allocation4 + $0x1590] sm:$0xff]  ;;  %v1738_v56 = vld [vmem:[#allocation4 + $0x1608] sm:$0xff] }
 0x4c8   :  { %2232 = vmatpush1.bf16.msra.mxu0 %v1577_v28  ;;  %2404 = vmatpush1.bf16.msra.mxu1 %v1579_v33  ;;  %v1740_v28 = vld [vmem:[#allocation4 + $0x1618] sm:$0xff]  ;;  %v1737_v33 = vld [vmem:[#allocation4 + $0x1600] sm:$0xff] }
 0x4c9   :  { %2233 = vmatprep.subr.bf16.mxu0 %v1594_v36  ;;  %2405 = vmatprep.subr.bf16.mxu1 %v1596_v30  ;;  %v1739_v36 = vld [vmem:[#allocation4 + $0x1610] sm:$0xff]  ;;  %v1754_v30 = vld [vmem:[#allocation4 + $0x1688] sm:$0xff] }
 0x4cc   :  { %2234 = vmatpush1.bf16.msra.mxu0 %v1593_v8  ;;  %2406 = vmatpush1.bf16.msra.mxu1 %v1595_v42  ;;  %v1756_v8 = vld [vmem:[#allocation4 + $0x1698] sm:$0xff]  ;;  %v1753_v42 = vld [vmem:[#allocation4 + $0x1680] sm:$0xff] }
 0x4cd   :  { %2235 = vmatprep.subr.bf16.mxu0 %v1610_v44  ;;  %2407 = vmatprep.subr.bf16.mxu1 %v1612_v15  ;;  %v1755_v44 = vld [vmem:[#allocation4 + $0x1690] sm:$0xff]  ;;  %v1770_v15 = vld [vmem:[#allocation4 + $0x1708] sm:$0xff] }
 0x4d0   :  { %2236 = vmatpush1.bf16.msra.mxu0 %v1609_v45  ;;  %2408 = vmatpush1.bf16.msra.mxu1 %v1611_v51  ;;  %v1772_v45 = vld [vmem:[#allocation4 + $0x1718] sm:$0xff]  ;;  %v1769_v51 = vld [vmem:[#allocation4 + $0x1700] sm:$0xff] }
 0x4d1   :  { %2237 = vmatprep.subr.bf16.mxu0 %v1626_v53  ;;  %2409 = vmatprep.subr.bf16.mxu1 %v1628_v57  ;;  %v1771_v53 = vld [vmem:[#allocation4 + $0x1710] sm:$0xff]  ;;  %v1786_v57 = vld [vmem:[#allocation4 + $0x1788] sm:$0xff] }
 0x4d4   :  { %2238 = vmatpush1.bf16.msra.mxu0 %v1625_v27  ;;  %2410 = vmatpush1.bf16.msra.mxu1 %v1627_v29  ;;  %v1788_v27 = vld [vmem:[#allocation4 + $0x1798] sm:$0xff]  ;;  %v1785_v29 = vld [vmem:[#allocation4 + $0x1780] sm:$0xff] }
 0x4d5   :  { %2239 = vmatprep.subr.bf16.mxu0 %v1642_v35  ;;  %2411 = vmatprep.subr.bf16.mxu1 %v1644_v38  ;;  %v1787_v35 = vld [vmem:[#allocation4 + $0x1790] sm:$0xff]  ;;  %v1802_v38 = vld [vmem:[#allocation4 + $0x1808] sm:$0xff] }
 0x4d8   :  { %2240 = vmatpush1.bf16.msra.mxu0 %v1641_v40  ;;  %2412 = vmatpush1.bf16.msra.mxu1 %v1643_v43  ;;  %v1804_v40 = vld [vmem:[#allocation4 + $0x1818] sm:$0xff]  ;;  %v6253_v43 = vpack.c.bf16 %v1017_v37, %v1009_v5  ;;  %v1819_v5 = vld [vmem:[#allocation4 + $0x1890] sm:$0xff] }
 0x4d9   :  { %2241 = vmatprep.subr.bf16.mxu0 %v1658_v49  ;;  %2413 = vmatprep.subr.bf16.mxu1 %v1660_v54  ;;  %v1801_v49 = vld [vmem:[#allocation4 + $0x1800] sm:$0xff]  ;;  %v1803_v54 = vld [vmem:[#allocation4 + $0x1810] sm:$0xff]  ;;  %v1836_v37 = vld [vmem:[#allocation4 + $0x1918] sm:$0xff] }
 0x4dc   :  { %2242 = vmatpush1.bf16.msra.mxu0 %v1657_v59  ;;  %2414 = vmatpush1.bf16.msra.mxu1 %v1659_v0  ;;  %v1818_v59 = vld [vmem:[#allocation4 + $0x1888] sm:$0xff]  ;;  %v1820_v0 = vld [vmem:[#allocation4 + $0x1898] sm:$0xff] }
 0x4dd   :  { %2243 = vmatprep.subr.bf16.mxu0 %v1674_v1  ;;  %2415 = vmatprep.subr.bf16.mxu1 %v1676_v2  ;;  %v6259_v1 = vpack.c.bf16 %v1020_v63, %v1012_v21  ;;  %v1835_v21 = vld [vmem:[#allocation4 + $0x1910] sm:$0xff]  ;;  %v1852_v63 = vld [vmem:[#allocation4 + $0x1998] sm:$0xff]  ;;  %v1849_v2 = vld [vmem:[#allocation4 + $0x1980] sm:$0xff] }
 0x4e0   :  { %2244 = vmatpush1.bf16.msra.mxu0 %v1673_v3  ;;  %2416 = vmatpush1.bf16.msra.mxu1 %v1675_v4  ;;  %v1851_v3 = vld [vmem:[#allocation4 + $0x1990] sm:$0xff]  ;;  %v1866_v4 = vld [vmem:[#allocation4 + $0x1a08] sm:$0xff] }
 0x4e1   :  { %2245 = vmatprep.subr.bf16.mxu0 %v1690_v6  ;;  %2417 = vmatprep.subr.bf16.mxu1 %v1692_v10  ;;  %v1868_v6 = vld [vmem:[#allocation4 + $0x1a18] sm:$0xff]  ;;  %v1865_v10 = vld [vmem:[#allocation4 + $0x1a00] sm:$0xff] }
 0x4e4   :  { %2246 = vmatpush1.bf16.msra.mxu0 %v1689_v13  ;;  %2418 = vmatpush1.bf16.msra.mxu1 %v1691_v12  ;;  %v1867_v13 = vld [vmem:[#allocation4 + $0x1a10] sm:$0xff]  ;;  %v1882_v12 = vld [vmem:[#allocation4 + $0x1a88] sm:$0xff] }
 0x4e5   :  { %2247 = vmatprep.subr.bf16.mxu0 %v1706_v16  ;;  %2419 = vmatprep.subr.bf16.mxu1 %v1708_v9  ;;  %v1884_v16 = vld [vmem:[#allocation4 + $0x1a98] sm:$0xff]  ;;  %v1881_v9 = vld [vmem:[#allocation4 + $0x1a80] sm:$0xff] }
 0x4e8   :  { %2248 = vmatpush1.bf16.msra.mxu0 %v1705_v52  ;;  %2420 = vmatpush1.bf16.msra.mxu1 %v1707_v11  ;;  %v1883_v52 = vld [vmem:[#allocation4 + $0x1a90] sm:$0xff]  ;;  %v1898_v11 = vld [vmem:[#allocation4 + $0x1b08] sm:$0xff] }
 0x4e9   :  { %2249 = vmatprep.subr.bf16.mxu0 %v1722_v18  ;;  %2421 = vmatprep.subr.bf16.mxu1 %v1724_v41  ;;  %v1900_v18 = vld [vmem:[#allocation4 + $0x1b18] sm:$0xff]  ;;  %v1897_v41 = vld [vmem:[#allocation4 + $0x1b00] sm:$0xff] }
 0x4ec   :  { %2250 = vmatpush1.bf16.msra.mxu0 %v1721_v47  ;;  %2422 = vmatpush1.bf16.msra.mxu1 %v1723_v48  ;;  %v1899_v47 = vld [vmem:[#allocation4 + $0x1b10] sm:$0xff]  ;;  %v1914_v48 = vld [vmem:[#allocation4 + $0x1b88] sm:$0xff] }
 0x4ed   :  { %2251 = vmatprep.subr.bf16.mxu0 %v1738_v56  ;;  %2423 = vmatprep.subr.bf16.mxu1 %v1740_v28  ;;  %v1916_v56 = vld [vmem:[#allocation4 + $0x1b98] sm:$0xff]  ;;  %v1913_v28 = vld [vmem:[#allocation4 + $0x1b80] sm:$0xff] }
 0x4f0   :  { %2252 = vmatpush1.bf16.msra.mxu0 %v1737_v33  ;;  %2424 = vmatpush1.bf16.msra.mxu1 %v1739_v36  ;;  %v1915_v33 = vld [vmem:[#allocation4 + $0x1b90] sm:$0xff]  ;;  %v1930_v36 = vld [vmem:[#allocation4 + $0x1c08] sm:$0xff] }
 0x4f1   :  { %2253 = vmatprep.subr.bf16.mxu0 %v1754_v30  ;;  %2425 = vmatprep.subr.bf16.mxu1 %v1756_v8  ;;  %v1932_v30 = vld [vmem:[#allocation4 + $0x1c18] sm:$0xff]  ;;  %v1929_v8 = vld [vmem:[#allocation4 + $0x1c00] sm:$0xff] }
 0x4f4   :  { %2254 = vmatpush1.bf16.msra.mxu0 %v1753_v42  ;;  %2426 = vmatpush1.bf16.msra.mxu1 %v1755_v44  ;;  %v1931_v42 = vld [vmem:[#allocation4 + $0x1c10] sm:$0xff]  ;;  %v1946_v44 = vld [vmem:[#allocation4 + $0x1c88] sm:$0xff] }
 0x4f5   :  { %2255 = vmatprep.subr.bf16.mxu0 %v1770_v15  ;;  %2427 = vmatprep.subr.bf16.mxu1 %v1772_v45  ;;  %v1948_v15 = vld [vmem:[#allocation4 + $0x1c98] sm:$0xff]  ;;  %v1945_v45 = vld [vmem:[#allocation4 + $0x1c80] sm:$0xff] }
 0x4f8   :  { %2256 = vmatpush1.bf16.msra.mxu0 %v1769_v51  ;;  %2428 = vmatpush1.bf16.msra.mxu1 %v1771_v53  ;;  %v1947_v51 = vld [vmem:[#allocation4 + $0x1c90] sm:$0xff]  ;;  %v1962_v53 = vld [vmem:[#allocation4 + $0x1d08] sm:$0xff] }
 0x4f9   :  { %2257 = vmatprep.subr.bf16.mxu0 %v1786_v57  ;;  %2429 = vmatprep.subr.bf16.mxu1 %v1788_v27  ;;  %v1964_v57 = vld [vmem:[#allocation4 + $0x1d18] sm:$0xff]  ;;  %v1961_v27 = vld [vmem:[#allocation4 + $0x1d00] sm:$0xff] }
 0x4fc   :  { %2258 = vmatpush1.bf16.msra.mxu0 %v1785_v29  ;;  %2430 = vmatpush1.bf16.msra.mxu1 %v1787_v35  ;;  %v1963_v29 = vld [vmem:[#allocation4 + $0x1d10] sm:$0xff]  ;;  %v1978_v35 = vld [vmem:[#allocation4 + $0x1d88] sm:$0xff] }
 0x4fd   :  { %2270 = vmatprep.subr.bf16.mxu0 %v1802_v38  ;;  %2442 = vmatprep.subr.bf16.mxu1 %v1804_v40  ;;  %v1980_v38 = vld [vmem:[#allocation4 + $0x1d98] sm:$0xff]  ;;  %v1977_v40 = vld [vmem:[#allocation4 + $0x1d80] sm:$0xff] }
 0x4ff   :  { %2260 = vmatmul.mubr.bf16.vlgmr.msra.gmra.mrb[4].mxu0 %v6253_v43  ;;  %2432 = vmatmul.mubr.bf16.vlgmr.msra.gmra.mrb[20].mxu1 %v6253_v43 }
 0x500   :  { %2271 = vmatpush1.bf16.msra.mxu0 %v1801_v49  ;;  %2443 = vmatpush1.bf16.msra.mxu1 %v1803_v54  ;;  %v1979_v49 = vld [vmem:[#allocation4 + $0x1d90] sm:$0xff]  ;;  %v1994_v54 = vld [vmem:[#allocation4 + $0x1e08] sm:$0xff] }
 0x501   :  { %2272 = vmatprep.subr.bf16.mxu0 %v1818_v59  ;;  %2444 = vmatprep.subr.bf16.mxu1 %v1820_v0  ;;  %v1996_v59 = vld [vmem:[#allocation4 + $0x1e18] sm:$0xff]  ;;  %v1993_v0 = vld [vmem:[#allocation4 + $0x1e00] sm:$0xff] }
 0x502   :  { %2302 = vmatprep.mubr.bf16.mxu0 %v6259_v1  ;;  %2474 = vmatprep.mubr.bf16.mxu1 %v6259_v1 }
 0x504   :  { %2273 = vmatpush1.bf16.msra.mxu0 %v1817_v24  ;;  %2445 = vmatpush1.bf16.msra.mxu1 %v1819_v5  ;;  %v1995_v24 = vld [vmem:[#allocation4 + $0x1e10] sm:$0xff]  ;;  %v2010_v5 = vld [vmem:[#allocation4 + $0x1e88] sm:$0xff] }
 0x505   :  { %2274 = vmatprep.subr.bf16.mxu0 %v1834_v32  ;;  %2446 = vmatprep.subr.bf16.mxu1 %v1836_v37  ;;  %v2012_v32 = vld [vmem:[#allocation4 + $0x1e98] sm:$0xff]  ;;  %v2009_v37 = vld [vmem:[#allocation4 + $0x1e80] sm:$0xff] }
 0x508   :  { %2275 = vmatpush1.bf16.msra.mxu0 %v1833_v50  ;;  %2447 = vmatpush1.bf16.msra.mxu1 %v1835_v21  ;;  %v2011_v50 = vld [vmem:[#allocation4 + $0x1e90] sm:$0xff]  ;;  %v2026_v21 = vld [vmem:[#allocation4 + $0x1f08] sm:$0xff] }
 0x509   :  { %2276 = vmatprep.subr.bf16.mxu0 %v1850_v60  ;;  %2448 = vmatprep.subr.bf16.mxu1 %v1852_v63  ;;  %v2028_v60 = vld [vmem:[#allocation4 + $0x1f18] sm:$0xff]  ;;  %v2025_v63 = vld [vmem:[#allocation4 + $0x1f00] sm:$0xff] }
 0x50c   :  { %2277 = vmatpush1.bf16.msra.mxu0 %v1849_v2  ;;  %2449 = vmatpush1.bf16.msra.mxu1 %v1851_v3  ;;  %v2027_v2 = vld [vmem:[#allocation4 + $0x1f10] sm:$0xff]  ;;  %v2042_v3 = vld [vmem:[#allocation4 + $0x1f88] sm:$0xff] }
 0x50d   :  { %2278 = vmatprep.subr.bf16.mxu0 %v1866_v4  ;;  %2450 = vmatprep.subr.bf16.mxu1 %v1868_v6  ;;  %v2044_v4 = vld [vmem:[#allocation4 + $0x1f98] sm:$0xff]  ;;  %v2041_v6 = vld [vmem:[#allocation4 + $0x1f80] sm:$0xff] }
 0x510   :  { %2279 = vmatpush1.bf16.msra.mxu0 %v1865_v10  ;;  %2451 = vmatpush1.bf16.msra.mxu1 %v1867_v13  ;;  %v2043_v10 = vld [vmem:[#allocation4 + $0x1f90] sm:$0xff]  ;;  %v1038_v13 = vld [vmem:[#allocation4 + $0x28] sm:$0xff] }
 0x511   :  { %2280 = vmatprep.subr.bf16.mxu0 %v1882_v12  ;;  %2452 = vmatprep.subr.bf16.mxu1 %v1884_v16  ;;  %v1040_v12 = vld [vmem:[#allocation4 + $0x38] sm:$0xff]  ;;  %v6269_v16 = vpack.c.bf16 %v1019_v61, %v1011_v58  ;;  %v1070_v58 = vld [vmem:[#allocation4 + $0x128] sm:$0xff] }
 0x512   :  { %v1072_v61 = vld [vmem:[#allocation4 + $0x138] sm:$0xff] }
 0x514   :  { %2281 = vmatpush1.bf16.msra.mxu0 %v1881_v9  ;;  %2453 = vmatpush1.bf16.msra.mxu1 %v1883_v52  ;;  %v1037_v9 = vld [vmem:[#allocation4 + $0x20] sm:$0xff]  ;;  %v1039_v52 = vld [vmem:[#allocation4 + $0x30] sm:$0xff] }
 0x515   :  { %2282 = vmatprep.subr.bf16.mxu0 %v1898_v11  ;;  %2454 = vmatprep.subr.bf16.mxu1 %v1900_v18  ;;  %v1054_v11 = vld [vmem:[#allocation4 + $0xa8] sm:$0xff]  ;;  %v1056_v18 = vld [vmem:[#allocation4 + $0xb8] sm:$0xff] }
 0x518   :  { %2283 = vmatpush1.bf16.msra.mxu0 %v1897_v41  ;;  %2455 = vmatpush1.bf16.msra.mxu1 %v1899_v47  ;;  %v1069_v41 = vld [vmem:[#allocation4 + $0x120] sm:$0xff]  ;;  %v1071_v47 = vld [vmem:[#allocation4 + $0x130] sm:$0xff] }
 0x519   :  { %2284 = vmatprep.subr.bf16.mxu0 %v1914_v48  ;;  %2456 = vmatprep.subr.bf16.mxu1 %v1916_v56  ;;  %v1086_v48 = vld [vmem:[#allocation4 + $0x1a8] sm:$0xff]  ;;  %v1088_v56 = vld [vmem:[#allocation4 + $0x1b8] sm:$0xff] }
 0x51c   :  { %2285 = vmatpush1.bf16.msra.mxu0 %v1913_v28  ;;  %2457 = vmatpush1.bf16.msra.mxu1 %v1915_v33  ;;  %v1085_v28 = vld [vmem:[#allocation4 + $0x1a0] sm:$0xff]  ;;  %v1087_v33 = vld [vmem:[#allocation4 + $0x1b0] sm:$0xff] }
 0x51d   :  { %2286 = vmatprep.subr.bf16.mxu0 %v1930_v36  ;;  %2458 = vmatprep.subr.bf16.mxu1 %v1932_v30  ;;  %v1102_v36 = vld [vmem:[#allocation4 + $0x228] sm:$0xff]  ;;  %v1104_v30 = vld [vmem:[#allocation4 + $0x238] sm:$0xff] }
 0x520   :  { %2287 = vmatpush1.bf16.msra.mxu0 %v1929_v8  ;;  %2459 = vmatpush1.bf16.msra.mxu1 %v1931_v42  ;;  %v1101_v8 = vld [vmem:[#allocation4 + $0x220] sm:$0xff]  ;;  %v1103_v42 = vld [vmem:[#allocation4 + $0x230] sm:$0xff] }
 0x521   :  { %2288 = vmatprep.subr.bf16.mxu0 %v1946_v44  ;;  %2460 = vmatprep.subr.bf16.mxu1 %v1948_v15  ;;  %v1118_v44 = vld [vmem:[#allocation4 + $0x2a8] sm:$0xff]  ;;  %v1120_v15 = vld [vmem:[#allocation4 + $0x2b8] sm:$0xff] }
 0x524   :  { %2289 = vmatpush1.bf16.msra.mxu0 %v1945_v45  ;;  %2461 = vmatpush1.bf16.msra.mxu1 %v1947_v51  ;;  %v1117_v45 = vld [vmem:[#allocation4 + $0x2a0] sm:$0xff]  ;;  %v1119_v51 = vld [vmem:[#allocation4 + $0x2b0] sm:$0xff] }
 0x525   :  { %2290 = vmatprep.subr.bf16.mxu0 %v1962_v53  ;;  %2462 = vmatprep.subr.bf16.mxu1 %v1964_v57  ;;  %v1134_v53 = vld [vmem:[#allocation4 + $0x328] sm:$0xff]  ;;  %v1136_v57 = vld [vmem:[#allocation4 + $0x338] sm:$0xff] }
 0x528   :  { %2291 = vmatpush1.bf16.msra.mxu0 %v1961_v27  ;;  %2463 = vmatpush1.bf16.msra.mxu1 %v1963_v29  ;;  %v1133_v27 = vld [vmem:[#allocation4 + $0x320] sm:$0xff]  ;;  %v1135_v29 = vld [vmem:[#allocation4 + $0x330] sm:$0xff] }
 0x529   :  { %2292 = vmatprep.subr.bf16.mxu0 %v1978_v35  ;;  %2464 = vmatprep.subr.bf16.mxu1 %v1980_v38  ;;  %v1150_v35 = vld [vmem:[#allocation4 + $0x3a8] sm:$0xff]  ;;  %v1152_v38 = vld [vmem:[#allocation4 + $0x3b8] sm:$0xff] }
 0x52c   :  { %2293 = vmatpush1.bf16.msra.mxu0 %v1977_v40  ;;  %2465 = vmatpush1.bf16.msra.mxu1 %v1979_v49  ;;  %v1149_v40 = vld [vmem:[#allocation4 + $0x3a0] sm:$0xff]  ;;  %v1151_v49 = vld [vmem:[#allocation4 + $0x3b0] sm:$0xff] }
 0x52d   :  { %2294 = vmatprep.subr.bf16.mxu0 %v1994_v54  ;;  %2466 = vmatprep.subr.bf16.mxu1 %v1996_v59  ;;  %v1166_v54 = vld [vmem:[#allocation4 + $0x428] sm:$0xff]  ;;  %v1168_v59 = vld [vmem:[#allocation4 + $0x438] sm:$0xff] }
 0x530   :  { %2295 = vmatpush1.bf16.msra.mxu0 %v1993_v0  ;;  %2467 = vmatpush1.bf16.msra.mxu1 %v1995_v24  ;;  %v1165_v0 = vld [vmem:[#allocation4 + $0x420] sm:$0xff]  ;;  %v1167_v24 = vld [vmem:[#allocation4 + $0x430] sm:$0xff] }
 0x531   :  { %2296 = vmatprep.subr.bf16.mxu0 %v2010_v5  ;;  %2468 = vmatprep.subr.bf16.mxu1 %v2012_v32  ;;  %v1182_v5 = vld [vmem:[#allocation4 + $0x4a8] sm:$0xff]  ;;  %v1184_v32 = vld [vmem:[#allocation4 + $0x4b8] sm:$0xff] }
 0x534   :  { %2297 = vmatpush1.bf16.msra.mxu0 %v2009_v37  ;;  %2469 = vmatpush1.bf16.msra.mxu1 %v2011_v50  ;;  %v1181_v37 = vld [vmem:[#allocation4 + $0x4a0] sm:$0xff]  ;;  %v1183_v50 = vld [vmem:[#allocation4 + $0x4b0] sm:$0xff] }
 0x535   :  { %2298 = vmatprep.subr.bf16.mxu0 %v2026_v21  ;;  %2470 = vmatprep.subr.bf16.mxu1 %v2028_v60  ;;  %v1198_v21 = vld [vmem:[#allocation4 + $0x528] sm:$0xff]  ;;  %v1200_v60 = vld [vmem:[#allocation4 + $0x538] sm:$0xff] }
 0x538   :  { %2299 = vmatpush1.bf16.msra.mxu0 %v2025_v63  ;;  %2471 = vmatpush1.bf16.msra.mxu1 %v2027_v2  ;;  %v1197_v63 = vld [vmem:[#allocation4 + $0x520] sm:$0xff]  ;;  %v1199_v2 = vld [vmem:[#allocation4 + $0x530] sm:$0xff] }
 0x539   :  { %2300 = vmatprep.subr.bf16.mxu0 %v2042_v3  ;;  %2472 = vmatprep.subr.bf16.mxu1 %v2044_v4  ;;  %v1214_v3 = vld [vmem:[#allocation4 + $0x5a8] sm:$0xff]  ;;  %v1216_v4 = vld [vmem:[#allocation4 + $0x5b8] sm:$0xff] }
 0x53c   :  { %2301 = vmatpush1.bf16.msra.mxu0 %v2041_v6  ;;  %2473 = vmatpush1.bf16.msra.mxu1 %v2043_v10  ;;  %v1213_v6 = vld [vmem:[#allocation4 + $0x5a0] sm:$0xff]  ;;  %v1215_v10 = vld [vmem:[#allocation4 + $0x5b0] sm:$0xff] }
 0x53d   :  { %2485 = vmatprep.subr.bf16.mxu0 %v1038_v13  ;;  %2657 = vmatprep.subr.bf16.mxu1 %v1040_v12  ;;  %v1230_v13 = vld [vmem:[#allocation4 + $0x628] sm:$0xff]  ;;  %v1232_v12 = vld [vmem:[#allocation4 + $0x638] sm:$0xff] }
 0x53f   :  { %2303 = vmatmul.mubr.bf16.vlgmr.msra.gmra.mrb[4].mxu0 %v6269_v16  ;;  %2475 = vmatmul.mubr.bf16.vlgmr.msra.gmra.mrb[20].mxu1 %v6269_v16 }
 0x540   :  { %2486 = vmatpush1.bf16.msra.mxu0 %v1037_v9  ;;  %2658 = vmatpush1.bf16.msra.mxu1 %v1039_v52  ;;  %v1229_v9 = vld [vmem:[#allocation4 + $0x620] sm:$0xff]  ;;  %v1231_v52 = vld [vmem:[#allocation4 + $0x630] sm:$0xff] }
 0x541   :  { %2487 = vmatprep.subr.bf16.mxu0 %v1054_v11  ;;  %2659 = vmatprep.subr.bf16.mxu1 %v1056_v18  ;;  %v1246_v11 = vld [vmem:[#allocation4 + $0x6a8] sm:$0xff]  ;;  %v1248_v18 = vld [vmem:[#allocation4 + $0x6b8] sm:$0xff] }
 0x542   :  { %2517 = vmatprep.mubr.bf16.mxu0 %v6213_v62  ;;  %2689 = vmatprep.mubr.bf16.mxu1 %v6213_v62 }
 0x544   :  { %2488 = vmatpush1.bf16.msra.mxu0 %v1053_v46  ;;  %2660 = vmatpush1.bf16.msra.mxu1 %v1055_v55  ;;  %v1245_v46 = vld [vmem:[#allocation4 + $0x6a0] sm:$0xff]  ;;  %v1247_v55 = vld [vmem:[#allocation4 + $0x6b0] sm:$0xff] }
 0x545   :  { %2489 = vmatprep.subr.bf16.mxu0 %v1070_v58  ;;  %2661 = vmatprep.subr.bf16.mxu1 %v1072_v61  ;;  %v1262_v58 = vld [vmem:[#allocation4 + $0x728] sm:$0xff]  ;;  %v1264_v61 = vld [vmem:[#allocation4 + $0x738] sm:$0xff] }
 0x548   :  { %2490 = vmatpush1.bf16.msra.mxu0 %v1069_v41  ;;  %2662 = vmatpush1.bf16.msra.mxu1 %v1071_v47  ;;  %v1261_v41 = vld [vmem:[#allocation4 + $0x720] sm:$0xff]  ;;  %v1263_v47 = vld [vmem:[#allocation4 + $0x730] sm:$0xff] }
 0x549   :  { %2491 = vmatprep.subr.bf16.mxu0 %v1086_v48  ;;  %2663 = vmatprep.subr.bf16.mxu1 %v1088_v56  ;;  %v1278_v48 = vld [vmem:[#allocation4 + $0x7a8] sm:$0xff]  ;;  %v1280_v56 = vld [vmem:[#allocation4 + $0x7b8] sm:$0xff] }
 0x54c   :  { %2492 = vmatpush1.bf16.msra.mxu0 %v1085_v28  ;;  %2664 = vmatpush1.bf16.msra.mxu1 %v1087_v33  ;;  %v1277_v28 = vld [vmem:[#allocation4 + $0x7a0] sm:$0xff]  ;;  %v1279_v33 = vld [vmem:[#allocation4 + $0x7b0] sm:$0xff] }
 0x54d   :  { %2493 = vmatprep.subr.bf16.mxu0 %v1102_v36  ;;  %2665 = vmatprep.subr.bf16.mxu1 %v1104_v30  ;;  %v1294_v36 = vld [vmem:[#allocation4 + $0x828] sm:$0xff]  ;;  %v1296_v30 = vld [vmem:[#allocation4 + $0x838] sm:$0xff] }
 0x550   :  { %2494 = vmatpush1.bf16.msra.mxu0 %v1101_v8  ;;  %2666 = vmatpush1.bf16.msra.mxu1 %v1103_v42  ;;  %v1293_v8 = vld [vmem:[#allocation4 + $0x820] sm:$0xff]  ;;  %v1295_v42 = vld [vmem:[#allocation4 + $0x830] sm:$0xff] }
 0x551   :  { %2495 = vmatprep.subr.bf16.mxu0 %v1118_v44  ;;  %2667 = vmatprep.subr.bf16.mxu1 %v1120_v15  ;;  %v1310_v44 = vld [vmem:[#allocation4 + $0x8a8] sm:$0xff]  ;;  %v1312_v15 = vld [vmem:[#allocation4 + $0x8b8] sm:$0xff] }
 0x554   :  { %2496 = vmatpush1.bf16.msra.mxu0 %v1117_v45  ;;  %2668 = vmatpush1.bf16.msra.mxu1 %v1119_v51  ;;  %v1309_v45 = vld [vmem:[#allocation4 + $0x8a0] sm:$0xff]  ;;  %v1311_v51 = vld [vmem:[#allocation4 + $0x8b0] sm:$0xff] }
 0x555   :  { %2497 = vmatprep.subr.bf16.mxu0 %v1134_v53  ;;  %2669 = vmatprep.subr.bf16.mxu1 %v1136_v57  ;;  %v1326_v53 = vld [vmem:[#allocation4 + $0x928] sm:$0xff]  ;;  %v1328_v57 = vld [vmem:[#allocation4 + $0x938] sm:$0xff] }
 0x558   :  { %2498 = vmatpush1.bf16.msra.mxu0 %v1133_v27  ;;  %2670 = vmatpush1.bf16.msra.mxu1 %v1135_v29  ;;  %v1325_v27 = vld [vmem:[#allocation4 + $0x920] sm:$0xff]  ;;  %v1327_v29 = vld [vmem:[#allocation4 + $0x930] sm:$0xff] }
 0x559   :  { %2499 = vmatprep.subr.bf16.mxu0 %v1150_v35  ;;  %2671 = vmatprep.subr.bf16.mxu1 %v1152_v38  ;;  %v1342_v35 = vld [vmem:[#allocation4 + $0x9a8] sm:$0xff]  ;;  %v1344_v38 = vld [vmem:[#allocation4 + $0x9b8] sm:$0xff] }
 0x55c   :  { %2500 = vmatpush1.bf16.msra.mxu0 %v1149_v40  ;;  %2672 = vmatpush1.bf16.msra.mxu1 %v1151_v49  ;;  %v1341_v40 = vld [vmem:[#allocation4 + $0x9a0] sm:$0xff]  ;;  %v1343_v49 = vld [vmem:[#allocation4 + $0x9b0] sm:$0xff] }
 0x55d   :  { %2501 = vmatprep.subr.bf16.mxu0 %v1166_v54  ;;  %2673 = vmatprep.subr.bf16.mxu1 %v1168_v59  ;;  %v1358_v54 = vld [vmem:[#allocation4 + $0xa28] sm:$0xff]  ;;  %v1360_v59 = vld [vmem:[#allocation4 + $0xa38] sm:$0xff] }
 0x560   :  { %2502 = vmatpush1.bf16.msra.mxu0 %v1165_v0  ;;  %2674 = vmatpush1.bf16.msra.mxu1 %v1167_v24  ;;  %v1357_v0 = vld [vmem:[#allocation4 + $0xa20] sm:$0xff]  ;;  %v1359_v24 = vld [vmem:[#allocation4 + $0xa30] sm:$0xff] }
 0x561   :  { %2503 = vmatprep.subr.bf16.mxu0 %v1182_v5  ;;  %2675 = vmatprep.subr.bf16.mxu1 %v1184_v32  ;;  %v1374_v5 = vld [vmem:[#allocation4 + $0xaa8] sm:$0xff]  ;;  %v1376_v32 = vld [vmem:[#allocation4 + $0xab8] sm:$0xff] }
 0x564   :  { %2504 = vmatpush1.bf16.msra.mxu0 %v1181_v37  ;;  %2676 = vmatpush1.bf16.msra.mxu1 %v1183_v50  ;;  %v1373_v37 = vld [vmem:[#allocation4 + $0xaa0] sm:$0xff]  ;;  %v1375_v50 = vld [vmem:[#allocation4 + $0xab0] sm:$0xff] }
 0x565   :  { %2505 = vmatprep.subr.bf16.mxu0 %v1198_v21  ;;  %2677 = vmatprep.subr.bf16.mxu1 %v1200_v60  ;;  %v1390_v21 = vld [vmem:[#allocation4 + $0xb28] sm:$0xff]  ;;  %v1392_v60 = vld [vmem:[#allocation4 + $0xb38] sm:$0xff] }
 0x568   :  { %2506 = vmatpush1.bf16.msra.mxu0 %v1197_v63  ;;  %2678 = vmatpush1.bf16.msra.mxu1 %v1199_v2  ;;  %v1389_v63 = vld [vmem:[#allocation4 + $0xb20] sm:$0xff]  ;;  %v1391_v2 = vld [vmem:[#allocation4 + $0xb30] sm:$0xff] }
 0x569   :  { %2507 = vmatprep.subr.bf16.mxu0 %v1214_v3  ;;  %2679 = vmatprep.subr.bf16.mxu1 %v1216_v4  ;;  %v1406_v3 = vld [vmem:[#allocation4 + $0xba8] sm:$0xff]  ;;  %v1408_v4 = vld [vmem:[#allocation4 + $0xbb8] sm:$0xff] }
 0x56c   :  { %2508 = vmatpush1.bf16.msra.mxu0 %v1213_v6  ;;  %2680 = vmatpush1.bf16.msra.mxu1 %v1215_v10  ;;  %v1405_v6 = vld [vmem:[#allocation4 + $0xba0] sm:$0xff]  ;;  %v1407_v10 = vld [vmem:[#allocation4 + $0xbb0] sm:$0xff] }
 0x56d   :  { %2509 = vmatprep.subr.bf16.mxu0 %v1230_v13  ;;  %2681 = vmatprep.subr.bf16.mxu1 %v1232_v12  ;;  %v1422_v13 = vld [vmem:[#allocation4 + $0xc28] sm:$0xff]  ;;  %v1424_v12 = vld [vmem:[#allocation4 + $0xc38] sm:$0xff] }
 0x570   :  { %2510 = vmatpush1.bf16.msra.mxu0 %v1229_v9  ;;  %2682 = vmatpush1.bf16.msra.mxu1 %v1231_v52  ;;  %v1421_v9 = vld [vmem:[#allocation4 + $0xc20] sm:$0xff]  ;;  %v1423_v52 = vld [vmem:[#allocation4 + $0xc30] sm:$0xff] }
 0x571   :  { %2511 = vmatprep.subr.bf16.mxu0 %v1246_v11  ;;  %2683 = vmatprep.subr.bf16.mxu1 %v1248_v18  ;;  %v1438_v11 = vld [vmem:[#allocation4 + $0xca8] sm:$0xff]  ;;  %v1440_v18 = vld [vmem:[#allocation4 + $0xcb8] sm:$0xff] }
 0x574   :  { %2512 = vmatpush1.bf16.msra.mxu0 %v1245_v46  ;;  %2684 = vmatpush1.bf16.msra.mxu1 %v1247_v55  ;;  %v1437_v46 = vld [vmem:[#allocation4 + $0xca0] sm:$0xff]  ;;  %v1439_v55 = vld [vmem:[#allocation4 + $0xcb0] sm:$0xff] }
 0x575   :  { %2513 = vmatprep.subr.bf16.mxu0 %v1262_v58  ;;  %2685 = vmatprep.subr.bf16.mxu1 %v1264_v61  ;;  %v1454_v58 = vld [vmem:[#allocation4 + $0xd28] sm:$0xff]  ;;  %v1456_v61 = vld [vmem:[#allocation4 + $0xd38] sm:$0xff] }
 0x578   :  { %2514 = vmatpush1.bf16.msra.mxu0 %v1261_v41  ;;  %2686 = vmatpush1.bf16.msra.mxu1 %v1263_v47  ;;  %v1453_v41 = vld [vmem:[#allocation4 + $0xd20] sm:$0xff]  ;;  %v1455_v47 = vld [vmem:[#allocation4 + $0xd30] sm:$0xff] }
 0x579   :  { %2515 = vmatprep.subr.bf16.mxu0 %v1278_v48  ;;  %2687 = vmatprep.subr.bf16.mxu1 %v1280_v56  ;;  %v1470_v48 = vld [vmem:[#allocation4 + $0xda8] sm:$0xff]  ;;  %v1472_v56 = vld [vmem:[#allocation4 + $0xdb8] sm:$0xff] }
 0x57c   :  { %2516 = vmatpush1.bf16.msra.mxu0 %v1277_v28  ;;  %2688 = vmatpush1.bf16.msra.mxu1 %v1279_v33  ;;  %v1469_v28 = vld [vmem:[#allocation4 + $0xda0] sm:$0xff]  ;;  %v1471_v33 = vld [vmem:[#allocation4 + $0xdb0] sm:$0xff] }
 0x57d   :  { %2528 = vmatprep.subr.bf16.mxu0 %v1294_v36  ;;  %2700 = vmatprep.subr.bf16.mxu1 %v1296_v30  ;;  %v1486_v36 = vld [vmem:[#allocation4 + $0xe28] sm:$0xff]  ;;  %v1488_v30 = vld [vmem:[#allocation4 + $0xe38] sm:$0xff] }
 0x57f   :  { %2518 = vmatmul.mubr.bf16.vlgmr.msra.gmra.mrb[8].mxu0 %v6221_v34  ;;  %2690 = vmatmul.mubr.bf16.vlgmr.msra.gmra.mrb[24].mxu1 %v6221_v34 }
 0x580   :  { %2529 = vmatpush1.bf16.msra.mxu0 %v1293_v8  ;;  %2701 = vmatpush1.bf16.msra.mxu1 %v1295_v42  ;;  %v1485_v8 = vld [vmem:[#allocation4 + $0xe20] sm:$0xff]  ;;  %v1487_v42 = vld [vmem:[#allocation4 + $0xe30] sm:$0xff] }
 0x581   :  { %2530 = vmatprep.subr.bf16.mxu0 %v1310_v44  ;;  %2702 = vmatprep.subr.bf16.mxu1 %v1312_v15  ;;  %v1502_v44 = vld [vmem:[#allocation4 + $0xea8] sm:$0xff]  ;;  %v1504_v15 = vld [vmem:[#allocation4 + $0xeb8] sm:$0xff] }
 0x582   :  { %2560 = vmatprep.mubr.bf16.mxu0 %v6227_v20  ;;  %2732 = vmatprep.mubr.bf16.mxu1 %v6227_v20 }
 0x584   :  { %2531 = vmatpush1.bf16.msra.mxu0 %v1309_v45  ;;  %2703 = vmatpush1.bf16.msra.mxu1 %v1311_v51  ;;  %v1501_v45 = vld [vmem:[#allocation4 + $0xea0] sm:$0xff]  ;;  %v1503_v51 = vld [vmem:[#allocation4 + $0xeb0] sm:$0xff] }
 0x585   :  { %2532 = vmatprep.subr.bf16.mxu0 %v1326_v53  ;;  %2704 = vmatprep.subr.bf16.mxu1 %v1328_v57  ;;  %v1518_v53 = vld [vmem:[#allocation4 + $0xf28] sm:$0xff]  ;;  %v1520_v57 = vld [vmem:[#allocation4 + $0xf38] sm:$0xff] }
 0x588   :  { %2533 = vmatpush1.bf16.msra.mxu0 %v1325_v27  ;;  %2705 = vmatpush1.bf16.msra.mxu1 %v1327_v29  ;;  %v1517_v27 = vld [vmem:[#allocation4 + $0xf20] sm:$0xff]  ;;  %v1519_v29 = vld [vmem:[#allocation4 + $0xf30] sm:$0xff] }
 0x589   :  { %2534 = vmatprep.subr.bf16.mxu0 %v1342_v35  ;;  %2706 = vmatprep.subr.bf16.mxu1 %v1344_v38  ;;  %v1534_v35 = vld [vmem:[#allocation4 + $0xfa8] sm:$0xff]  ;;  %v1536_v38 = vld [vmem:[#allocation4 + $0xfb8] sm:$0xff] }
 0x58c   :  { %2535 = vmatpush1.bf16.msra.mxu0 %v1341_v40  ;;  %2707 = vmatpush1.bf16.msra.mxu1 %v1343_v49  ;;  %v1533_v40 = vld [vmem:[#allocation4 + $0xfa0] sm:$0xff]  ;;  %v1535_v49 = vld [vmem:[#allocation4 + $0xfb0] sm:$0xff] }
 0x58d   :  { %2536 = vmatprep.subr.bf16.mxu0 %v1358_v54  ;;  %2708 = vmatprep.subr.bf16.mxu1 %v1360_v59  ;;  %v1550_v54 = vld [vmem:[#allocation4 + $0x1028] sm:$0xff]  ;;  %v1552_v59 = vld [vmem:[#allocation4 + $0x1038] sm:$0xff] }
 0x590   :  { %2537 = vmatpush1.bf16.msra.mxu0 %v1357_v0  ;;  %2709 = vmatpush1.bf16.msra.mxu1 %v1359_v24  ;;  %v1549_v0 = vld [vmem:[#allocation4 + $0x1020] sm:$0xff]  ;;  %v1551_v24 = vld [vmem:[#allocation4 + $0x1030] sm:$0xff] }
 0x591   :  { %2538 = vmatprep.subr.bf16.mxu0 %v1374_v5  ;;  %2710 = vmatprep.subr.bf16.mxu1 %v1376_v32  ;;  %v1566_v5 = vld [vmem:[#allocation4 + $0x10a8] sm:$0xff]  ;;  %v1568_v32 = vld [vmem:[#allocation4 + $0x10b8] sm:$0xff] }
 0x594   :  { %2539 = vmatpush1.bf16.msra.mxu0 %v1373_v37  ;;  %2711 = vmatpush1.bf16.msra.mxu1 %v1375_v50  ;;  %v1565_v37 = vld [vmem:[#allocation4 + $0x10a0] sm:$0xff]  ;;  %v1567_v50 = vld [vmem:[#allocation4 + $0x10b0] sm:$0xff] }
 0x595   :  { %2540 = vmatprep.subr.bf16.mxu0 %v1390_v21  ;;  %2712 = vmatprep.subr.bf16.mxu1 %v1392_v60  ;;  %v1582_v21 = vld [vmem:[#allocation4 + $0x1128] sm:$0xff]  ;;  %v1584_v60 = vld [vmem:[#allocation4 + $0x1138] sm:$0xff] }
 0x598   :  { %2541 = vmatpush1.bf16.msra.mxu0 %v1389_v63  ;;  %2713 = vmatpush1.bf16.msra.mxu1 %v1391_v2  ;;  %v1581_v63 = vld [vmem:[#allocation4 + $0x1120] sm:$0xff]  ;;  %v1583_v2 = vld [vmem:[#allocation4 + $0x1130] sm:$0xff] }
 0x599   :  { %2542 = vmatprep.subr.bf16.mxu0 %v1406_v3  ;;  %2714 = vmatprep.subr.bf16.mxu1 %v1408_v4  ;;  %v1598_v3 = vld [vmem:[#allocation4 + $0x11a8] sm:$0xff]  ;;  %v1600_v4 = vld [vmem:[#allocation4 + $0x11b8] sm:$0xff] }
 0x59c   :  { %2543 = vmatpush1.bf16.msra.mxu0 %v1405_v6  ;;  %2715 = vmatpush1.bf16.msra.mxu1 %v1407_v10  ;;  %v1597_v6 = vld [vmem:[#allocation4 + $0x11a0] sm:$0xff]  ;;  %v1599_v10 = vld [vmem:[#allocation4 + $0x11b0] sm:$0xff] }
 0x59d   :  { %2544 = vmatprep.subr.bf16.mxu0 %v1422_v13  ;;  %2716 = vmatprep.subr.bf16.mxu1 %v1424_v12  ;;  %v1614_v13 = vld [vmem:[#allocation4 + $0x1228] sm:$0xff]  ;;  %v1616_v12 = vld [vmem:[#allocation4 + $0x1238] sm:$0xff] }
 0x5a0   :  { %2545 = vmatpush1.bf16.msra.mxu0 %v1421_v9  ;;  %2717 = vmatpush1.bf16.msra.mxu1 %v1423_v52  ;;  %v1613_v9 = vld [vmem:[#allocation4 + $0x1220] sm:$0xff]  ;;  %v1615_v52 = vld [vmem:[#allocation4 + $0x1230] sm:$0xff] }
 0x5a1   :  { %2546 = vmatprep.subr.bf16.mxu0 %v1438_v11  ;;  %2718 = vmatprep.subr.bf16.mxu1 %v1440_v18  ;;  %v1630_v11 = vld [vmem:[#allocation4 + $0x12a8] sm:$0xff]  ;;  %v1632_v18 = vld [vmem:[#allocation4 + $0x12b8] sm:$0xff] }
 0x5a4   :  { %2547 = vmatpush1.bf16.msra.mxu0 %v1437_v46  ;;  %2719 = vmatpush1.bf16.msra.mxu1 %v1439_v55  ;;  %v1629_v46 = vld [vmem:[#allocation4 + $0x12a0] sm:$0xff]  ;;  %v1631_v55 = vld [vmem:[#allocation4 + $0x12b0] sm:$0xff] }
 0x5a5   :  { %2548 = vmatprep.subr.bf16.mxu0 %v1454_v58  ;;  %2720 = vmatprep.subr.bf16.mxu1 %v1456_v61  ;;  %v1646_v58 = vld [vmem:[#allocation4 + $0x1328] sm:$0xff]  ;;  %v1648_v61 = vld [vmem:[#allocation4 + $0x1338] sm:$0xff] }
 0x5a8   :  { %2549 = vmatpush1.bf16.msra.mxu0 %v1453_v41  ;;  %2721 = vmatpush1.bf16.msra.mxu1 %v1455_v47  ;;  %v1645_v41 = vld [vmem:[#allocation4 + $0x1320] sm:$0xff]  ;;  %v1647_v47 = vld [vmem:[#allocation4 + $0x1330] sm:$0xff] }
 0x5a9   :  { %2550 = vmatprep.subr.bf16.mxu0 %v1470_v48  ;;  %2722 = vmatprep.subr.bf16.mxu1 %v1472_v56  ;;  %v1662_v48 = vld [vmem:[#allocation4 + $0x13a8] sm:$0xff]  ;;  %v1664_v56 = vld [vmem:[#allocation4 + $0x13b8] sm:$0xff] }
 0x5ac   :  { %2551 = vmatpush1.bf16.msra.mxu0 %v1469_v28  ;;  %2723 = vmatpush1.bf16.msra.mxu1 %v1471_v33  ;;  %v1661_v28 = vld [vmem:[#allocation4 + $0x13a0] sm:$0xff]  ;;  %v1663_v33 = vld [vmem:[#allocation4 + $0x13b0] sm:$0xff] }
 0x5ad   :  { %2552 = vmatprep.subr.bf16.mxu0 %v1486_v36  ;;  %2724 = vmatprep.subr.bf16.mxu1 %v1488_v30  ;;  %v1678_v36 = vld [vmem:[#allocation4 + $0x1428] sm:$0xff]  ;;  %v1680_v30 = vld [vmem:[#allocation4 + $0x1438] sm:$0xff] }
 0x5b0   :  { %2553 = vmatpush1.bf16.msra.mxu0 %v1485_v8  ;;  %2725 = vmatpush1.bf16.msra.mxu1 %v1487_v42  ;;  %v1677_v8 = vld [vmem:[#allocation4 + $0x1420] sm:$0xff]  ;;  %v1679_v42 = vld [vmem:[#allocation4 + $0x1430] sm:$0xff] }
 0x5b1   :  { %2554 = vmatprep.subr.bf16.mxu0 %v1502_v44  ;;  %2726 = vmatprep.subr.bf16.mxu1 %v1504_v15  ;;  %v1694_v44 = vld [vmem:[#allocation4 + $0x14a8] sm:$0xff]  ;;  %v1696_v15 = vld [vmem:[#allocation4 + $0x14b8] sm:$0xff] }
 0x5b4   :  { %2555 = vmatpush1.bf16.msra.mxu0 %v1501_v45  ;;  %2727 = vmatpush1.bf16.msra.mxu1 %v1503_v51  ;;  %v1693_v45 = vld [vmem:[#allocation4 + $0x14a0] sm:$0xff]  ;;  %v1695_v51 = vld [vmem:[#allocation4 + $0x14b0] sm:$0xff] }
 0x5b5   :  { %2556 = vmatprep.subr.bf16.mxu0 %v1518_v53  ;;  %2728 = vmatprep.subr.bf16.mxu1 %v1520_v57  ;;  %v1710_v53 = vld [vmem:[#allocation4 + $0x1528] sm:$0xff]  ;;  %v1712_v57 = vld [vmem:[#allocation4 + $0x1538] sm:$0xff] }
 0x5b8   :  { %2557 = vmatpush1.bf16.msra.mxu0 %v1517_v27  ;;  %2729 = vmatpush1.bf16.msra.mxu1 %v1519_v29  ;;  %v1709_v27 = vld [vmem:[#allocation4 + $0x1520] sm:$0xff]  ;;  %v1711_v29 = vld [vmem:[#allocation4 + $0x1530] sm:$0xff] }
 0x5b9   :  { %2558 = vmatprep.subr.bf16.mxu0 %v1534_v35  ;;  %2730 = vmatprep.subr.bf16.mxu1 %v1536_v38  ;;  %v1726_v35 = vld [vmem:[#allocation4 + $0x15a8] sm:$0xff]  ;;  %v1728_v38 = vld [vmem:[#allocation4 + $0x15b8] sm:$0xff] }
 0x5bc   :  { %2559 = vmatpush1.bf16.msra.mxu0 %v1533_v40  ;;  %2731 = vmatpush1.bf16.msra.mxu1 %v1535_v49  ;;  %v1725_v40 = vld [vmem:[#allocation4 + $0x15a0] sm:$0xff]  ;;  %v1727_v49 = vld [vmem:[#allocation4 + $0x15b0] sm:$0xff] }
 0x5bd   :  { %2571 = vmatprep.subr.bf16.mxu0 %v1550_v54  ;;  %2743 = vmatprep.subr.bf16.mxu1 %v1552_v59  ;;  %v1742_v54 = vld [vmem:[#allocation4 + $0x1628] sm:$0xff]  ;;  %v1744_v59 = vld [vmem:[#allocation4 + $0x1638] sm:$0xff] }
 0x5bf   :  { %2561 = vmatmul.mubr.bf16.vlgmr.msra.gmra.mrb[8].mxu0 %v6237_v7  ;;  %2733 = vmatmul.mubr.bf16.vlgmr.msra.gmra.mrb[24].mxu1 %v6237_v7 }
 0x5c0   :  { %2572 = vmatpush1.bf16.msra.mxu0 %v1549_v0  ;;  %2744 = vmatpush1.bf16.msra.mxu1 %v1551_v24  ;;  %v1741_v0 = vld [vmem:[#allocation4 + $0x1620] sm:$0xff]  ;;  %v1743_v24 = vld [vmem:[#allocation4 + $0x1630] sm:$0xff] }
 0x5c1   :  { %2573 = vmatprep.subr.bf16.mxu0 %v1566_v5  ;;  %2745 = vmatprep.subr.bf16.mxu1 %v1568_v32  ;;  %v1758_v5 = vld [vmem:[#allocation4 + $0x16a8] sm:$0xff]  ;;  %v1760_v32 = vld [vmem:[#allocation4 + $0x16b8] sm:$0xff] }
 0x5c2   :  { %2603 = vmatprep.mubr.bf16.mxu0 %v6243_v19  ;;  %2775 = vmatprep.mubr.bf16.mxu1 %v6243_v19 }
 0x5c4   :  { %2574 = vmatpush1.bf16.msra.mxu0 %v1565_v37  ;;  %2746 = vmatpush1.bf16.msra.mxu1 %v1567_v50  ;;  %v1757_v37 = vld [vmem:[#allocation4 + $0x16a0] sm:$0xff]  ;;  %v1759_v50 = vld [vmem:[#allocation4 + $0x16b0] sm:$0xff] }
 0x5c5   :  { %2575 = vmatprep.subr.bf16.mxu0 %v1582_v21  ;;  %2747 = vmatprep.subr.bf16.mxu1 %v1584_v60  ;;  %v1774_v21 = vld [vmem:[#allocation4 + $0x1728] sm:$0xff]  ;;  %v1776_v60 = vld [vmem:[#allocation4 + $0x1738] sm:$0xff] }
 0x5c8   :  { %2576 = vmatpush1.bf16.msra.mxu0 %v1581_v63  ;;  %2748 = vmatpush1.bf16.msra.mxu1 %v1583_v2  ;;  %v1773_v63 = vld [vmem:[#allocation4 + $0x1720] sm:$0xff]  ;;  %v1775_v2 = vld [vmem:[#allocation4 + $0x1730] sm:$0xff] }
 0x5c9   :  { %2577 = vmatprep.subr.bf16.mxu0 %v1598_v3  ;;  %2749 = vmatprep.subr.bf16.mxu1 %v1600_v4  ;;  %v1790_v3 = vld [vmem:[#allocation4 + $0x17a8] sm:$0xff]  ;;  %v1792_v4 = vld [vmem:[#allocation4 + $0x17b8] sm:$0xff] }
 0x5cc   :  { %2578 = vmatpush1.bf16.msra.mxu0 %v1597_v6  ;;  %2750 = vmatpush1.bf16.msra.mxu1 %v1599_v10  ;;  %v1789_v6 = vld [vmem:[#allocation4 + $0x17a0] sm:$0xff]  ;;  %v1791_v10 = vld [vmem:[#allocation4 + $0x17b0] sm:$0xff] }
 0x5cd   :  { %2579 = vmatprep.subr.bf16.mxu0 %v1614_v13  ;;  %2751 = vmatprep.subr.bf16.mxu1 %v1616_v12  ;;  %v1806_v13 = vld [vmem:[#allocation4 + $0x1828] sm:$0xff]  ;;  %v1808_v12 = vld [vmem:[#allocation4 + $0x1838] sm:$0xff] }
 0x5d0   :  { %2580 = vmatpush1.bf16.msra.mxu0 %v1613_v9  ;;  %2752 = vmatpush1.bf16.msra.mxu1 %v1615_v52  ;;  %v1805_v9 = vld [vmem:[#allocation4 + $0x1820] sm:$0xff]  ;;  %v1807_v52 = vld [vmem:[#allocation4 + $0x1830] sm:$0xff] }
 0x5d1   :  { %2581 = vmatprep.subr.bf16.mxu0 %v1630_v11  ;;  %2753 = vmatprep.subr.bf16.mxu1 %v1632_v18  ;;  %v1822_v11 = vld [vmem:[#allocation4 + $0x18a8] sm:$0xff]  ;;  %v1824_v18 = vld [vmem:[#allocation4 + $0x18b8] sm:$0xff] }
 0x5d4   :  { %2582 = vmatpush1.bf16.msra.mxu0 %v1629_v46  ;;  %2754 = vmatpush1.bf16.msra.mxu1 %v1631_v55  ;;  %v1821_v46 = vld [vmem:[#allocation4 + $0x18a0] sm:$0xff]  ;;  %v1823_v55 = vld [vmem:[#allocation4 + $0x18b0] sm:$0xff] }
 0x5d5   :  { %2583 = vmatprep.subr.bf16.mxu0 %v1646_v58  ;;  %2755 = vmatprep.subr.bf16.mxu1 %v1648_v61  ;;  %v1838_v58 = vld [vmem:[#allocation4 + $0x1928] sm:$0xff]  ;;  %v1840_v61 = vld [vmem:[#allocation4 + $0x1938] sm:$0xff] }
 0x5d8   :  { %2584 = vmatpush1.bf16.msra.mxu0 %v1645_v41  ;;  %2756 = vmatpush1.bf16.msra.mxu1 %v1647_v47  ;;  %v1837_v41 = vld [vmem:[#allocation4 + $0x1920] sm:$0xff]  ;;  %v1839_v47 = vld [vmem:[#allocation4 + $0x1930] sm:$0xff] }
 0x5d9   :  { %2585 = vmatprep.subr.bf16.mxu0 %v1662_v48  ;;  %2757 = vmatprep.subr.bf16.mxu1 %v1664_v56  ;;  %v1854_v48 = vld [vmem:[#allocation4 + $0x19a8] sm:$0xff]  ;;  %v1856_v56 = vld [vmem:[#allocation4 + $0x19b8] sm:$0xff] }
 0x5dc   :  { %2586 = vmatpush1.bf16.msra.mxu0 %v1661_v28  ;;  %2758 = vmatpush1.bf16.msra.mxu1 %v1663_v33  ;;  %v1853_v28 = vld [vmem:[#allocation4 + $0x19a0] sm:$0xff]  ;;  %v1855_v33 = vld [vmem:[#allocation4 + $0x19b0] sm:$0xff] }
 0x5dd   :  { %2587 = vmatprep.subr.bf16.mxu0 %v1678_v36  ;;  %2759 = vmatprep.subr.bf16.mxu1 %v1680_v30  ;;  %v1870_v36 = vld [vmem:[#allocation4 + $0x1a28] sm:$0xff]  ;;  %v1872_v30 = vld [vmem:[#allocation4 + $0x1a38] sm:$0xff] }
 0x5e0   :  { %2588 = vmatpush1.bf16.msra.mxu0 %v1677_v8  ;;  %2760 = vmatpush1.bf16.msra.mxu1 %v1679_v42  ;;  %v2057_v8 = vld [vmem:[#allocation11] sm:$0xff]  ;;  %v1869_v42 = vld [vmem:[#allocation4 + $0x1a20] sm:$0xff] }
 0x5e1   :  { %2589 = vmatprep.subr.bf16.mxu0 %v1694_v44  ;;  %2761 = vmatprep.subr.bf16.mxu1 %v1696_v15  ;;  %v1871_v44 = vld [vmem:[#allocation4 + $0x1a30] sm:$0xff]  ;;  %v1886_v15 = vld [vmem:[#allocation4 + $0x1aa8] sm:$0xff] }
 0x5e4   :  { %2590 = vmatpush1.bf16.msra.mxu0 %v1693_v45  ;;  %2762 = vmatpush1.bf16.msra.mxu1 %v1695_v51  ;;  %v1888_v45 = vld [vmem:[#allocation4 + $0x1ab8] sm:$0xff]  ;;  %v2064_v51 = vrot.slane %v2057_v8, %v6062_v22 }
 0x5e5   :  { %2591 = vmatprep.subr.bf16.mxu0 %v1710_v53  ;;  %2763 = vmatprep.subr.bf16.mxu1 %v1712_v57  ;;  %v2072_v53 = vrot.slane %v2057_v8, %v6065_v23  ;;  %v2068_v57 = vrot.slane %v2057_v8, %v6068_v25 }
 0x5e8   :  { %2592 = vmatpush1.bf16.msra.mxu0 %v1709_v27  ;;  %2764 = vmatpush1.bf16.msra.mxu1 %v1711_v29  ;;  %v2076_v27 = vrot.slane %v2057_v8, %v6071_v26  ;;  %v1885_v29 = vld [vmem:[#allocation4 + $0x1aa0] sm:$0xff]  ;;  %v1952_v8 = vld [vmem:[#allocation4 + $0x1cb8] sm:$0xff] }
 0x5e9   :  { %2593 = vmatprep.subr.bf16.mxu0 %v1726_v35  ;;  %2765 = vmatprep.subr.bf16.mxu1 %v1728_v38  ;;  %v1887_v35 = vld [vmem:[#allocation4 + $0x1ab0] sm:$0xff] }
 0x5ec   :  { %2594 = vmatpush1.bf16.msra.mxu0 %v1725_v40  ;;  %2766 = vmatpush1.bf16.msra.mxu1 %v1727_v49  ;;  %v1902_v49 = vld [vmem:[#allocation4 + $0x1b28] sm:$0xff] }
 0x5ed   :  { %2595 = vmatprep.subr.bf16.mxu0 %v1742_v54  ;;  %2767 = vmatprep.subr.bf16.mxu1 %v1744_v59  ;;  %v1904_v54 = vld [vmem:[#allocation4 + $0x1b38] sm:$0xff] }
 0x5f0   :  { %2596 = vmatpush1.bf16.msra.mxu0 %v1741_v0  ;;  %2768 = vmatpush1.bf16.msra.mxu1 %v1743_v24 }
 0x5f1   :  { %2597 = vmatprep.subr.bf16.mxu0 %v1758_v5  ;;  %2769 = vmatprep.subr.bf16.mxu1 %v1760_v32 }
 0x5f4   :  { %2598 = vmatpush1.bf16.msra.mxu0 %v1757_v37  ;;  %2770 = vmatpush1.bf16.msra.mxu1 %v1759_v50 }
 0x5f5   :  { %2599 = vmatprep.subr.bf16.mxu0 %v1774_v21  ;;  %2771 = vmatprep.subr.bf16.mxu1 %v1776_v60 }
 0x5f8   :  { %2600 = vmatpush1.bf16.msra.mxu0 %v1773_v63  ;;  %2772 = vmatpush1.bf16.msra.mxu1 %v1775_v2 }
 0x5f9   :  { %2601 = vmatprep.subr.bf16.mxu0 %v1790_v3  ;;  %2773 = vmatprep.subr.bf16.mxu1 %v1792_v4 }
 0x5fc   :  { %2602 = vmatpush1.bf16.msra.mxu0 %v1789_v6  ;;  %2774 = vmatpush1.bf16.msra.mxu1 %v1791_v10  ;;  %v1901_v10 = vld [vmem:[#allocation4 + $0x1b20] sm:$0xff] }
 0x5fd   :  { %2614 = vmatprep.subr.bf16.mxu0 %v1806_v13  ;;  %2786 = vmatprep.subr.bf16.mxu1 %v1808_v12  ;;  %v1903_v13 = vld [vmem:[#allocation4 + $0x1b30] sm:$0xff] }
 0x5ff   :  { %2604 = vmatmul.mubr.bf16.vlgmr.msra.gmra.mrb[8].mxu0 %v6253_v43  ;;  %2776 = vmatmul.mubr.bf16.vlgmr.msra.gmra.mrb[24].mxu1 %v6253_v43 }
 0x600   :  { %2615 = vmatpush1.bf16.msra.mxu0 %v1805_v9  ;;  %2787 = vmatpush1.bf16.msra.mxu1 %v1807_v52 }
 0x601   :  { %2616 = vmatprep.subr.bf16.mxu0 %v1822_v11  ;;  %2788 = vmatprep.subr.bf16.mxu1 %v1824_v18  ;;  %v1918_v18 = vld [vmem:[#allocation4 + $0x1ba8] sm:$0xff] }
 0x602   :  { %2646 = vmatprep.mubr.bf16.mxu0 %v6259_v1  ;;  %2818 = vmatprep.mubr.bf16.mxu1 %v6259_v1 }
 0x604   :  { %2617 = vmatpush1.bf16.msra.mxu0 %v1821_v46  ;;  %2789 = vmatpush1.bf16.msra.mxu1 %v1823_v55  ;;  %v1920_v46 = vld [vmem:[#allocation4 + $0x1bb8] sm:$0xff] }
 0x605   :  { %2618 = vmatprep.subr.bf16.mxu0 %v1838_v58  ;;  %2790 = vmatprep.subr.bf16.mxu1 %v1840_v61 }
 0x608   :  { %2619 = vmatpush1.bf16.msra.mxu0 %v1837_v41  ;;  %2791 = vmatpush1.bf16.msra.mxu1 %v1839_v47  ;;  %v1917_v47 = vld [vmem:[#allocation4 + $0x1ba0] sm:$0xff] }
 0x609   :  { %2620 = vmatprep.subr.bf16.mxu0 %v1854_v48  ;;  %2792 = vmatprep.subr.bf16.mxu1 %v1856_v56  ;;  %v1919_v48 = vld [vmem:[#allocation4 + $0x1bb0] sm:$0xff]  ;;  %v1934_v56 = vld [vmem:[#allocation4 + $0x1c28] sm:$0xff] }
 0x60c   :  { %2621 = vmatpush1.bf16.msra.mxu0 %v1853_v28  ;;  %2793 = vmatpush1.bf16.msra.mxu1 %v1855_v33  ;;  %v1936_v28 = vld [vmem:[#allocation4 + $0x1c38] sm:$0xff]  ;;  %v1933_v33 = vld [vmem:[#allocation4 + $0x1c20] sm:$0xff] }
 0x60d   :  { %2622 = vmatprep.subr.bf16.mxu0 %v1870_v36  ;;  %2794 = vmatprep.subr.bf16.mxu1 %v1872_v30  ;;  %v1935_v36 = vld [vmem:[#allocation4 + $0x1c30] sm:$0xff]  ;;  %v1950_v30 = vld [vmem:[#allocation4 + $0x1ca8] sm:$0xff] }
 0x610   :  { %2623 = vmatpush1.bf16.msra.mxu0 %v1869_v42  ;;  %2795 = vmatpush1.bf16.msra.mxu1 %v1871_v44  ;;  %v1949_v42 = vld [vmem:[#allocation4 + $0x1ca0] sm:$0xff]  ;;  %v1951_v44 = vld [vmem:[#allocation4 + $0x1cb0] sm:$0xff] }
 0x611   :  { %2624 = vmatprep.subr.bf16.mxu0 %v1886_v15  ;;  %2796 = vmatprep.subr.bf16.mxu1 %v1888_v45  ;;  %v1966_v15 = vld [vmem:[#allocation4 + $0x1d28] sm:$0xff]  ;;  %v1968_v45 = vld [vmem:[#allocation4 + $0x1d38] sm:$0xff] }
 0x612   :  { %v2304_v38 = vpop.f32.mrb[4].mxu0  ;;  %v2476_v40 = vpop.f32.mrb[20].mxu1 }
 0x613   :  { %v6291_v59 = vadd.f32 %v2304_v38, %v2064_v51  ;;  %v6293_v0 = vadd.f32 %v2476_v40, %v2072_v53  ;;  %v2306_v24 = vpop.f32.mrb[5].mxu0  ;;  %v2478_v5 = vpop.f32.mrb[21].mxu1  ;;  %v1998_v38 = vld [vmem:[#allocation4 + $0x1e28] sm:$0xff]  ;;  %v2000_v40 = vld [vmem:[#allocation4 + $0x1e38] sm:$0xff] }
 0x614   :  { %v6295_v32 = vadd.f32 %v2306_v24, %v2068_v57  ;;  %v6297_v37 = vadd.f32 %v2478_v5, %v2076_v27  ;;  %v2308_v50 = vpop.f32.mrb[6].mxu0  ;;  %v2480_v21 = vpop.f32.mrb[22].mxu1  ;;  %2625 = vmatpush1.bf16.msra.mxu0 %v1885_v29  ;;  %2797 = vmatpush1.bf16.msra.mxu1 %v1887_v35  ;;  %v1981_v29 = vld [vmem:[#allocation4 + $0x1da0] sm:$0xff]  ;;  %v1983_v35 = vld [vmem:[#allocation4 + $0x1db0] sm:$0xff]  ;;  %v2014_v24 = vld [vmem:[#allocation4 + $0x1ea8] sm:$0xff] }
 0x615   :  { %v3517_v60 = vmax.f32 %v6291_v59, 0.0  ;;  %v3519_v63 = vmax.f32 %v6293_v0, 0.0  ;;  %v6301_v2 = vadd.f32 %v2308_v50, %v2064_v51  ;;  %v6303_v3 = vadd.f32 %v2480_v21, %v2072_v53  ;;  %v2310_v4 = vpop.f32.mrb[7].mxu0  ;;  %v2482_v6 = vpop.f32.mrb[23].mxu1  ;;  %2626 = vmatprep.subr.bf16.mxu0 %v1902_v49  ;;  %2798 = vmatprep.subr.bf16.mxu1 %v1904_v54  ;;  %v1965_v51 = vld [vmem:[#allocation4 + $0x1d20] sm:$0xff]  ;;  %v1967_v53 = vld [vmem:[#allocation4 + $0x1d30] sm:$0xff] }
 0x616   :  { %v3518_v12 = vmax.f32 %v6295_v32, 0.0  ;;  %v3520_v9 = vmax.f32 %v6297_v37, 0.0  ;;  %v6307_v52 = vadd.f32 %v2310_v4, %v2068_v57  ;;  %v6309_v11 = vadd.f32 %v2482_v6, %v2076_v27  ;;  %v1982_v57 = vld [vmem:[#allocation4 + $0x1da8] sm:$0xff]  ;;  %v1984_v27 = vld [vmem:[#allocation4 + $0x1db8] sm:$0xff]  ;;  %v1997_v49 = vld [vmem:[#allocation4 + $0x1e20] sm:$0xff] }
 0x617   :  { %v3533_v55 = vmax.f32 %v6301_v2, 0.0  ;;  %v3535_v58 = vmax.f32 %v6303_v3, 0.0  ;;  %v1999_v54 = vld [vmem:[#allocation4 + $0x1e30] sm:$0xff]  ;;  %v2016_v5 = vld [vmem:[#allocation4 + $0x1eb8] sm:$0xff]  ;;  %v2013_v50 = vld [vmem:[#allocation4 + $0x1ea0] sm:$0xff] }
 0x618   :  { %v3534_v61 = vmax.f32 %v6307_v52, 0.0  ;;  %v3536_v41 = vmax.f32 %v6309_v11, 0.0  ;;  %2627 = vmatpush1.bf16.msra.mxu0 %v1901_v10  ;;  %2799 = vmatpush1.bf16.msra.mxu1 %v1903_v13  ;;  %v2015_v21 = vld [vmem:[#allocation4 + $0x1eb0] sm:$0xff]  ;;  %v2030_v4 = vld [vmem:[#allocation4 + $0x1f28] sm:$0xff]  ;;  %v2032_v6 = vld [vmem:[#allocation4 + $0x1f38] sm:$0xff] }
 0x619   :  { %2628 = vmatprep.subr.bf16.mxu0 %v1918_v18  ;;  %2800 = vmatprep.subr.bf16.mxu1 %v1920_v46  ;;  %v2029_v10 = vld [vmem:[#allocation4 + $0x1f20] sm:$0xff]  ;;  %v2031_v13 = vld [vmem:[#allocation4 + $0x1f30] sm:$0xff]  ;;  %v2046_v18 = vld [vmem:[#allocation4 + $0x1fa8] sm:$0xff] }
 0x61a   :  { %v2048_v46 = vld [vmem:[#allocation4 + $0x1fb8] sm:$0xff] }
 0x61c   :  { %2629 = vmatpush1.bf16.msra.mxu0 %v1917_v47  ;;  %2801 = vmatpush1.bf16.msra.mxu1 %v1919_v48  ;;  %v2045_v47 = vld [vmem:[#allocation4 + $0x1fa0] sm:$0xff]  ;;  %v2047_v48 = vld [vmem:[#allocation4 + $0x1fb0] sm:$0xff] }
 0x61d   :  { %2630 = vmatprep.subr.bf16.mxu0 %v1934_v56  ;;  %2802 = vmatprep.subr.bf16.mxu1 %v1936_v28  ;;  %v1042_v56 = vld [vmem:[#allocation4 + $0x48] sm:$0xff]  ;;  %v1044_v28 = vld [vmem:[#allocation4 + $0x58] sm:$0xff] }
 0x620   :  { %2631 = vmatpush1.bf16.msra.mxu0 %v1933_v33  ;;  %2803 = vmatpush1.bf16.msra.mxu1 %v1935_v36  ;;  %v1041_v33 = vld [vmem:[#allocation4 + $0x40] sm:$0xff]  ;;  %v1043_v36 = vld [vmem:[#allocation4 + $0x50] sm:$0xff] }
 0x621   :  { %2632 = vmatprep.subr.bf16.mxu0 %v1950_v30  ;;  %2804 = vmatprep.subr.bf16.mxu1 %v1952_v8  ;;  %v1058_v30 = vld [vmem:[#allocation4 + $0xc8] sm:$0xff]  ;;  %v1060_v8 = vld [vmem:[#allocation4 + $0xd8] sm:$0xff] }
 0x624   :  { %2633 = vmatpush1.bf16.msra.mxu0 %v1949_v42  ;;  %2805 = vmatpush1.bf16.msra.mxu1 %v1951_v44  ;;  %v1057_v42 = vld [vmem:[#allocation4 + $0xc0] sm:$0xff]  ;;  %v1059_v44 = vld [vmem:[#allocation4 + $0xd0] sm:$0xff] }
 0x625   :  { %2634 = vmatprep.subr.bf16.mxu0 %v1966_v15  ;;  %2806 = vmatprep.subr.bf16.mxu1 %v1968_v45  ;;  %v1074_v15 = vld [vmem:[#allocation4 + $0x148] sm:$0xff]  ;;  %v1076_v45 = vld [vmem:[#allocation4 + $0x158] sm:$0xff] }
 0x628   :  { %2635 = vmatpush1.bf16.msra.mxu0 %v1965_v51  ;;  %2807 = vmatpush1.bf16.msra.mxu1 %v1967_v53  ;;  %v1073_v51 = vld [vmem:[#allocation4 + $0x140] sm:$0xff]  ;;  %v1075_v53 = vld [vmem:[#allocation4 + $0x150] sm:$0xff] }
 0x629   :  { %2636 = vmatprep.subr.bf16.mxu0 %v1982_v57  ;;  %2808 = vmatprep.subr.bf16.mxu1 %v1984_v27  ;;  %v1090_v57 = vld [vmem:[#allocation4 + $0x1c8] sm:$0xff]  ;;  %v1092_v27 = vld [vmem:[#allocation4 + $0x1d8] sm:$0xff] }
 0x62c   :  { %2637 = vmatpush1.bf16.msra.mxu0 %v1981_v29  ;;  %2809 = vmatpush1.bf16.msra.mxu1 %v1983_v35  ;;  %v1089_v29 = vld [vmem:[#allocation4 + $0x1c0] sm:$0xff]  ;;  %v1091_v35 = vld [vmem:[#allocation4 + $0x1d0] sm:$0xff] }
 0x62d   :  { %2638 = vmatprep.subr.bf16.mxu0 %v1998_v38  ;;  %2810 = vmatprep.subr.bf16.mxu1 %v2000_v40  ;;  %v1106_v38 = vld [vmem:[#allocation4 + $0x248] sm:$0xff]  ;;  %v1108_v40 = vld [vmem:[#allocation4 + $0x258] sm:$0xff] }
 0x630   :  { %2639 = vmatpush1.bf16.msra.mxu0 %v1997_v49  ;;  %2811 = vmatpush1.bf16.msra.mxu1 %v1999_v54  ;;  %v1105_v49 = vld [vmem:[#allocation4 + $0x240] sm:$0xff]  ;;  %v1107_v54 = vld [vmem:[#allocation4 + $0x250] sm:$0xff] }
 0x631   :  { %2640 = vmatprep.subr.bf16.mxu0 %v2014_v24  ;;  %2812 = vmatprep.subr.bf16.mxu1 %v2016_v5  ;;  %v1122_v24 = vld [vmem:[#allocation4 + $0x2c8] sm:$0xff]  ;;  %v1124_v5 = vld [vmem:[#allocation4 + $0x2d8] sm:$0xff] }
 0x634   :  { %2641 = vmatpush1.bf16.msra.mxu0 %v2013_v50  ;;  %2813 = vmatpush1.bf16.msra.mxu1 %v2015_v21  ;;  %v1121_v50 = vld [vmem:[#allocation4 + $0x2c0] sm:$0xff]  ;;  %v1123_v21 = vld [vmem:[#allocation4 + $0x2d0] sm:$0xff] }
 0x635   :  { %2642 = vmatprep.subr.bf16.mxu0 %v2030_v4  ;;  %2814 = vmatprep.subr.bf16.mxu1 %v2032_v6  ;;  %v1138_v4 = vld [vmem:[#allocation4 + $0x348] sm:$0xff]  ;;  %v1140_v6 = vld [vmem:[#allocation4 + $0x358] sm:$0xff] }
 0x638   :  { %2643 = vmatpush1.bf16.msra.mxu0 %v2029_v10  ;;  %2815 = vmatpush1.bf16.msra.mxu1 %v2031_v13  ;;  %v1137_v10 = vld [vmem:[#allocation4 + $0x340] sm:$0xff]  ;;  %v1139_v13 = vld [vmem:[#allocation4 + $0x350] sm:$0xff] }
 0x639   :  { %2644 = vmatprep.subr.bf16.mxu0 %v2046_v18  ;;  %2816 = vmatprep.subr.bf16.mxu1 %v2048_v46  ;;  %v1154_v18 = vld [vmem:[#allocation4 + $0x3c8] sm:$0xff]  ;;  %v1156_v46 = vld [vmem:[#allocation4 + $0x3d8] sm:$0xff] }
 0x63c   :  { %2645 = vmatpush1.bf16.msra.mxu0 %v2045_v47  ;;  %2817 = vmatpush1.bf16.msra.mxu1 %v2047_v48  ;;  %v1153_v47 = vld [vmem:[#allocation4 + $0x3c0] sm:$0xff]  ;;  %v1155_v48 = vld [vmem:[#allocation4 + $0x3d0] sm:$0xff] }
 0x63d   :  { %2829 = vmatprep.subr.bf16.mxu0 %v1042_v56  ;;  %3001 = vmatprep.subr.bf16.mxu1 %v1044_v28  ;;  %v1170_v56 = vld [vmem:[#allocation4 + $0x448] sm:$0xff]  ;;  %v1172_v28 = vld [vmem:[#allocation4 + $0x458] sm:$0xff] }
 0x63f   :  { %2647 = vmatmul.mubr.bf16.vlgmr.msra.gmra.mrb[8].mxu0 %v6269_v16  ;;  %2819 = vmatmul.mubr.bf16.vlgmr.msra.gmra.mrb[24].mxu1 %v6269_v16 }
 0x640   :  { %2830 = vmatpush1.bf16.msra.mxu0 %v1041_v33  ;;  %3002 = vmatpush1.bf16.msra.mxu1 %v1043_v36  ;;  %v1169_v33 = vld [vmem:[#allocation4 + $0x440] sm:$0xff]  ;;  %v1171_v36 = vld [vmem:[#allocation4 + $0x450] sm:$0xff] }
 0x641   :  { %2831 = vmatprep.subr.bf16.mxu0 %v1058_v30  ;;  %3003 = vmatprep.subr.bf16.mxu1 %v1060_v8  ;;  %v1186_v30 = vld [vmem:[#allocation4 + $0x4c8] sm:$0xff]  ;;  %v1188_v8 = vld [vmem:[#allocation4 + $0x4d8] sm:$0xff] }
 0x642   :  { %2861 = vmatprep.mubr.bf16.mxu0 %v6213_v62  ;;  %3033 = vmatprep.mubr.bf16.mxu1 %v6213_v62 }
 0x644   :  { %2832 = vmatpush1.bf16.msra.mxu0 %v1057_v42  ;;  %3004 = vmatpush1.bf16.msra.mxu1 %v1059_v44  ;;  %v1185_v42 = vld [vmem:[#allocation4 + $0x4c0] sm:$0xff]  ;;  %v1187_v44 = vld [vmem:[#allocation4 + $0x4d0] sm:$0xff] }
 0x645   :  { %2833 = vmatprep.subr.bf16.mxu0 %v1074_v15  ;;  %3005 = vmatprep.subr.bf16.mxu1 %v1076_v45  ;;  %v1202_v15 = vld [vmem:[#allocation4 + $0x548] sm:$0xff]  ;;  %v1204_v45 = vld [vmem:[#allocation4 + $0x558] sm:$0xff] }
 0x648   :  { %2834 = vmatpush1.bf16.msra.mxu0 %v1073_v51  ;;  %3006 = vmatpush1.bf16.msra.mxu1 %v1075_v53  ;;  %v1201_v51 = vld [vmem:[#allocation4 + $0x540] sm:$0xff]  ;;  %v1203_v53 = vld [vmem:[#allocation4 + $0x550] sm:$0xff] }
 0x649   :  { %2835 = vmatprep.subr.bf16.mxu0 %v1090_v57  ;;  %3007 = vmatprep.subr.bf16.mxu1 %v1092_v27  ;;  %v1218_v57 = vld [vmem:[#allocation4 + $0x5c8] sm:$0xff]  ;;  %v1220_v27 = vld [vmem:[#allocation4 + $0x5d8] sm:$0xff] }
 0x64c   :  { %2836 = vmatpush1.bf16.msra.mxu0 %v1089_v29  ;;  %3008 = vmatpush1.bf16.msra.mxu1 %v1091_v35  ;;  %v1217_v29 = vld [vmem:[#allocation4 + $0x5c0] sm:$0xff]  ;;  %v1219_v35 = vld [vmem:[#allocation4 + $0x5d0] sm:$0xff] }
 0x64d   :  { %2837 = vmatprep.subr.bf16.mxu0 %v1106_v38  ;;  %3009 = vmatprep.subr.bf16.mxu1 %v1108_v40  ;;  %v1234_v38 = vld [vmem:[#allocation4 + $0x648] sm:$0xff]  ;;  %v1236_v40 = vld [vmem:[#allocation4 + $0x658] sm:$0xff] }
 0x650   :  { %2838 = vmatpush1.bf16.msra.mxu0 %v1105_v49  ;;  %3010 = vmatpush1.bf16.msra.mxu1 %v1107_v54  ;;  %v1233_v49 = vld [vmem:[#allocation4 + $0x640] sm:$0xff]  ;;  %v1235_v54 = vld [vmem:[#allocation4 + $0x650] sm:$0xff] }
 0x651   :  { %2839 = vmatprep.subr.bf16.mxu0 %v1122_v24  ;;  %3011 = vmatprep.subr.bf16.mxu1 %v1124_v5  ;;  %v1250_v24 = vld [vmem:[#allocation4 + $0x6c8] sm:$0xff]  ;;  %v1252_v5 = vld [vmem:[#allocation4 + $0x6d8] sm:$0xff] }
 0x654   :  { %2840 = vmatpush1.bf16.msra.mxu0 %v1121_v50  ;;  %3012 = vmatpush1.bf16.msra.mxu1 %v1123_v21  ;;  %v1249_v50 = vld [vmem:[#allocation4 + $0x6c0] sm:$0xff]  ;;  %v1251_v21 = vld [vmem:[#allocation4 + $0x6d0] sm:$0xff] }
 0x655   :  { %2841 = vmatprep.subr.bf16.mxu0 %v1138_v4  ;;  %3013 = vmatprep.subr.bf16.mxu1 %v1140_v6  ;;  %v1266_v4 = vld [vmem:[#allocation4 + $0x748] sm:$0xff]  ;;  %v1268_v6 = vld [vmem:[#allocation4 + $0x758] sm:$0xff] }
 0x658   :  { %2842 = vmatpush1.bf16.msra.mxu0 %v1137_v10  ;;  %3014 = vmatpush1.bf16.msra.mxu1 %v1139_v13  ;;  %v1265_v10 = vld [vmem:[#allocation4 + $0x740] sm:$0xff]  ;;  %v1267_v13 = vld [vmem:[#allocation4 + $0x750] sm:$0xff] }
 0x659   :  { %2843 = vmatprep.subr.bf16.mxu0 %v1154_v18  ;;  %3015 = vmatprep.subr.bf16.mxu1 %v1156_v46  ;;  %v1282_v18 = vld [vmem:[#allocation4 + $0x7c8] sm:$0xff]  ;;  %v1284_v46 = vld [vmem:[#allocation4 + $0x7d8] sm:$0xff] }
 0x65c   :  { %2844 = vmatpush1.bf16.msra.mxu0 %v1153_v47  ;;  %3016 = vmatpush1.bf16.msra.mxu1 %v1155_v48  ;;  %v1281_v47 = vld [vmem:[#allocation4 + $0x7c0] sm:$0xff]  ;;  %v1283_v48 = vld [vmem:[#allocation4 + $0x7d0] sm:$0xff] }
 0x65d   :  { %2845 = vmatprep.subr.bf16.mxu0 %v1170_v56  ;;  %3017 = vmatprep.subr.bf16.mxu1 %v1172_v28  ;;  %v1298_v56 = vld [vmem:[#allocation4 + $0x848] sm:$0xff]  ;;  %v1300_v28 = vld [vmem:[#allocation4 + $0x858] sm:$0xff] }
 0x660   :  { %2846 = vmatpush1.bf16.msra.mxu0 %v1169_v33  ;;  %3018 = vmatpush1.bf16.msra.mxu1 %v1171_v36  ;;  %v1297_v33 = vld [vmem:[#allocation4 + $0x840] sm:$0xff]  ;;  %v1299_v36 = vld [vmem:[#allocation4 + $0x850] sm:$0xff] }
 0x661   :  { %2847 = vmatprep.subr.bf16.mxu0 %v1186_v30  ;;  %3019 = vmatprep.subr.bf16.mxu1 %v1188_v8  ;;  %v1314_v30 = vld [vmem:[#allocation4 + $0x8c8] sm:$0xff]  ;;  %v1316_v8 = vld [vmem:[#allocation4 + $0x8d8] sm:$0xff] }
 0x664   :  { %2848 = vmatpush1.bf16.msra.mxu0 %v1185_v42  ;;  %3020 = vmatpush1.bf16.msra.mxu1 %v1187_v44  ;;  %v1313_v42 = vld [vmem:[#allocation4 + $0x8c0] sm:$0xff]  ;;  %v1315_v44 = vld [vmem:[#allocation4 + $0x8d0] sm:$0xff] }
 0x665   :  { %2849 = vmatprep.subr.bf16.mxu0 %v1202_v15  ;;  %3021 = vmatprep.subr.bf16.mxu1 %v1204_v45  ;;  %v1330_v15 = vld [vmem:[#allocation4 + $0x948] sm:$0xff]  ;;  %v1332_v45 = vld [vmem:[#allocation4 + $0x958] sm:$0xff] }
 0x668   :  { %2850 = vmatpush1.bf16.msra.mxu0 %v1201_v51  ;;  %3022 = vmatpush1.bf16.msra.mxu1 %v1203_v53  ;;  %v1329_v51 = vld [vmem:[#allocation4 + $0x940] sm:$0xff]  ;;  %v1331_v53 = vld [vmem:[#allocation4 + $0x950] sm:$0xff] }
 0x669   :  { %2851 = vmatprep.subr.bf16.mxu0 %v1218_v57  ;;  %3023 = vmatprep.subr.bf16.mxu1 %v1220_v27  ;;  %v1346_v57 = vld [vmem:[#allocation4 + $0x9c8] sm:$0xff]  ;;  %v1348_v27 = vld [vmem:[#allocation4 + $0x9d8] sm:$0xff] }
 0x66c   :  { %2852 = vmatpush1.bf16.msra.mxu0 %v1217_v29  ;;  %3024 = vmatpush1.bf16.msra.mxu1 %v1219_v35  ;;  %v1345_v29 = vld [vmem:[#allocation4 + $0x9c0] sm:$0xff]  ;;  %v1347_v35 = vld [vmem:[#allocation4 + $0x9d0] sm:$0xff] }
 0x66d   :  { %2853 = vmatprep.subr.bf16.mxu0 %v1234_v38  ;;  %3025 = vmatprep.subr.bf16.mxu1 %v1236_v40  ;;  %v1362_v38 = vld [vmem:[#allocation4 + $0xa48] sm:$0xff]  ;;  %v1364_v40 = vld [vmem:[#allocation4 + $0xa58] sm:$0xff] }
 0x670   :  { %2854 = vmatpush1.bf16.msra.mxu0 %v1233_v49  ;;  %3026 = vmatpush1.bf16.msra.mxu1 %v1235_v54  ;;  %v1361_v49 = vld [vmem:[#allocation4 + $0xa40] sm:$0xff]  ;;  %v1363_v54 = vld [vmem:[#allocation4 + $0xa50] sm:$0xff] }
 0x671   :  { %2855 = vmatprep.subr.bf16.mxu0 %v1250_v24  ;;  %3027 = vmatprep.subr.bf16.mxu1 %v1252_v5  ;;  %v1378_v24 = vld [vmem:[#allocation4 + $0xac8] sm:$0xff]  ;;  %v1380_v5 = vld [vmem:[#allocation4 + $0xad8] sm:$0xff] }
 0x674   :  { %2856 = vmatpush1.bf16.msra.mxu0 %v1249_v50  ;;  %3028 = vmatpush1.bf16.msra.mxu1 %v1251_v21  ;;  %v1377_v50 = vld [vmem:[#allocation4 + $0xac0] sm:$0xff]  ;;  %v1379_v21 = vld [vmem:[#allocation4 + $0xad0] sm:$0xff] }
 0x675   :  { %2857 = vmatprep.subr.bf16.mxu0 %v1266_v4  ;;  %3029 = vmatprep.subr.bf16.mxu1 %v1268_v6  ;;  %v1394_v4 = vld [vmem:[#allocation4 + $0xb48] sm:$0xff]  ;;  %v1396_v6 = vld [vmem:[#allocation4 + $0xb58] sm:$0xff] }
 0x678   :  { %2858 = vmatpush1.bf16.msra.mxu0 %v1265_v10  ;;  %3030 = vmatpush1.bf16.msra.mxu1 %v1267_v13  ;;  %v1393_v10 = vld [vmem:[#allocation4 + $0xb40] sm:$0xff]  ;;  %v1395_v13 = vld [vmem:[#allocation4 + $0xb50] sm:$0xff] }
 0x679   :  { %2859 = vmatprep.subr.bf16.mxu0 %v1282_v18  ;;  %3031 = vmatprep.subr.bf16.mxu1 %v1284_v46  ;;  %v1410_v18 = vld [vmem:[#allocation4 + $0xbc8] sm:$0xff]  ;;  %v1412_v46 = vld [vmem:[#allocation4 + $0xbd8] sm:$0xff] }
 0x67c   :  { %2860 = vmatpush1.bf16.msra.mxu0 %v1281_v47  ;;  %3032 = vmatpush1.bf16.msra.mxu1 %v1283_v48  ;;  %v1409_v47 = vld [vmem:[#allocation4 + $0xbc0] sm:$0xff]  ;;  %v1411_v48 = vld [vmem:[#allocation4 + $0xbd0] sm:$0xff] }
 0x67d   :  { %2872 = vmatprep.subr.bf16.mxu0 %v1298_v56  ;;  %3044 = vmatprep.subr.bf16.mxu1 %v1300_v28  ;;  %v1426_v56 = vld [vmem:[#allocation4 + $0xc48] sm:$0xff]  ;;  %v1428_v28 = vld [vmem:[#allocation4 + $0xc58] sm:$0xff] }
 0x67f   :  { %2862 = vmatmul.mubr.bf16.vlgmr.msra.gmra.mrb[12].mxu0 %v6221_v34  ;;  %3034 = vmatmul.mubr.bf16.vlgmr.msra.gmra.mrb[28].mxu1 %v6221_v34 }
 0x680   :  { %2873 = vmatpush1.bf16.msra.mxu0 %v1297_v33  ;;  %3045 = vmatpush1.bf16.msra.mxu1 %v1299_v36  ;;  %v1425_v33 = vld [vmem:[#allocation4 + $0xc40] sm:$0xff]  ;;  %v1427_v36 = vld [vmem:[#allocation4 + $0xc50] sm:$0xff] }
 0x681   :  { %2874 = vmatprep.subr.bf16.mxu0 %v1314_v30  ;;  %3046 = vmatprep.subr.bf16.mxu1 %v1316_v8  ;;  %v1442_v30 = vld [vmem:[#allocation4 + $0xcc8] sm:$0xff]  ;;  %v1444_v8 = vld [vmem:[#allocation4 + $0xcd8] sm:$0xff] }
 0x682   :  { %2904 = vmatprep.mubr.bf16.mxu0 %v6227_v20  ;;  %3076 = vmatprep.mubr.bf16.mxu1 %v6227_v20 }
 0x684   :  { %2875 = vmatpush1.bf16.msra.mxu0 %v1313_v42  ;;  %3047 = vmatpush1.bf16.msra.mxu1 %v1315_v44  ;;  %v1441_v42 = vld [vmem:[#allocation4 + $0xcc0] sm:$0xff]  ;;  %v1443_v44 = vld [vmem:[#allocation4 + $0xcd0] sm:$0xff] }
 0x685   :  { %2876 = vmatprep.subr.bf16.mxu0 %v1330_v15  ;;  %3048 = vmatprep.subr.bf16.mxu1 %v1332_v45  ;;  %v1458_v15 = vld [vmem:[#allocation4 + $0xd48] sm:$0xff]  ;;  %v1460_v45 = vld [vmem:[#allocation4 + $0xd58] sm:$0xff] }
 0x688   :  { %2877 = vmatpush1.bf16.msra.mxu0 %v1329_v51  ;;  %3049 = vmatpush1.bf16.msra.mxu1 %v1331_v53  ;;  %v1457_v51 = vld [vmem:[#allocation4 + $0xd40] sm:$0xff]  ;;  %v1459_v53 = vld [vmem:[#allocation4 + $0xd50] sm:$0xff] }
 0x689   :  { %2878 = vmatprep.subr.bf16.mxu0 %v1346_v57  ;;  %3050 = vmatprep.subr.bf16.mxu1 %v1348_v27  ;;  %v1474_v57 = vld [vmem:[#allocation4 + $0xdc8] sm:$0xff]  ;;  %v1476_v27 = vld [vmem:[#allocation4 + $0xdd8] sm:$0xff] }
 0x68c   :  { %2879 = vmatpush1.bf16.msra.mxu0 %v1345_v29  ;;  %3051 = vmatpush1.bf16.msra.mxu1 %v1347_v35  ;;  %v1473_v29 = vld [vmem:[#allocation4 + $0xdc0] sm:$0xff]  ;;  %v1475_v35 = vld [vmem:[#allocation4 + $0xdd0] sm:$0xff] }
 0x68d   :  { %2880 = vmatprep.subr.bf16.mxu0 %v1362_v38  ;;  %3052 = vmatprep.subr.bf16.mxu1 %v1364_v40  ;;  %v1490_v38 = vld [vmem:[#allocation4 + $0xe48] sm:$0xff]  ;;  %v1492_v40 = vld [vmem:[#allocation4 + $0xe58] sm:$0xff] }
 0x690   :  { %2881 = vmatpush1.bf16.msra.mxu0 %v1361_v49  ;;  %3053 = vmatpush1.bf16.msra.mxu1 %v1363_v54  ;;  %v1489_v49 = vld [vmem:[#allocation4 + $0xe40] sm:$0xff]  ;;  %v1491_v54 = vld [vmem:[#allocation4 + $0xe50] sm:$0xff] }
 0x691   :  { %2882 = vmatprep.subr.bf16.mxu0 %v1378_v24  ;;  %3054 = vmatprep.subr.bf16.mxu1 %v1380_v5  ;;  %v1506_v24 = vld [vmem:[#allocation4 + $0xec8] sm:$0xff]  ;;  %v1508_v5 = vld [vmem:[#allocation4 + $0xed8] sm:$0xff] }
 0x694   :  { %2883 = vmatpush1.bf16.msra.mxu0 %v1377_v50  ;;  %3055 = vmatpush1.bf16.msra.mxu1 %v1379_v21  ;;  %v1505_v50 = vld [vmem:[#allocation4 + $0xec0] sm:$0xff]  ;;  %v1507_v21 = vld [vmem:[#allocation4 + $0xed0] sm:$0xff] }
 0x695   :  { %2884 = vmatprep.subr.bf16.mxu0 %v1394_v4  ;;  %3056 = vmatprep.subr.bf16.mxu1 %v1396_v6  ;;  %v1522_v4 = vld [vmem:[#allocation4 + $0xf48] sm:$0xff]  ;;  %v1524_v6 = vld [vmem:[#allocation4 + $0xf58] sm:$0xff] }
 0x698   :  { %2885 = vmatpush1.bf16.msra.mxu0 %v1393_v10  ;;  %3057 = vmatpush1.bf16.msra.mxu1 %v1395_v13  ;;  %v1521_v10 = vld [vmem:[#allocation4 + $0xf40] sm:$0xff]  ;;  %v1523_v13 = vld [vmem:[#allocation4 + $0xf50] sm:$0xff] }
 0x699   :  { %2886 = vmatprep.subr.bf16.mxu0 %v1410_v18  ;;  %3058 = vmatprep.subr.bf16.mxu1 %v1412_v46  ;;  %v1538_v18 = vld [vmem:[#allocation4 + $0xfc8] sm:$0xff]  ;;  %v1540_v46 = vld [vmem:[#allocation4 + $0xfd8] sm:$0xff] }
 0x69c   :  { %2887 = vmatpush1.bf16.msra.mxu0 %v1409_v47  ;;  %3059 = vmatpush1.bf16.msra.mxu1 %v1411_v48  ;;  %v1537_v47 = vld [vmem:[#allocation4 + $0xfc0] sm:$0xff]  ;;  %v1539_v48 = vld [vmem:[#allocation4 + $0xfd0] sm:$0xff] }
 0x69d   :  { %2888 = vmatprep.subr.bf16.mxu0 %v1426_v56  ;;  %3060 = vmatprep.subr.bf16.mxu1 %v1428_v28  ;;  %v1554_v56 = vld [vmem:[#allocation4 + $0x1048] sm:$0xff]  ;;  %v1556_v28 = vld [vmem:[#allocation4 + $0x1058] sm:$0xff] }
 0x6a0   :  { %2889 = vmatpush1.bf16.msra.mxu0 %v1425_v33  ;;  %3061 = vmatpush1.bf16.msra.mxu1 %v1427_v36  ;;  %v1553_v33 = vld [vmem:[#allocation4 + $0x1040] sm:$0xff]  ;;  %v1555_v36 = vld [vmem:[#allocation4 + $0x1050] sm:$0xff] }
 0x6a1   :  { %2890 = vmatprep.subr.bf16.mxu0 %v1442_v30  ;;  %3062 = vmatprep.subr.bf16.mxu1 %v1444_v8  ;;  %v1570_v30 = vld [vmem:[#allocation4 + $0x10c8] sm:$0xff]  ;;  %v1572_v8 = vld [vmem:[#allocation4 + $0x10d8] sm:$0xff] }
 0x6a4   :  { %2891 = vmatpush1.bf16.msra.mxu0 %v1441_v42  ;;  %3063 = vmatpush1.bf16.msra.mxu1 %v1443_v44  ;;  %v1569_v42 = vld [vmem:[#allocation4 + $0x10c0] sm:$0xff]  ;;  %v1571_v44 = vld [vmem:[#allocation4 + $0x10d0] sm:$0xff] }
 0x6a5   :  { %2892 = vmatprep.subr.bf16.mxu0 %v1458_v15  ;;  %3064 = vmatprep.subr.bf16.mxu1 %v1460_v45  ;;  %v1586_v15 = vld [vmem:[#allocation4 + $0x1148] sm:$0xff]  ;;  %v1588_v45 = vld [vmem:[#allocation4 + $0x1158] sm:$0xff] }
 0x6a8   :  { %2893 = vmatpush1.bf16.msra.mxu0 %v1457_v51  ;;  %3065 = vmatpush1.bf16.msra.mxu1 %v1459_v53  ;;  %v1585_v51 = vld [vmem:[#allocation4 + $0x1140] sm:$0xff]  ;;  %v1587_v53 = vld [vmem:[#allocation4 + $0x1150] sm:$0xff] }
 0x6a9   :  { %2894 = vmatprep.subr.bf16.mxu0 %v1474_v57  ;;  %3066 = vmatprep.subr.bf16.mxu1 %v1476_v27  ;;  %v1602_v57 = vld [vmem:[#allocation4 + $0x11c8] sm:$0xff]  ;;  %v1604_v27 = vld [vmem:[#allocation4 + $0x11d8] sm:$0xff] }
 0x6ac   :  { %2895 = vmatpush1.bf16.msra.mxu0 %v1473_v29  ;;  %3067 = vmatpush1.bf16.msra.mxu1 %v1475_v35  ;;  %v1601_v29 = vld [vmem:[#allocation4 + $0x11c0] sm:$0xff]  ;;  %v1603_v35 = vld [vmem:[#allocation4 + $0x11d0] sm:$0xff] }
 0x6ad   :  { %2896 = vmatprep.subr.bf16.mxu0 %v1490_v38  ;;  %3068 = vmatprep.subr.bf16.mxu1 %v1492_v40  ;;  %v1618_v38 = vld [vmem:[#allocation4 + $0x1248] sm:$0xff]  ;;  %v1620_v40 = vld [vmem:[#allocation4 + $0x1258] sm:$0xff] }
 0x6b0   :  { %2897 = vmatpush1.bf16.msra.mxu0 %v1489_v49  ;;  %3069 = vmatpush1.bf16.msra.mxu1 %v1491_v54  ;;  %v1617_v49 = vld [vmem:[#allocation4 + $0x1240] sm:$0xff]  ;;  %v1619_v54 = vld [vmem:[#allocation4 + $0x1250] sm:$0xff] }
 0x6b1   :  { %2898 = vmatprep.subr.bf16.mxu0 %v1506_v24  ;;  %3070 = vmatprep.subr.bf16.mxu1 %v1508_v5  ;;  %v1634_v24 = vld [vmem:[#allocation4 + $0x12c8] sm:$0xff]  ;;  %v1636_v5 = vld [vmem:[#allocation4 + $0x12d8] sm:$0xff] }
 0x6b4   :  { %2899 = vmatpush1.bf16.msra.mxu0 %v1505_v50  ;;  %3071 = vmatpush1.bf16.msra.mxu1 %v1507_v21  ;;  %v1633_v50 = vld [vmem:[#allocation4 + $0x12c0] sm:$0xff]  ;;  %v1635_v21 = vld [vmem:[#allocation4 + $0x12d0] sm:$0xff] }
 0x6b5   :  { %2900 = vmatprep.subr.bf16.mxu0 %v1522_v4  ;;  %3072 = vmatprep.subr.bf16.mxu1 %v1524_v6  ;;  %v1650_v4 = vld [vmem:[#allocation4 + $0x1348] sm:$0xff]  ;;  %v1652_v6 = vld [vmem:[#allocation4 + $0x1358] sm:$0xff] }
 0x6b8   :  { %2901 = vmatpush1.bf16.msra.mxu0 %v1521_v10  ;;  %3073 = vmatpush1.bf16.msra.mxu1 %v1523_v13  ;;  %v1649_v10 = vld [vmem:[#allocation4 + $0x1340] sm:$0xff]  ;;  %v1651_v13 = vld [vmem:[#allocation4 + $0x1350] sm:$0xff] }
 0x6b9   :  { %2902 = vmatprep.subr.bf16.mxu0 %v1538_v18  ;;  %3074 = vmatprep.subr.bf16.mxu1 %v1540_v46  ;;  %v1666_v18 = vld [vmem:[#allocation4 + $0x13c8] sm:$0xff]  ;;  %v1668_v46 = vld [vmem:[#allocation4 + $0x13d8] sm:$0xff] }
 0x6bc   :  { %2903 = vmatpush1.bf16.msra.mxu0 %v1537_v47  ;;  %3075 = vmatpush1.bf16.msra.mxu1 %v1539_v48  ;;  %v1665_v47 = vld [vmem:[#allocation4 + $0x13c0] sm:$0xff]  ;;  %v1667_v48 = vld [vmem:[#allocation4 + $0x13d0] sm:$0xff] }
 0x6bd   :  { %2915 = vmatprep.subr.bf16.mxu0 %v1554_v56  ;;  %3087 = vmatprep.subr.bf16.mxu1 %v1556_v28  ;;  %v1682_v56 = vld [vmem:[#allocation4 + $0x1448] sm:$0xff]  ;;  %v1684_v28 = vld [vmem:[#allocation4 + $0x1458] sm:$0xff] }
 0x6bf   :  { %2905 = vmatmul.mubr.bf16.vlgmr.msra.gmra.mrb[12].mxu0 %v6237_v7  ;;  %3077 = vmatmul.mubr.bf16.vlgmr.msra.gmra.mrb[28].mxu1 %v6237_v7 }
 0x6c0   :  { %2916 = vmatpush1.bf16.msra.mxu0 %v1553_v33  ;;  %3088 = vmatpush1.bf16.msra.mxu1 %v1555_v36  ;;  %v1681_v33 = vld [vmem:[#allocation4 + $0x1440] sm:$0xff]  ;;  %v1683_v36 = vld [vmem:[#allocation4 + $0x1450] sm:$0xff] }
 0x6c1   :  { %2917 = vmatprep.subr.bf16.mxu0 %v1570_v30  ;;  %3089 = vmatprep.subr.bf16.mxu1 %v1572_v8  ;;  %v1698_v30 = vld [vmem:[#allocation4 + $0x14c8] sm:$0xff]  ;;  %v1700_v8 = vld [vmem:[#allocation4 + $0x14d8] sm:$0xff] }
 0x6c2   :  { %2947 = vmatprep.mubr.bf16.mxu0 %v6243_v19  ;;  %3119 = vmatprep.mubr.bf16.mxu1 %v6243_v19 }
 0x6c4   :  { %2918 = vmatpush1.bf16.msra.mxu0 %v1569_v42  ;;  %3090 = vmatpush1.bf16.msra.mxu1 %v1571_v44  ;;  %v1697_v42 = vld [vmem:[#allocation4 + $0x14c0] sm:$0xff]  ;;  %v1699_v44 = vld [vmem:[#allocation4 + $0x14d0] sm:$0xff] }
 0x6c5   :  { %2919 = vmatprep.subr.bf16.mxu0 %v1586_v15  ;;  %3091 = vmatprep.subr.bf16.mxu1 %v1588_v45  ;;  %v1714_v15 = vld [vmem:[#allocation4 + $0x1548] sm:$0xff]  ;;  %v1716_v45 = vld [vmem:[#allocation4 + $0x1558] sm:$0xff] }
 0x6c8   :  { %2920 = vmatpush1.bf16.msra.mxu0 %v1585_v51  ;;  %3092 = vmatpush1.bf16.msra.mxu1 %v1587_v53  ;;  %v1713_v51 = vld [vmem:[#allocation4 + $0x1540] sm:$0xff]  ;;  %v1715_v53 = vld [vmem:[#allocation4 + $0x1550] sm:$0xff] }
 0x6c9   :  { %2921 = vmatprep.subr.bf16.mxu0 %v1602_v57  ;;  %3093 = vmatprep.subr.bf16.mxu1 %v1604_v27  ;;  %v1730_v57 = vld [vmem:[#allocation4 + $0x15c8] sm:$0xff]  ;;  %v1732_v27 = vld [vmem:[#allocation4 + $0x15d8] sm:$0xff] }
 0x6cc   :  { %2922 = vmatpush1.bf16.msra.mxu0 %v1601_v29  ;;  %3094 = vmatpush1.bf16.msra.mxu1 %v1603_v35  ;;  %v1729_v29 = vld [vmem:[#allocation4 + $0x15c0] sm:$0xff]  ;;  %v1731_v35 = vld [vmem:[#allocation4 + $0x15d0] sm:$0xff] }
 0x6cd   :  { %2923 = vmatprep.subr.bf16.mxu0 %v1618_v38  ;;  %3095 = vmatprep.subr.bf16.mxu1 %v1620_v40  ;;  %v1746_v38 = vld [vmem:[#allocation4 + $0x1648] sm:$0xff]  ;;  %v1748_v40 = vld [vmem:[#allocation4 + $0x1658] sm:$0xff] }
 0x6d0   :  { %2924 = vmatpush1.bf16.msra.mxu0 %v1617_v49  ;;  %3096 = vmatpush1.bf16.msra.mxu1 %v1619_v54  ;;  %v1745_v49 = vld [vmem:[#allocation4 + $0x1640] sm:$0xff]  ;;  %v1747_v54 = vld [vmem:[#allocation4 + $0x1650] sm:$0xff] }
 0x6d1   :  { %2925 = vmatprep.subr.bf16.mxu0 %v1634_v24  ;;  %3097 = vmatprep.subr.bf16.mxu1 %v1636_v5  ;;  %v1762_v24 = vld [vmem:[#allocation4 + $0x16c8] sm:$0xff]  ;;  %v1764_v5 = vld [vmem:[#allocation4 + $0x16d8] sm:$0xff] }
 0x6d4   :  { %2926 = vmatpush1.bf16.msra.mxu0 %v1633_v50  ;;  %3098 = vmatpush1.bf16.msra.mxu1 %v1635_v21  ;;  %v1761_v50 = vld [vmem:[#allocation4 + $0x16c0] sm:$0xff]  ;;  %v1763_v21 = vld [vmem:[#allocation4 + $0x16d0] sm:$0xff] }
 0x6d5   :  { %2927 = vmatprep.subr.bf16.mxu0 %v1650_v4  ;;  %3099 = vmatprep.subr.bf16.mxu1 %v1652_v6  ;;  %v1778_v4 = vld [vmem:[#allocation4 + $0x1748] sm:$0xff]  ;;  %v1780_v6 = vld [vmem:[#allocation4 + $0x1758] sm:$0xff] }
 0x6d8   :  { %2928 = vmatpush1.bf16.msra.mxu0 %v1649_v10  ;;  %3100 = vmatpush1.bf16.msra.mxu1 %v1651_v13  ;;  %v1777_v10 = vld [vmem:[#allocation4 + $0x1740] sm:$0xff]  ;;  %v1779_v13 = vld [vmem:[#allocation4 + $0x1750] sm:$0xff] }
 0x6d9   :  { %2929 = vmatprep.subr.bf16.mxu0 %v1666_v18  ;;  %3101 = vmatprep.subr.bf16.mxu1 %v1668_v46  ;;  %v1794_v18 = vld [vmem:[#allocation4 + $0x17c8] sm:$0xff]  ;;  %v1796_v46 = vld [vmem:[#allocation4 + $0x17d8] sm:$0xff] }
 0x6dc   :  { %2930 = vmatpush1.bf16.msra.mxu0 %v1665_v47  ;;  %3102 = vmatpush1.bf16.msra.mxu1 %v1667_v48  ;;  %v1793_v47 = vld [vmem:[#allocation4 + $0x17c0] sm:$0xff]  ;;  %v1795_v48 = vld [vmem:[#allocation4 + $0x17d0] sm:$0xff] }
 0x6dd   :  { %2931 = vmatprep.subr.bf16.mxu0 %v1682_v56  ;;  %3103 = vmatprep.subr.bf16.mxu1 %v1684_v28  ;;  %v1810_v56 = vld [vmem:[#allocation4 + $0x1848] sm:$0xff]  ;;  %v1812_v28 = vld [vmem:[#allocation4 + $0x1858] sm:$0xff] }
 0x6e0   :  { %2932 = vmatpush1.bf16.msra.mxu0 %v1681_v33  ;;  %3104 = vmatpush1.bf16.msra.mxu1 %v1683_v36  ;;  %v1809_v33 = vld [vmem:[#allocation4 + $0x1840] sm:$0xff]  ;;  %v1811_v36 = vld [vmem:[#allocation4 + $0x1850] sm:$0xff] }
 0x6e1   :  { %2933 = vmatprep.subr.bf16.mxu0 %v1698_v30  ;;  %3105 = vmatprep.subr.bf16.mxu1 %v1700_v8  ;;  %v1826_v30 = vld [vmem:[#allocation4 + $0x18c8] sm:$0xff]  ;;  %v1828_v8 = vld [vmem:[#allocation4 + $0x18d8] sm:$0xff] }
 0x6e4   :  { %2934 = vmatpush1.bf16.msra.mxu0 %v1697_v42  ;;  %3106 = vmatpush1.bf16.msra.mxu1 %v1699_v44  ;;  %v1825_v42 = vld [vmem:[#allocation4 + $0x18c0] sm:$0xff]  ;;  %v1827_v44 = vld [vmem:[#allocation4 + $0x18d0] sm:$0xff] }
 0x6e5   :  { %2935 = vmatprep.subr.bf16.mxu0 %v1714_v15  ;;  %3107 = vmatprep.subr.bf16.mxu1 %v1716_v45  ;;  %v1842_v15 = vld [vmem:[#allocation4 + $0x1948] sm:$0xff]  ;;  %v1844_v45 = vld [vmem:[#allocation4 + $0x1958] sm:$0xff] }
 0x6e8   :  { %2936 = vmatpush1.bf16.msra.mxu0 %v1713_v51  ;;  %3108 = vmatpush1.bf16.msra.mxu1 %v1715_v53  ;;  %v1841_v51 = vld [vmem:[#allocation4 + $0x1940] sm:$0xff]  ;;  %v1843_v53 = vld [vmem:[#allocation4 + $0x1950] sm:$0xff] }
 0x6e9   :  { %2937 = vmatprep.subr.bf16.mxu0 %v1730_v57  ;;  %3109 = vmatprep.subr.bf16.mxu1 %v1732_v27  ;;  %v1858_v57 = vld [vmem:[#allocation4 + $0x19c8] sm:$0xff]  ;;  %v1860_v27 = vld [vmem:[#allocation4 + $0x19d8] sm:$0xff] }
 0x6ec   :  { %2938 = vmatpush1.bf16.msra.mxu0 %v1729_v29  ;;  %3110 = vmatpush1.bf16.msra.mxu1 %v1731_v35  ;;  %v1857_v29 = vld [vmem:[#allocation4 + $0x19c0] sm:$0xff]  ;;  %v1859_v35 = vld [vmem:[#allocation4 + $0x19d0] sm:$0xff] }
 0x6ed   :  { %2939 = vmatprep.subr.bf16.mxu0 %v1746_v38  ;;  %3111 = vmatprep.subr.bf16.mxu1 %v1748_v40  ;;  %v1874_v38 = vld [vmem:[#allocation4 + $0x1a48] sm:$0xff]  ;;  %v1876_v40 = vld [vmem:[#allocation4 + $0x1a58] sm:$0xff] }
 0x6f0   :  { %2940 = vmatpush1.bf16.msra.mxu0 %v1745_v49  ;;  %3112 = vmatpush1.bf16.msra.mxu1 %v1747_v54  ;;  %v1873_v49 = vld [vmem:[#allocation4 + $0x1a40] sm:$0xff]  ;;  %v1875_v54 = vld [vmem:[#allocation4 + $0x1a50] sm:$0xff] }
 0x6f1   :  { %2941 = vmatprep.subr.bf16.mxu0 %v1762_v24  ;;  %3113 = vmatprep.subr.bf16.mxu1 %v1764_v5  ;;  %v1890_v24 = vld [vmem:[#allocation4 + $0x1ac8] sm:$0xff]  ;;  %v1892_v5 = vld [vmem:[#allocation4 + $0x1ad8] sm:$0xff] }
 0x6f4   :  { %2942 = vmatpush1.bf16.msra.mxu0 %v1761_v50  ;;  %3114 = vmatpush1.bf16.msra.mxu1 %v1763_v21  ;;  %v5759_v50 = vld [vmem:[#allocation11] sm:$0xff] }
 0x6f5   :  { %2943 = vmatprep.subr.bf16.mxu0 %v1778_v4  ;;  %3115 = vmatprep.subr.bf16.mxu1 %v1780_v6  ;;  %v2080_v21 = vrot.slane %v5759_v50, %v6166_v14  ;;  %v2088_v4 = vrot.slane %v5759_v50, %v6188_v31  ;;  %v2084_v6 = vrot.slane %v5759_v50, %v6169_v17 }
 0x6f8   :  { %2944 = vmatpush1.bf16.msra.mxu0 %v1777_v10  ;;  %3116 = vmatpush1.bf16.msra.mxu1 %v1779_v13  ;;  %v2092_v10 = vrot.slane %v5759_v50, %v6191_v39  ;;  %v1889_v13 = vld [vmem:[#allocation4 + $0x1ac0] sm:$0xff]  ;;  %v1924_v50 = vld [vmem:[#allocation4 + $0x1bd8] sm:$0xff] }
 0x6f9   :  { %2945 = vmatprep.subr.bf16.mxu0 %v1794_v18  ;;  %3117 = vmatprep.subr.bf16.mxu1 %v1796_v46  ;;  %v1891_v18 = vld [vmem:[#allocation4 + $0x1ad0] sm:$0xff] }
 0x6fc   :  { %2946 = vmatpush1.bf16.msra.mxu0 %v1793_v47  ;;  %3118 = vmatpush1.bf16.msra.mxu1 %v1795_v48  ;;  %v1906_v48 = vld [vmem:[#allocation4 + $0x1b48] sm:$0xff] }
 0x6fd   :  { %2958 = vmatprep.subr.bf16.mxu0 %v1810_v56  ;;  %3130 = vmatprep.subr.bf16.mxu1 %v1812_v28  ;;  %v1908_v56 = vld [vmem:[#allocation4 + $0x1b58] sm:$0xff] }
 0x6ff   :  { %2948 = vmatmul.mubr.bf16.vlgmr.msra.gmra.mrb[12].mxu0 %v6253_v43  ;;  %3120 = vmatmul.mubr.bf16.vlgmr.msra.gmra.mrb[28].mxu1 %v6253_v43 }
 0x700   :  { %2959 = vmatpush1.bf16.msra.mxu0 %v1809_v33  ;;  %3131 = vmatpush1.bf16.msra.mxu1 %v1811_v36 }
 0x701   :  { %2960 = vmatprep.subr.bf16.mxu0 %v1826_v30  ;;  %3132 = vmatprep.subr.bf16.mxu1 %v1828_v8 }
 0x702   :  { %2990 = vmatprep.mubr.bf16.mxu0 %v6259_v1  ;;  %3162 = vmatprep.mubr.bf16.mxu1 %v6259_v1 }
 0x704   :  { %2961 = vmatpush1.bf16.msra.mxu0 %v1825_v42  ;;  %3133 = vmatpush1.bf16.msra.mxu1 %v1827_v44 }
 0x705   :  { %2962 = vmatprep.subr.bf16.mxu0 %v1842_v15  ;;  %3134 = vmatprep.subr.bf16.mxu1 %v1844_v45 }
 0x708   :  { %2963 = vmatpush1.bf16.msra.mxu0 %v1841_v51  ;;  %3135 = vmatpush1.bf16.msra.mxu1 %v1843_v53  ;;  %v1958_v51 = vld [vmem:[#allocation4 + $0x1ce8] sm:$0xff] }
 0x709   :  { %2964 = vmatprep.subr.bf16.mxu0 %v1858_v57  ;;  %3136 = vmatprep.subr.bf16.mxu1 %v1860_v27 }
 0x70c   :  { %2965 = vmatpush1.bf16.msra.mxu0 %v1857_v29  ;;  %3137 = vmatpush1.bf16.msra.mxu1 %v1859_v35  ;;  %v1905_v35 = vld [vmem:[#allocation4 + $0x1b40] sm:$0xff] }
 0x70d   :  { %2966 = vmatprep.subr.bf16.mxu0 %v1874_v38  ;;  %3138 = vmatprep.subr.bf16.mxu1 %v1876_v40  ;;  %v1907_v38 = vld [vmem:[#allocation4 + $0x1b50] sm:$0xff] }
 0x710   :  { %2967 = vmatpush1.bf16.msra.mxu0 %v1873_v49  ;;  %3139 = vmatpush1.bf16.msra.mxu1 %v1875_v54 }
 0x711   :  { %2968 = vmatprep.subr.bf16.mxu0 %v1890_v24  ;;  %3140 = vmatprep.subr.bf16.mxu1 %v1892_v5  ;;  %v1922_v5 = vld [vmem:[#allocation4 + $0x1bc8] sm:$0xff] }
 0x712   :  { %v2648_v46 = vpop.f32.mrb[8].mxu0  ;;  %v2820_v47 = vpop.f32.mrb[24].mxu1 }
 0x713   :  { %v6335_v28 = vadd.f32 %v2648_v46, %v2080_v21  ;;  %v6337_v33 = vadd.f32 %v2820_v47, %v2088_v4  ;;  %v2650_v36 = vpop.f32.mrb[9].mxu0  ;;  %v2822_v30 = vpop.f32.mrb[25].mxu1  ;;  %v1921_v46 = vld [vmem:[#allocation4 + $0x1bc0] sm:$0xff]  ;;  %v1923_v47 = vld [vmem:[#allocation4 + $0x1bd0] sm:$0xff] }
 0x714   :  { %v6339_v8 = vadd.f32 %v2650_v36, %v2084_v6  ;;  %v6341_v42 = vadd.f32 %v2822_v30, %v2092_v10  ;;  %v2652_v44 = vpop.f32.mrb[10].mxu0  ;;  %v2824_v15 = vpop.f32.mrb[26].mxu1  ;;  %2969 = vmatpush1.bf16.msra.mxu0 %v1889_v13  ;;  %3141 = vmatpush1.bf16.msra.mxu1 %v1891_v18  ;;  %v1954_v36 = vld [vmem:[#allocation4 + $0x1cc8] sm:$0xff]  ;;  %v1956_v30 = vld [vmem:[#allocation4 + $0x1cd8] sm:$0xff] }
 0x715   :  { %v3521_v45 = vmax.f32 %v6335_v28, 0.0  ;;  %v6345_v53 = vadd.f32 %v2652_v44, %v2080_v21  ;;  %v6347_v57 = vadd.f32 %v2824_v15, %v2088_v4  ;;  %v2654_v27 = vpop.f32.mrb[11].mxu0  ;;  %v2826_v29 = vpop.f32.mrb[27].mxu1  ;;  %2970 = vmatprep.subr.bf16.mxu0 %v1906_v48  ;;  %3142 = vmatprep.subr.bf16.mxu1 %v1908_v56  ;;  %v1940_v48 = vld [vmem:[#allocation4 + $0x1c58] sm:$0xff]  ;;  %v1939_v56 = vld [vmem:[#allocation4 + $0x1c50] sm:$0xff]  ;;  %v1953_v44 = vld [vmem:[#allocation4 + $0x1cc0] sm:$0xff] }
 0x716   :  { %v3522_v40 = vmax.f32 %v6339_v8, 0.0  ;;  %v3524_v49 = vmax.f32 %v6341_v42, 0.0  ;;  %v6351_v54 = vadd.f32 %v2654_v27, %v2084_v6  ;;  %v6353_v24 = vadd.f32 %v2826_v29, %v2092_v10  ;;  %v1938_v6 = vld [vmem:[#allocation4 + $0x1c48] sm:$0xff]  ;;  %v1937_v10 = vld [vmem:[#allocation4 + $0x1c40] sm:$0xff]  ;;  %v1955_v15 = vld [vmem:[#allocation4 + $0x1cd0] sm:$0xff] }
 0x717   :  { %v3537_v21 = vmax.f32 %v6345_v53, 0.0  ;;  %v1970_v27 = vld [vmem:[#allocation4 + $0x1d48] sm:$0xff]  ;;  %v1972_v29 = vld [vmem:[#allocation4 + $0x1d58] sm:$0xff]  ;;  %v1911_v4 = vld [vmem:[#allocation4 + $0x1b70] sm:$0xff] }
 0x718   :  { %v3538_v13 = vmax.f32 %v6351_v54, 0.0  ;;  %2971 = vmatpush1.bf16.msra.mxu0 %v1905_v35  ;;  %3143 = vmatpush1.bf16.msra.mxu1 %v1907_v38  ;;  %v1969_v35 = vld [vmem:[#allocation4 + $0x1d40] sm:$0xff]  ;;  %v1971_v38 = vld [vmem:[#allocation4 + $0x1d50] sm:$0xff] }
 0x719   :  { %2972 = vmatprep.subr.bf16.mxu0 %v1922_v5  ;;  %3144 = vmatprep.subr.bf16.mxu1 %v1924_v50  ;;  %v1986_v5 = vld [vmem:[#allocation4 + $0x1dc8] sm:$0xff]  ;;  %v1988_v50 = vld [vmem:[#allocation4 + $0x1dd8] sm:$0xff] }
 0x71c   :  { %2973 = vmatpush1.bf16.msra.mxu0 %v1921_v46  ;;  %3145 = vmatpush1.bf16.msra.mxu1 %v1923_v47  ;;  %v1985_v46 = vld [vmem:[#allocation4 + $0x1dc0] sm:$0xff]  ;;  %v1987_v47 = vld [vmem:[#allocation4 + $0x1dd0] sm:$0xff] }
 0x71d   :  { %2974 = vmatprep.subr.bf16.mxu0 %v1938_v6  ;;  %3146 = vmatprep.subr.bf16.mxu1 %v1940_v48  ;;  %v2002_v6 = vld [vmem:[#allocation4 + $0x1e48] sm:$0xff]  ;;  %v2004_v48 = vld [vmem:[#allocation4 + $0x1e58] sm:$0xff] }
 0x720   :  { %2975 = vmatpush1.bf16.msra.mxu0 %v1937_v10  ;;  %3147 = vmatpush1.bf16.msra.mxu1 %v1939_v56  ;;  %v2001_v10 = vld [vmem:[#allocation4 + $0x1e40] sm:$0xff]  ;;  %v2003_v56 = vld [vmem:[#allocation4 + $0x1e50] sm:$0xff] }
 0x721   :  { %2976 = vmatprep.subr.bf16.mxu0 %v1954_v36  ;;  %3148 = vmatprep.subr.bf16.mxu1 %v1956_v30  ;;  %v2018_v36 = vld [vmem:[#allocation4 + $0x1ec8] sm:$0xff]  ;;  %v2020_v30 = vld [vmem:[#allocation4 + $0x1ed8] sm:$0xff] }
 0x724   :  { %2977 = vmatpush1.bf16.msra.mxu0 %v1953_v44  ;;  %3149 = vmatpush1.bf16.msra.mxu1 %v1955_v15  ;;  %v2017_v44 = vld [vmem:[#allocation4 + $0x1ec0] sm:$0xff]  ;;  %v2019_v15 = vld [vmem:[#allocation4 + $0x1ed0] sm:$0xff] }
 0x725   :  { %2978 = vmatprep.subr.bf16.mxu0 %v1970_v27  ;;  %3150 = vmatprep.subr.bf16.mxu1 %v1972_v29  ;;  %v2034_v27 = vld [vmem:[#allocation4 + $0x1f48] sm:$0xff]  ;;  %v2036_v29 = vld [vmem:[#allocation4 + $0x1f58] sm:$0xff] }
 0x728   :  { %2979 = vmatpush1.bf16.msra.mxu0 %v1969_v35  ;;  %3151 = vmatpush1.bf16.msra.mxu1 %v1971_v38  ;;  %v2033_v35 = vld [vmem:[#allocation4 + $0x1f40] sm:$0xff]  ;;  %v2035_v38 = vld [vmem:[#allocation4 + $0x1f50] sm:$0xff] }
 0x729   :  { %2980 = vmatprep.subr.bf16.mxu0 %v1986_v5  ;;  %3152 = vmatprep.subr.bf16.mxu1 %v1988_v50  ;;  %v2050_v5 = vld [vmem:[#allocation4 + $0x1fc8] sm:$0xff]  ;;  %v2052_v50 = vld [vmem:[#allocation4 + $0x1fd8] sm:$0xff] }
 0x72c   :  { %2981 = vmatpush1.bf16.msra.mxu0 %v1985_v46  ;;  %3153 = vmatpush1.bf16.msra.mxu1 %v1987_v47  ;;  %v2049_v46 = vld [vmem:[#allocation4 + $0x1fc0] sm:$0xff]  ;;  %v2051_v47 = vld [vmem:[#allocation4 + $0x1fd0] sm:$0xff] }
 0x72d   :  { %2982 = vmatprep.subr.bf16.mxu0 %v2002_v6  ;;  %3154 = vmatprep.subr.bf16.mxu1 %v2004_v48  ;;  %v1046_v6 = vld [vmem:[#allocation4 + $0x68] sm:$0xff]  ;;  %v1048_v48 = vld [vmem:[#allocation4 + $0x78] sm:$0xff] }
 0x730   :  { %2983 = vmatpush1.bf16.msra.mxu0 %v2001_v10  ;;  %3155 = vmatpush1.bf16.msra.mxu1 %v2003_v56  ;;  %v1045_v10 = vld [vmem:[#allocation4 + $0x60] sm:$0xff]  ;;  %v1047_v56 = vld [vmem:[#allocation4 + $0x70] sm:$0xff] }
 0x731   :  { %2984 = vmatprep.subr.bf16.mxu0 %v2018_v36  ;;  %3156 = vmatprep.subr.bf16.mxu1 %v2020_v30  ;;  %v1062_v36 = vld [vmem:[#allocation4 + $0xe8] sm:$0xff]  ;;  %v1064_v30 = vld [vmem:[#allocation4 + $0xf8] sm:$0xff] }
 0x734   :  { %2985 = vmatpush1.bf16.msra.mxu0 %v2017_v44  ;;  %3157 = vmatpush1.bf16.msra.mxu1 %v2019_v15  ;;  %v1061_v44 = vld [vmem:[#allocation4 + $0xe0] sm:$0xff]  ;;  %v1063_v15 = vld [vmem:[#allocation4 + $0xf0] sm:$0xff] }
 0x735   :  { %2986 = vmatprep.subr.bf16.mxu0 %v2034_v27  ;;  %3158 = vmatprep.subr.bf16.mxu1 %v2036_v29  ;;  %v1078_v27 = vld [vmem:[#allocation4 + $0x168] sm:$0xff]  ;;  %v1080_v29 = vld [vmem:[#allocation4 + $0x178] sm:$0xff] }
 0x738   :  { %2987 = vmatpush1.bf16.msra.mxu0 %v2033_v35  ;;  %3159 = vmatpush1.bf16.msra.mxu1 %v2035_v38  ;;  %v1077_v35 = vld [vmem:[#allocation4 + $0x160] sm:$0xff]  ;;  %v1079_v38 = vld [vmem:[#allocation4 + $0x170] sm:$0xff] }
 0x739   :  { %2988 = vmatprep.subr.bf16.mxu0 %v2050_v5  ;;  %3160 = vmatprep.subr.bf16.mxu1 %v2052_v50  ;;  %v1094_v5 = vld [vmem:[#allocation4 + $0x1e8] sm:$0xff]  ;;  %v1096_v50 = vld [vmem:[#allocation4 + $0x1f8] sm:$0xff] }
 0x73c   :  { %2989 = vmatpush1.bf16.msra.mxu0 %v2049_v46  ;;  %3161 = vmatpush1.bf16.msra.mxu1 %v2051_v47  ;;  %v1093_v46 = vld [vmem:[#allocation4 + $0x1e0] sm:$0xff]  ;;  %v1095_v47 = vld [vmem:[#allocation4 + $0x1f0] sm:$0xff] }
 0x73d   :  { %3173 = vmatprep.subr.bf16.mxu0 %v1046_v6  ;;  %3345 = vmatprep.subr.bf16.mxu1 %v1048_v48  ;;  %v1110_v6 = vld [vmem:[#allocation4 + $0x268] sm:$0xff]  ;;  %v1112_v48 = vld [vmem:[#allocation4 + $0x278] sm:$0xff] }
 0x73f   :  { %2991 = vmatmul.mubr.bf16.vlgmr.msra.gmra.mrb[12].mxu0 %v6269_v16  ;;  %3163 = vmatmul.mubr.bf16.vlgmr.msra.gmra.mrb[28].mxu1 %v6269_v16 }
 0x740   :  { %3174 = vmatpush1.bf16.msra.mxu0 %v1045_v10  ;;  %3346 = vmatpush1.bf16.msra.mxu1 %v1047_v56  ;;  %v1111_v10 = vld [vmem:[#allocation4 + $0x270] sm:$0xff]  ;;  %v1126_v56 = vld [vmem:[#allocation4 + $0x2e8] sm:$0xff] }
 0x741   :  { %3175 = vmatprep.subr.bf16.mxu0 %v1062_v36  ;;  %3347 = vmatprep.subr.bf16.mxu1 %v1064_v30  ;;  %v1128_v36 = vld [vmem:[#allocation4 + $0x2f8] sm:$0xff]  ;;  %v1125_v30 = vld [vmem:[#allocation4 + $0x2e0] sm:$0xff] }
 0x742   :  { %3205 = vmatprep.mubr.bf16.mxu0 %v6213_v62  ;;  %3377 = vmatprep.mubr.bf16.mxu1 %v6213_v62  ;;  %v1109_v62 = vld [vmem:[#allocation4 + $0x260] sm:$0xff] }
 0x744   :  { %3176 = vmatpush1.bf16.msra.mxu0 %v1061_v44  ;;  %3348 = vmatpush1.bf16.msra.mxu1 %v1063_v15  ;;  %v1127_v44 = vld [vmem:[#allocation4 + $0x2f0] sm:$0xff]  ;;  %v1142_v15 = vld [vmem:[#allocation4 + $0x368] sm:$0xff] }
 0x745   :  { %3177 = vmatprep.subr.bf16.mxu0 %v1078_v27  ;;  %3349 = vmatprep.subr.bf16.mxu1 %v1080_v29  ;;  %v1144_v27 = vld [vmem:[#allocation4 + $0x378] sm:$0xff]  ;;  %v1141_v29 = vld [vmem:[#allocation4 + $0x360] sm:$0xff] }
 0x748   :  { %3178 = vmatpush1.bf16.msra.mxu0 %v1077_v35  ;;  %3350 = vmatpush1.bf16.msra.mxu1 %v1079_v38  ;;  %v1143_v35 = vld [vmem:[#allocation4 + $0x370] sm:$0xff]  ;;  %v1158_v38 = vld [vmem:[#allocation4 + $0x3e8] sm:$0xff] }
 0x749   :  { %3179 = vmatprep.subr.bf16.mxu0 %v1094_v5  ;;  %3351 = vmatprep.subr.bf16.mxu1 %v1096_v50  ;;  %v1160_v5 = vld [vmem:[#allocation4 + $0x3f8] sm:$0xff]  ;;  %v1157_v50 = vld [vmem:[#allocation4 + $0x3e0] sm:$0xff] }
 0x74c   :  { %3180 = vmatpush1.bf16.msra.mxu0 %v1093_v46  ;;  %3352 = vmatpush1.bf16.msra.mxu1 %v1095_v47  ;;  %v1159_v46 = vld [vmem:[#allocation4 + $0x3f0] sm:$0xff]  ;;  %v1174_v47 = vld [vmem:[#allocation4 + $0x468] sm:$0xff] }
 0x74d   :  { %3181 = vmatprep.subr.bf16.mxu0 %v1110_v6  ;;  %3353 = vmatprep.subr.bf16.mxu1 %v1112_v48  ;;  %v1176_v6 = vld [vmem:[#allocation4 + $0x478] sm:$0xff]  ;;  %v1173_v48 = vld [vmem:[#allocation4 + $0x460] sm:$0xff] }
 0x750   :  { %3182 = vmatpush1.bf16.msra.mxu0 %v1109_v62  ;;  %3354 = vmatpush1.bf16.msra.mxu1 %v1111_v10  ;;  %v1175_v62 = vld [vmem:[#allocation4 + $0x470] sm:$0xff]  ;;  %v1190_v10 = vld [vmem:[#allocation4 + $0x4e8] sm:$0xff] }
 0x751   :  { %3183 = vmatprep.subr.bf16.mxu0 %v1126_v56  ;;  %3355 = vmatprep.subr.bf16.mxu1 %v1128_v36  ;;  %v1192_v56 = vld [vmem:[#allocation4 + $0x4f8] sm:$0xff]  ;;  %v1189_v36 = vld [vmem:[#allocation4 + $0x4e0] sm:$0xff] }
 0x754   :  { %3184 = vmatpush1.bf16.msra.mxu0 %v1125_v30  ;;  %3356 = vmatpush1.bf16.msra.mxu1 %v1127_v44  ;;  %v1191_v30 = vld [vmem:[#allocation4 + $0x4f0] sm:$0xff]  ;;  %v1206_v44 = vld [vmem:[#allocation4 + $0x568] sm:$0xff] }
 0x755   :  { %3185 = vmatprep.subr.bf16.mxu0 %v1142_v15  ;;  %3357 = vmatprep.subr.bf16.mxu1 %v1144_v27  ;;  %v1208_v15 = vld [vmem:[#allocation4 + $0x578] sm:$0xff]  ;;  %v1205_v27 = vld [vmem:[#allocation4 + $0x560] sm:$0xff] }
 0x758   :  { %3186 = vmatpush1.bf16.msra.mxu0 %v1141_v29  ;;  %3358 = vmatpush1.bf16.msra.mxu1 %v1143_v35  ;;  %v1207_v29 = vld [vmem:[#allocation4 + $0x570] sm:$0xff]  ;;  %v1222_v35 = vld [vmem:[#allocation4 + $0x5e8] sm:$0xff] }
 0x759   :  { %3187 = vmatprep.subr.bf16.mxu0 %v1158_v38  ;;  %3359 = vmatprep.subr.bf16.mxu1 %v1160_v5  ;;  %v1224_v38 = vld [vmem:[#allocation4 + $0x5f8] sm:$0xff]  ;;  %v1221_v5 = vld [vmem:[#allocation4 + $0x5e0] sm:$0xff] }
 0x75c   :  { %3188 = vmatpush1.bf16.msra.mxu0 %v1157_v50  ;;  %3360 = vmatpush1.bf16.msra.mxu1 %v1159_v46  ;;  %v1223_v50 = vld [vmem:[#allocation4 + $0x5f0] sm:$0xff]  ;;  %v1238_v46 = vld [vmem:[#allocation4 + $0x668] sm:$0xff] }
 0x75d   :  { %3189 = vmatprep.subr.bf16.mxu0 %v1174_v47  ;;  %3361 = vmatprep.subr.bf16.mxu1 %v1176_v6  ;;  %v1240_v47 = vld [vmem:[#allocation4 + $0x678] sm:$0xff]  ;;  %v1237_v6 = vld [vmem:[#allocation4 + $0x660] sm:$0xff] }
 0x760   :  { %3190 = vmatpush1.bf16.msra.mxu0 %v1173_v48  ;;  %3362 = vmatpush1.bf16.msra.mxu1 %v1175_v62  ;;  %v1239_v48 = vld [vmem:[#allocation4 + $0x670] sm:$0xff]  ;;  %v1254_v62 = vld [vmem:[#allocation4 + $0x6e8] sm:$0xff] }
 0x761   :  { %3191 = vmatprep.subr.bf16.mxu0 %v1190_v10  ;;  %3363 = vmatprep.subr.bf16.mxu1 %v1192_v56  ;;  %v1256_v10 = vld [vmem:[#allocation4 + $0x6f8] sm:$0xff]  ;;  %v1253_v56 = vld [vmem:[#allocation4 + $0x6e0] sm:$0xff] }
 0x764   :  { %3192 = vmatpush1.bf16.msra.mxu0 %v1189_v36  ;;  %3364 = vmatpush1.bf16.msra.mxu1 %v1191_v30  ;;  %v1255_v36 = vld [vmem:[#allocation4 + $0x6f0] sm:$0xff]  ;;  %v1270_v30 = vld [vmem:[#allocation4 + $0x768] sm:$0xff] }
 0x765   :  { %3193 = vmatprep.subr.bf16.mxu0 %v1206_v44  ;;  %3365 = vmatprep.subr.bf16.mxu1 %v1208_v15  ;;  %v1272_v44 = vld [vmem:[#allocation4 + $0x778] sm:$0xff]  ;;  %v1269_v15 = vld [vmem:[#allocation4 + $0x760] sm:$0xff] }
 0x768   :  { %3194 = vmatpush1.bf16.msra.mxu0 %v1205_v27  ;;  %3366 = vmatpush1.bf16.msra.mxu1 %v1207_v29  ;;  %v1271_v27 = vld [vmem:[#allocation4 + $0x770] sm:$0xff]  ;;  %v1286_v29 = vld [vmem:[#allocation4 + $0x7e8] sm:$0xff] }
 0x769   :  { %3195 = vmatprep.subr.bf16.mxu0 %v1222_v35  ;;  %3367 = vmatprep.subr.bf16.mxu1 %v1224_v38  ;;  %v1288_v35 = vld [vmem:[#allocation4 + $0x7f8] sm:$0xff]  ;;  %v1285_v38 = vld [vmem:[#allocation4 + $0x7e0] sm:$0xff] }
 0x76c   :  { %3196 = vmatpush1.bf16.msra.mxu0 %v1221_v5  ;;  %3368 = vmatpush1.bf16.msra.mxu1 %v1223_v50  ;;  %v1287_v5 = vld [vmem:[#allocation4 + $0x7f0] sm:$0xff]  ;;  %v1302_v50 = vld [vmem:[#allocation4 + $0x868] sm:$0xff] }
 0x76d   :  { %3197 = vmatprep.subr.bf16.mxu0 %v1238_v46  ;;  %3369 = vmatprep.subr.bf16.mxu1 %v1240_v47  ;;  %v1304_v46 = vld [vmem:[#allocation4 + $0x878] sm:$0xff]  ;;  %v1301_v47 = vld [vmem:[#allocation4 + $0x860] sm:$0xff] }
 0x770   :  { %3198 = vmatpush1.bf16.msra.mxu0 %v1237_v6  ;;  %3370 = vmatpush1.bf16.msra.mxu1 %v1239_v48  ;;  %v1303_v6 = vld [vmem:[#allocation4 + $0x870] sm:$0xff]  ;;  %v1318_v48 = vld [vmem:[#allocation4 + $0x8e8] sm:$0xff] }
 0x771   :  { %3199 = vmatprep.subr.bf16.mxu0 %v1254_v62  ;;  %3371 = vmatprep.subr.bf16.mxu1 %v1256_v10  ;;  %v1320_v62 = vld [vmem:[#allocation4 + $0x8f8] sm:$0xff]  ;;  %v1317_v10 = vld [vmem:[#allocation4 + $0x8e0] sm:$0xff] }
 0x774   :  { %3200 = vmatpush1.bf16.msra.mxu0 %v1253_v56  ;;  %3372 = vmatpush1.bf16.msra.mxu1 %v1255_v36  ;;  %v1319_v56 = vld [vmem:[#allocation4 + $0x8f0] sm:$0xff]  ;;  %v1334_v36 = vld [vmem:[#allocation4 + $0x968] sm:$0xff] }
 0x775   :  { %3201 = vmatprep.subr.bf16.mxu0 %v1270_v30  ;;  %3373 = vmatprep.subr.bf16.mxu1 %v1272_v44  ;;  %v1336_v30 = vld [vmem:[#allocation4 + $0x978] sm:$0xff]  ;;  %v1333_v44 = vld [vmem:[#allocation4 + $0x960] sm:$0xff] }
 0x778   :  { %3202 = vmatpush1.bf16.msra.mxu0 %v1269_v15  ;;  %3374 = vmatpush1.bf16.msra.mxu1 %v1271_v27  ;;  %v1335_v15 = vld [vmem:[#allocation4 + $0x970] sm:$0xff]  ;;  %v1350_v27 = vld [vmem:[#allocation4 + $0x9e8] sm:$0xff] }
 0x779   :  { %3203 = vmatprep.subr.bf16.mxu0 %v1286_v29  ;;  %3375 = vmatprep.subr.bf16.mxu1 %v1288_v35  ;;  %v1349_v29 = vld [vmem:[#allocation4 + $0x9e0] sm:$0xff]  ;;  %v1351_v35 = vld [vmem:[#allocation4 + $0x9f0] sm:$0xff] }
 0x77c   :  { %3204 = vmatpush1.bf16.msra.mxu0 %v1285_v38  ;;  %3376 = vmatpush1.bf16.msra.mxu1 %v1287_v5  ;;  %v1366_v38 = vld [vmem:[#allocation4 + $0xa68] sm:$0xff]  ;;  %v1368_v5 = vld [vmem:[#allocation4 + $0xa78] sm:$0xff] }
 0x77d   :  { %3216 = vmatprep.subr.bf16.mxu0 %v1302_v50  ;;  %3388 = vmatprep.subr.bf16.mxu1 %v1304_v46  ;;  %v1367_v50 = vld [vmem:[#allocation4 + $0xa70] sm:$0xff]  ;;  %v1382_v46 = vld [vmem:[#allocation4 + $0xae8] sm:$0xff] }
 0x77f   :  { %3206 = vmatmul.mubr.bf16.vlgmr.msra.gmra.mrb[16].mxu0 %v6221_v34  ;;  %3378 = vmatmul.mubr.bf16.vlgmr.msra.gmra.mrb[32].mxu1 %v6221_v34  ;;  %v1352_v34 = vld [vmem:[#allocation4 + $0x9f8] sm:$0xff] }
 0x780   :  { %3217 = vmatpush1.bf16.msra.mxu0 %v1301_v47  ;;  %3389 = vmatpush1.bf16.msra.mxu1 %v1303_v6  ;;  %v1384_v47 = vld [vmem:[#allocation4 + $0xaf8] sm:$0xff]  ;;  %v1381_v6 = vld [vmem:[#allocation4 + $0xae0] sm:$0xff] }
 0x781   :  { %3218 = vmatprep.subr.bf16.mxu0 %v1318_v48  ;;  %3390 = vmatprep.subr.bf16.mxu1 %v1320_v62  ;;  %v1383_v48 = vld [vmem:[#allocation4 + $0xaf0] sm:$0xff]  ;;  %v1398_v62 = vld [vmem:[#allocation4 + $0xb68] sm:$0xff] }
 0x782   :  { %3248 = vmatprep.mubr.bf16.mxu0 %v6227_v20  ;;  %3420 = vmatprep.mubr.bf16.mxu1 %v6227_v20  ;;  %v1365_v20 = vld [vmem:[#allocation4 + $0xa60] sm:$0xff] }
 0x784   :  { %3219 = vmatpush1.bf16.msra.mxu0 %v1317_v10  ;;  %3391 = vmatpush1.bf16.msra.mxu1 %v1319_v56  ;;  %v1400_v10 = vld [vmem:[#allocation4 + $0xb78] sm:$0xff]  ;;  %v1397_v56 = vld [vmem:[#allocation4 + $0xb60] sm:$0xff] }
 0x785   :  { %3220 = vmatprep.subr.bf16.mxu0 %v1334_v36  ;;  %3392 = vmatprep.subr.bf16.mxu1 %v1336_v30  ;;  %v1399_v36 = vld [vmem:[#allocation4 + $0xb70] sm:$0xff]  ;;  %v1414_v30 = vld [vmem:[#allocation4 + $0xbe8] sm:$0xff] }
 0x788   :  { %3221 = vmatpush1.bf16.msra.mxu0 %v1333_v44  ;;  %3393 = vmatpush1.bf16.msra.mxu1 %v1335_v15  ;;  %v1416_v44 = vld [vmem:[#allocation4 + $0xbf8] sm:$0xff]  ;;  %v1413_v15 = vld [vmem:[#allocation4 + $0xbe0] sm:$0xff] }
 0x789   :  { %3222 = vmatprep.subr.bf16.mxu0 %v1350_v27  ;;  %3394 = vmatprep.subr.bf16.mxu1 %v1352_v34  ;;  %v1415_v27 = vld [vmem:[#allocation4 + $0xbf0] sm:$0xff]  ;;  %v1430_v34 = vld [vmem:[#allocation4 + $0xc68] sm:$0xff] }
 0x78c   :  { %3223 = vmatpush1.bf16.msra.mxu0 %v1349_v29  ;;  %3395 = vmatpush1.bf16.msra.mxu1 %v1351_v35  ;;  %v1432_v29 = vld [vmem:[#allocation4 + $0xc78] sm:$0xff]  ;;  %v1429_v35 = vld [vmem:[#allocation4 + $0xc60] sm:$0xff] }
 0x78d   :  { %3224 = vmatprep.subr.bf16.mxu0 %v1366_v38  ;;  %3396 = vmatprep.subr.bf16.mxu1 %v1368_v5  ;;  %v1431_v38 = vld [vmem:[#allocation4 + $0xc70] sm:$0xff]  ;;  %v1446_v5 = vld [vmem:[#allocation4 + $0xce8] sm:$0xff] }
 0x790   :  { %3225 = vmatpush1.bf16.msra.mxu0 %v1365_v20  ;;  %3397 = vmatpush1.bf16.msra.mxu1 %v1367_v50  ;;  %v1448_v20 = vld [vmem:[#allocation4 + $0xcf8] sm:$0xff]  ;;  %v1445_v50 = vld [vmem:[#allocation4 + $0xce0] sm:$0xff] }
 0x791   :  { %3226 = vmatprep.subr.bf16.mxu0 %v1382_v46  ;;  %3398 = vmatprep.subr.bf16.mxu1 %v1384_v47  ;;  %v1447_v46 = vld [vmem:[#allocation4 + $0xcf0] sm:$0xff]  ;;  %v1462_v47 = vld [vmem:[#allocation4 + $0xd68] sm:$0xff] }
 0x794   :  { %3227 = vmatpush1.bf16.msra.mxu0 %v1381_v6  ;;  %3399 = vmatpush1.bf16.msra.mxu1 %v1383_v48  ;;  %v1464_v6 = vld [vmem:[#allocation4 + $0xd78] sm:$0xff]  ;;  %v1461_v48 = vld [vmem:[#allocation4 + $0xd60] sm:$0xff] }
 0x795   :  { %3228 = vmatprep.subr.bf16.mxu0 %v1398_v62  ;;  %3400 = vmatprep.subr.bf16.mxu1 %v1400_v10  ;;  %v1463_v62 = vld [vmem:[#allocation4 + $0xd70] sm:$0xff]  ;;  %v1478_v10 = vld [vmem:[#allocation4 + $0xde8] sm:$0xff] }
 0x798   :  { %3229 = vmatpush1.bf16.msra.mxu0 %v1397_v56  ;;  %3401 = vmatpush1.bf16.msra.mxu1 %v1399_v36  ;;  %v1480_v56 = vld [vmem:[#allocation4 + $0xdf8] sm:$0xff]  ;;  %v1477_v36 = vld [vmem:[#allocation4 + $0xde0] sm:$0xff] }
 0x799   :  { %3230 = vmatprep.subr.bf16.mxu0 %v1414_v30  ;;  %3402 = vmatprep.subr.bf16.mxu1 %v1416_v44  ;;  %v1479_v30 = vld [vmem:[#allocation4 + $0xdf0] sm:$0xff]  ;;  %v1494_v44 = vld [vmem:[#allocation4 + $0xe68] sm:$0xff] }
 0x79c   :  { %3231 = vmatpush1.bf16.msra.mxu0 %v1413_v15  ;;  %3403 = vmatpush1.bf16.msra.mxu1 %v1415_v27  ;;  %v1496_v15 = vld [vmem:[#allocation4 + $0xe78] sm:$0xff]  ;;  %v1493_v27 = vld [vmem:[#allocation4 + $0xe60] sm:$0xff] }
 0x79d   :  { %3232 = vmatprep.subr.bf16.mxu0 %v1430_v34  ;;  %3404 = vmatprep.subr.bf16.mxu1 %v1432_v29  ;;  %v1495_v34 = vld [vmem:[#allocation4 + $0xe70] sm:$0xff]  ;;  %v1510_v29 = vld [vmem:[#allocation4 + $0xee8] sm:$0xff] }
 0x7a0   :  { %3233 = vmatpush1.bf16.msra.mxu0 %v1429_v35  ;;  %3405 = vmatpush1.bf16.msra.mxu1 %v1431_v38  ;;  %v1512_v35 = vld [vmem:[#allocation4 + $0xef8] sm:$0xff]  ;;  %v1509_v38 = vld [vmem:[#allocation4 + $0xee0] sm:$0xff] }
 0x7a1   :  { %3234 = vmatprep.subr.bf16.mxu0 %v1446_v5  ;;  %3406 = vmatprep.subr.bf16.mxu1 %v1448_v20  ;;  %v1511_v5 = vld [vmem:[#allocation4 + $0xef0] sm:$0xff]  ;;  %v1526_v20 = vld [vmem:[#allocation4 + $0xf68] sm:$0xff] }
 0x7a4   :  { %3235 = vmatpush1.bf16.msra.mxu0 %v1445_v50  ;;  %3407 = vmatpush1.bf16.msra.mxu1 %v1447_v46  ;;  %v1528_v50 = vld [vmem:[#allocation4 + $0xf78] sm:$0xff]  ;;  %v1525_v46 = vld [vmem:[#allocation4 + $0xf60] sm:$0xff] }
 0x7a5   :  { %3236 = vmatprep.subr.bf16.mxu0 %v1462_v47  ;;  %3408 = vmatprep.subr.bf16.mxu1 %v1464_v6  ;;  %v1527_v47 = vld [vmem:[#allocation4 + $0xf70] sm:$0xff]  ;;  %v1542_v6 = vld [vmem:[#allocation4 + $0xfe8] sm:$0xff] }
 0x7a8   :  { %3237 = vmatpush1.bf16.msra.mxu0 %v1461_v48  ;;  %3409 = vmatpush1.bf16.msra.mxu1 %v1463_v62  ;;  %v1544_v48 = vld [vmem:[#allocation4 + $0xff8] sm:$0xff]  ;;  %v1541_v62 = vld [vmem:[#allocation4 + $0xfe0] sm:$0xff] }
 0x7a9   :  { %3238 = vmatprep.subr.bf16.mxu0 %v1478_v10  ;;  %3410 = vmatprep.subr.bf16.mxu1 %v1480_v56  ;;  %v1543_v10 = vld [vmem:[#allocation4 + $0xff0] sm:$0xff]  ;;  %v1558_v56 = vld [vmem:[#allocation4 + $0x1068] sm:$0xff] }
 0x7ac   :  { %3239 = vmatpush1.bf16.msra.mxu0 %v1477_v36  ;;  %3411 = vmatpush1.bf16.msra.mxu1 %v1479_v30  ;;  %v1560_v36 = vld [vmem:[#allocation4 + $0x1078] sm:$0xff]  ;;  %v1557_v30 = vld [vmem:[#allocation4 + $0x1060] sm:$0xff] }
 0x7ad   :  { %3240 = vmatprep.subr.bf16.mxu0 %v1494_v44  ;;  %3412 = vmatprep.subr.bf16.mxu1 %v1496_v15  ;;  %v1559_v44 = vld [vmem:[#allocation4 + $0x1070] sm:$0xff]  ;;  %v1574_v15 = vld [vmem:[#allocation4 + $0x10e8] sm:$0xff] }
 0x7b0   :  { %3241 = vmatpush1.bf16.msra.mxu0 %v1493_v27  ;;  %3413 = vmatpush1.bf16.msra.mxu1 %v1495_v34  ;;  %v1576_v27 = vld [vmem:[#allocation4 + $0x10f8] sm:$0xff]  ;;  %v1573_v34 = vld [vmem:[#allocation4 + $0x10e0] sm:$0xff] }
 0x7b1   :  { %3242 = vmatprep.subr.bf16.mxu0 %v1510_v29  ;;  %3414 = vmatprep.subr.bf16.mxu1 %v1512_v35  ;;  %v1575_v29 = vld [vmem:[#allocation4 + $0x10f0] sm:$0xff]  ;;  %v1590_v35 = vld [vmem:[#allocation4 + $0x1168] sm:$0xff] }
 0x7b4   :  { %3243 = vmatpush1.bf16.msra.mxu0 %v1509_v38  ;;  %3415 = vmatpush1.bf16.msra.mxu1 %v1511_v5  ;;  %v1592_v38 = vld [vmem:[#allocation4 + $0x1178] sm:$0xff]  ;;  %v1589_v5 = vld [vmem:[#allocation4 + $0x1160] sm:$0xff] }
 0x7b5   :  { %3244 = vmatprep.subr.bf16.mxu0 %v1526_v20  ;;  %3416 = vmatprep.subr.bf16.mxu1 %v1528_v50  ;;  %v1591_v20 = vld [vmem:[#allocation4 + $0x1170] sm:$0xff]  ;;  %v1606_v50 = vld [vmem:[#allocation4 + $0x11e8] sm:$0xff] }
 0x7b8   :  { %3245 = vmatpush1.bf16.msra.mxu0 %v1525_v46  ;;  %3417 = vmatpush1.bf16.msra.mxu1 %v1527_v47  ;;  %v1605_v46 = vld [vmem:[#allocation4 + $0x11e0] sm:$0xff]  ;;  %v1607_v47 = vld [vmem:[#allocation4 + $0x11f0] sm:$0xff] }
 0x7b9   :  { %3246 = vmatprep.subr.bf16.mxu0 %v1542_v6  ;;  %3418 = vmatprep.subr.bf16.mxu1 %v1544_v48  ;;  %v1622_v6 = vld [vmem:[#allocation4 + $0x1268] sm:$0xff]  ;;  %v1624_v48 = vld [vmem:[#allocation4 + $0x1278] sm:$0xff] }
 0x7bc   :  { %3247 = vmatpush1.bf16.msra.mxu0 %v1541_v62  ;;  %3419 = vmatpush1.bf16.msra.mxu1 %v1543_v10  ;;  %v1623_v62 = vld [vmem:[#allocation4 + $0x1270] sm:$0xff]  ;;  %v1638_v10 = vld [vmem:[#allocation4 + $0x12e8] sm:$0xff] }
 0x7bd   :  { %3259 = vmatprep.subr.bf16.mxu0 %v1558_v56  ;;  %3431 = vmatprep.subr.bf16.mxu1 %v1560_v36  ;;  %v1640_v56 = vld [vmem:[#allocation4 + $0x12f8] sm:$0xff]  ;;  %v1637_v36 = vld [vmem:[#allocation4 + $0x12e0] sm:$0xff] }
 0x7bf   :  { %3249 = vmatmul.mubr.bf16.vlgmr.msra.gmra.mrb[16].mxu0 %v6237_v7  ;;  %3421 = vmatmul.mubr.bf16.vlgmr.msra.gmra.mrb[32].mxu1 %v6237_v7  ;;  %v1608_v7 = vld [vmem:[#allocation4 + $0x11f8] sm:$0xff] }
 0x7c0   :  { %3260 = vmatpush1.bf16.msra.mxu0 %v1557_v30  ;;  %3432 = vmatpush1.bf16.msra.mxu1 %v1559_v44  ;;  %v1639_v30 = vld [vmem:[#allocation4 + $0x12f0] sm:$0xff]  ;;  %v1654_v44 = vld [vmem:[#allocation4 + $0x1368] sm:$0xff] }
 0x7c1   :  { %3261 = vmatprep.subr.bf16.mxu0 %v1574_v15  ;;  %3433 = vmatprep.subr.bf16.mxu1 %v1576_v27  ;;  %v1656_v15 = vld [vmem:[#allocation4 + $0x1378] sm:$0xff]  ;;  %v1653_v27 = vld [vmem:[#allocation4 + $0x1360] sm:$0xff] }
 0x7c2   :  { %3291 = vmatprep.mubr.bf16.mxu0 %v6243_v19  ;;  %3463 = vmatprep.mubr.bf16.mxu1 %v6243_v19  ;;  %v1621_v19 = vld [vmem:[#allocation4 + $0x1260] sm:$0xff] }
 0x7c4   :  { %3262 = vmatpush1.bf16.msra.mxu0 %v1573_v34  ;;  %3434 = vmatpush1.bf16.msra.mxu1 %v1575_v29  ;;  %v1655_v34 = vld [vmem:[#allocation4 + $0x1370] sm:$0xff]  ;;  %v1670_v29 = vld [vmem:[#allocation4 + $0x13e8] sm:$0xff] }
 0x7c5   :  { %3263 = vmatprep.subr.bf16.mxu0 %v1590_v35  ;;  %3435 = vmatprep.subr.bf16.mxu1 %v1592_v38  ;;  %v1672_v35 = vld [vmem:[#allocation4 + $0x13f8] sm:$0xff]  ;;  %v1669_v38 = vld [vmem:[#allocation4 + $0x13e0] sm:$0xff] }
 0x7c8   :  { %3264 = vmatpush1.bf16.msra.mxu0 %v1589_v5  ;;  %3436 = vmatpush1.bf16.msra.mxu1 %v1591_v20  ;;  %v1671_v5 = vld [vmem:[#allocation4 + $0x13f0] sm:$0xff]  ;;  %v1686_v20 = vld [vmem:[#allocation4 + $0x1468] sm:$0xff] }
 0x7c9   :  { %3265 = vmatprep.subr.bf16.mxu0 %v1606_v50  ;;  %3437 = vmatprep.subr.bf16.mxu1 %v1608_v7  ;;  %v1688_v50 = vld [vmem:[#allocation4 + $0x1478] sm:$0xff]  ;;  %v1685_v7 = vld [vmem:[#allocation4 + $0x1460] sm:$0xff] }
 0x7cc   :  { %3266 = vmatpush1.bf16.msra.mxu0 %v1605_v46  ;;  %3438 = vmatpush1.bf16.msra.mxu1 %v1607_v47  ;;  %v1687_v46 = vld [vmem:[#allocation4 + $0x1470] sm:$0xff]  ;;  %v1702_v47 = vld [vmem:[#allocation4 + $0x14e8] sm:$0xff] }
 0x7cd   :  { %3267 = vmatprep.subr.bf16.mxu0 %v1622_v6  ;;  %3439 = vmatprep.subr.bf16.mxu1 %v1624_v48  ;;  %v1704_v6 = vld [vmem:[#allocation4 + $0x14f8] sm:$0xff]  ;;  %v1701_v48 = vld [vmem:[#allocation4 + $0x14e0] sm:$0xff] }
 0x7d0   :  { %3268 = vmatpush1.bf16.msra.mxu0 %v1621_v19  ;;  %3440 = vmatpush1.bf16.msra.mxu1 %v1623_v62  ;;  %v1703_v19 = vld [vmem:[#allocation4 + $0x14f0] sm:$0xff]  ;;  %v1718_v62 = vld [vmem:[#allocation4 + $0x1568] sm:$0xff] }
 0x7d1   :  { %3269 = vmatprep.subr.bf16.mxu0 %v1638_v10  ;;  %3441 = vmatprep.subr.bf16.mxu1 %v1640_v56  ;;  %v1720_v10 = vld [vmem:[#allocation4 + $0x1578] sm:$0xff]  ;;  %v1717_v56 = vld [vmem:[#allocation4 + $0x1560] sm:$0xff] }
 0x7d4   :  { %3270 = vmatpush1.bf16.msra.mxu0 %v1637_v36  ;;  %3442 = vmatpush1.bf16.msra.mxu1 %v1639_v30  ;;  %v1719_v36 = vld [vmem:[#allocation4 + $0x1570] sm:$0xff]  ;;  %v1734_v30 = vld [vmem:[#allocation4 + $0x15e8] sm:$0xff] }
 0x7d5   :  { %3271 = vmatprep.subr.bf16.mxu0 %v1654_v44  ;;  %3443 = vmatprep.subr.bf16.mxu1 %v1656_v15  ;;  %v1736_v44 = vld [vmem:[#allocation4 + $0x15f8] sm:$0xff]  ;;  %v1733_v15 = vld [vmem:[#allocation4 + $0x15e0] sm:$0xff] }
 0x7d8   :  { %3272 = vmatpush1.bf16.msra.mxu0 %v1653_v27  ;;  %3444 = vmatpush1.bf16.msra.mxu1 %v1655_v34  ;;  %v1735_v27 = vld [vmem:[#allocation4 + $0x15f0] sm:$0xff]  ;;  %v1750_v34 = vld [vmem:[#allocation4 + $0x1668] sm:$0xff] }
 0x7d9   :  { %3273 = vmatprep.subr.bf16.mxu0 %v1670_v29  ;;  %3445 = vmatprep.subr.bf16.mxu1 %v1672_v35  ;;  %v1752_v29 = vld [vmem:[#allocation4 + $0x1678] sm:$0xff]  ;;  %v1749_v35 = vld [vmem:[#allocation4 + $0x1660] sm:$0xff] }
 0x7dc   :  { %3274 = vmatpush1.bf16.msra.mxu0 %v1669_v38  ;;  %3446 = vmatpush1.bf16.msra.mxu1 %v1671_v5  ;;  %v1751_v38 = vld [vmem:[#allocation4 + $0x1670] sm:$0xff]  ;;  %v1766_v5 = vld [vmem:[#allocation4 + $0x16e8] sm:$0xff] }
 0x7dd   :  { %3275 = vmatprep.subr.bf16.mxu0 %v1686_v20  ;;  %3447 = vmatprep.subr.bf16.mxu1 %v1688_v50  ;;  %v1768_v20 = vld [vmem:[#allocation4 + $0x16f8] sm:$0xff]  ;;  %v1765_v50 = vld [vmem:[#allocation4 + $0x16e0] sm:$0xff] }
 0x7e0   :  { %3276 = vmatpush1.bf16.msra.mxu0 %v1685_v7  ;;  %3448 = vmatpush1.bf16.msra.mxu1 %v1687_v46  ;;  %v1767_v7 = vld [vmem:[#allocation4 + $0x16f0] sm:$0xff]  ;;  %v1782_v46 = vld [vmem:[#allocation4 + $0x1768] sm:$0xff] }
 0x7e1   :  { %3277 = vmatprep.subr.bf16.mxu0 %v1702_v47  ;;  %3449 = vmatprep.subr.bf16.mxu1 %v1704_v6  ;;  %v1784_v47 = vld [vmem:[#allocation4 + $0x1778] sm:$0xff]  ;;  %v1781_v6 = vld [vmem:[#allocation4 + $0x1760] sm:$0xff] }
 0x7e4   :  { %3278 = vmatpush1.bf16.msra.mxu0 %v1701_v48  ;;  %3450 = vmatpush1.bf16.msra.mxu1 %v1703_v19  ;;  %v1783_v48 = vld [vmem:[#allocation4 + $0x1770] sm:$0xff]  ;;  %v1798_v19 = vld [vmem:[#allocation4 + $0x17e8] sm:$0xff] }
 0x7e5   :  { %3279 = vmatprep.subr.bf16.mxu0 %v1718_v62  ;;  %3451 = vmatprep.subr.bf16.mxu1 %v1720_v10  ;;  %v1800_v62 = vld [vmem:[#allocation4 + $0x17f8] sm:$0xff]  ;;  %v1797_v10 = vld [vmem:[#allocation4 + $0x17e0] sm:$0xff] }
 0x7e8   :  { %3280 = vmatpush1.bf16.msra.mxu0 %v1717_v56  ;;  %3452 = vmatpush1.bf16.msra.mxu1 %v1719_v36  ;;  %v1799_v56 = vld [vmem:[#allocation4 + $0x17f0] sm:$0xff]  ;;  %v1814_v36 = vld [vmem:[#allocation4 + $0x1868] sm:$0xff] }
 0x7e9   :  { %3281 = vmatprep.subr.bf16.mxu0 %v1734_v30  ;;  %3453 = vmatprep.subr.bf16.mxu1 %v1736_v44  ;;  %v1816_v30 = vld [vmem:[#allocation4 + $0x1878] sm:$0xff]  ;;  %v1813_v44 = vld [vmem:[#allocation4 + $0x1860] sm:$0xff] }
 0x7ec   :  { %3282 = vmatpush1.bf16.msra.mxu0 %v1733_v15  ;;  %3454 = vmatpush1.bf16.msra.mxu1 %v1735_v27  ;;  %v1815_v15 = vld [vmem:[#allocation4 + $0x1870] sm:$0xff]  ;;  %v1830_v27 = vld [vmem:[#allocation4 + $0x18e8] sm:$0xff] }
 0x7ed   :  { %3283 = vmatprep.subr.bf16.mxu0 %v1750_v34  ;;  %3455 = vmatprep.subr.bf16.mxu1 %v1752_v29  ;;  %v1832_v34 = vld [vmem:[#allocation4 + $0x18f8] sm:$0xff]  ;;  %v1829_v29 = vld [vmem:[#allocation4 + $0x18e0] sm:$0xff] }
 0x7f0   :  { %3284 = vmatpush1.bf16.msra.mxu0 %v1749_v35  ;;  %3456 = vmatpush1.bf16.msra.mxu1 %v1751_v38  ;;  %v1831_v35 = vld [vmem:[#allocation4 + $0x18f0] sm:$0xff]  ;;  %v1846_v38 = vld [vmem:[#allocation4 + $0x1968] sm:$0xff] }
 0x7f1   :  { %3285 = vmatprep.subr.bf16.mxu0 %v1766_v5  ;;  %3457 = vmatprep.subr.bf16.mxu1 %v1768_v20  ;;  %v1848_v5 = vld [vmem:[#allocation4 + $0x1978] sm:$0xff]  ;;  %v1845_v20 = vld [vmem:[#allocation4 + $0x1960] sm:$0xff] }
 0x7f4   :  { %3286 = vmatpush1.bf16.msra.mxu0 %v1765_v50  ;;  %3458 = vmatpush1.bf16.msra.mxu1 %v1767_v7  ;;  %v1847_v50 = vld [vmem:[#allocation4 + $0x1970] sm:$0xff]  ;;  %v1862_v7 = vld [vmem:[#allocation4 + $0x19e8] sm:$0xff] }
 0x7f5   :  { %3287 = vmatprep.subr.bf16.mxu0 %v1782_v46  ;;  %3459 = vmatprep.subr.bf16.mxu1 %v1784_v47  ;;  %v1861_v46 = vld [vmem:[#allocation4 + $0x19e0] sm:$0xff]  ;;  %v1863_v47 = vld [vmem:[#allocation4 + $0x19f0] sm:$0xff] }
 0x7f8   :  { %3288 = vmatpush1.bf16.msra.mxu0 %v1781_v6  ;;  %3460 = vmatpush1.bf16.msra.mxu1 %v1783_v48  ;;  %v1878_v6 = vld [vmem:[#allocation4 + $0x1a68] sm:$0xff]  ;;  %v1880_v48 = vld [vmem:[#allocation4 + $0x1a78] sm:$0xff] }
 0x7f9   :  { %3289 = vmatprep.subr.bf16.mxu0 %v1798_v19  ;;  %3461 = vmatprep.subr.bf16.mxu1 %v1800_v62  ;;  %v6375_v19 = vld [vmem:[#allocation11 + $0x8] sm:$0xff] }
 0x7fa   :  { %v1879_v62 = vld [vmem:[#allocation4 + $0x1a70] sm:$0xff] }
 0x7fc   :  { %3290 = vmatpush1.bf16.msra.mxu0 %v1797_v10  ;;  %3462 = vmatpush1.bf16.msra.mxu1 %v1799_v56  ;;  %v1894_v10 = vld [vmem:[#allocation4 + $0x1ae8] sm:$0xff]  ;;  %v1896_v56 = vld [vmem:[#allocation4 + $0x1af8] sm:$0xff] }
 0x7fd   :  { %3302 = vmatprep.subr.bf16.mxu0 %v1814_v36  ;;  %3474 = vmatprep.subr.bf16.mxu1 %v1816_v30  ;;  %v2096_v36 = vrot.slane %v6375_v19, %v6062_v22  ;;  %v2104_v30 = vrot.slane %v6375_v19, %v6065_v23 }
 0x7ff   :  { %3292 = vmatmul.mubr.bf16.vlgmr.msra.gmra.mrb[16].mxu0 %v6253_v43  ;;  %3464 = vmatmul.mubr.bf16.vlgmr.msra.gmra.mrb[32].mxu1 %v6253_v43  ;;  %v1864_v43 = vld [vmem:[#allocation4 + $0x19f8] sm:$0xff] }
 0x800   :  { %3303 = vmatpush1.bf16.msra.mxu0 %v1813_v44  ;;  %3475 = vmatpush1.bf16.msra.mxu1 %v1815_v15  ;;  %v2100_v44 = vrot.slane %v6375_v19, %v6068_v25  ;;  %v2108_v15 = vrot.slane %v6375_v19, %v6071_v26 }
 0x801   :  { %3304 = vmatprep.subr.bf16.mxu0 %v1830_v27  ;;  %3476 = vmatprep.subr.bf16.mxu1 %v1832_v34  ;;  %v1893_v27 = vld [vmem:[#allocation4 + $0x1ae0] sm:$0xff]  ;;  %v1895_v34 = vld [vmem:[#allocation4 + $0x1af0] sm:$0xff] }
 0x802   :  { %3334 = vmatprep.mubr.bf16.mxu0 %v6259_v1  ;;  %3506 = vmatprep.mubr.bf16.mxu1 %v6259_v1  ;;  %v1877_v1 = vld [vmem:[#allocation4 + $0x1a60] sm:$0xff] }
 0x804   :  { %3305 = vmatpush1.bf16.msra.mxu0 %v1829_v29  ;;  %3477 = vmatpush1.bf16.msra.mxu1 %v1831_v35 }
 0x805   :  { %3306 = vmatprep.subr.bf16.mxu0 %v1846_v38  ;;  %3478 = vmatprep.subr.bf16.mxu1 %v1848_v5  ;;  %v1910_v38 = vld [vmem:[#allocation4 + $0x1b68] sm:$0xff]  ;;  %v1912_v5 = vld [vmem:[#allocation4 + $0x1b78] sm:$0xff] }
 0x808   :  { %3307 = vmatpush1.bf16.msra.mxu0 %v1845_v20  ;;  %3479 = vmatpush1.bf16.msra.mxu1 %v1847_v50 }
 0x809   :  { %3308 = vmatprep.subr.bf16.mxu0 %v1862_v7  ;;  %3480 = vmatprep.subr.bf16.mxu1 %v1864_v43 }
 0x80c   :  { %3309 = vmatpush1.bf16.msra.mxu0 %v1861_v46  ;;  %3481 = vmatpush1.bf16.msra.mxu1 %v1863_v47 }
 0x80d   :  { %3310 = vmatprep.subr.bf16.mxu0 %v1878_v6  ;;  %3482 = vmatprep.subr.bf16.mxu1 %v1880_v48 }
 0x810   :  { %3311 = vmatpush1.bf16.msra.mxu0 %v1877_v1  ;;  %3483 = vmatpush1.bf16.msra.mxu1 %v1879_v62  ;;  %v1926_v1 = vld [vmem:[#allocation4 + $0x1be8] sm:$0xff]  ;;  %v1928_v62 = vld [vmem:[#allocation4 + $0x1bf8] sm:$0xff] }
 0x811   :  { %3312 = vmatprep.subr.bf16.mxu0 %v1894_v10  ;;  %3484 = vmatprep.subr.bf16.mxu1 %v1896_v56 }
 0x812   :  { %v2992_v29 = vpop.f32.mrb[12].mxu0  ;;  %v3164_v35 = vpop.f32.mrb[28].mxu1 }
 0x813   :  { %v6385_v20 = vadd.f32 %v2992_v29, %v2096_v36  ;;  %v6387_v50 = vadd.f32 %v3164_v35, %v2104_v30  ;;  %v2994_v7 = vpop.f32.mrb[13].mxu0  ;;  %v3166_v43 = vpop.f32.mrb[29].mxu1 }
 0x814   :  { %v6389_v46 = vadd.f32 %v2994_v7, %v2100_v44  ;;  %v6391_v47 = vadd.f32 %v3166_v43, %v2108_v15  ;;  %v2996_v6 = vpop.f32.mrb[14].mxu0  ;;  %v3168_v48 = vpop.f32.mrb[30].mxu1  ;;  %3313 = vmatpush1.bf16.msra.mxu0 %v1893_v27  ;;  %3485 = vmatpush1.bf16.msra.mxu1 %v1895_v34  ;;  %v1909_v7 = vld [vmem:[#allocation4 + $0x1b60] sm:$0xff] }
 0x815   :  { %v6395_v10 = vadd.f32 %v2996_v6, %v2096_v36  ;;  %v6397_v56 = vadd.f32 %v3168_v48, %v2104_v30  ;;  %v2998_v29 = vpop.f32.mrb[15].mxu0  ;;  %v3170_v35 = vpop.f32.mrb[31].mxu1  ;;  %3314 = vmatprep.subr.bf16.mxu0 %v1910_v38  ;;  %3486 = vmatprep.subr.bf16.mxu1 %v1912_v5  ;;  %v1925_v5 = vld [vmem:[#allocation4 + $0x1be0] sm:$0xff]  ;;  %v1927_v48 = vld [vmem:[#allocation4 + $0x1bf0] sm:$0xff]  ;;  %v1960_v30 = vld [vmem:[#allocation4 + $0x1cf8] sm:$0xff] }
 0x816   :  { %v6401_v27 = vadd.f32 %v2998_v29, %v2100_v44  ;;  %v6403_v34 = vadd.f32 %v3170_v35, %v2108_v15  ;;  %v1942_v44 = vld [vmem:[#allocation4 + $0x1c68] sm:$0xff]  ;;  %v1944_v29 = vld [vmem:[#allocation4 + $0x1c78] sm:$0xff]  ;;  %v1941_v15 = vld [vmem:[#allocation4 + $0x1c60] sm:$0xff] }
 0x817   :  { %v1943_v35 = vld [vmem:[#allocation4 + $0x1c70] sm:$0xff] }
 0x818   :  { %3315 = vmatpush1.bf16.msra.mxu0 %v1909_v7  ;;  %3487 = vmatpush1.bf16.msra.mxu1 %v1911_v4  ;;  %v1957_v7 = vld [vmem:[#allocation4 + $0x1ce0] sm:$0xff]  ;;  %v1959_v4 = vld [vmem:[#allocation4 + $0x1cf0] sm:$0xff] }
 0x819   :  { %3316 = vmatprep.subr.bf16.mxu0 %v1926_v1  ;;  %3488 = vmatprep.subr.bf16.mxu1 %v1928_v62  ;;  %v1974_v1 = vld [vmem:[#allocation4 + $0x1d68] sm:$0xff]  ;;  %v1976_v62 = vld [vmem:[#allocation4 + $0x1d78] sm:$0xff] }
 0x81c   :  { %3317 = vmatpush1.bf16.msra.mxu0 %v1925_v5  ;;  %3489 = vmatpush1.bf16.msra.mxu1 %v1927_v48  ;;  %v1973_v5 = vld [vmem:[#allocation4 + $0x1d60] sm:$0xff]  ;;  %v1975_v48 = vld [vmem:[#allocation4 + $0x1d70] sm:$0xff] }
 0x81d   :  { %3318 = vmatprep.subr.bf16.mxu0 %v1942_v44  ;;  %3490 = vmatprep.subr.bf16.mxu1 %v1944_v29  ;;  %v1990_v44 = vld [vmem:[#allocation4 + $0x1de8] sm:$0xff]  ;;  %v1992_v29 = vld [vmem:[#allocation4 + $0x1df8] sm:$0xff] }
 0x820   :  { %3319 = vmatpush1.bf16.msra.mxu0 %v1941_v15  ;;  %3491 = vmatpush1.bf16.msra.mxu1 %v1943_v35  ;;  %v1989_v15 = vld [vmem:[#allocation4 + $0x1de0] sm:$0xff]  ;;  %v1991_v35 = vld [vmem:[#allocation4 + $0x1df0] sm:$0xff] }
 0x821   :  { %3320 = vmatprep.subr.bf16.mxu0 %v1958_v51  ;;  %3492 = vmatprep.subr.bf16.mxu1 %v1960_v30  ;;  %v2006_v51 = vld [vmem:[#allocation4 + $0x1e68] sm:$0xff]  ;;  %v2008_v30 = vld [vmem:[#allocation4 + $0x1e78] sm:$0xff] }
 0x824   :  { %3321 = vmatpush1.bf16.msra.mxu0 %v1957_v7  ;;  %3493 = vmatpush1.bf16.msra.mxu1 %v1959_v4  ;;  %v2005_v7 = vld [vmem:[#allocation4 + $0x1e60] sm:$0xff]  ;;  %v2007_v4 = vld [vmem:[#allocation4 + $0x1e70] sm:$0xff] }
 0x825   :  { %3322 = vmatprep.subr.bf16.mxu0 %v1974_v1  ;;  %3494 = vmatprep.subr.bf16.mxu1 %v1976_v62  ;;  %v2022_v1 = vld [vmem:[#allocation4 + $0x1ee8] sm:$0xff]  ;;  %v2024_v62 = vld [vmem:[#allocation4 + $0x1ef8] sm:$0xff] }
 0x828   :  { %3323 = vmatpush1.bf16.msra.mxu0 %v1973_v5  ;;  %3495 = vmatpush1.bf16.msra.mxu1 %v1975_v48  ;;  %v2021_v5 = vld [vmem:[#allocation4 + $0x1ee0] sm:$0xff]  ;;  %v2023_v48 = vld [vmem:[#allocation4 + $0x1ef0] sm:$0xff] }
 0x829   :  { %3324 = vmatprep.subr.bf16.mxu0 %v1990_v44  ;;  %3496 = vmatprep.subr.bf16.mxu1 %v1992_v29  ;;  %v2038_v44 = vld [vmem:[#allocation4 + $0x1f68] sm:$0xff]  ;;  %v2040_v29 = vld [vmem:[#allocation4 + $0x1f78] sm:$0xff] }
 0x82c   :  { %3325 = vmatpush1.bf16.msra.mxu0 %v1989_v15  ;;  %3497 = vmatpush1.bf16.msra.mxu1 %v1991_v35  ;;  %v2037_v15 = vld [vmem:[#allocation4 + $0x1f60] sm:$0xff]  ;;  %v2039_v35 = vld [vmem:[#allocation4 + $0x1f70] sm:$0xff] }
 0x82d   :  { %3326 = vmatprep.subr.bf16.mxu0 %v2006_v51  ;;  %3498 = vmatprep.subr.bf16.mxu1 %v2008_v30  ;;  %v2054_v51 = vld [vmem:[#allocation4 + $0x1fe8] sm:$0xff]  ;;  %v2056_v30 = vld [vmem:[#allocation4 + $0x1ff8] sm:$0xff] }
 0x830   :  { %3327 = vmatpush1.bf16.msra.mxu0 %v2005_v7  ;;  %3499 = vmatpush1.bf16.msra.mxu1 %v2007_v4  ;;  %v2053_v7 = vld [vmem:[#allocation4 + $0x1fe0] sm:$0xff]  ;;  %v2055_v4 = vld [vmem:[#allocation4 + $0x1ff0] sm:$0xff] }
 0x831   :  { %3328 = vmatprep.subr.bf16.mxu0 %v2022_v1  ;;  %3500 = vmatprep.subr.bf16.mxu1 %v2024_v62  ;;  %v2112_v1 = vrot.slane %v6375_v19, %v6166_v14  ;;  %v2120_v62 = vrot.slane %v6375_v19, %v6188_v31 }
 0x834   :  { %3329 = vmatpush1.bf16.msra.mxu0 %v2021_v5  ;;  %3501 = vmatpush1.bf16.msra.mxu1 %v2023_v48  ;;  %v2116_v5 = vrot.slane %v6375_v19, %v6169_v17  ;;  %v2124_v48 = vrot.slane %v6375_v19, %v6191_v39 }
 0x835   :  { %3330 = vmatprep.subr.bf16.mxu0 %v2038_v44  ;;  %3502 = vmatprep.subr.bf16.mxu1 %v2040_v29 }
 0x838   :  { %3331 = vmatpush1.bf16.msra.mxu0 %v2037_v15  ;;  %3503 = vmatpush1.bf16.msra.mxu1 %v2039_v35 }
 0x839   :  { %3332 = vmatprep.subr.bf16.mxu0 %v2054_v51  ;;  %3504 = vmatprep.subr.bf16.mxu1 %v2056_v30 }
 0x83c   :  { %3333 = vmatpush1.bf16.msra.mxu0 %v2053_v7  ;;  %3505 = vmatpush1.bf16.msra.mxu1 %v2055_v4 }
 0x83f   :  { %3335 = vmatmul.mubr.bf16.vlgmr.msra.gmra.mrb[16].mxu0 %v6269_v16  ;;  %3507 = vmatmul.mubr.bf16.vlgmr.msra.gmra.mrb[32].mxu1 %v6269_v16 }
 0x912   :  { %v3336_v44 = vpop.f32.mrb[16].mxu0  ;;  %v3508_v29 = vpop.f32.mrb[32].mxu1 }
 0x913   :  { %v6419_v15 = vadd.f32 %v3336_v44, %v2112_v1  ;;  %v6421_v35 = vadd.f32 %v3508_v29, %v2120_v62  ;;  %v3338_v51 = vpop.f32.mrb[17].mxu0  ;;  %v3510_v16 = vpop.f32.mrb[33].mxu1 }
 0x914   :  { %v6423_v30 = vadd.f32 %v3338_v51, %v2116_v5  ;;  %v6425_v7 = vadd.f32 %v3510_v16, %v2124_v48  ;;  %v3340_v4 = vpop.f32.mrb[18].mxu0  ;;  %v3512_v31 = vpop.f32.mrb[34].mxu1 }
 0x915   :  { %v6429_v6 = vadd.f32 %v3340_v4, %v2112_v1  ;;  %v6431_v39 = vadd.f32 %v3512_v31, %v2120_v62  ;;  %v3342_v19 = vpop.f32.mrb[19].mxu0  ;;  %v3514_v44 = vpop.f32.mrb[35].mxu1 }
 0x916   :  { %v3530_v29 = vmax.f32 %v6423_v30, 0.0  ;;  %v6435_v51 = vadd.f32 %v3342_v19, %v2116_v5  ;;  %v6437_v16 = vadd.f32 %v3514_v44, %v2124_v48 }
 0x917   :  { %v3545_v18 = vmax.f32 %v6429_v6, 0.0 }
 0x918   :  { %v3546_v36 = vmax.f32 %v6435_v51, 0.0 }
 0x919   :  { %5884 = dma.done.wait [#allocation6 + $0x3], 98304 }
 0x91a   :  { %5885 = vsyncadd [#allocation6 + $0x3], 4294868992  ;;  %v6447_v62 = vpack.c.bf16 %v3534_v61, %v3518_v12  ;;  %v3570_v5 = vld [vmem:[#allocation5 + $0x8] sm:$0xff]  ;;  %v3569_v48 = vld [vmem:[#allocation5] sm:$0xff] }
 0x91b   :  { %v3576_v4 = vld [vmem:[#allocation5 + $0x38] sm:$0xff]  ;;  %4369 = vmatprep.subr.bf16.mxu0 %v3570_v5  ;;  %v3575_v31 = vld [vmem:[#allocation5 + $0x30] sm:$0xff]  ;;  %v3582_v19 = vld [vmem:[#allocation5 + $0x68] sm:$0xff] }
 0x91c   :  { %4401 = vmatprep.mubr.bf16.mxu0 %v6447_v62  ;;  %4745 = vmatprep.mubr.bf16.mxu1 %v6447_v62  ;;  %v3581_v44 = vld [vmem:[#allocation5 + $0x60] sm:$0xff]  ;;  %v3588_v32 = vld [vmem:[#allocation5 + $0x98] sm:$0xff]  ;;  %v3587_v12 = vld [vmem:[#allocation5 + $0x90] sm:$0xff] }
 0x91d   :  { %4370 = vmatpush1.bf16.msra.mxu0 %v3569_v48  ;;  %v3572_v52 = vld [vmem:[#allocation5 + $0x18] sm:$0xff]  ;;  %v3571_v61 = vld [vmem:[#allocation5 + $0x10] sm:$0xff]  ;;  %v3594_v38 = vld [vmem:[#allocation5 + $0xc8] sm:$0xff] }
 0x91e   :  { %4371 = vmatprep.subr.bf16.mxu0 %v3576_v4  ;;  %4713 = vmatprep.subr.bf16.mxu1 %v3572_v52  ;;  %v3578_v1 = vld [vmem:[#allocation5 + $0x48] sm:$0xff]  ;;  %v3577_v43 = vld [vmem:[#allocation5 + $0x40] sm:$0xff]  ;;  %v3584_v5 = vld [vmem:[#allocation5 + $0x78] sm:$0xff] }
 0x91f   :  { %4714 = vmatpush1.bf16.msra.mxu1 %v3571_v61  ;;  %v3593_v48 = vld [vmem:[#allocation5 + $0xc0] sm:$0xff]  ;;  %v3600_v4 = vld [vmem:[#allocation5 + $0xf8] sm:$0xff]  ;;  %v3655_v59 = vld [vmem:[#allocation5 + $0x2b0] sm:$0xff] }
 0x920   :  { %4715 = vmatprep.subr.bf16.mxu1 %v3578_v1  ;;  %v3589_v52 = vld [vmem:[#allocation5 + $0xa0] sm:$0xff]  ;;  %v3596_v61 = vld [vmem:[#allocation5 + $0xd8] sm:$0xff]  ;;  %v3671_v2 = vld [vmem:[#allocation5 + $0x330] sm:$0xff] }
 0x921   :  { %4372 = vmatpush1.bf16.msra.mxu0 %v3575_v31  ;;  %v3583_v31 = vld [vmem:[#allocation5 + $0x70] sm:$0xff]  ;;  %v3605_v1 = vld [vmem:[#allocation5 + $0x120] sm:$0xff]  ;;  %v4164_v51 = vld [vmem:[#allocation5 + $0x1298] sm:$0xff] }
 0x922   :  { %4373 = vmatprep.subr.bf16.mxu0 %v3582_v19  ;;  %v3590_v19 = vld [vmem:[#allocation5 + $0xa8] sm:$0xff]  ;;  %v3661_v37 = vld [vmem:[#allocation5 + $0x2e0] sm:$0xff]  ;;  %v3751_v0 = vld [vmem:[#allocation5 + $0x5b0] sm:$0xff] }
 0x923   :  { %4716 = vmatpush1.bf16.msra.mxu1 %v3577_v43  ;;  %v3602_v43 = vld [vmem:[#allocation5 + $0x108] sm:$0xff]  ;;  %v3677_v11 = vld [vmem:[#allocation5 + $0x360] sm:$0xff]  ;;  %v3767_v3 = vld [vmem:[#allocation5 + $0x630] sm:$0xff] }
 0x924   :  { %4717 = vmatprep.subr.bf16.mxu1 %v3584_v5  ;;  %v3611_v5 = vld [vmem:[#allocation5 + $0x150] sm:$0xff]  ;;  %v3757_v8 = vld [vmem:[#allocation5 + $0x5e0] sm:$0xff] }
 0x925   :  { %4374 = vmatpush1.bf16.msra.mxu0 %v3581_v44  ;;  %v3599_v44 = vld [vmem:[#allocation5 + $0xf0] sm:$0xff]  ;;  %v3773_v54 = vld [vmem:[#allocation5 + $0x660] sm:$0xff] }
 0x926   :  { %4375 = vmatprep.subr.bf16.mxu0 %v3588_v32  ;;  %v3606_v32 = vld [vmem:[#allocation5 + $0x128] sm:$0xff]  ;;  %v3847_v28 = vld [vmem:[#allocation5 + $0x8b0] sm:$0xff]  ;;  %v3853_v42 = vld [vmem:[#allocation5 + $0x8e0] sm:$0xff] }
 0x927   :  { %4718 = vmatpush1.bf16.msra.mxu1 %v3583_v31  ;;  %v3608_v31 = vld [vmem:[#allocation5 + $0x138] sm:$0xff]  ;;  %v3863_v53 = vld [vmem:[#allocation5 + $0x930] sm:$0xff]  ;;  %v4141_v30 = vld [vmem:[#allocation5 + $0x11e0] sm:$0xff] }
 0x928   :  { %4719 = vmatprep.subr.bf16.mxu1 %v3590_v19  ;;  %v3617_v19 = vld [vmem:[#allocation5 + $0x180] sm:$0xff]  ;;  %v4231_v6 = vld [vmem:[#allocation5 + $0x14b0] sm:$0xff] }
 0x929   :  { %4376 = vmatpush1.bf16.msra.mxu0 %v3587_v12  ;;  %v3612_v12 = vld [vmem:[#allocation5 + $0x158] sm:$0xff] }
 0x92a   :  { %4377 = vmatprep.subr.bf16.mxu0 %v3594_v38  ;;  %v3595_v38 = vld [vmem:[#allocation5 + $0xd0] sm:$0xff] }
 0x92b   :  { %4720 = vmatpush1.bf16.msra.mxu1 %v3589_v52  ;;  %v3614_v52 = vld [vmem:[#allocation5 + $0x168] sm:$0xff] }
 0x92c   :  { %4721 = vmatprep.subr.bf16.mxu1 %v3596_v61  ;;  %v3623_v61 = vld [vmem:[#allocation5 + $0x1b0] sm:$0xff] }
 0x92d   :  { %4378 = vmatpush1.bf16.msra.mxu0 %v3593_v48  ;;  %v3618_v48 = vld [vmem:[#allocation5 + $0x188] sm:$0xff] }
 0x92e   :  { %4379 = vmatprep.subr.bf16.mxu0 %v3600_v4  ;;  %v3601_v4 = vld [vmem:[#allocation5 + $0x100] sm:$0xff] }
 0x92f   :  { %4722 = vmatpush1.bf16.msra.mxu1 %v3595_v38  ;;  %v3620_v38 = vld [vmem:[#allocation5 + $0x198] sm:$0xff] }
 0x930   :  { %4723 = vmatprep.subr.bf16.mxu1 %v3602_v43  ;;  %v3629_v43 = vld [vmem:[#allocation5 + $0x1e0] sm:$0xff] }
 0x931   :  { %4380 = vmatpush1.bf16.msra.mxu0 %v3599_v44  ;;  %v3624_v44 = vld [vmem:[#allocation5 + $0x1b8] sm:$0xff] }
 0x932   :  { %4381 = vmatprep.subr.bf16.mxu0 %v3606_v32  ;;  %v3607_v32 = vld [vmem:[#allocation5 + $0x130] sm:$0xff] }
 0x933   :  { %4724 = vmatpush1.bf16.msra.mxu1 %v3601_v4  ;;  %v3626_v4 = vld [vmem:[#allocation5 + $0x1c8] sm:$0xff] }
 0x934   :  { %4725 = vmatprep.subr.bf16.mxu1 %v3608_v31  ;;  %v3635_v31 = vld [vmem:[#allocation5 + $0x210] sm:$0xff] }
 0x935   :  { %4382 = vmatpush1.bf16.msra.mxu0 %v3605_v1  ;;  %v3630_v1 = vld [vmem:[#allocation5 + $0x1e8] sm:$0xff] }
 0x936   :  { %4383 = vmatprep.subr.bf16.mxu0 %v3612_v12  ;;  %v3613_v12 = vld [vmem:[#allocation5 + $0x160] sm:$0xff] }
 0x937   :  { %4726 = vmatpush1.bf16.msra.mxu1 %v3607_v32  ;;  %v3632_v32 = vld [vmem:[#allocation5 + $0x1f8] sm:$0xff] }
 0x938   :  { %4727 = vmatprep.subr.bf16.mxu1 %v3614_v52  ;;  %v3641_v52 = vld [vmem:[#allocation5 + $0x240] sm:$0xff] }
 0x939   :  { %4384 = vmatpush1.bf16.msra.mxu0 %v3611_v5  ;;  %v3636_v5 = vld [vmem:[#allocation5 + $0x218] sm:$0xff] }
 0x93a   :  { %4385 = vmatprep.subr.bf16.mxu0 %v3618_v48  ;;  %v3619_v48 = vld [vmem:[#allocation5 + $0x190] sm:$0xff] }
 0x93b   :  { %4728 = vmatpush1.bf16.msra.mxu1 %v3613_v12  ;;  %v3638_v12 = vld [vmem:[#allocation5 + $0x228] sm:$0xff] }
 0x93c   :  { %4729 = vmatprep.subr.bf16.mxu1 %v3620_v38  ;;  %v3647_v38 = vld [vmem:[#allocation5 + $0x270] sm:$0xff] }
 0x93d   :  { %4386 = vmatpush1.bf16.msra.mxu0 %v3617_v19  ;;  %v3642_v19 = vld [vmem:[#allocation5 + $0x248] sm:$0xff] }
 0x93e   :  { %4387 = vmatprep.subr.bf16.mxu0 %v3624_v44  ;;  %v3625_v44 = vld [vmem:[#allocation5 + $0x1c0] sm:$0xff] }
 0x93f   :  { %4730 = vmatpush1.bf16.msra.mxu1 %v3619_v48  ;;  %v3644_v48 = vld [vmem:[#allocation5 + $0x258] sm:$0xff] }
 0x940   :  { %4731 = vmatprep.subr.bf16.mxu1 %v3626_v4  ;;  %v3653_v4 = vld [vmem:[#allocation5 + $0x2a0] sm:$0xff] }
 0x941   :  { %4388 = vmatpush1.bf16.msra.mxu0 %v3623_v61  ;;  %v3648_v61 = vld [vmem:[#allocation5 + $0x278] sm:$0xff] }
 0x942   :  { %4389 = vmatprep.subr.bf16.mxu0 %v3630_v1  ;;  %v3631_v1 = vld [vmem:[#allocation5 + $0x1f0] sm:$0xff] }
 0x943   :  { %4732 = vmatpush1.bf16.msra.mxu1 %v3625_v44  ;;  %v3650_v44 = vld [vmem:[#allocation5 + $0x288] sm:$0xff] }
 0x944   :  { %4733 = vmatprep.subr.bf16.mxu1 %v3632_v32  ;;  %v3659_v32 = vld [vmem:[#allocation5 + $0x2d0] sm:$0xff] }
 0x945   :  { %4390 = vmatpush1.bf16.msra.mxu0 %v3629_v43  ;;  %v3654_v43 = vld [vmem:[#allocation5 + $0x2a8] sm:$0xff] }
 0x946   :  { %4391 = vmatprep.subr.bf16.mxu0 %v3636_v5  ;;  %v3637_v5 = vld [vmem:[#allocation5 + $0x220] sm:$0xff] }
 0x947   :  { %4734 = vmatpush1.bf16.msra.mxu1 %v3631_v1  ;;  %v3649_v1 = vld [vmem:[#allocation5 + $0x280] sm:$0xff] }
 0x948   :  { %4735 = vmatprep.subr.bf16.mxu1 %v3638_v12  ;;  %v3656_v12 = vld [vmem:[#allocation5 + $0x2b8] sm:$0xff] }
 0x949   :  { %4392 = vmatpush1.bf16.msra.mxu0 %v3635_v31  ;;  %v3660_v31 = vld [vmem:[#allocation5 + $0x2d8] sm:$0xff] }
 0x94a   :  { %4393 = vmatprep.subr.bf16.mxu0 %v3642_v19  ;;  %v3643_v19 = vld [vmem:[#allocation5 + $0x250] sm:$0xff] }
 0x94b   :  { %4736 = vmatpush1.bf16.msra.mxu1 %v3637_v5  ;;  %v3672_v5 = vld [vmem:[#allocation5 + $0x338] sm:$0xff] }
 0x94c   :  { %4737 = vmatprep.subr.bf16.mxu1 %v3644_v48  ;;  %v3667_v48 = vld [vmem:[#allocation5 + $0x310] sm:$0xff] }
 0x94d   :  { %4394 = vmatpush1.bf16.msra.mxu0 %v3641_v52  ;;  %v3666_v52 = vld [vmem:[#allocation5 + $0x308] sm:$0xff] }
 0x94e   :  { %4395 = vmatprep.subr.bf16.mxu0 %v3648_v61  ;;  %v6455_v61 = vpack.c.bf16 %v3533_v55, %v3517_v60  ;;  %v3662_v60 = vld [vmem:[#allocation5 + $0x2e8] sm:$0xff] }
 0x94f   :  { %4738 = vmatpush1.bf16.msra.mxu1 %v3643_v19  ;;  %v3678_v55 = vld [vmem:[#allocation5 + $0x368] sm:$0xff] }
 0x950   :  { %4739 = vmatprep.subr.bf16.mxu1 %v3650_v44  ;;  %v3690_v19 = vld [vmem:[#allocation5 + $0x3c8] sm:$0xff]  ;;  %v3673_v44 = vld [vmem:[#allocation5 + $0x340] sm:$0xff] }
 0x951   :  { %4396 = vmatpush1.bf16.msra.mxu0 %v3647_v38  ;;  %v6461_v38 = vpack.c.bf16 %v3536_v41, %v3520_v9  ;;  %v3668_v9 = vld [vmem:[#allocation5 + $0x318] sm:$0xff] }
 0x952   :  { %4397 = vmatprep.subr.bf16.mxu0 %v3654_v43  ;;  %v3665_v43 = vld [vmem:[#allocation5 + $0x300] sm:$0xff]  ;;  %v3684_v41 = vld [vmem:[#allocation5 + $0x398] sm:$0xff] }
 0x953   :  { %4740 = vmatpush1.bf16.msra.mxu1 %v3649_v1  ;;  %v3696_v1 = vld [vmem:[#allocation5 + $0x3f8] sm:$0xff] }
 0x954   :  { %4741 = vmatprep.subr.bf16.mxu1 %v3656_v12  ;;  %v3679_v12 = vld [vmem:[#allocation5 + $0x370] sm:$0xff] }
 0x955   :  { %4398 = vmatpush1.bf16.msra.mxu0 %v3653_v4  ;;  %v3674_v4 = vld [vmem:[#allocation5 + $0x348] sm:$0xff] }
 0x956   :  { %4399 = vmatprep.subr.bf16.mxu0 %v3660_v31  ;;  %v3683_v31 = vld [vmem:[#allocation5 + $0x390] sm:$0xff] }
 0x957   :  { %4742 = vmatpush1.bf16.msra.mxu1 %v3655_v59  ;;  %v3702_v59 = vld [vmem:[#allocation5 + $0x428] sm:$0xff] }
 0x958   :  { %4743 = vmatprep.subr.bf16.mxu1 %v3662_v60  ;;  %v3685_v60 = vld [vmem:[#allocation5 + $0x3a0] sm:$0xff] }
 0x959   :  { %4400 = vmatpush1.bf16.msra.mxu0 %v3659_v32  ;;  %v3680_v32 = vld [vmem:[#allocation5 + $0x378] sm:$0xff] }
 0x95a   :  { %4412 = vmatprep.subr.bf16.mxu0 %v3666_v52  ;;  %v3689_v52 = vld [vmem:[#allocation5 + $0x3c0] sm:$0xff] }
 0x95b   :  { %4744 = vmatpush1.bf16.msra.mxu1 %v3661_v37  ;;  %v3708_v37 = vld [vmem:[#allocation5 + $0x458] sm:$0xff] }
 0x95c   :  { %4402 = vmatmul.mubr.bf16.vlgmr.msra.gmra.mrb[20].mxu0 %v6455_v61  ;;  %4756 = vmatprep.subr.bf16.mxu1 %v3668_v9  ;;  %v3691_v9 = vld [vmem:[#allocation5 + $0x3d0] sm:$0xff] }
 0x95d   :  { %4413 = vmatpush1.bf16.msra.mxu0 %v3665_v43  ;;  %4444 = vmatprep.mubr.bf16.mxu0 %v6461_v38  ;;  %v3686_v43 = vld [vmem:[#allocation5 + $0x3a8] sm:$0xff] }
 0x95e   :  { %4414 = vmatprep.subr.bf16.mxu0 %v3672_v5  ;;  %4746 = vmatmul.mubr.bf16.vlgmr.msra.gmra.mrb[36].mxu1 %v6455_v61  ;;  %v3695_v5 = vld [vmem:[#allocation5 + $0x3f0] sm:$0xff] }
 0x95f   :  { %4757 = vmatpush1.bf16.msra.mxu1 %v3667_v48  ;;  %4788 = vmatprep.mubr.bf16.mxu1 %v6461_v38  ;;  %v3714_v48 = vld [vmem:[#allocation5 + $0x488] sm:$0xff] }
 0x960   :  { %4758 = vmatprep.subr.bf16.mxu1 %v3674_v4  ;;  %v3697_v4 = vld [vmem:[#allocation5 + $0x400] sm:$0xff] }
 0x961   :  { %4415 = vmatpush1.bf16.msra.mxu0 %v3671_v2  ;;  %v3692_v2 = vld [vmem:[#allocation5 + $0x3d8] sm:$0xff] }
 0x962   :  { %4416 = vmatprep.subr.bf16.mxu0 %v3678_v55  ;;  %v3701_v55 = vld [vmem:[#allocation5 + $0x420] sm:$0xff] }
 0x963   :  { %4759 = vmatpush1.bf16.msra.mxu1 %v3673_v44  ;;  %v3720_v44 = vld [vmem:[#allocation5 + $0x4b8] sm:$0xff] }
 0x964   :  { %4760 = vmatprep.subr.bf16.mxu1 %v3680_v32  ;;  %v3703_v32 = vld [vmem:[#allocation5 + $0x430] sm:$0xff] }
 0x965   :  { %4417 = vmatpush1.bf16.msra.mxu0 %v3677_v11  ;;  %v3698_v11 = vld [vmem:[#allocation5 + $0x408] sm:$0xff] }
 0x966   :  { %4418 = vmatprep.subr.bf16.mxu0 %v3684_v41  ;;  %v3707_v41 = vld [vmem:[#allocation5 + $0x450] sm:$0xff] }
 0x967   :  { %4761 = vmatpush1.bf16.msra.mxu1 %v3679_v12  ;;  %v3726_v12 = vld [vmem:[#allocation5 + $0x4e8] sm:$0xff] }
 0x968   :  { %4762 = vmatprep.subr.bf16.mxu1 %v3686_v43  ;;  %v3709_v43 = vld [vmem:[#allocation5 + $0x460] sm:$0xff] }
 0x969   :  { %4419 = vmatpush1.bf16.msra.mxu0 %v3683_v31  ;;  %v3704_v31 = vld [vmem:[#allocation5 + $0x438] sm:$0xff] }
 0x96a   :  { %4420 = vmatprep.subr.bf16.mxu0 %v3690_v19  ;;  %v3713_v19 = vld [vmem:[#allocation5 + $0x480] sm:$0xff] }
 0x96b   :  { %4763 = vmatpush1.bf16.msra.mxu1 %v3685_v60  ;;  %v3732_v60 = vld [vmem:[#allocation5 + $0x518] sm:$0xff] }
 0x96c   :  { %4764 = vmatprep.subr.bf16.mxu1 %v3692_v2  ;;  %v3715_v2 = vld [vmem:[#allocation5 + $0x490] sm:$0xff] }
 0x96d   :  { %4421 = vmatpush1.bf16.msra.mxu0 %v3689_v52  ;;  %v3710_v52 = vld [vmem:[#allocation5 + $0x468] sm:$0xff] }
 0x96e   :  { %4422 = vmatprep.subr.bf16.mxu0 %v3696_v1  ;;  %v3719_v1 = vld [vmem:[#allocation5 + $0x4b0] sm:$0xff] }
 0x96f   :  { %4765 = vmatpush1.bf16.msra.mxu1 %v3691_v9  ;;  %v3738_v9 = vld [vmem:[#allocation5 + $0x548] sm:$0xff] }
 0x970   :  { %4766 = vmatprep.subr.bf16.mxu1 %v3698_v11  ;;  %v3721_v11 = vld [vmem:[#allocation5 + $0x4c0] sm:$0xff] }
 0x971   :  { %4423 = vmatpush1.bf16.msra.mxu0 %v3695_v5  ;;  %v3716_v5 = vld [vmem:[#allocation5 + $0x498] sm:$0xff] }
 0x972   :  { %4424 = vmatprep.subr.bf16.mxu0 %v3702_v59  ;;  %v3725_v59 = vld [vmem:[#allocation5 + $0x4e0] sm:$0xff] }
 0x973   :  { %4767 = vmatpush1.bf16.msra.mxu1 %v3697_v4  ;;  %v3744_v4 = vld [vmem:[#allocation5 + $0x578] sm:$0xff] }
 0x974   :  { %4768 = vmatprep.subr.bf16.mxu1 %v3704_v31  ;;  %v3727_v31 = vld [vmem:[#allocation5 + $0x4f0] sm:$0xff] }
 0x975   :  { %4425 = vmatpush1.bf16.msra.mxu0 %v3701_v55  ;;  %v3722_v55 = vld [vmem:[#allocation5 + $0x4c8] sm:$0xff] }
 0x976   :  { %4426 = vmatprep.subr.bf16.mxu0 %v3708_v37  ;;  %v3731_v37 = vld [vmem:[#allocation5 + $0x510] sm:$0xff] }
 0x977   :  { %4769 = vmatpush1.bf16.msra.mxu1 %v3703_v32  ;;  %v3750_v32 = vld [vmem:[#allocation5 + $0x5a8] sm:$0xff] }
 0x978   :  { %4770 = vmatprep.subr.bf16.mxu1 %v3710_v52  ;;  %v3733_v52 = vld [vmem:[#allocation5 + $0x520] sm:$0xff] }
 0x979   :  { %4427 = vmatpush1.bf16.msra.mxu0 %v3707_v41  ;;  %v3728_v41 = vld [vmem:[#allocation5 + $0x4f8] sm:$0xff] }
 0x97a   :  { %4428 = vmatprep.subr.bf16.mxu0 %v3714_v48  ;;  %v3737_v48 = vld [vmem:[#allocation5 + $0x540] sm:$0xff] }
 0x97b   :  { %4771 = vmatpush1.bf16.msra.mxu1 %v3709_v43  ;;  %v3756_v43 = vld [vmem:[#allocation5 + $0x5d8] sm:$0xff] }
 0x97c   :  { %4772 = vmatprep.subr.bf16.mxu1 %v3716_v5  ;;  %v3739_v5 = vld [vmem:[#allocation5 + $0x550] sm:$0xff] }
 0x97d   :  { %4429 = vmatpush1.bf16.msra.mxu0 %v3713_v19  ;;  %v3734_v19 = vld [vmem:[#allocation5 + $0x528] sm:$0xff] }
 0x97e   :  { %4430 = vmatprep.subr.bf16.mxu0 %v3720_v44  ;;  %v3743_v44 = vld [vmem:[#allocation5 + $0x570] sm:$0xff] }
 0x97f   :  { %4773 = vmatpush1.bf16.msra.mxu1 %v3715_v2  ;;  %v3762_v2 = vld [vmem:[#allocation5 + $0x608] sm:$0xff] }
 0x980   :  { %4774 = vmatprep.subr.bf16.mxu1 %v3722_v55  ;;  %v6471_v55 = vpack.c.bf16 %v3535_v58, %v3519_v63  ;;  %v3758_v63 = vld [vmem:[#allocation5 + $0x5e8] sm:$0xff] }
 0x981   :  { %4431 = vmatpush1.bf16.msra.mxu0 %v3719_v1  ;;  %v3740_v1 = vld [vmem:[#allocation5 + $0x558] sm:$0xff]  ;;  %v3774_v58 = vld [vmem:[#allocation5 + $0x668] sm:$0xff] }
 0x982   :  { %4432 = vmatprep.subr.bf16.mxu0 %v3726_v12  ;;  %v3749_v12 = vld [vmem:[#allocation5 + $0x5a0] sm:$0xff] }
 0x983   :  { %4775 = vmatpush1.bf16.msra.mxu1 %v3721_v11  ;;  %v6477_v11 = vpack.c.bf16 %v3538_v13, %v3522_v40  ;;  %v3764_v40 = vld [vmem:[#allocation5 + $0x618] sm:$0xff] }
 0x984   :  { %4776 = vmatprep.subr.bf16.mxu1 %v3728_v41  ;;  %v3761_v41 = vld [vmem:[#allocation5 + $0x600] sm:$0xff]  ;;  %v3780_v13 = vld [vmem:[#allocation5 + $0x698] sm:$0xff] }
 0x985   :  { %4433 = vmatpush1.bf16.msra.mxu0 %v3725_v59  ;;  %v3746_v59 = vld [vmem:[#allocation5 + $0x588] sm:$0xff] }
 0x986   :  { %4434 = vmatprep.subr.bf16.mxu0 %v3732_v60  ;;  %v3755_v60 = vld [vmem:[#allocation5 + $0x5d0] sm:$0xff] }
 0x987   :  { %4777 = vmatpush1.bf16.msra.mxu1 %v3727_v31  ;;  %v3770_v31 = vld [vmem:[#allocation5 + $0x648] sm:$0xff] }
 0x988   :  { %4778 = vmatprep.subr.bf16.mxu1 %v3734_v19  ;;  %v3779_v19 = vld [vmem:[#allocation5 + $0x690] sm:$0xff] }
 0x989   :  { %4435 = vmatpush1.bf16.msra.mxu0 %v3731_v37  ;;  %v3745_v37 = vld [vmem:[#allocation5 + $0x580] sm:$0xff] }
 0x98a   :  { %4436 = vmatprep.subr.bf16.mxu0 %v3738_v9  ;;  %v3752_v9 = vld [vmem:[#allocation5 + $0x5b8] sm:$0xff] }
 0x98b   :  { %4779 = vmatpush1.bf16.msra.mxu1 %v3733_v52  ;;  %v3776_v52 = vld [vmem:[#allocation5 + $0x678] sm:$0xff] }
 0x98c   :  { %4780 = vmatprep.subr.bf16.mxu1 %v3740_v1  ;;  %v3785_v1 = vld [vmem:[#allocation5 + $0x6c0] sm:$0xff] }
 0x98d   :  { %4437 = vmatpush1.bf16.msra.mxu0 %v3737_v48  ;;  %v3768_v48 = vld [vmem:[#allocation5 + $0x638] sm:$0xff] }
 0x98e   :  { %4438 = vmatprep.subr.bf16.mxu0 %v3744_v4  ;;  %v3763_v4 = vld [vmem:[#allocation5 + $0x610] sm:$0xff] }
 0x98f   :  { %4781 = vmatpush1.bf16.msra.mxu1 %v3739_v5  ;;  %v3782_v5 = vld [vmem:[#allocation5 + $0x6a8] sm:$0xff] }
 0x990   :  { %4782 = vmatprep.subr.bf16.mxu1 %v3746_v59  ;;  %v3791_v59 = vld [vmem:[#allocation5 + $0x6f0] sm:$0xff] }
 0x991   :  { %4439 = vmatpush1.bf16.msra.mxu0 %v3743_v44  ;;  %v3786_v44 = vld [vmem:[#allocation5 + $0x6c8] sm:$0xff] }
 0x992   :  { %4440 = vmatprep.subr.bf16.mxu0 %v3750_v32  ;;  %v3769_v32 = vld [vmem:[#allocation5 + $0x640] sm:$0xff] }
 0x993   :  { %4783 = vmatpush1.bf16.msra.mxu1 %v3745_v37  ;;  %v3788_v37 = vld [vmem:[#allocation5 + $0x6d8] sm:$0xff] }
 0x994   :  { %4784 = vmatprep.subr.bf16.mxu1 %v3752_v9  ;;  %v3797_v9 = vld [vmem:[#allocation5 + $0x720] sm:$0xff] }
 0x995   :  { %4441 = vmatpush1.bf16.msra.mxu0 %v3749_v12  ;;  %v3792_v12 = vld [vmem:[#allocation5 + $0x6f8] sm:$0xff] }
 0x996   :  { %4442 = vmatprep.subr.bf16.mxu0 %v3756_v43  ;;  %v3775_v43 = vld [vmem:[#allocation5 + $0x670] sm:$0xff] }
 0x997   :  { %4785 = vmatpush1.bf16.msra.mxu1 %v3751_v0  ;;  %v3794_v0 = vld [vmem:[#allocation5 + $0x708] sm:$0xff] }
 0x998   :  { %4786 = vmatprep.subr.bf16.mxu1 %v3758_v63  ;;  %v3803_v63 = vld [vmem:[#allocation5 + $0x750] sm:$0xff] }
 0x999   :  { %4443 = vmatpush1.bf16.msra.mxu0 %v3755_v60  ;;  %v3798_v60 = vld [vmem:[#allocation5 + $0x728] sm:$0xff] }
 0x99a   :  { %4455 = vmatprep.subr.bf16.mxu0 %v3762_v2  ;;  %v3781_v2 = vld [vmem:[#allocation5 + $0x6a0] sm:$0xff] }
 0x99b   :  { %4787 = vmatpush1.bf16.msra.mxu1 %v3757_v8  ;;  %v3800_v8 = vld [vmem:[#allocation5 + $0x738] sm:$0xff] }
 0x99c   :  { %4445 = vmatmul.mubr.bf16.vlgmr.msra.gmra.mrb[20].mxu0 %v6471_v55  ;;  %4799 = vmatprep.subr.bf16.mxu1 %v3764_v40  ;;  %v3809_v40 = vld [vmem:[#allocation5 + $0x780] sm:$0xff] }
 0x99d   :  { %4456 = vmatpush1.bf16.msra.mxu0 %v3761_v41  ;;  %4487 = vmatprep.mubr.bf16.mxu0 %v6477_v11  ;;  %v3804_v41 = vld [vmem:[#allocation5 + $0x758] sm:$0xff] }
 0x99e   :  { %4457 = vmatprep.subr.bf16.mxu0 %v3768_v48  ;;  %4789 = vmatmul.mubr.bf16.vlgmr.msra.gmra.mrb[36].mxu1 %v6471_v55  ;;  %v3787_v48 = vld [vmem:[#allocation5 + $0x6d0] sm:$0xff] }
 0x99f   :  { %4800 = vmatpush1.bf16.msra.mxu1 %v3763_v4  ;;  %4831 = vmatprep.mubr.bf16.mxu1 %v6477_v11  ;;  %v3806_v4 = vld [vmem:[#allocation5 + $0x768] sm:$0xff] }
 0x9a0   :  { %4801 = vmatprep.subr.bf16.mxu1 %v3770_v31  ;;  %v3815_v31 = vld [vmem:[#allocation5 + $0x7b0] sm:$0xff] }
 0x9a1   :  { %4458 = vmatpush1.bf16.msra.mxu0 %v3767_v3  ;;  %v3810_v3 = vld [vmem:[#allocation5 + $0x788] sm:$0xff] }
 0x9a2   :  { %4459 = vmatprep.subr.bf16.mxu0 %v3774_v58  ;;  %v3793_v58 = vld [vmem:[#allocation5 + $0x700] sm:$0xff] }
 0x9a3   :  { %4802 = vmatpush1.bf16.msra.mxu1 %v3769_v32  ;;  %v3812_v32 = vld [vmem:[#allocation5 + $0x798] sm:$0xff] }
 0x9a4   :  { %4803 = vmatprep.subr.bf16.mxu1 %v3776_v52  ;;  %v3821_v52 = vld [vmem:[#allocation5 + $0x7e0] sm:$0xff] }
 0x9a5   :  { %4460 = vmatpush1.bf16.msra.mxu0 %v3773_v54  ;;  %v3816_v54 = vld [vmem:[#allocation5 + $0x7b8] sm:$0xff] }
 0x9a6   :  { %4461 = vmatprep.subr.bf16.mxu0 %v3780_v13  ;;  %v3799_v13 = vld [vmem:[#allocation5 + $0x730] sm:$0xff] }
 0x9a7   :  { %4804 = vmatpush1.bf16.msra.mxu1 %v3775_v43  ;;  %v3818_v43 = vld [vmem:[#allocation5 + $0x7c8] sm:$0xff] }
 0x9a8   :  { %4805 = vmatprep.subr.bf16.mxu1 %v3782_v5  ;;  %v3827_v5 = vld [vmem:[#allocation5 + $0x810] sm:$0xff] }
 0x9a9   :  { %4462 = vmatpush1.bf16.msra.mxu0 %v3779_v19  ;;  %v3822_v19 = vld [vmem:[#allocation5 + $0x7e8] sm:$0xff] }
 0x9aa   :  { %4463 = vmatprep.subr.bf16.mxu0 %v3786_v44  ;;  %v3805_v44 = vld [vmem:[#allocation5 + $0x760] sm:$0xff] }
 0x9ab   :  { %4806 = vmatpush1.bf16.msra.mxu1 %v3781_v2  ;;  %v3824_v2 = vld [vmem:[#allocation5 + $0x7f8] sm:$0xff] }
 0x9ac   :  { %4807 = vmatprep.subr.bf16.mxu1 %v3788_v37  ;;  %v3833_v37 = vld [vmem:[#allocation5 + $0x840] sm:$0xff] }
 0x9ad   :  { %4464 = vmatpush1.bf16.msra.mxu0 %v3785_v1  ;;  %v3828_v1 = vld [vmem:[#allocation5 + $0x818] sm:$0xff] }
 0x9ae   :  { %4465 = vmatprep.subr.bf16.mxu0 %v3792_v12  ;;  %v3811_v12 = vld [vmem:[#allocation5 + $0x790] sm:$0xff] }
 0x9af   :  { %4808 = vmatpush1.bf16.msra.mxu1 %v3787_v48  ;;  %v3830_v48 = vld [vmem:[#allocation5 + $0x828] sm:$0xff] }
 0x9b0   :  { %4809 = vmatprep.subr.bf16.mxu1 %v3794_v0  ;;  %v3839_v0 = vld [vmem:[#allocation5 + $0x870] sm:$0xff] }
 0x9b1   :  { %4466 = vmatpush1.bf16.msra.mxu0 %v3791_v59  ;;  %v3834_v59 = vld [vmem:[#allocation5 + $0x848] sm:$0xff] }
 0x9b2   :  { %4467 = vmatprep.subr.bf16.mxu0 %v3798_v60  ;;  %v3817_v60 = vld [vmem:[#allocation5 + $0x7c0] sm:$0xff] }
 0x9b3   :  { %4810 = vmatpush1.bf16.msra.mxu1 %v3793_v58  ;;  %v3836_v58 = vld [vmem:[#allocation5 + $0x858] sm:$0xff] }
 0x9b4   :  { %4811 = vmatprep.subr.bf16.mxu1 %v3800_v8  ;;  %v3845_v8 = vld [vmem:[#allocation5 + $0x8a0] sm:$0xff] }
 0x9b5   :  { %4468 = vmatpush1.bf16.msra.mxu0 %v3797_v9  ;;  %v3840_v9 = vld [vmem:[#allocation5 + $0x878] sm:$0xff] }
 0x9b6   :  { %4469 = vmatprep.subr.bf16.mxu0 %v3804_v41  ;;  %v3823_v41 = vld [vmem:[#allocation5 + $0x7f0] sm:$0xff] }
 0x9b7   :  { %4812 = vmatpush1.bf16.msra.mxu1 %v3799_v13  ;;  %v3842_v13 = vld [vmem:[#allocation5 + $0x888] sm:$0xff] }
 0x9b8   :  { %4813 = vmatprep.subr.bf16.mxu1 %v3806_v4  ;;  %v3851_v4 = vld [vmem:[#allocation5 + $0x8d0] sm:$0xff] }
 0x9b9   :  { %4470 = vmatpush1.bf16.msra.mxu0 %v3803_v63  ;;  %v3846_v63 = vld [vmem:[#allocation5 + $0x8a8] sm:$0xff] }
 0x9ba   :  { %4471 = vmatprep.subr.bf16.mxu0 %v3810_v3  ;;  %v3829_v3 = vld [vmem:[#allocation5 + $0x820] sm:$0xff] }
 0x9bb   :  { %4814 = vmatpush1.bf16.msra.mxu1 %v3805_v44  ;;  %v3841_v44 = vld [vmem:[#allocation5 + $0x880] sm:$0xff] }
 0x9bc   :  { %4815 = vmatprep.subr.bf16.mxu1 %v3812_v32  ;;  %v3848_v32 = vld [vmem:[#allocation5 + $0x8b8] sm:$0xff] }
 0x9bd   :  { %4472 = vmatpush1.bf16.msra.mxu0 %v3809_v40  ;;  %v3852_v40 = vld [vmem:[#allocation5 + $0x8d8] sm:$0xff] }
 0x9be   :  { %4473 = vmatprep.subr.bf16.mxu0 %v3816_v54  ;;  %v3835_v54 = vld [vmem:[#allocation5 + $0x850] sm:$0xff] }
 0x9bf   :  { %4816 = vmatpush1.bf16.msra.mxu1 %v3811_v12  ;;  %v3857_v12 = vld [vmem:[#allocation5 + $0x900] sm:$0xff] }
 0x9c0   :  { %4817 = vmatprep.subr.bf16.mxu1 %v3818_v43  ;;  %v3864_v43 = vld [vmem:[#allocation5 + $0x938] sm:$0xff] }
 0x9c1   :  { %4474 = vmatpush1.bf16.msra.mxu0 %v3815_v31  ;;  %v3858_v31 = vld [vmem:[#allocation5 + $0x908] sm:$0xff] }
 0x9c2   :  { %4475 = vmatprep.subr.bf16.mxu0 %v3822_v19  ;;  %v6487_v19 = vpack.c.bf16 %v3537_v21, %v3521_v45  ;;  %v3854_v45 = vld [vmem:[#allocation5 + $0x8e8] sm:$0xff] }
 0x9c3   :  { %4818 = vmatpush1.bf16.msra.mxu1 %v3817_v60  ;;  %v3870_v21 = vld [vmem:[#allocation5 + $0x968] sm:$0xff] }
 0x9c4   :  { %4819 = vmatprep.subr.bf16.mxu1 %v3824_v2  ;;  %v3866_v60 = vld [vmem:[#allocation5 + $0x948] sm:$0xff]  ;;  %v3875_v2 = vld [vmem:[#allocation5 + $0x990] sm:$0xff] }
 0x9c5   :  { %4476 = vmatpush1.bf16.msra.mxu0 %v3821_v52  ;;  %v6647_v52 = vmax.f32 %v6353_v24, 0.0  ;;  %v3869_v24 = vld [vmem:[#allocation5 + $0x960] sm:$0xff] }
 0x9c6   :  { %4477 = vmatprep.subr.bf16.mxu0 %v3828_v1 }
 0x9c7   :  { %4820 = vmatpush1.bf16.msra.mxu1 %v3823_v41  ;;  %v6493_v1 = vpack.c.bf16 %v6647_v52, %v3524_v49  ;;  %v3860_v49 = vld [vmem:[#allocation5 + $0x918] sm:$0xff]  ;;  %v3906_v52 = vld [vmem:[#allocation5 + $0xa88] sm:$0xff] }
 0x9c8   :  { %4821 = vmatprep.subr.bf16.mxu1 %v3830_v48  ;;  %v3872_v41 = vld [vmem:[#allocation5 + $0x978] sm:$0xff]  ;;  %v3881_v48 = vld [vmem:[#allocation5 + $0x9c0] sm:$0xff] }
 0x9c9   :  { %4478 = vmatpush1.bf16.msra.mxu0 %v3827_v5  ;;  %v3876_v5 = vld [vmem:[#allocation5 + $0x998] sm:$0xff] }
 0x9ca   :  { %4479 = vmatprep.subr.bf16.mxu0 %v3834_v59  ;;  %v3859_v59 = vld [vmem:[#allocation5 + $0x910] sm:$0xff] }
 0x9cb   :  { %4822 = vmatpush1.bf16.msra.mxu1 %v3829_v3  ;;  %v3878_v3 = vld [vmem:[#allocation5 + $0x9a8] sm:$0xff] }
 0x9cc   :  { %4823 = vmatprep.subr.bf16.mxu1 %v3836_v58  ;;  %v3887_v58 = vld [vmem:[#allocation5 + $0x9f0] sm:$0xff] }
 0x9cd   :  { %4480 = vmatpush1.bf16.msra.mxu0 %v3833_v37  ;;  %v3882_v37 = vld [vmem:[#allocation5 + $0x9c8] sm:$0xff] }
 0x9ce   :  { %4481 = vmatprep.subr.bf16.mxu0 %v3840_v9  ;;  %v3865_v9 = vld [vmem:[#allocation5 + $0x940] sm:$0xff] }
 0x9cf   :  { %4824 = vmatpush1.bf16.msra.mxu1 %v3835_v54  ;;  %v3884_v54 = vld [vmem:[#allocation5 + $0x9d8] sm:$0xff] }
 0x9d0   :  { %4825 = vmatprep.subr.bf16.mxu1 %v3842_v13  ;;  %v3893_v13 = vld [vmem:[#allocation5 + $0xa20] sm:$0xff] }
 0x9d1   :  { %4482 = vmatpush1.bf16.msra.mxu0 %v3839_v0  ;;  %v3888_v0 = vld [vmem:[#allocation5 + $0x9f8] sm:$0xff] }
 0x9d2   :  { %4483 = vmatprep.subr.bf16.mxu0 %v3846_v63  ;;  %v3871_v63 = vld [vmem:[#allocation5 + $0x970] sm:$0xff] }
 0x9d3   :  { %4826 = vmatpush1.bf16.msra.mxu1 %v3841_v44  ;;  %v3890_v44 = vld [vmem:[#allocation5 + $0xa08] sm:$0xff] }
 0x9d4   :  { %4827 = vmatprep.subr.bf16.mxu1 %v3848_v32  ;;  %v3899_v32 = vld [vmem:[#allocation5 + $0xa50] sm:$0xff] }
 0x9d5   :  { %4484 = vmatpush1.bf16.msra.mxu0 %v3845_v8  ;;  %v3894_v8 = vld [vmem:[#allocation5 + $0xa28] sm:$0xff] }
 0x9d6   :  { %4485 = vmatprep.subr.bf16.mxu0 %v3852_v40  ;;  %v3877_v40 = vld [vmem:[#allocation5 + $0x9a0] sm:$0xff] }
 0x9d7   :  { %4828 = vmatpush1.bf16.msra.mxu1 %v3847_v28  ;;  %v3905_v28 = vld [vmem:[#allocation5 + $0xa80] sm:$0xff] }
 0x9d8   :  { %4829 = vmatprep.subr.bf16.mxu1 %v3854_v45  ;;  %v3912_v45 = vld [vmem:[#allocation5 + $0xab8] sm:$0xff] }
 0x9d9   :  { %4486 = vmatpush1.bf16.msra.mxu0 %v3851_v4  ;;  %v3900_v4 = vld [vmem:[#allocation5 + $0xa58] sm:$0xff] }
 0x9da   :  { %4498 = vmatprep.subr.bf16.mxu0 %v3858_v31  ;;  %v3883_v31 = vld [vmem:[#allocation5 + $0x9d0] sm:$0xff] }
 0x9db   :  { %4830 = vmatpush1.bf16.msra.mxu1 %v3853_v42  ;;  %v3911_v42 = vld [vmem:[#allocation5 + $0xab0] sm:$0xff] }
 0x9dc   :  { %4488 = vmatmul.mubr.bf16.vlgmr.msra.gmra.mrb[20].mxu0 %v6487_v19  ;;  %4842 = vmatprep.subr.bf16.mxu1 %v3860_v49  ;;  %v3918_v49 = vld [vmem:[#allocation5 + $0xae8] sm:$0xff] }
 0x9dd   :  { %4499 = vmatpush1.bf16.msra.mxu0 %v3857_v12  ;;  %4530 = vmatprep.mubr.bf16.mxu0 %v6493_v1  ;;  %v3889_v12 = vld [vmem:[#allocation5 + $0xa00] sm:$0xff] }
 0x9de   :  { %4500 = vmatprep.subr.bf16.mxu0 %v3864_v43  ;;  %4832 = vmatmul.mubr.bf16.vlgmr.msra.gmra.mrb[36].mxu1 %v6487_v19  ;;  %v3896_v43 = vld [vmem:[#allocation5 + $0xa38] sm:$0xff] }
 0x9df   :  { %4843 = vmatpush1.bf16.msra.mxu1 %v3859_v59  ;;  %4874 = vmatprep.mubr.bf16.mxu1 %v6493_v1  ;;  %v3917_v59 = vld [vmem:[#allocation5 + $0xae0] sm:$0xff] }
 0x9e0   :  { %4844 = vmatprep.subr.bf16.mxu1 %v3866_v60  ;;  %v3924_v60 = vld [vmem:[#allocation5 + $0xb18] sm:$0xff] }
 0x9e1   :  { %4501 = vmatpush1.bf16.msra.mxu0 %v3863_v53  ;;  %v3895_v53 = vld [vmem:[#allocation5 + $0xa30] sm:$0xff] }
 0x9e2   :  { %4502 = vmatprep.subr.bf16.mxu0 %v3870_v21  ;;  %v3902_v21 = vld [vmem:[#allocation5 + $0xa68] sm:$0xff] }
 0x9e3   :  { %4845 = vmatpush1.bf16.msra.mxu1 %v3865_v9  ;;  %v3923_v9 = vld [vmem:[#allocation5 + $0xb10] sm:$0xff] }
 0x9e4   :  { %4846 = vmatprep.subr.bf16.mxu1 %v3872_v41  ;;  %v3930_v41 = vld [vmem:[#allocation5 + $0xb48] sm:$0xff] }
 0x9e5   :  { %4503 = vmatpush1.bf16.msra.mxu0 %v3869_v24  ;;  %v3901_v24 = vld [vmem:[#allocation5 + $0xa60] sm:$0xff] }
 0x9e6   :  { %4504 = vmatprep.subr.bf16.mxu0 %v3876_v5  ;;  %v3908_v5 = vld [vmem:[#allocation5 + $0xa98] sm:$0xff] }
 0x9e7   :  { %4847 = vmatpush1.bf16.msra.mxu1 %v3871_v63  ;;  %v3929_v63 = vld [vmem:[#allocation5 + $0xb40] sm:$0xff] }
 0x9e8   :  { %4848 = vmatprep.subr.bf16.mxu1 %v3878_v3  ;;  %v3936_v3 = vld [vmem:[#allocation5 + $0xb78] sm:$0xff] }
 0x9e9   :  { %4505 = vmatpush1.bf16.msra.mxu0 %v3875_v2  ;;  %v3907_v2 = vld [vmem:[#allocation5 + $0xa90] sm:$0xff] }
 0x9ea   :  { %4506 = vmatprep.subr.bf16.mxu0 %v3882_v37  ;;  %v3914_v37 = vld [vmem:[#allocation5 + $0xac8] sm:$0xff] }
 0x9eb   :  { %4849 = vmatpush1.bf16.msra.mxu1 %v3877_v40  ;;  %v3935_v40 = vld [vmem:[#allocation5 + $0xb70] sm:$0xff] }
 0x9ec   :  { %4850 = vmatprep.subr.bf16.mxu1 %v3884_v54  ;;  %v3942_v54 = vld [vmem:[#allocation5 + $0xba8] sm:$0xff] }
 0x9ed   :  { %4507 = vmatpush1.bf16.msra.mxu0 %v3881_v48  ;;  %v3913_v48 = vld [vmem:[#allocation5 + $0xac0] sm:$0xff] }
 0x9ee   :  { %4508 = vmatprep.subr.bf16.mxu0 %v3888_v0  ;;  %v3920_v0 = vld [vmem:[#allocation5 + $0xaf8] sm:$0xff] }
 0x9ef   :  { %4851 = vmatpush1.bf16.msra.mxu1 %v3883_v31  ;;  %v3941_v31 = vld [vmem:[#allocation5 + $0xba0] sm:$0xff] }
 0x9f0   :  { %4852 = vmatprep.subr.bf16.mxu1 %v3890_v44  ;;  %v3948_v44 = vld [vmem:[#allocation5 + $0xbd8] sm:$0xff] }
 0x9f1   :  { %4509 = vmatpush1.bf16.msra.mxu0 %v3887_v58  ;;  %v3919_v58 = vld [vmem:[#allocation5 + $0xaf0] sm:$0xff] }
 0x9f2   :  { %4510 = vmatprep.subr.bf16.mxu0 %v3894_v8  ;;  %v3926_v8 = vld [vmem:[#allocation5 + $0xb28] sm:$0xff] }
 0x9f3   :  { %4853 = vmatpush1.bf16.msra.mxu1 %v3889_v12  ;;  %v3947_v12 = vld [vmem:[#allocation5 + $0xbd0] sm:$0xff] }
 0x9f4   :  { %4854 = vmatprep.subr.bf16.mxu1 %v3896_v43  ;;  %v3954_v43 = vld [vmem:[#allocation5 + $0xc08] sm:$0xff] }
 0x9f5   :  { %4511 = vmatpush1.bf16.msra.mxu0 %v3893_v13  ;;  %v3925_v13 = vld [vmem:[#allocation5 + $0xb20] sm:$0xff] }
 0x9f6   :  { %4512 = vmatprep.subr.bf16.mxu0 %v3900_v4  ;;  %v3932_v4 = vld [vmem:[#allocation5 + $0xb58] sm:$0xff] }
 0x9f7   :  { %4855 = vmatpush1.bf16.msra.mxu1 %v3895_v53 }
 0x9f8   :  { %4856 = vmatprep.subr.bf16.mxu1 %v3902_v21  ;;  %v3937_v21 = vld [vmem:[#allocation5 + $0xb80] sm:$0xff] }
 0x9f9   :  { %4513 = vmatpush1.bf16.msra.mxu0 %v3899_v32  ;;  %v3931_v32 = vld [vmem:[#allocation5 + $0xb50] sm:$0xff] }
 0x9fa   :  { %4514 = vmatprep.subr.bf16.mxu0 %v3906_v52  ;;  %v3938_v52 = vld [vmem:[#allocation5 + $0xb88] sm:$0xff] }
 0x9fb   :  { %4857 = vmatpush1.bf16.msra.mxu1 %v3901_v24  ;;  %v6651_v24 = vmax.f32 %v6401_v27, 0.0  ;;  %v3956_v27 = vld [vmem:[#allocation5 + $0xc18] sm:$0xff] }
 0x9fc   :  { %4858 = vmatprep.subr.bf16.mxu1 %v3908_v5 }
 0x9fd   :  { %4515 = vmatpush1.bf16.msra.mxu0 %v3905_v28  ;;  %v6648_v28 = vmax.f32 %v6337_v33, 0.0  ;;  %v3943_v33 = vld [vmem:[#allocation5 + $0xbb0] sm:$0xff] }
 0x9fe   :  { %4516 = vmatprep.subr.bf16.mxu0 %v3912_v45  ;;  %v6649_v45 = vmax.f32 %v6347_v57, 0.0  ;;  %v3950_v57 = vld [vmem:[#allocation5 + $0xbe8] sm:$0xff] }
 0x9ff   :  { %4859 = vmatpush1.bf16.msra.mxu1 %v3907_v2  ;;  %v3959_v2 = vld [vmem:[#allocation5 + $0xc30] sm:$0xff] }
 0xa00   :  { %4860 = vmatprep.subr.bf16.mxu1 %v3914_v37  ;;  %v6503_v53 = vpack.c.bf16 %v6649_v45, %v6648_v28  ;;  %v3966_v37 = vld [vmem:[#allocation5 + $0xc68] sm:$0xff]  ;;  %v3979_v28 = vld [vmem:[#allocation5 + $0xcd0] sm:$0xff] }
 0xa01   :  { %4517 = vmatpush1.bf16.msra.mxu0 %v3911_v42  ;;  %v3944_v42 = vld [vmem:[#allocation5 + $0xbb8] sm:$0xff]  ;;  %v3986_v45 = vld [vmem:[#allocation5 + $0xd08] sm:$0xff] }
 0xa02   :  { %4518 = vmatprep.subr.bf16.mxu0 %v3918_v49  ;;  %v6650_v49 = vmax.f32 %v6389_v46, 0.0  ;;  %v3949_v46 = vld [vmem:[#allocation5 + $0xbe0] sm:$0xff] }
 0xa03   :  { %4861 = vmatpush1.bf16.msra.mxu1 %v3913_v48  ;;  %v3955_v48 = vld [vmem:[#allocation5 + $0xc10] sm:$0xff] }
 0xa04   :  { %4862 = vmatprep.subr.bf16.mxu1 %v3920_v0  ;;  %v6509_v5 = vpack.c.bf16 %v6651_v24, %v6650_v49  ;;  %v3962_v0 = vld [vmem:[#allocation5 + $0xc48] sm:$0xff]  ;;  %v3985_v49 = vld [vmem:[#allocation5 + $0xd00] sm:$0xff]  ;;  %v3992_v24 = vld [vmem:[#allocation5 + $0xd38] sm:$0xff] }
 0xa05   :  { %4519 = vmatpush1.bf16.msra.mxu0 %v3917_v59  ;;  %v3953_v59 = vld [vmem:[#allocation5 + $0xc00] sm:$0xff] }
 0xa06   :  { %4520 = vmatprep.subr.bf16.mxu0 %v3924_v60  ;;  %v3960_v60 = vld [vmem:[#allocation5 + $0xc38] sm:$0xff] }
 0xa07   :  { %4863 = vmatpush1.bf16.msra.mxu1 %v3919_v58  ;;  %v3961_v58 = vld [vmem:[#allocation5 + $0xc40] sm:$0xff] }
 0xa08   :  { %4864 = vmatprep.subr.bf16.mxu1 %v3926_v8  ;;  %v3968_v8 = vld [vmem:[#allocation5 + $0xc78] sm:$0xff] }
 0xa09   :  { %4521 = vmatpush1.bf16.msra.mxu0 %v3923_v9  ;;  %v3965_v9 = vld [vmem:[#allocation5 + $0xc60] sm:$0xff] }
 0xa0a   :  { %4522 = vmatprep.subr.bf16.mxu0 %v3930_v41  ;;  %v3972_v41 = vld [vmem:[#allocation5 + $0xc98] sm:$0xff] }
 0xa0b   :  { %4865 = vmatpush1.bf16.msra.mxu1 %v3925_v13  ;;  %v3967_v13 = vld [vmem:[#allocation5 + $0xc70] sm:$0xff] }
 0xa0c   :  { %4866 = vmatprep.subr.bf16.mxu1 %v3932_v4  ;;  %v3974_v4 = vld [vmem:[#allocation5 + $0xca8] sm:$0xff] }
 0xa0d   :  { %4523 = vmatpush1.bf16.msra.mxu0 %v3929_v63  ;;  %v3971_v63 = vld [vmem:[#allocation5 + $0xc90] sm:$0xff] }
 0xa0e   :  { %4524 = vmatprep.subr.bf16.mxu0 %v3936_v3  ;;  %v3978_v3 = vld [vmem:[#allocation5 + $0xcc8] sm:$0xff] }
 0xa0f   :  { %4867 = vmatpush1.bf16.msra.mxu1 %v3931_v32  ;;  %v3973_v32 = vld [vmem:[#allocation5 + $0xca0] sm:$0xff] }
 0xa10   :  { %4868 = vmatprep.subr.bf16.mxu1 %v3938_v52  ;;  %v3980_v52 = vld [vmem:[#allocation5 + $0xcd8] sm:$0xff] }
 0xa11   :  { %4525 = vmatpush1.bf16.msra.mxu0 %v3935_v40  ;;  %v3977_v40 = vld [vmem:[#allocation5 + $0xcc0] sm:$0xff] }
 0xa12   :  { %4526 = vmatprep.subr.bf16.mxu0 %v3942_v54  ;;  %v3984_v54 = vld [vmem:[#allocation5 + $0xcf8] sm:$0xff] }
 0xa13   :  { %4869 = vmatpush1.bf16.msra.mxu1 %v3937_v21  ;;  %v3995_v21 = vld [vmem:[#allocation5 + $0xd50] sm:$0xff] }
 0xa14   :  { %4870 = vmatprep.subr.bf16.mxu1 %v3944_v42  ;;  %v4002_v42 = vld [vmem:[#allocation5 + $0xd88] sm:$0xff] }
 0xa15   :  { %4527 = vmatpush1.bf16.msra.mxu0 %v3941_v31  ;;  %v3983_v31 = vld [vmem:[#allocation5 + $0xcf0] sm:$0xff] }
 0xa16   :  { %4528 = vmatprep.subr.bf16.mxu0 %v3948_v44  ;;  %v3990_v44 = vld [vmem:[#allocation5 + $0xd28] sm:$0xff] }
 0xa17   :  { %4871 = vmatpush1.bf16.msra.mxu1 %v3943_v33  ;;  %v3991_v33 = vld [vmem:[#allocation5 + $0xd30] sm:$0xff] }
 0xa18   :  { %4872 = vmatprep.subr.bf16.mxu1 %v3950_v57  ;;  %v3998_v57 = vld [vmem:[#allocation5 + $0xd68] sm:$0xff] }
 0xa19   :  { %4529 = vmatpush1.bf16.msra.mxu0 %v3947_v12  ;;  %v3989_v12 = vld [vmem:[#allocation5 + $0xd20] sm:$0xff] }
 0xa1a   :  { %4541 = vmatprep.subr.bf16.mxu0 %v3954_v43  ;;  %v3996_v43 = vld [vmem:[#allocation5 + $0xd58] sm:$0xff] }
 0xa1b   :  { %4873 = vmatpush1.bf16.msra.mxu1 %v3949_v46  ;;  %v3997_v46 = vld [vmem:[#allocation5 + $0xd60] sm:$0xff] }
 0xa1c   :  { %4531 = vmatmul.mubr.bf16.vlgmr.msra.gmra.mrb[20].mxu0 %v6503_v53  ;;  %4885 = vmatprep.subr.bf16.mxu1 %v3956_v27  ;;  %v4004_v27 = vld [vmem:[#allocation5 + $0xd98] sm:$0xff] }
 0xa1d   :  { %4542 = vmatpush1.bf16.msra.mxu0 %v3953_v59  ;;  %4573 = vmatprep.mubr.bf16.mxu0 %v6509_v5  ;;  %v4001_v59 = vld [vmem:[#allocation5 + $0xd80] sm:$0xff] }
 0xa1e   :  { %4543 = vmatprep.subr.bf16.mxu0 %v3960_v60  ;;  %4875 = vmatmul.mubr.bf16.vlgmr.msra.gmra.mrb[36].mxu1 %v6503_v53  ;;  %v4008_v60 = vld [vmem:[#allocation5 + $0xdb8] sm:$0xff] }
 0xa1f   :  { %4886 = vmatpush1.bf16.msra.mxu1 %v3955_v48  ;;  %4917 = vmatprep.mubr.bf16.mxu1 %v6509_v5  ;;  %v4003_v48 = vld [vmem:[#allocation5 + $0xd90] sm:$0xff] }
 0xa20   :  { %4887 = vmatprep.subr.bf16.mxu1 %v3962_v0  ;;  %v4010_v0 = vld [vmem:[#allocation5 + $0xdc8] sm:$0xff] }
 0xa21   :  { %4544 = vmatpush1.bf16.msra.mxu0 %v3959_v2  ;;  %v4007_v2 = vld [vmem:[#allocation5 + $0xdb0] sm:$0xff] }
 0xa22   :  { %4545 = vmatprep.subr.bf16.mxu0 %v3966_v37  ;;  %v4014_v37 = vld [vmem:[#allocation5 + $0xde8] sm:$0xff] }
 0xa23   :  { %4888 = vmatpush1.bf16.msra.mxu1 %v3961_v58  ;;  %v4009_v58 = vld [vmem:[#allocation5 + $0xdc0] sm:$0xff] }
 0xa24   :  { %4889 = vmatprep.subr.bf16.mxu1 %v3968_v8  ;;  %v4016_v8 = vld [vmem:[#allocation5 + $0xdf8] sm:$0xff] }
 0xa25   :  { %4546 = vmatpush1.bf16.msra.mxu0 %v3965_v9  ;;  %v4013_v9 = vld [vmem:[#allocation5 + $0xde0] sm:$0xff] }
 0xa26   :  { %4547 = vmatprep.subr.bf16.mxu0 %v3972_v41  ;;  %v4020_v41 = vld [vmem:[#allocation5 + $0xe18] sm:$0xff] }
 0xa27   :  { %4890 = vmatpush1.bf16.msra.mxu1 %v3967_v13  ;;  %v4015_v13 = vld [vmem:[#allocation5 + $0xdf0] sm:$0xff] }
 0xa28   :  { %4891 = vmatprep.subr.bf16.mxu1 %v3974_v4  ;;  %v4022_v4 = vld [vmem:[#allocation5 + $0xe28] sm:$0xff] }
 0xa29   :  { %4548 = vmatpush1.bf16.msra.mxu0 %v3971_v63  ;;  %v4019_v63 = vld [vmem:[#allocation5 + $0xe10] sm:$0xff] }
 0xa2a   :  { %4549 = vmatprep.subr.bf16.mxu0 %v3978_v3  ;;  %v4026_v3 = vld [vmem:[#allocation5 + $0xe48] sm:$0xff] }
 0xa2b   :  { %4892 = vmatpush1.bf16.msra.mxu1 %v3973_v32  ;;  %v4021_v32 = vld [vmem:[#allocation5 + $0xe20] sm:$0xff] }
 0xa2c   :  { %4893 = vmatprep.subr.bf16.mxu1 %v3980_v52  ;;  %v4028_v52 = vld [vmem:[#allocation5 + $0xe58] sm:$0xff] }
 0xa2d   :  { %4550 = vmatpush1.bf16.msra.mxu0 %v3977_v40  ;;  %v4025_v40 = vld [vmem:[#allocation5 + $0xe40] sm:$0xff] }
 0xa2e   :  { %4551 = vmatprep.subr.bf16.mxu0 %v3984_v54  ;;  %v4032_v54 = vld [vmem:[#allocation5 + $0xe78] sm:$0xff] }
 0xa2f   :  { %4894 = vmatpush1.bf16.msra.mxu1 %v3979_v28  ;;  %v4027_v28 = vld [vmem:[#allocation5 + $0xe50] sm:$0xff] }
 0xa30   :  { %4895 = vmatprep.subr.bf16.mxu1 %v3986_v45  ;;  %v4034_v45 = vld [vmem:[#allocation5 + $0xe88] sm:$0xff] }
 0xa31   :  { %4552 = vmatpush1.bf16.msra.mxu0 %v3983_v31  ;;  %v4031_v31 = vld [vmem:[#allocation5 + $0xe70] sm:$0xff] }
 0xa32   :  { %4553 = vmatprep.subr.bf16.mxu0 %v3990_v44  ;;  %v4038_v44 = vld [vmem:[#allocation5 + $0xea8] sm:$0xff] }
 0xa33   :  { %4896 = vmatpush1.bf16.msra.mxu1 %v3985_v49  ;;  %v6652_v49 = vmax.f32 %v6385_v20, 0.0  ;;  %v4039_v20 = vld [vmem:[#allocation5 + $0xeb0] sm:$0xff] }
 0xa34   :  { %4897 = vmatprep.subr.bf16.mxu1 %v3992_v24  ;;  %v6653_v24 = vmax.f32 %v6395_v10, 0.0  ;;  %v4046_v10 = vld [vmem:[#allocation5 + $0xee8] sm:$0xff] }
 0xa35   :  { %4554 = vmatpush1.bf16.msra.mxu0 %v3989_v12  ;;  %v4037_v12 = vld [vmem:[#allocation5 + $0xea0] sm:$0xff] }
 0xa36   :  { %4555 = vmatprep.subr.bf16.mxu0 %v3996_v43  ;;  %v4044_v43 = vld [vmem:[#allocation5 + $0xed8] sm:$0xff] }
 0xa37   :  { %4898 = vmatpush1.bf16.msra.mxu1 %v3991_v33  ;;  %v4040_v33 = vld [vmem:[#allocation5 + $0xeb8] sm:$0xff] }
 0xa38   :  { %4899 = vmatprep.subr.bf16.mxu1 %v3998_v57  ;;  %v6654_v57 = vmax.f32 %v6391_v47, 0.0  ;;  %v4045_v47 = vld [vmem:[#allocation5 + $0xee0] sm:$0xff] }
 0xa39   :  { %4556 = vmatpush1.bf16.msra.mxu0 %v3995_v21  ;;  %v4043_v21 = vld [vmem:[#allocation5 + $0xed0] sm:$0xff] }
 0xa3a   :  { %4557 = vmatprep.subr.bf16.mxu0 %v4002_v42  ;;  %v4050_v42 = vld [vmem:[#allocation5 + $0xf08] sm:$0xff] }
 0xa3b   :  { %4900 = vmatpush1.bf16.msra.mxu1 %v3997_v46  ;;  %v4049_v46 = vld [vmem:[#allocation5 + $0xf00] sm:$0xff] }
 0xa3c   :  { %4901 = vmatprep.subr.bf16.mxu1 %v4004_v27  ;;  %v4056_v27 = vld [vmem:[#allocation5 + $0xf38] sm:$0xff] }
 0xa3d   :  { %4558 = vmatpush1.bf16.msra.mxu0 %v4001_v59  ;;  %v6519_v59 = vpack.c.bf16 %v6653_v24, %v6652_v49  ;;  %v4091_v49 = vld [vmem:[#allocation5 + $0x1050] sm:$0xff]  ;;  %v4098_v24 = vld [vmem:[#allocation5 + $0x1088] sm:$0xff] }
 0xa3e   :  { %4559 = vmatprep.subr.bf16.mxu0 %v4008_v60  ;;  %v4033_v60 = vld [vmem:[#allocation5 + $0xe80] sm:$0xff] }
 0xa3f   :  { %4902 = vmatpush1.bf16.msra.mxu1 %v4003_v48  ;;  %v4061_v48 = vld [vmem:[#allocation5 + $0xf60] sm:$0xff] }
 0xa40   :  { %4903 = vmatprep.subr.bf16.mxu1 %v4010_v0  ;;  %v4068_v0 = vld [vmem:[#allocation5 + $0xf98] sm:$0xff] }
 0xa41   :  { %4560 = vmatpush1.bf16.msra.mxu0 %v4007_v2  ;;  %v6655_v2 = vmax.f32 %v6403_v34, 0.0  ;;  %v4052_v34 = vld [vmem:[#allocation5 + $0xf18] sm:$0xff] }
 0xa42   :  { %4561 = vmatprep.subr.bf16.mxu0 %v4014_v37 }
 0xa43   :  { %4904 = vmatpush1.bf16.msra.mxu1 %v4009_v58  ;;  %v6525_v37 = vpack.c.bf16 %v6655_v2, %v6654_v57  ;;  %v4067_v58 = vld [vmem:[#allocation5 + $0xf90] sm:$0xff]  ;;  %v4097_v57 = vld [vmem:[#allocation5 + $0x1080] sm:$0xff]  ;;  %v4104_v2 = vld [vmem:[#allocation5 + $0x10b8] sm:$0xff] }
 0xa44   :  { %4905 = vmatprep.subr.bf16.mxu1 %v4016_v8  ;;  %v4074_v8 = vld [vmem:[#allocation5 + $0xfc8] sm:$0xff] }
 0xa45   :  { %4562 = vmatpush1.bf16.msra.mxu0 %v4013_v9  ;;  %v4055_v9 = vld [vmem:[#allocation5 + $0xf30] sm:$0xff] }
 0xa46   :  { %4563 = vmatprep.subr.bf16.mxu0 %v4020_v41  ;;  %v4062_v41 = vld [vmem:[#allocation5 + $0xf68] sm:$0xff] }
 0xa47   :  { %4906 = vmatpush1.bf16.msra.mxu1 %v4015_v13  ;;  %v4073_v13 = vld [vmem:[#allocation5 + $0xfc0] sm:$0xff] }
 0xa48   :  { %4907 = vmatprep.subr.bf16.mxu1 %v4022_v4  ;;  %v4080_v4 = vld [vmem:[#allocation5 + $0xff8] sm:$0xff] }
 0xa49   :  { %4564 = vmatpush1.bf16.msra.mxu0 %v4019_v63  ;;  %v4051_v63 = vld [vmem:[#allocation5 + $0xf10] sm:$0xff] }
 0xa4a   :  { %4565 = vmatprep.subr.bf16.mxu0 %v4026_v3  ;;  %v4058_v3 = vld [vmem:[#allocation5 + $0xf48] sm:$0xff] }
 0xa4b   :  { %4908 = vmatpush1.bf16.msra.mxu1 %v4021_v32  ;;  %v4079_v32 = vld [vmem:[#allocation5 + $0xff0] sm:$0xff] }
 0xa4c   :  { %4909 = vmatprep.subr.bf16.mxu1 %v4028_v52  ;;  %v4086_v52 = vld [vmem:[#allocation5 + $0x1028] sm:$0xff] }
 0xa4d   :  { %4566 = vmatpush1.bf16.msra.mxu0 %v4025_v40  ;;  %v4057_v40 = vld [vmem:[#allocation5 + $0xf40] sm:$0xff] }
 0xa4e   :  { %4567 = vmatprep.subr.bf16.mxu0 %v4032_v54  ;;  %v4064_v54 = vld [vmem:[#allocation5 + $0xf78] sm:$0xff] }
 0xa4f   :  { %4910 = vmatpush1.bf16.msra.mxu1 %v4027_v28  ;;  %v4085_v28 = vld [vmem:[#allocation5 + $0x1020] sm:$0xff] }
 0xa50   :  { %4911 = vmatprep.subr.bf16.mxu1 %v4034_v45  ;;  %v4092_v45 = vld [vmem:[#allocation5 + $0x1058] sm:$0xff] }
 0xa51   :  { %4568 = vmatpush1.bf16.msra.mxu0 %v4031_v31  ;;  %v4063_v31 = vld [vmem:[#allocation5 + $0xf70] sm:$0xff] }
 0xa52   :  { %4569 = vmatprep.subr.bf16.mxu0 %v4038_v44  ;;  %v4070_v44 = vld [vmem:[#allocation5 + $0xfa8] sm:$0xff] }
 0xa53   :  { %4912 = vmatpush1.bf16.msra.mxu1 %v4033_v60  ;;  %v4081_v60 = vld [vmem:[#allocation5 + $0x1000] sm:$0xff] }
 0xa54   :  { %4913 = vmatprep.subr.bf16.mxu1 %v4040_v33  ;;  %v4088_v33 = vld [vmem:[#allocation5 + $0x1038] sm:$0xff] }
 0xa55   :  { %4570 = vmatpush1.bf16.msra.mxu0 %v4037_v12  ;;  %v4069_v12 = vld [vmem:[#allocation5 + $0xfa0] sm:$0xff] }
 0xa56   :  { %4571 = vmatprep.subr.bf16.mxu0 %v4044_v43  ;;  %v4076_v43 = vld [vmem:[#allocation5 + $0xfd8] sm:$0xff] }
 0xa57   :  { %4914 = vmatpush1.bf16.msra.mxu1 %v4039_v20  ;;  %v4103_v20 = vld [vmem:[#allocation5 + $0x10b0] sm:$0xff] }
 0xa58   :  { %4915 = vmatprep.subr.bf16.mxu1 %v4046_v10  ;;  %v4110_v10 = vld [vmem:[#allocation5 + $0x10e8] sm:$0xff] }
 0xa59   :  { %4572 = vmatpush1.bf16.msra.mxu0 %v4043_v21  ;;  %v4075_v21 = vld [vmem:[#allocation5 + $0xfd0] sm:$0xff] }
 0xa5a   :  { %4584 = vmatprep.subr.bf16.mxu0 %v4050_v42  ;;  %v4082_v42 = vld [vmem:[#allocation5 + $0x1008] sm:$0xff] }
 0xa5b   :  { %4916 = vmatpush1.bf16.msra.mxu1 %v4045_v47  ;;  %v4109_v47 = vld [vmem:[#allocation5 + $0x10e0] sm:$0xff] }
 0xa5c   :  { %4574 = vmatmul.mubr.bf16.vlgmr.msra.gmra.mrb[20].mxu0 %v6519_v59  ;;  %4928 = vmatprep.subr.bf16.mxu1 %v4052_v34  ;;  %v4116_v34 = vld [vmem:[#allocation5 + $0x1118] sm:$0xff] }
 0xa5d   :  { %4585 = vmatpush1.bf16.msra.mxu0 %v4049_v46  ;;  %4616 = vmatprep.mubr.bf16.mxu0 %v6525_v37  ;;  %v4087_v46 = vld [vmem:[#allocation5 + $0x1030] sm:$0xff] }
 0xa5e   :  { %4586 = vmatprep.subr.bf16.mxu0 %v4056_v27  ;;  %4918 = vmatmul.mubr.bf16.vlgmr.msra.gmra.mrb[36].mxu1 %v6519_v59  ;;  %v4094_v27 = vld [vmem:[#allocation5 + $0x1068] sm:$0xff] }
 0xa5f   :  { %4929 = vmatpush1.bf16.msra.mxu1 %v4051_v63  ;;  %4960 = vmatprep.mubr.bf16.mxu1 %v6525_v37  ;;  %v4115_v63 = vld [vmem:[#allocation5 + $0x1110] sm:$0xff] }
 0xa60   :  { %4930 = vmatprep.subr.bf16.mxu1 %v4058_v3  ;;  %v4122_v3 = vld [vmem:[#allocation5 + $0x1148] sm:$0xff] }
 0xa61   :  { %4587 = vmatpush1.bf16.msra.mxu0 %v4055_v9  ;;  %v4093_v9 = vld [vmem:[#allocation5 + $0x1060] sm:$0xff] }
 0xa62   :  { %4588 = vmatprep.subr.bf16.mxu0 %v4062_v41  ;;  %v4100_v41 = vld [vmem:[#allocation5 + $0x1098] sm:$0xff] }
 0xa63   :  { %4931 = vmatpush1.bf16.msra.mxu1 %v4057_v40  ;;  %v4121_v40 = vld [vmem:[#allocation5 + $0x1140] sm:$0xff] }
 0xa64   :  { %4932 = vmatprep.subr.bf16.mxu1 %v4064_v54  ;;  %v4128_v54 = vld [vmem:[#allocation5 + $0x1178] sm:$0xff] }
 0xa65   :  { %4589 = vmatpush1.bf16.msra.mxu0 %v4061_v48  ;;  %v4099_v48 = vld [vmem:[#allocation5 + $0x1090] sm:$0xff] }
 0xa66   :  { %4590 = vmatprep.subr.bf16.mxu0 %v4068_v0  ;;  %v4106_v0 = vld [vmem:[#allocation5 + $0x10c8] sm:$0xff] }
 0xa67   :  { %4933 = vmatpush1.bf16.msra.mxu1 %v4063_v31  ;;  %v4127_v31 = vld [vmem:[#allocation5 + $0x1170] sm:$0xff] }
 0xa68   :  { %4934 = vmatprep.subr.bf16.mxu1 %v4070_v44  ;;  %v4134_v44 = vld [vmem:[#allocation5 + $0x11a8] sm:$0xff] }
 0xa69   :  { %4591 = vmatpush1.bf16.msra.mxu0 %v4067_v58  ;;  %v4105_v58 = vld [vmem:[#allocation5 + $0x10c0] sm:$0xff] }
 0xa6a   :  { %4592 = vmatprep.subr.bf16.mxu0 %v4074_v8  ;;  %v4112_v8 = vld [vmem:[#allocation5 + $0x10f8] sm:$0xff] }
 0xa6b   :  { %4935 = vmatpush1.bf16.msra.mxu1 %v4069_v12  ;;  %v4133_v12 = vld [vmem:[#allocation5 + $0x11a0] sm:$0xff] }
 0xa6c   :  { %4936 = vmatprep.subr.bf16.mxu1 %v4076_v43  ;;  %v4140_v43 = vld [vmem:[#allocation5 + $0x11d8] sm:$0xff] }
 0xa6d   :  { %4593 = vmatpush1.bf16.msra.mxu0 %v4073_v13  ;;  %v4111_v13 = vld [vmem:[#allocation5 + $0x10f0] sm:$0xff] }
 0xa6e   :  { %4594 = vmatprep.subr.bf16.mxu0 %v4080_v4  ;;  %v4118_v4 = vld [vmem:[#allocation5 + $0x1128] sm:$0xff] }
 0xa6f   :  { %4937 = vmatpush1.bf16.msra.mxu1 %v4075_v21  ;;  %v4139_v21 = vld [vmem:[#allocation5 + $0x11d0] sm:$0xff] }
 0xa70   :  { %4938 = vmatprep.subr.bf16.mxu1 %v4082_v42  ;;  %v4146_v42 = vld [vmem:[#allocation5 + $0x1208] sm:$0xff] }
 0xa71   :  { %4595 = vmatpush1.bf16.msra.mxu0 %v4079_v32  ;;  %v4117_v32 = vld [vmem:[#allocation5 + $0x1120] sm:$0xff] }
 0xa72   :  { %4596 = vmatprep.subr.bf16.mxu0 %v4086_v52  ;;  %v4124_v52 = vld [vmem:[#allocation5 + $0x1158] sm:$0xff] }
 0xa73   :  { %4939 = vmatpush1.bf16.msra.mxu1 %v4081_v60 }
 0xa74   :  { %4940 = vmatprep.subr.bf16.mxu1 %v4088_v33  ;;  %v4129_v33 = vld [vmem:[#allocation5 + $0x1180] sm:$0xff] }
 0xa75   :  { %4597 = vmatpush1.bf16.msra.mxu0 %v4085_v28  ;;  %v4123_v28 = vld [vmem:[#allocation5 + $0x1150] sm:$0xff] }
 0xa76   :  { %4598 = vmatprep.subr.bf16.mxu0 %v4092_v45  ;;  %v4130_v45 = vld [vmem:[#allocation5 + $0x1188] sm:$0xff] }
 0xa77   :  { %4941 = vmatpush1.bf16.msra.mxu1 %v4087_v46  ;;  %v4145_v46 = vld [vmem:[#allocation5 + $0x1200] sm:$0xff] }
 0xa78   :  { %4942 = vmatprep.subr.bf16.mxu1 %v4094_v27  ;;  %v4152_v27 = vld [vmem:[#allocation5 + $0x1238] sm:$0xff] }
 0xa79   :  { %4599 = vmatpush1.bf16.msra.mxu0 %v4091_v49  ;;  %v6656_v49 = vmax.f32 %v6387_v50, 0.0  ;;  %v4135_v50 = vld [vmem:[#allocation5 + $0x11b0] sm:$0xff] }
 0xa7a   :  { %4600 = vmatprep.subr.bf16.mxu0 %v4098_v24  ;;  %v6657_v24 = vmax.f32 %v6397_v56, 0.0  ;;  %v4142_v56 = vld [vmem:[#allocation5 + $0x11e8] sm:$0xff] }
 0xa7b   :  { %4943 = vmatpush1.bf16.msra.mxu1 %v4093_v9  ;;  %v4147_v9 = vld [vmem:[#allocation5 + $0x1210] sm:$0xff] }
 0xa7c   :  { %4944 = vmatprep.subr.bf16.mxu1 %v4100_v41  ;;  %v6535_v60 = vpack.c.bf16 %v6657_v24, %v6656_v49  ;;  %v4154_v41 = vld [vmem:[#allocation5 + $0x1248] sm:$0xff]  ;;  %v4183_v49 = vld [vmem:[#allocation5 + $0x1330] sm:$0xff] }
 0xa7d   :  { %4601 = vmatpush1.bf16.msra.mxu0 %v4097_v57  ;;  %v4136_v57 = vld [vmem:[#allocation5 + $0x11b8] sm:$0xff]  ;;  %v4190_v24 = vld [vmem:[#allocation5 + $0x1368] sm:$0xff] }
 0xa7e   :  { %4602 = vmatprep.subr.bf16.mxu0 %v4104_v2  ;;  %v6541_v2 = vpack.c.bf16 %v3546_v36, %v3530_v29  ;;  %v4148_v36 = vld [vmem:[#allocation5 + $0x1218] sm:$0xff]  ;;  %v4157_v29 = vld [vmem:[#allocation5 + $0x1260] sm:$0xff] }
 0xa7f   :  { %4945 = vmatpush1.bf16.msra.mxu1 %v4099_v48  ;;  %v4153_v48 = vld [vmem:[#allocation5 + $0x1240] sm:$0xff] }
 0xa80   :  { %4946 = vmatprep.subr.bf16.mxu1 %v4106_v0  ;;  %v4160_v0 = vld [vmem:[#allocation5 + $0x1278] sm:$0xff] }
 0xa81   :  { %4603 = vmatpush1.bf16.msra.mxu0 %v4103_v20  ;;  %v4151_v20 = vld [vmem:[#allocation5 + $0x1230] sm:$0xff] }
 0xa82   :  { %4604 = vmatprep.subr.bf16.mxu0 %v4110_v10  ;;  %v4158_v10 = vld [vmem:[#allocation5 + $0x1268] sm:$0xff] }
 0xa83   :  { %4947 = vmatpush1.bf16.msra.mxu1 %v4105_v58  ;;  %v4159_v58 = vld [vmem:[#allocation5 + $0x1270] sm:$0xff] }
 0xa84   :  { %4948 = vmatprep.subr.bf16.mxu1 %v4112_v8  ;;  %v4166_v8 = vld [vmem:[#allocation5 + $0x12a8] sm:$0xff] }
 0xa85   :  { %4605 = vmatpush1.bf16.msra.mxu0 %v4109_v47  ;;  %v4163_v47 = vld [vmem:[#allocation5 + $0x1290] sm:$0xff] }
 0xa86   :  { %4606 = vmatprep.subr.bf16.mxu0 %v4116_v34  ;;  %v4170_v34 = vld [vmem:[#allocation5 + $0x12c8] sm:$0xff] }
 0xa87   :  { %4949 = vmatpush1.bf16.msra.mxu1 %v4111_v13  ;;  %v4165_v13 = vld [vmem:[#allocation5 + $0x12a0] sm:$0xff] }
 0xa88   :  { %4950 = vmatprep.subr.bf16.mxu1 %v4118_v4  ;;  %v4172_v4 = vld [vmem:[#allocation5 + $0x12d8] sm:$0xff] }
 0xa89   :  { %4607 = vmatpush1.bf16.msra.mxu0 %v4115_v63  ;;  %v4169_v63 = vld [vmem:[#allocation5 + $0x12c0] sm:$0xff] }
 0xa8a   :  { %4608 = vmatprep.subr.bf16.mxu0 %v4122_v3  ;;  %v4176_v3 = vld [vmem:[#allocation5 + $0x12f8] sm:$0xff] }
 0xa8b   :  { %4951 = vmatpush1.bf16.msra.mxu1 %v4117_v32  ;;  %v4171_v32 = vld [vmem:[#allocation5 + $0x12d0] sm:$0xff] }
 0xa8c   :  { %4952 = vmatprep.subr.bf16.mxu1 %v4124_v52  ;;  %v4178_v52 = vld [vmem:[#allocation5 + $0x1308] sm:$0xff] }
 0xa8d   :  { %4609 = vmatpush1.bf16.msra.mxu0 %v4121_v40  ;;  %v4175_v40 = vld [vmem:[#allocation5 + $0x12f0] sm:$0xff] }
 0xa8e   :  { %4610 = vmatprep.subr.bf16.mxu0 %v4128_v54  ;;  %v4182_v54 = vld [vmem:[#allocation5 + $0x1328] sm:$0xff] }
 0xa8f   :  { %4953 = vmatpush1.bf16.msra.mxu1 %v4123_v28  ;;  %v4177_v28 = vld [vmem:[#allocation5 + $0x1300] sm:$0xff] }
 0xa90   :  { %4954 = vmatprep.subr.bf16.mxu1 %v4130_v45  ;;  %v4184_v45 = vld [vmem:[#allocation5 + $0x1338] sm:$0xff] }
 0xa91   :  { %4611 = vmatpush1.bf16.msra.mxu0 %v4127_v31  ;;  %v4181_v31 = vld [vmem:[#allocation5 + $0x1320] sm:$0xff] }
 0xa92   :  { %4612 = vmatprep.subr.bf16.mxu0 %v4134_v44  ;;  %v4188_v44 = vld [vmem:[#allocation5 + $0x1358] sm:$0xff] }
 0xa93   :  { %4955 = vmatpush1.bf16.msra.mxu1 %v4129_v33  ;;  %v4199_v33 = vld [vmem:[#allocation5 + $0x13b0] sm:$0xff] }
 0xa94   :  { %4956 = vmatprep.subr.bf16.mxu1 %v4136_v57  ;;  %v4206_v57 = vld [vmem:[#allocation5 + $0x13e8] sm:$0xff] }
 0xa95   :  { %4613 = vmatpush1.bf16.msra.mxu0 %v4133_v12  ;;  %v4187_v12 = vld [vmem:[#allocation5 + $0x1350] sm:$0xff] }
 0xa96   :  { %4614 = vmatprep.subr.bf16.mxu0 %v4140_v43  ;;  %v4194_v43 = vld [vmem:[#allocation5 + $0x1388] sm:$0xff] }
 0xa97   :  { %4957 = vmatpush1.bf16.msra.mxu1 %v4135_v50  ;;  %v4205_v50 = vld [vmem:[#allocation5 + $0x13e0] sm:$0xff] }
 0xa98   :  { %4958 = vmatprep.subr.bf16.mxu1 %v4142_v56  ;;  %v4212_v56 = vld [vmem:[#allocation5 + $0x1418] sm:$0xff] }
 0xa99   :  { %4615 = vmatpush1.bf16.msra.mxu0 %v4139_v21  ;;  %v4193_v21 = vld [vmem:[#allocation5 + $0x1380] sm:$0xff] }
 0xa9a   :  { %4627 = vmatprep.subr.bf16.mxu0 %v4146_v42  ;;  %v4200_v42 = vld [vmem:[#allocation5 + $0x13b8] sm:$0xff] }
 0xa9b   :  { %4959 = vmatpush1.bf16.msra.mxu1 %v4141_v30  ;;  %v4211_v30 = vld [vmem:[#allocation5 + $0x1410] sm:$0xff] }
 0xa9c   :  { %4617 = vmatmul.mubr.bf16.vlgmr.msra.gmra.mrb[20].mxu0 %v6535_v60  ;;  %4971 = vmatprep.subr.bf16.mxu1 %v4148_v36  ;;  %v4218_v36 = vld [vmem:[#allocation5 + $0x1448] sm:$0xff] }
 0xa9d   :  { %4628 = vmatpush1.bf16.msra.mxu0 %v4145_v46  ;;  %4659 = vmatprep.mubr.bf16.mxu0 %v6541_v2  ;;  %v4189_v46 = vld [vmem:[#allocation5 + $0x1360] sm:$0xff] }
 0xa9e   :  { %4629 = vmatprep.subr.bf16.mxu0 %v4152_v27  ;;  %4961 = vmatmul.mubr.bf16.vlgmr.msra.gmra.mrb[36].mxu1 %v6535_v60  ;;  %v4196_v27 = vld [vmem:[#allocation5 + $0x1398] sm:$0xff] }
 0xa9f   :  { %4972 = vmatpush1.bf16.msra.mxu1 %v4147_v9  ;;  %5003 = vmatprep.mubr.bf16.mxu1 %v6541_v2  ;;  %v4217_v9 = vld [vmem:[#allocation5 + $0x1440] sm:$0xff] }
 0xaa0   :  { %4973 = vmatprep.subr.bf16.mxu1 %v4154_v41  ;;  %v4224_v41 = vld [vmem:[#allocation5 + $0x1478] sm:$0xff] }
 0xaa1   :  { %4630 = vmatpush1.bf16.msra.mxu0 %v4151_v20  ;;  %v4195_v20 = vld [vmem:[#allocation5 + $0x1390] sm:$0xff] }
 0xaa2   :  { %4631 = vmatprep.subr.bf16.mxu0 %v4158_v10  ;;  %v4202_v10 = vld [vmem:[#allocation5 + $0x13c8] sm:$0xff] }
 0xaa3   :  { %4974 = vmatpush1.bf16.msra.mxu1 %v4153_v48  ;;  %v4223_v48 = vld [vmem:[#allocation5 + $0x1470] sm:$0xff] }
 0xaa4   :  { %4975 = vmatprep.subr.bf16.mxu1 %v4160_v0  ;;  %v4230_v0 = vld [vmem:[#allocation5 + $0x14a8] sm:$0xff] }
 0xaa5   :  { %4632 = vmatpush1.bf16.msra.mxu0 %v4157_v29  ;;  %v4201_v29 = vld [vmem:[#allocation5 + $0x13c0] sm:$0xff] }
 0xaa6   :  { %4633 = vmatprep.subr.bf16.mxu0 %v4164_v51  ;;  %v4208_v51 = vld [vmem:[#allocation5 + $0x13f8] sm:$0xff] }
 0xaa7   :  { %4976 = vmatpush1.bf16.msra.mxu1 %v4159_v58  ;;  %v4229_v58 = vld [vmem:[#allocation5 + $0x14a0] sm:$0xff] }
 0xaa8   :  { %4977 = vmatprep.subr.bf16.mxu1 %v4166_v8  ;;  %v4236_v8 = vld [vmem:[#allocation5 + $0x14d8] sm:$0xff] }
 0xaa9   :  { %4634 = vmatpush1.bf16.msra.mxu0 %v4163_v47  ;;  %v4207_v47 = vld [vmem:[#allocation5 + $0x13f0] sm:$0xff] }
 0xaaa   :  { %4635 = vmatprep.subr.bf16.mxu0 %v4170_v34  ;;  %v4214_v34 = vld [vmem:[#allocation5 + $0x1428] sm:$0xff] }
 0xaab   :  { %4978 = vmatpush1.bf16.msra.mxu1 %v4165_v13  ;;  %v4235_v13 = vld [vmem:[#allocation5 + $0x14d0] sm:$0xff] }
 0xaac   :  { %4979 = vmatprep.subr.bf16.mxu1 %v4172_v4  ;;  %v4242_v4 = vld [vmem:[#allocation5 + $0x1508] sm:$0xff] }
 0xaad   :  { %4636 = vmatpush1.bf16.msra.mxu0 %v4169_v63  ;;  %v4213_v63 = vld [vmem:[#allocation5 + $0x1420] sm:$0xff] }
 0xaae   :  { %4637 = vmatprep.subr.bf16.mxu0 %v4176_v3  ;;  %v4220_v3 = vld [vmem:[#allocation5 + $0x1458] sm:$0xff] }
 0xaaf   :  { %4980 = vmatpush1.bf16.msra.mxu1 %v4171_v32  ;;  %v4225_v32 = vld [vmem:[#allocation5 + $0x1480] sm:$0xff] }
 0xab0   :  { %4981 = vmatprep.subr.bf16.mxu1 %v4178_v52  ;;  %v4232_v52 = vld [vmem:[#allocation5 + $0x14b8] sm:$0xff] }
 0xab1   :  { %4638 = vmatpush1.bf16.msra.mxu0 %v4175_v40  ;;  %v4219_v40 = vld [vmem:[#allocation5 + $0x1450] sm:$0xff] }
 0xab2   :  { %4639 = vmatprep.subr.bf16.mxu0 %v4182_v54  ;;  %v4226_v54 = vld [vmem:[#allocation5 + $0x1488] sm:$0xff] }
 0xab3   :  { %4982 = vmatpush1.bf16.msra.mxu1 %v4177_v28 }
 0xab4   :  { %4983 = vmatprep.subr.bf16.mxu1 %v4184_v45  ;;  %v4241_v45 = vld [vmem:[#allocation5 + $0x1500] sm:$0xff] }
 0xab5   :  { %4640 = vmatpush1.bf16.msra.mxu0 %v4181_v31  ;;  %v6658_v31 = vmax.f32 %v6419_v15, 0.0  ;;  %v4247_v15 = vld [vmem:[#allocation5 + $0x1530] sm:$0xff] }
 0xab6   :  { %4641 = vmatprep.subr.bf16.mxu0 %v4188_v44 }
 0xab7   :  { %4984 = vmatpush1.bf16.msra.mxu1 %v4183_v49  ;;  %v6551_v44 = vpack.c.bf16 %v3545_v18, %v6658_v31  ;;  %v4238_v18 = vld [vmem:[#allocation5 + $0x14e8] sm:$0xff]  ;;  %v4253_v49 = vld [vmem:[#allocation5 + $0x1560] sm:$0xff]  ;;  %v4295_v31 = vld [vmem:[#allocation5 + $0x16b0] sm:$0xff] }
 0xab8   :  { %4985 = vmatprep.subr.bf16.mxu1 %v4190_v24  ;;  %v4260_v24 = vld [vmem:[#allocation5 + $0x1598] sm:$0xff] }
 0xab9   :  { %4642 = vmatpush1.bf16.msra.mxu0 %v4187_v12  ;;  %v6659_v12 = vmax.f32 %v6425_v7, 0.0  ;;  %v4237_v7 = vld [vmem:[#allocation5 + $0x14e0] sm:$0xff] }
 0xaba   :  { %4643 = vmatprep.subr.bf16.mxu0 %v4194_v43  ;;  %v6660_v43 = vmax.f32 %v6437_v16, 0.0  ;;  %v4244_v16 = vld [vmem:[#allocation5 + $0x1518] sm:$0xff] }
 0xabb   :  { %4986 = vmatpush1.bf16.msra.mxu1 %v4189_v46  ;;  %v4259_v46 = vld [vmem:[#allocation5 + $0x1590] sm:$0xff] }
 0xabc   :  { %4987 = vmatprep.subr.bf16.mxu1 %v4196_v27  ;;  %v6557_v28 = vpack.c.bf16 %v6660_v43, %v6659_v12  ;;  %v4266_v27 = vld [vmem:[#allocation5 + $0x15c8] sm:$0xff]  ;;  %v4292_v12 = vld [vmem:[#allocation5 + $0x1698] sm:$0xff]  ;;  %v4301_v43 = vld [vmem:[#allocation5 + $0x16e0] sm:$0xff] }
 0xabd   :  { %4644 = vmatpush1.bf16.msra.mxu0 %v4193_v21  ;;  %v4248_v21 = vld [vmem:[#allocation5 + $0x1538] sm:$0xff] }
 0xabe   :  { %4645 = vmatprep.subr.bf16.mxu0 %v4200_v42  ;;  %v4254_v42 = vld [vmem:[#allocation5 + $0x1568] sm:$0xff] }
 0xabf   :  { %4988 = vmatpush1.bf16.msra.mxu1 %v4195_v20  ;;  %v4265_v20 = vld [vmem:[#allocation5 + $0x15c0] sm:$0xff] }
 0xac0   :  { %4989 = vmatprep.subr.bf16.mxu1 %v4202_v10  ;;  %v4272_v10 = vld [vmem:[#allocation5 + $0x15f8] sm:$0xff] }
 0xac1   :  { %4646 = vmatpush1.bf16.msra.mxu0 %v4199_v33  ;;  %v4243_v33 = vld [vmem:[#allocation5 + $0x1510] sm:$0xff] }
 0xac2   :  { %4647 = vmatprep.subr.bf16.mxu0 %v4206_v57  ;;  %v4250_v57 = vld [vmem:[#allocation5 + $0x1548] sm:$0xff] }
 0xac3   :  { %4990 = vmatpush1.bf16.msra.mxu1 %v4201_v29  ;;  %v4271_v29 = vld [vmem:[#allocation5 + $0x15f0] sm:$0xff] }
 0xac4   :  { %4991 = vmatprep.subr.bf16.mxu1 %v4208_v51  ;;  %v4278_v51 = vld [vmem:[#allocation5 + $0x1628] sm:$0xff] }
 0xac5   :  { %4648 = vmatpush1.bf16.msra.mxu0 %v4205_v50  ;;  %v4249_v50 = vld [vmem:[#allocation5 + $0x1540] sm:$0xff] }
 0xac6   :  { %4649 = vmatprep.subr.bf16.mxu0 %v4212_v56  ;;  %v4256_v56 = vld [vmem:[#allocation5 + $0x1578] sm:$0xff] }
 0xac7   :  { %4992 = vmatpush1.bf16.msra.mxu1 %v4207_v47  ;;  %v4277_v47 = vld [vmem:[#allocation5 + $0x1620] sm:$0xff] }
 0xac8   :  { %4993 = vmatprep.subr.bf16.mxu1 %v4214_v34  ;;  %v4284_v34 = vld [vmem:[#allocation5 + $0x1658] sm:$0xff] }
 0xac9   :  { %4650 = vmatpush1.bf16.msra.mxu0 %v4211_v30  ;;  %v4255_v30 = vld [vmem:[#allocation5 + $0x1570] sm:$0xff] }
 0xaca   :  { %4651 = vmatprep.subr.bf16.mxu0 %v4218_v36  ;;  %v4262_v36 = vld [vmem:[#allocation5 + $0x15a8] sm:$0xff] }
 0xacb   :  { %4994 = vmatpush1.bf16.msra.mxu1 %v4213_v63  ;;  %v4283_v63 = vld [vmem:[#allocation5 + $0x1650] sm:$0xff] }
 0xacc   :  { %4995 = vmatprep.subr.bf16.mxu1 %v4220_v3  ;;  %v4290_v3 = vld [vmem:[#allocation5 + $0x1688] sm:$0xff] }
 0xacd   :  { %4652 = vmatpush1.bf16.msra.mxu0 %v4217_v9  ;;  %v4261_v9 = vld [vmem:[#allocation5 + $0x15a0] sm:$0xff] }
 0xace   :  { %4653 = vmatprep.subr.bf16.mxu0 %v4224_v41  ;;  %v4268_v41 = vld [vmem:[#allocation5 + $0x15d8] sm:$0xff] }
 0xacf   :  { %4996 = vmatpush1.bf16.msra.mxu1 %v4219_v40  ;;  %v4289_v40 = vld [vmem:[#allocation5 + $0x1680] sm:$0xff] }
 0xad0   :  { %4997 = vmatprep.subr.bf16.mxu1 %v4226_v54  ;;  %v4296_v54 = vld [vmem:[#allocation5 + $0x16b8] sm:$0xff] }
 0xad1   :  { %4654 = vmatpush1.bf16.msra.mxu0 %v4223_v48  ;;  %v4267_v48 = vld [vmem:[#allocation5 + $0x15d0] sm:$0xff] }
 0xad2   :  { %4655 = vmatprep.subr.bf16.mxu0 %v4230_v0  ;;  %v4274_v0 = vld [vmem:[#allocation5 + $0x1608] sm:$0xff] }
 0xad3   :  { %4998 = vmatpush1.bf16.msra.mxu1 %v4225_v32  ;;  %v4302_v32 = vld [vmem:[#allocation5 + $0x16e8] sm:$0xff] }
 0xad4   :  { %4999 = vmatprep.subr.bf16.mxu1 %v4232_v52  ;;  %v4285_v52 = vld [vmem:[#allocation5 + $0x1660] sm:$0xff] }
 0xad5   :  { %4656 = vmatpush1.bf16.msra.mxu0 %v4229_v58  ;;  %v4273_v58 = vld [vmem:[#allocation5 + $0x1600] sm:$0xff] }
 0xad6   :  { %4657 = vmatprep.subr.bf16.mxu0 %v4236_v8  ;;  %v4280_v8 = vld [vmem:[#allocation5 + $0x1638] sm:$0xff] }
 0xad7   :  { %5000 = vmatpush1.bf16.msra.mxu1 %v4231_v6  ;;  %v4298_v6 = vld [vmem:[#allocation5 + $0x16c8] sm:$0xff] }
 0xad8   :  { %5001 = vmatprep.subr.bf16.mxu1 %v4238_v18  ;;  %v4307_v18 = vld [vmem:[#allocation5 + $0x1710] sm:$0xff] }
 0xad9   :  { %4658 = vmatpush1.bf16.msra.mxu0 %v4235_v13  ;;  %v4279_v13 = vld [vmem:[#allocation5 + $0x1630] sm:$0xff] }
 0xada   :  { %4670 = vmatprep.subr.bf16.mxu0 %v4242_v4  ;;  %v4286_v4 = vld [vmem:[#allocation5 + $0x1668] sm:$0xff] }
 0xadb   :  { %5002 = vmatpush1.bf16.msra.mxu1 %v4237_v7  ;;  %v4304_v7 = vld [vmem:[#allocation5 + $0x16f8] sm:$0xff] }
 0xadc   :  { %4660 = vmatmul.mubr.bf16.vlgmr.msra.gmra.mrb[20].mxu0 %v6551_v44  ;;  %5014 = vmatprep.subr.bf16.mxu1 %v4244_v16  ;;  %v4313_v16 = vld [vmem:[#allocation5 + $0x1740] sm:$0xff] }
 0xadd   :  { %4671 = vmatpush1.bf16.msra.mxu0 %v4241_v45  ;;  %4702 = vmatprep.mubr.bf16.mxu0 %v6557_v28  ;;  %v4308_v45 = vld [vmem:[#allocation5 + $0x1718] sm:$0xff] }
 0xade   :  { %4672 = vmatprep.subr.bf16.mxu0 %v4248_v21  ;;  %5004 = vmatmul.mubr.bf16.vlgmr.msra.gmra.mrb[36].mxu1 %v6551_v44  ;;  %v4291_v21 = vld [vmem:[#allocation5 + $0x1690] sm:$0xff] }
 0xadf   :  { %5015 = vmatpush1.bf16.msra.mxu1 %v4243_v33  ;;  %5046 = vmatprep.mubr.bf16.mxu1 %v6557_v28  ;;  %v4310_v33 = vld [vmem:[#allocation5 + $0x1728] sm:$0xff] }
 0xae0   :  { %5016 = vmatprep.subr.bf16.mxu1 %v4250_v57  ;;  %v4319_v57 = vld [vmem:[#allocation5 + $0x1770] sm:$0xff] }
 0xae1   :  { %4673 = vmatpush1.bf16.msra.mxu0 %v4247_v15  ;;  %v4314_v15 = vld [vmem:[#allocation5 + $0x1748] sm:$0xff] }
 0xae2   :  { %4674 = vmatprep.subr.bf16.mxu0 %v4254_v42  ;;  %v4297_v42 = vld [vmem:[#allocation5 + $0x16c0] sm:$0xff] }
 0xae3   :  { %5017 = vmatpush1.bf16.msra.mxu1 %v4249_v50  ;;  %v4316_v50 = vld [vmem:[#allocation5 + $0x1758] sm:$0xff] }
 0xae4   :  { %5018 = vmatprep.subr.bf16.mxu1 %v4256_v56  ;;  %v4325_v56 = vld [vmem:[#allocation5 + $0x17a0] sm:$0xff] }
 0xae5   :  { %4675 = vmatpush1.bf16.msra.mxu0 %v4253_v49  ;;  %v4320_v49 = vld [vmem:[#allocation5 + $0x1778] sm:$0xff] }
 0xae6   :  { %4676 = vmatprep.subr.bf16.mxu0 %v4260_v24  ;;  %v4303_v24 = vld [vmem:[#allocation5 + $0x16f0] sm:$0xff] }
 0xae7   :  { %5019 = vmatpush1.bf16.msra.mxu1 %v4255_v30  ;;  %v4322_v30 = vld [vmem:[#allocation5 + $0x1788] sm:$0xff] }
 0xae8   :  { %5020 = vmatprep.subr.bf16.mxu1 %v4262_v36  ;;  %v4331_v36 = vld [vmem:[#allocation5 + $0x17d0] sm:$0xff] }
 0xae9   :  { %4677 = vmatpush1.bf16.msra.mxu0 %v4259_v46  ;;  %v4326_v46 = vld [vmem:[#allocation5 + $0x17a8] sm:$0xff] }
 0xaea   :  { %4678 = vmatprep.subr.bf16.mxu0 %v4266_v27  ;;  %v4309_v27 = vld [vmem:[#allocation5 + $0x1720] sm:$0xff] }
 0xaeb   :  { %5021 = vmatpush1.bf16.msra.mxu1 %v4261_v9  ;;  %v6662_v9 = vmax.f32 %v6431_v39, 0.0  ;;  %v3586_v39 = vld [vmem:[#allocation5 + $0x88] sm:$0xff] }
 0xaec   :  { %5022 = vmatprep.subr.bf16.mxu1 %v4268_v41 }
 0xaed   :  { %4679 = vmatpush1.bf16.msra.mxu0 %v4265_v20  ;;  %v4332_v20 = vld [vmem:[#allocation5 + $0x17d8] sm:$0xff] }
 0xaee   :  { %4680 = vmatprep.subr.bf16.mxu0 %v4272_v10  ;;  %v4315_v10 = vld [vmem:[#allocation5 + $0x1750] sm:$0xff] }
 0xaef   :  { %5023 = vmatpush1.bf16.msra.mxu1 %v4267_v48  ;;  %v3573_v48 = vld [vmem:[#allocation5 + $0x20] sm:$0xff] }
 0xaf0   :  { %5024 = vmatprep.subr.bf16.mxu1 %v4274_v0  ;;  %v3580_v0 = vld [vmem:[#allocation5 + $0x58] sm:$0xff] }
 0xaf1   :  { %4681 = vmatpush1.bf16.msra.mxu0 %v4271_v29  ;;  %v3574_v29 = vld [vmem:[#allocation5 + $0x28] sm:$0xff] }
 0xaf2   :  { %4682 = vmatprep.subr.bf16.mxu0 %v4278_v51  ;;  %v6661_v51 = vmax.f32 %v6421_v35, 0.0  ;;  %v3579_v35 = vld [vmem:[#allocation5 + $0x50] sm:$0xff] }
 0xaf3   :  { %5025 = vmatpush1.bf16.msra.mxu1 %v4273_v58  ;;  %v4333_v58 = vld [vmem:[#allocation5 + $0x17e0] sm:$0xff] }
 0xaf4   :  { %5026 = vmatprep.subr.bf16.mxu1 %v4280_v8  ;;  %v6567_v41 = vpack.c.bf16 %v6662_v9, %v6661_v51  ;;  %v3585_v8 = vld [vmem:[#allocation5 + $0x80] sm:$0xff]  ;;  %v3688_v9 = vld [vmem:[#allocation5 + $0x3b8] sm:$0xff] }
 0xaf5   :  { %4683 = vmatpush1.bf16.msra.mxu0 %v4277_v47  ;;  %v4321_v47 = vld [vmem:[#allocation5 + $0x1780] sm:$0xff] }
 0xaf6   :  { %4684 = vmatprep.subr.bf16.mxu0 %v4284_v34  ;;  %v4328_v34 = vld [vmem:[#allocation5 + $0x17b8] sm:$0xff]  ;;  %v3681_v51 = vld [vmem:[#allocation5 + $0x380] sm:$0xff] }
 0xaf7   :  { %5027 = vmatpush1.bf16.msra.mxu1 %v4279_v13  ;;  %v3598_v13 = vld [vmem:[#allocation5 + $0xe8] sm:$0xff] }
 0xaf8   :  { %5028 = vmatprep.subr.bf16.mxu1 %v4286_v4  ;;  %v3604_v4 = vld [vmem:[#allocation5 + $0x118] sm:$0xff] }
 0xaf9   :  { %4685 = vmatpush1.bf16.msra.mxu0 %v4283_v63  ;;  %v4327_v63 = vld [vmem:[#allocation5 + $0x17b0] sm:$0xff] }
 0xafa   :  { %4686 = vmatprep.subr.bf16.mxu0 %v4290_v3  ;;  %v4334_v3 = vld [vmem:[#allocation5 + $0x17e8] sm:$0xff] }
 0xafb   :  { %5029 = vmatpush1.bf16.msra.mxu1 %v4285_v52  ;;  %v3609_v52 = vld [vmem:[#allocation5 + $0x140] sm:$0xff] }
 0xafc   :  { %5030 = vmatprep.subr.bf16.mxu1 %v4292_v12  ;;  %v3616_v12 = vld [vmem:[#allocation5 + $0x178] sm:$0xff] }
 0xafd   :  { %4687 = vmatpush1.bf16.msra.mxu0 %v4289_v40  ;;  %v3592_v40 = vld [vmem:[#allocation5 + $0xb8] sm:$0xff] }
 0xafe   :  { %4688 = vmatprep.subr.bf16.mxu0 %v4296_v54  ;;  %v3591_v54 = vld [vmem:[#allocation5 + $0xb0] sm:$0xff] }
 0xaff   :  { %5031 = vmatpush1.bf16.msra.mxu1 %v4291_v21  ;;  %v3621_v21 = vld [vmem:[#allocation5 + $0x1a0] sm:$0xff] }
 0xb00   :  { %5032 = vmatprep.subr.bf16.mxu1 %v4298_v6  ;;  %v3628_v6 = vld [vmem:[#allocation5 + $0x1d8] sm:$0xff] }
 0xb01   :  { %4689 = vmatpush1.bf16.msra.mxu0 %v4295_v31  ;;  %v3603_v31 = vld [vmem:[#allocation5 + $0x110] sm:$0xff] }
 0xb02   :  { %4690 = vmatprep.subr.bf16.mxu0 %v4302_v32  ;;  %v3610_v32 = vld [vmem:[#allocation5 + $0x148] sm:$0xff] }
 0xb03   :  { %5033 = vmatpush1.bf16.msra.mxu1 %v4297_v42  ;;  %v3633_v42 = vld [vmem:[#allocation5 + $0x200] sm:$0xff] }
 0xb04   :  { %5034 = vmatprep.subr.bf16.mxu1 %v4304_v7  ;;  %v3640_v7 = vld [vmem:[#allocation5 + $0x238] sm:$0xff] }
 0xb05   :  { %4691 = vmatpush1.bf16.msra.mxu0 %v4301_v43  ;;  %v3615_v43 = vld [vmem:[#allocation5 + $0x170] sm:$0xff] }
 0xb06   :  { %4692 = vmatprep.subr.bf16.mxu0 %v4308_v45  ;;  %v3622_v45 = vld [vmem:[#allocation5 + $0x1a8] sm:$0xff] }
 0xb07   :  { %5035 = vmatpush1.bf16.msra.mxu1 %v4303_v24  ;;  %v3645_v24 = vld [vmem:[#allocation5 + $0x260] sm:$0xff] }
 0xb08   :  { %5036 = vmatprep.subr.bf16.mxu1 %v4310_v33  ;;  %v3652_v33 = vld [vmem:[#allocation5 + $0x298] sm:$0xff] }
 0xb09   :  { %4693 = vmatpush1.bf16.msra.mxu0 %v4307_v18  ;;  %v3627_v18 = vld [vmem:[#allocation5 + $0x1d0] sm:$0xff] }
 0xb0a   :  { %4694 = vmatprep.subr.bf16.mxu0 %v4314_v15  ;;  %v3634_v15 = vld [vmem:[#allocation5 + $0x208] sm:$0xff] }
 0xb0b   :  { %5037 = vmatpush1.bf16.msra.mxu1 %v4309_v27  ;;  %v3657_v27 = vld [vmem:[#allocation5 + $0x2c0] sm:$0xff] }
 0xb0c   :  { %5038 = vmatprep.subr.bf16.mxu1 %v4316_v50  ;;  %v3664_v50 = vld [vmem:[#allocation5 + $0x2f8] sm:$0xff] }
 0xb0d   :  { %4695 = vmatpush1.bf16.msra.mxu0 %v4313_v16  ;;  %v3639_v16 = vld [vmem:[#allocation5 + $0x230] sm:$0xff] }
 0xb0e   :  { %4696 = vmatprep.subr.bf16.mxu0 %v4320_v49  ;;  %v3646_v49 = vld [vmem:[#allocation5 + $0x268] sm:$0xff] }
 0xb0f   :  { %5039 = vmatpush1.bf16.msra.mxu1 %v4315_v10  ;;  %v3669_v10 = vld [vmem:[#allocation5 + $0x320] sm:$0xff] }
 0xb10   :  { %5040 = vmatprep.subr.bf16.mxu1 %v4322_v30  ;;  %v3676_v30 = vld [vmem:[#allocation5 + $0x358] sm:$0xff] }
 0xb11   :  { %4697 = vmatpush1.bf16.msra.mxu0 %v4319_v57  ;;  %v3651_v57 = vld [vmem:[#allocation5 + $0x290] sm:$0xff] }
 0xb12   :  { %4698 = vmatprep.subr.bf16.mxu0 %v4326_v46  ;;  %v3658_v46 = vld [vmem:[#allocation5 + $0x2c8] sm:$0xff] }
 0xb13   :  { %5041 = vmatpush1.bf16.msra.mxu1 %v4321_v47  ;;  %v3687_v47 = vld [vmem:[#allocation5 + $0x3b0] sm:$0xff] }
 0xb14   :  { %5042 = vmatprep.subr.bf16.mxu1 %v4328_v34  ;;  %v3694_v34 = vld [vmem:[#allocation5 + $0x3e8] sm:$0xff] }
 0xb15   :  { %4699 = vmatpush1.bf16.msra.mxu0 %v4325_v56  ;;  %v3663_v56 = vld [vmem:[#allocation5 + $0x2f0] sm:$0xff] }
 0xb16   :  { %4700 = vmatprep.subr.bf16.mxu0 %v4332_v20  ;;  %v3670_v20 = vld [vmem:[#allocation5 + $0x328] sm:$0xff] }
 0xb17   :  { %5043 = vmatpush1.bf16.msra.mxu1 %v4327_v63  ;;  %v3706_v63 = vld [vmem:[#allocation5 + $0x448] sm:$0xff] }
 0xb18   :  { %5044 = vmatprep.subr.bf16.mxu1 %v4334_v3  ;;  %v3712_v3 = vld [vmem:[#allocation5 + $0x478] sm:$0xff] }
 0xb19   :  { %4701 = vmatpush1.bf16.msra.mxu0 %v4331_v36  ;;  %v3675_v36 = vld [vmem:[#allocation5 + $0x350] sm:$0xff] }
 0xb1a   :  { %5057 = vmatprep.subr.bf16.mxu0 %v3574_v29  ;;  %v3682_v29 = vld [vmem:[#allocation5 + $0x388] sm:$0xff] }
 0xb1b   :  { %5045 = vmatpush1.bf16.msra.mxu1 %v4333_v58  ;;  %v3717_v58 = vld [vmem:[#allocation5 + $0x4a0] sm:$0xff] }
 0xb1c   :  { %4703 = vmatmul.mubr.bf16.vlgmr.msra.gmra.mrb[20].mxu0 %v6567_v41 }
 0xb1d   :  { %5058 = vmatpush1.bf16.msra.mxu0 %v3573_v48  ;;  %5089 = vmatprep.mubr.bf16.mxu0 %v6447_v62  ;;  %v3597_v62 = vld [vmem:[#allocation5 + $0xe0] sm:$0xff] }
 0xb1e   :  { %5059 = vmatprep.subr.bf16.mxu0 %v3580_v0  ;;  %5047 = vmatmul.mubr.bf16.vlgmr.msra.gmra.mrb[36].mxu1 %v6567_v41  ;;  %v3693_v48 = vld [vmem:[#allocation5 + $0x3e0] sm:$0xff]  ;;  %v3700_v0 = vld [vmem:[#allocation5 + $0x418] sm:$0xff] }
 0xb21   :  { %5060 = vmatpush1.bf16.msra.mxu0 %v3579_v35  ;;  %v3711_v35 = vld [vmem:[#allocation5 + $0x470] sm:$0xff] }
 0xb22   :  { %5061 = vmatprep.subr.bf16.mxu0 %v3586_v39  ;;  %v3718_v39 = vld [vmem:[#allocation5 + $0x4a8] sm:$0xff] }
 0xb25   :  { %5062 = vmatpush1.bf16.msra.mxu0 %v3585_v8  ;;  %v3724_v8 = vld [vmem:[#allocation5 + $0x4d8] sm:$0xff] }
 0xb26   :  { %5063 = vmatprep.subr.bf16.mxu0 %v3592_v40  ;;  %v3723_v40 = vld [vmem:[#allocation5 + $0x4d0] sm:$0xff] }
 0xb29   :  { %5064 = vmatpush1.bf16.msra.mxu0 %v3591_v54  ;;  %v3730_v54 = vld [vmem:[#allocation5 + $0x508] sm:$0xff] }
 0xb2a   :  { %5065 = vmatprep.subr.bf16.mxu0 %v3598_v13  ;;  %v3729_v13 = vld [vmem:[#allocation5 + $0x500] sm:$0xff] }
 0xb2d   :  { %5066 = vmatpush1.bf16.msra.mxu0 %v3597_v62  ;;  %v3736_v62 = vld [vmem:[#allocation5 + $0x538] sm:$0xff] }
 0xb2e   :  { %5067 = vmatprep.subr.bf16.mxu0 %v3604_v4  ;;  %v3735_v4 = vld [vmem:[#allocation5 + $0x530] sm:$0xff] }
 0xb31   :  { %5068 = vmatpush1.bf16.msra.mxu0 %v3603_v31  ;;  %v3742_v31 = vld [vmem:[#allocation5 + $0x568] sm:$0xff] }
 0xb32   :  { %5069 = vmatprep.subr.bf16.mxu0 %v3610_v32  ;;  %v3741_v32 = vld [vmem:[#allocation5 + $0x560] sm:$0xff] }
 0xb35   :  { %5070 = vmatpush1.bf16.msra.mxu0 %v3609_v52  ;;  %v3748_v52 = vld [vmem:[#allocation5 + $0x598] sm:$0xff] }
 0xb36   :  { %5071 = vmatprep.subr.bf16.mxu0 %v3616_v12  ;;  %v3747_v12 = vld [vmem:[#allocation5 + $0x590] sm:$0xff] }
 0xb39   :  { %5072 = vmatpush1.bf16.msra.mxu0 %v3615_v43  ;;  %v3754_v43 = vld [vmem:[#allocation5 + $0x5c8] sm:$0xff] }
 0xb3a   :  { %5073 = vmatprep.subr.bf16.mxu0 %v3622_v45  ;;  %v3753_v45 = vld [vmem:[#allocation5 + $0x5c0] sm:$0xff] }
 0xb3d   :  { %5074 = vmatpush1.bf16.msra.mxu0 %v3621_v21  ;;  %v3760_v21 = vld [vmem:[#allocation5 + $0x5f8] sm:$0xff] }
 0xb3e   :  { %5075 = vmatprep.subr.bf16.mxu0 %v3628_v6  ;;  %v3759_v6 = vld [vmem:[#allocation5 + $0x5f0] sm:$0xff] }
 0xb41   :  { %5076 = vmatpush1.bf16.msra.mxu0 %v3627_v18  ;;  %v3766_v18 = vld [vmem:[#allocation5 + $0x628] sm:$0xff] }
 0xb42   :  { %5077 = vmatprep.subr.bf16.mxu0 %v3634_v15  ;;  %v3765_v15 = vld [vmem:[#allocation5 + $0x620] sm:$0xff] }
 0xb45   :  { %5078 = vmatpush1.bf16.msra.mxu0 %v3633_v42  ;;  %v3772_v42 = vld [vmem:[#allocation5 + $0x658] sm:$0xff] }
 0xb46   :  { %5079 = vmatprep.subr.bf16.mxu0 %v3640_v7  ;;  %v3771_v7 = vld [vmem:[#allocation5 + $0x650] sm:$0xff] }
 0xb49   :  { %5080 = vmatpush1.bf16.msra.mxu0 %v3639_v16  ;;  %v3778_v16 = vld [vmem:[#allocation5 + $0x688] sm:$0xff] }
 0xb4a   :  { %5081 = vmatprep.subr.bf16.mxu0 %v3646_v49  ;;  %v3777_v49 = vld [vmem:[#allocation5 + $0x680] sm:$0xff] }
 0xb4d   :  { %5082 = vmatpush1.bf16.msra.mxu0 %v3645_v24  ;;  %v3784_v24 = vld [vmem:[#allocation5 + $0x6b8] sm:$0xff] }
 0xb4e   :  { %5083 = vmatprep.subr.bf16.mxu0 %v3652_v33  ;;  %v3783_v33 = vld [vmem:[#allocation5 + $0x6b0] sm:$0xff] }
 0xb51   :  { %5084 = vmatpush1.bf16.msra.mxu0 %v3651_v57  ;;  %v3790_v57 = vld [vmem:[#allocation5 + $0x6e8] sm:$0xff] }
 0xb52   :  { %5085 = vmatprep.subr.bf16.mxu0 %v3658_v46  ;;  %v3789_v46 = vld [vmem:[#allocation5 + $0x6e0] sm:$0xff] }
 0xb55   :  { %5086 = vmatpush1.bf16.msra.mxu0 %v3657_v27  ;;  %v3796_v27 = vld [vmem:[#allocation5 + $0x718] sm:$0xff] }
 0xb56   :  { %5087 = vmatprep.subr.bf16.mxu0 %v3664_v50  ;;  %v3802_v50 = vld [vmem:[#allocation5 + $0x748] sm:$0xff] }
 0xb59   :  { %5088 = vmatpush1.bf16.msra.mxu0 %v3663_v56  ;;  %v3808_v56 = vld [vmem:[#allocation5 + $0x778] sm:$0xff] }
 0xb5a   :  { %5100 = vmatprep.subr.bf16.mxu0 %v3670_v20  ;;  %v3807_v20 = vld [vmem:[#allocation5 + $0x770] sm:$0xff] }
 0xb5c   :  { %5090 = vmatmul.mubr.bf16.vlgmr.msra.gmra.mrb[24].mxu0 %v6455_v61  ;;  %v3699_v61 = vld [vmem:[#allocation5 + $0x410] sm:$0xff] }
 0xb5d   :  { %5101 = vmatpush1.bf16.msra.mxu0 %v3669_v10  ;;  %5132 = vmatprep.mubr.bf16.mxu0 %v6461_v38  ;;  %v3705_v38 = vld [vmem:[#allocation5 + $0x440] sm:$0xff]  ;;  %v3814_v10 = vld [vmem:[#allocation5 + $0x7a8] sm:$0xff] }
 0xb5e   :  { %5102 = vmatprep.subr.bf16.mxu0 %v3676_v30  ;;  %v3813_v30 = vld [vmem:[#allocation5 + $0x7a0] sm:$0xff] }
 0xb61   :  { %5103 = vmatpush1.bf16.msra.mxu0 %v3675_v36  ;;  %v3820_v36 = vld [vmem:[#allocation5 + $0x7d8] sm:$0xff] }
 0xb62   :  { %5104 = vmatprep.subr.bf16.mxu0 %v3682_v29  ;;  %v3819_v29 = vld [vmem:[#allocation5 + $0x7d0] sm:$0xff] }
 0xb65   :  { %5105 = vmatpush1.bf16.msra.mxu0 %v3681_v51  ;;  %v3826_v51 = vld [vmem:[#allocation5 + $0x808] sm:$0xff] }
 0xb66   :  { %5106 = vmatprep.subr.bf16.mxu0 %v3688_v9  ;;  %v3825_v9 = vld [vmem:[#allocation5 + $0x800] sm:$0xff] }
 0xb69   :  { %5107 = vmatpush1.bf16.msra.mxu0 %v3687_v47  ;;  %v3832_v47 = vld [vmem:[#allocation5 + $0x838] sm:$0xff] }
 0xb6a   :  { %5108 = vmatprep.subr.bf16.mxu0 %v3694_v34  ;;  %v3831_v34 = vld [vmem:[#allocation5 + $0x830] sm:$0xff] }
 0xb6d   :  { %5109 = vmatpush1.bf16.msra.mxu0 %v3693_v48  ;;  %v3838_v48 = vld [vmem:[#allocation5 + $0x868] sm:$0xff] }
 0xb6e   :  { %5110 = vmatprep.subr.bf16.mxu0 %v3700_v0  ;;  %v3837_v0 = vld [vmem:[#allocation5 + $0x860] sm:$0xff] }
 0xb71   :  { %5111 = vmatpush1.bf16.msra.mxu0 %v3699_v61  ;;  %v3844_v61 = vld [vmem:[#allocation5 + $0x898] sm:$0xff] }
 0xb72   :  { %5112 = vmatprep.subr.bf16.mxu0 %v3706_v63  ;;  %v3843_v63 = vld [vmem:[#allocation5 + $0x890] sm:$0xff] }
 0xb75   :  { %5113 = vmatpush1.bf16.msra.mxu0 %v3705_v38  ;;  %v3850_v38 = vld [vmem:[#allocation5 + $0x8c8] sm:$0xff] }
 0xb76   :  { %5114 = vmatprep.subr.bf16.mxu0 %v3712_v3  ;;  %v3849_v3 = vld [vmem:[#allocation5 + $0x8c0] sm:$0xff] }
 0xb79   :  { %5115 = vmatpush1.bf16.msra.mxu0 %v3711_v35  ;;  %v3856_v35 = vld [vmem:[#allocation5 + $0x8f8] sm:$0xff] }
 0xb7a   :  { %5116 = vmatprep.subr.bf16.mxu0 %v3718_v39  ;;  %v3855_v39 = vld [vmem:[#allocation5 + $0x8f0] sm:$0xff] }
 0xb7d   :  { %5117 = vmatpush1.bf16.msra.mxu0 %v3717_v58  ;;  %v3862_v58 = vld [vmem:[#allocation5 + $0x928] sm:$0xff] }
 0xb7e   :  { %5118 = vmatprep.subr.bf16.mxu0 %v3724_v8  ;;  %v3861_v8 = vld [vmem:[#allocation5 + $0x920] sm:$0xff] }
 0xb81   :  { %5119 = vmatpush1.bf16.msra.mxu0 %v3723_v40  ;;  %v3868_v40 = vld [vmem:[#allocation5 + $0x958] sm:$0xff] }
 0xb82   :  { %5120 = vmatprep.subr.bf16.mxu0 %v3730_v54  ;;  %v3867_v54 = vld [vmem:[#allocation5 + $0x950] sm:$0xff] }
 0xb85   :  { %5121 = vmatpush1.bf16.msra.mxu0 %v3729_v13  ;;  %v3874_v13 = vld [vmem:[#allocation5 + $0x988] sm:$0xff] }
 0xb86   :  { %5122 = vmatprep.subr.bf16.mxu0 %v3736_v62  ;;  %v3873_v62 = vld [vmem:[#allocation5 + $0x980] sm:$0xff] }
 0xb89   :  { %5123 = vmatpush1.bf16.msra.mxu0 %v3735_v4  ;;  %v3880_v4 = vld [vmem:[#allocation5 + $0x9b8] sm:$0xff] }
 0xb8a   :  { %5124 = vmatprep.subr.bf16.mxu0 %v3742_v31  ;;  %v3879_v31 = vld [vmem:[#allocation5 + $0x9b0] sm:$0xff] }
 0xb8d   :  { %5125 = vmatpush1.bf16.msra.mxu0 %v3741_v32  ;;  %v3886_v32 = vld [vmem:[#allocation5 + $0x9e8] sm:$0xff] }
 0xb8e   :  { %5126 = vmatprep.subr.bf16.mxu0 %v3748_v52  ;;  %v6578_v52 = vld [vmem:[#allocation12] sm:$0x3f] }
 0xb91   :  { %5127 = vmatpush1.bf16.msra.mxu0 %v3747_v12  ;;  %v3885_v12 = vld [vmem:[#allocation5 + $0x9e0] sm:$0xff] }
 0xb92   :  { %5128 = vmatprep.subr.bf16.mxu0 %v3754_v43  ;;  %v4346_v43 = vrot.slane %v6578_v52, %v6068_v25  ;;  %v3903_v25 = vld [vmem:[#allocation5 + $0xa70] sm:$0xff] }
 0xb95   :  { %5129 = vmatpush1.bf16.msra.mxu0 %v3753_v45  ;;  %v3891_v45 = vld [vmem:[#allocation5 + $0xa10] sm:$0xff] }
 0xb96   :  { %5130 = vmatprep.subr.bf16.mxu0 %v3760_v21 }
 0xb99   :  { %5131 = vmatpush1.bf16.msra.mxu0 %v3759_v6  ;;  %v3898_v6 = vld [vmem:[#allocation5 + $0xa48] sm:$0xff] }
 0xb9a   :  { %5143 = vmatprep.subr.bf16.mxu0 %v3766_v18 }
 0xb9c   :  { %5133 = vmatmul.mubr.bf16.vlgmr.msra.gmra.mrb[24].mxu0 %v6471_v55  ;;  %v3795_v55 = vld [vmem:[#allocation5 + $0x710] sm:$0xff] }
 0xb9d   :  { %5144 = vmatpush1.bf16.msra.mxu0 %v3765_v15  ;;  %5175 = vmatprep.mubr.bf16.mxu0 %v6477_v11  ;;  %v3801_v11 = vld [vmem:[#allocation5 + $0x740] sm:$0xff] }
 0xb9e   :  { %5145 = vmatprep.subr.bf16.mxu0 %v3772_v42 }
 0xba1   :  { %5146 = vmatpush1.bf16.msra.mxu0 %v3771_v7 }
 0xba2   :  { %5147 = vmatprep.subr.bf16.mxu0 %v3778_v16 }
 0xba5   :  { %5148 = vmatpush1.bf16.msra.mxu0 %v3777_v49 }
 0xba6   :  { %5149 = vmatprep.subr.bf16.mxu0 %v3784_v24  ;;  %v3897_v24 = vld [vmem:[#allocation5 + $0xa40] sm:$0xff] }
 0xba9   :  { %5150 = vmatpush1.bf16.msra.mxu0 %v3783_v33  ;;  %v3904_v33 = vld [vmem:[#allocation5 + $0xa78] sm:$0xff] }
 0xbaa   :  { %5151 = vmatprep.subr.bf16.mxu0 %v3790_v57  ;;  %v4350_v57 = vrot.slane %v6578_v52, %v6065_v23 }
 0xbad   :  { %5152 = vmatpush1.bf16.msra.mxu0 %v3789_v46  ;;  %v3910_v46 = vld [vmem:[#allocation5 + $0xaa8] sm:$0xff] }
 0xbae   :  { %5153 = vmatprep.subr.bf16.mxu0 %v3796_v27  ;;  %v4354_v27 = vrot.slane %v6578_v52, %v6071_v26 }
 0xbb1   :  { %5154 = vmatpush1.bf16.msra.mxu0 %v3795_v55 }
 0xbb2   :  { %5155 = vmatprep.subr.bf16.mxu0 %v3802_v50  ;;  %v3909_v50 = vld [vmem:[#allocation5 + $0xaa0] sm:$0xff] }
 0xbb5   :  { %5156 = vmatpush1.bf16.msra.mxu0 %v3801_v11 }
 0xbb6   :  { %5157 = vmatprep.subr.bf16.mxu0 %v3808_v56 }
 0xbb9   :  { %5158 = vmatpush1.bf16.msra.mxu0 %v3807_v20  ;;  %v3916_v20 = vld [vmem:[#allocation5 + $0xad8] sm:$0xff] }
 0xbba   :  { %5159 = vmatprep.subr.bf16.mxu0 %v3814_v10 }
 0xbbd   :  { %5160 = vmatpush1.bf16.msra.mxu0 %v3813_v30 }
 0xbbe   :  { %5161 = vmatprep.subr.bf16.mxu0 %v3820_v36 }
 0xbc1   :  { %5162 = vmatpush1.bf16.msra.mxu0 %v3819_v29 }
 0xbc2   :  { %5163 = vmatprep.subr.bf16.mxu0 %v3826_v51 }
 0xbc5   :  { %5164 = vmatpush1.bf16.msra.mxu0 %v3825_v9 }
 0xbc6   :  { %5165 = vmatprep.subr.bf16.mxu0 %v3832_v47  ;;  %v3915_v47 = vld [vmem:[#allocation5 + $0xad0] sm:$0xff] }
 0xbc9   :  { %5166 = vmatpush1.bf16.msra.mxu0 %v3831_v34 }
 0xbca   :  { %5167 = vmatprep.subr.bf16.mxu0 %v3838_v48  ;;  %v3922_v48 = vld [vmem:[#allocation5 + $0xb08] sm:$0xff] }
 0xbcd   :  { %5168 = vmatpush1.bf16.msra.mxu0 %v3837_v0  ;;  %v3921_v0 = vld [vmem:[#allocation5 + $0xb00] sm:$0xff] }
 0xbce   :  { %5169 = vmatprep.subr.bf16.mxu0 %v3844_v61  ;;  %v3928_v61 = vld [vmem:[#allocation5 + $0xb38] sm:$0xff] }
 0xbd1   :  { %5170 = vmatpush1.bf16.msra.mxu0 %v3843_v63 }
 0xbd2   :  { %5171 = vmatprep.subr.bf16.mxu0 %v3850_v38  ;;  %v3927_v38 = vld [vmem:[#allocation5 + $0xb30] sm:$0xff] }
 0xbd5   :  { %5172 = vmatpush1.bf16.msra.mxu0 %v3849_v3 }
 0xbd6   :  { %5173 = vmatprep.subr.bf16.mxu0 %v3856_v35  ;;  %v3934_v35 = vld [vmem:[#allocation5 + $0xb68] sm:$0xff] }
 0xbd9   :  { %5174 = vmatpush1.bf16.msra.mxu0 %v3855_v39 }
 0xbda   :  { %5186 = vmatprep.subr.bf16.mxu0 %v3862_v58 }
 0xbdc   :  { %5176 = vmatmul.mubr.bf16.vlgmr.msra.gmra.mrb[24].mxu0 %v6487_v19  ;;  %v3892_v19 = vld [vmem:[#allocation5 + $0xa18] sm:$0xff] }
 0xbdd   :  { %5187 = vmatpush1.bf16.msra.mxu0 %v3861_v8  ;;  %5218 = vmatprep.mubr.bf16.mxu0 %v6493_v1  ;;  %v4342_v1 = vrot.slane %v6578_v52, %v6062_v22  ;;  %v3933_v8 = vld [vmem:[#allocation5 + $0xb60] sm:$0xff] }
 0xbde   :  { %5188 = vmatprep.subr.bf16.mxu0 %v3868_v40  ;;  %v3940_v40 = vld [vmem:[#allocation5 + $0xb98] sm:$0xff] }
 0xbe1   :  { %5189 = vmatpush1.bf16.msra.mxu0 %v3867_v54  ;;  %v3939_v54 = vld [vmem:[#allocation5 + $0xb90] sm:$0xff] }
 0xbe2   :  { %5190 = vmatprep.subr.bf16.mxu0 %v3874_v13  ;;  %v3946_v13 = vld [vmem:[#allocation5 + $0xbc8] sm:$0xff] }
 0xbe5   :  { %5191 = vmatpush1.bf16.msra.mxu0 %v3873_v62  ;;  %v3945_v62 = vld [vmem:[#allocation5 + $0xbc0] sm:$0xff] }
 0xbe6   :  { %5192 = vmatprep.subr.bf16.mxu0 %v3880_v4  ;;  %v3952_v4 = vld [vmem:[#allocation5 + $0xbf8] sm:$0xff] }
 0xbe9   :  { %5193 = vmatpush1.bf16.msra.mxu0 %v3879_v31  ;;  %v3951_v31 = vld [vmem:[#allocation5 + $0xbf0] sm:$0xff] }
 0xbea   :  { %5194 = vmatprep.subr.bf16.mxu0 %v3886_v32  ;;  %v3958_v32 = vld [vmem:[#allocation5 + $0xc28] sm:$0xff] }
 0xbed   :  { %5195 = vmatpush1.bf16.msra.mxu0 %v3885_v12  ;;  %v3957_v12 = vld [vmem:[#allocation5 + $0xc20] sm:$0xff] }
 0xbee   :  { %5196 = vmatprep.subr.bf16.mxu0 %v3892_v19  ;;  %v3964_v19 = vld [vmem:[#allocation5 + $0xc58] sm:$0xff] }
 0xbef   :  { %v4704_v21 = vpop.f32.mrb[20].mxu0 }
 0xbf0   :  { %v5521_v18 = vadd.f32 %v4704_v21, %v4342_v1  ;;  %v4706_v15 = vpop.f32.mrb[21].mxu0  ;;  %v3976_v21 = vld [vmem:[#allocation5 + $0xcb8] sm:$0xff] }
 0xbf1   :  { %v5522_v42 = vadd.f32 %v4706_v15, %v4346_v43  ;;  %v4708_v7 = vpop.f32.mrb[22].mxu0  ;;  %5197 = vmatpush1.bf16.msra.mxu0 %v3891_v45  ;;  %v5048_v55 = vpop.f32.mrb[36].mxu1  ;;  %v3969_v45 = vld [vmem:[#allocation5 + $0xc80] sm:$0xff] }
 0xbf2   :  { %5760 = vtanh.f32 %v5521_v18  ;;  %v5523_v16 = vadd.f32 %v4708_v7, %v4342_v1  ;;  %v4710_v49 = vpop.f32.mrb[23].mxu0  ;;  %5198 = vmatprep.subr.bf16.mxu0 %v3898_v6  ;;  %v5525_v11 = vadd.f32 %v5048_v55, %v4350_v57  ;;  %v5050_v56 = vpop.f32.mrb[37].mxu1  ;;  %v3963_v1 = vld [vmem:[#allocation5 + $0xc50] sm:$0xff]  ;;  %v3982_v18 = vld [vmem:[#allocation5 + $0xce8] sm:$0xff]  ;;  %v3981_v15 = vld [vmem:[#allocation5 + $0xce0] sm:$0xff] }
 0xbf3   :  { %5762 = vtanh.f32 %v5522_v42  ;;  %v5524_v22 = vadd.f32 %v4710_v49, %v4346_v43  ;;  %v5526_v10 = vadd.f32 %v5050_v56, %v4354_v27  ;;  %v5052_v30 = vpop.f32.mrb[38].mxu1  ;;  %v3970_v43 = vld [vmem:[#allocation5 + $0xc88] sm:$0xff]  ;;  %v3975_v6 = vld [vmem:[#allocation5 + $0xcb0] sm:$0xff]  ;;  %v3988_v42 = vld [vmem:[#allocation5 + $0xd18] sm:$0xff] }
 0xbf4   :  { %5764 = vtanh.f32 %v5523_v16  ;;  %v5527_v29 = vadd.f32 %v5052_v30, %v4350_v57  ;;  %v5054_v51 = vpop.f32.mrb[39].mxu1  ;;  %v3994_v7 = vld [vmem:[#allocation5 + $0xd48] sm:$0xff]  ;;  %v4000_v16 = vld [vmem:[#allocation5 + $0xd78] sm:$0xff]  ;;  %v3999_v49 = vld [vmem:[#allocation5 + $0xd70] sm:$0xff] }
 0xbf5   :  { %5766 = vtanh.f32 %v5524_v22  ;;  %5199 = vmatpush1.bf16.msra.mxu0 %v3897_v24  ;;  %v5528_v23 = vadd.f32 %v5054_v51, %v4354_v27  ;;  %v4006_v24 = vld [vmem:[#allocation5 + $0xda8] sm:$0xff]  ;;  %v4005_v22 = vld [vmem:[#allocation5 + $0xda0] sm:$0xff]  ;;  %v4024_v27 = vld [vmem:[#allocation5 + $0xe38] sm:$0xff] }
 0xbf6   :  { %5200 = vmatprep.subr.bf16.mxu0 %v3904_v33  ;;  %5768 = vtanh.f32 %v5525_v11  ;;  %v4012_v33 = vld [vmem:[#allocation5 + $0xdd8] sm:$0xff]  ;;  %v4018_v57 = vld [vmem:[#allocation5 + $0xe08] sm:$0xff]  ;;  %v4023_v55 = vld [vmem:[#allocation5 + $0xe30] sm:$0xff] }
 0xbf7   :  { %5770 = vtanh.f32 %v5526_v10  ;;  %v4029_v11 = vld [vmem:[#allocation5 + $0xe60] sm:$0xff]  ;;  %v4036_v56 = vld [vmem:[#allocation5 + $0xe98] sm:$0xff]  ;;  %v4042_v10 = vld [vmem:[#allocation5 + $0xec8] sm:$0xff] }
 0xbf8   :  { %5772 = vtanh.f32 %v5527_v29  ;;  %v4041_v30 = vld [vmem:[#allocation5 + $0xec0] sm:$0xff]  ;;  %v4047_v29 = vld [vmem:[#allocation5 + $0xef0] sm:$0xff]  ;;  %v4054_v51 = vld [vmem:[#allocation5 + $0xf28] sm:$0xff] }
 0xbf9   :  { %5201 = vmatpush1.bf16.msra.mxu0 %v3903_v25  ;;  %5774 = vtanh.f32 %v5528_v23  ;;  %v4011_v25 = vld [vmem:[#allocation5 + $0xdd0] sm:$0xff]  ;;  %v4060_v23 = vld [vmem:[#allocation5 + $0xf58] sm:$0xff] }
 0xbfa   :  { %5202 = vmatprep.subr.bf16.mxu0 %v3910_v46  ;;  %v4017_v46 = vld [vmem:[#allocation5 + $0xe00] sm:$0xff] }
 0xbfc   :  { %v5761_v36 = vpop.eup %5760 }
 0xbfd   :  { %v5763_v9 = vpop.eup %5762  ;;  %5413 = vst [vmem:[%s6646_s9] sm:$0xff] %v5761_v36  ;;  %5203 = vmatpush1.bf16.msra.mxu0 %v3909_v50  ;;  %v4030_v50 = vld [vmem:[#allocation5 + $0xe68] sm:$0xff]  ;;  %v4048_v36 = vld [vmem:[#allocation5 + $0xef8] sm:$0xff] }
 0xbfe   :  { %v5765_v26 = vpop.eup %5764  ;;  %5414 = vst [vmem:[%s6646_s9 + $0x8] sm:$0xff] %v5763_v9  ;;  %5204 = vmatprep.subr.bf16.mxu0 %v3916_v20  ;;  %v4035_v20 = vld [vmem:[#allocation5 + $0xe90] sm:$0xff]  ;;  %v4053_v9 = vld [vmem:[#allocation5 + $0xf20] sm:$0xff] }
 0xbff   :  { %v5767_v34 = vpop.eup %5766  ;;  %5419 = vst [vmem:[%s6646_s9 + $0x30] sm:$0xff] %v5765_v26  ;;  %v4059_v26 = vld [vmem:[#allocation5 + $0xf50] sm:$0xff] }
 0xc00   :  { %5420 = vst [vmem:[%s6646_s9 + $0x38] sm:$0xff] %v5767_v34  ;;  %v5769_v63 = vpop.eup %5768  ;;  %v4065_v34 = vld [vmem:[#allocation5 + $0xf80] sm:$0xff] }
 0xc01   :  { %5205 = vmatpush1.bf16.msra.mxu0 %v3915_v47  ;;  %v5771_v3 = vpop.eup %5770  ;;  %5415 = vst [vmem:[%s6646_s9 + $0x10] sm:$0xff] %v5769_v63  ;;  %v4066_v47 = vld [vmem:[#allocation5 + $0xf88] sm:$0xff]  ;;  %v4077_v63 = vld [vmem:[#allocation5 + $0xfe0] sm:$0xff] }
 0xc02   :  { %5206 = vmatprep.subr.bf16.mxu0 %v3922_v48  ;;  %v5773_v39 = vpop.eup %5772  ;;  %5416 = vst [vmem:[%s6646_s9 + $0x18] sm:$0xff] %v5771_v3  ;;  %v4072_v48 = vld [vmem:[#allocation5 + $0xfb8] sm:$0xff]  ;;  %v4090_v3 = vld [vmem:[#allocation5 + $0x1048] sm:$0xff] }
 0xc03   :  { %v5775_v58 = vpop.eup %5774  ;;  %5421 = vst [vmem:[%s6646_s9 + $0x40] sm:$0xff] %v5773_v39  ;;  %v4095_v39 = vld [vmem:[#allocation5 + $0x1070] sm:$0xff] }
 0xc04   :  { %5422 = vst [vmem:[%s6646_s9 + $0x48] sm:$0xff] %v5775_v58  ;;  %v4102_v58 = vld [vmem:[#allocation5 + $0x10a8] sm:$0xff] }
 0xc05   :  { %5207 = vmatpush1.bf16.msra.mxu0 %v3921_v0  ;;  %v4071_v0 = vld [vmem:[#allocation5 + $0xfb0] sm:$0xff] }
 0xc06   :  { %5208 = vmatprep.subr.bf16.mxu0 %v3928_v61  ;;  %v4078_v61 = vld [vmem:[#allocation5 + $0xfe8] sm:$0xff] }
 0xc09   :  { %5209 = vmatpush1.bf16.msra.mxu0 %v3927_v38  ;;  %v4084_v38 = vld [vmem:[#allocation5 + $0x1018] sm:$0xff] }
 0xc0a   :  { %5210 = vmatprep.subr.bf16.mxu0 %v3934_v35  ;;  %v4096_v35 = vld [vmem:[#allocation5 + $0x1078] sm:$0xff] }
 0xc0d   :  { %5211 = vmatpush1.bf16.msra.mxu0 %v3933_v8  ;;  %v4101_v8 = vld [vmem:[#allocation5 + $0x10a0] sm:$0xff] }
 0xc0e   :  { %5212 = vmatprep.subr.bf16.mxu0 %v3940_v40  ;;  %v4108_v40 = vld [vmem:[#allocation5 + $0x10d8] sm:$0xff] }
 0xc11   :  { %5213 = vmatpush1.bf16.msra.mxu0 %v3939_v54  ;;  %v4107_v54 = vld [vmem:[#allocation5 + $0x10d0] sm:$0xff] }
 0xc12   :  { %5214 = vmatprep.subr.bf16.mxu0 %v3946_v13  ;;  %v4114_v13 = vld [vmem:[#allocation5 + $0x1108] sm:$0xff] }
 0xc15   :  { %5215 = vmatpush1.bf16.msra.mxu0 %v3945_v62  ;;  %v4113_v62 = vld [vmem:[#allocation5 + $0x1100] sm:$0xff] }
 0xc16   :  { %5216 = vmatprep.subr.bf16.mxu0 %v3952_v4  ;;  %v4120_v4 = vld [vmem:[#allocation5 + $0x1138] sm:$0xff] }
 0xc19   :  { %5217 = vmatpush1.bf16.msra.mxu0 %v3951_v31  ;;  %v4119_v31 = vld [vmem:[#allocation5 + $0x1130] sm:$0xff] }
 0xc1a   :  { %5229 = vmatprep.subr.bf16.mxu0 %v3958_v32  ;;  %v4126_v32 = vld [vmem:[#allocation5 + $0x1168] sm:$0xff] }
 0xc1c   :  { %5219 = vmatmul.mubr.bf16.vlgmr.msra.gmra.mrb[24].mxu0 %v6503_v53  ;;  %v3987_v53 = vld [vmem:[#allocation5 + $0xd10] sm:$0xff] }
 0xc1d   :  { %5230 = vmatpush1.bf16.msra.mxu0 %v3957_v12  ;;  %5261 = vmatprep.mubr.bf16.mxu0 %v6509_v5  ;;  %v3993_v5 = vld [vmem:[#allocation5 + $0xd40] sm:$0xff] }
 0xc1e   :  { %5231 = vmatprep.subr.bf16.mxu0 %v3964_v19  ;;  %v4125_v12 = vld [vmem:[#allocation5 + $0x1160] sm:$0xff]  ;;  %v4132_v19 = vld [vmem:[#allocation5 + $0x1198] sm:$0xff] }
 0xc21   :  { %5232 = vmatpush1.bf16.msra.mxu0 %v3963_v1  ;;  %v4131_v1 = vld [vmem:[#allocation5 + $0x1190] sm:$0xff] }
 0xc22   :  { %5233 = vmatprep.subr.bf16.mxu0 %v3970_v43  ;;  %v4138_v43 = vld [vmem:[#allocation5 + $0x11c8] sm:$0xff] }
 0xc25   :  { %5234 = vmatpush1.bf16.msra.mxu0 %v3969_v45  ;;  %v4137_v45 = vld [vmem:[#allocation5 + $0x11c0] sm:$0xff] }
 0xc26   :  { %5235 = vmatprep.subr.bf16.mxu0 %v3976_v21  ;;  %v4144_v21 = vld [vmem:[#allocation5 + $0x11f8] sm:$0xff] }
 0xc29   :  { %5236 = vmatpush1.bf16.msra.mxu0 %v3975_v6  ;;  %v4143_v6 = vld [vmem:[#allocation5 + $0x11f0] sm:$0xff] }
 0xc2a   :  { %5237 = vmatprep.subr.bf16.mxu0 %v3982_v18  ;;  %v4150_v18 = vld [vmem:[#allocation5 + $0x1228] sm:$0xff] }
 0xc2d   :  { %5238 = vmatpush1.bf16.msra.mxu0 %v3981_v15  ;;  %v4149_v15 = vld [vmem:[#allocation5 + $0x1220] sm:$0xff] }
 0xc2e   :  { %5239 = vmatprep.subr.bf16.mxu0 %v3988_v42  ;;  %v4156_v42 = vld [vmem:[#allocation5 + $0x1258] sm:$0xff] }
 0xc31   :  { %5240 = vmatpush1.bf16.msra.mxu0 %v3987_v53  ;;  %v4155_v53 = vld [vmem:[#allocation5 + $0x1250] sm:$0xff] }
 0xc32   :  { %5241 = vmatprep.subr.bf16.mxu0 %v3994_v7  ;;  %v4162_v7 = vld [vmem:[#allocation5 + $0x1288] sm:$0xff] }
 0xc35   :  { %5242 = vmatpush1.bf16.msra.mxu0 %v3993_v5  ;;  %v4161_v5 = vld [vmem:[#allocation5 + $0x1280] sm:$0xff] }
 0xc36   :  { %5243 = vmatprep.subr.bf16.mxu0 %v4000_v16  ;;  %v4168_v16 = vld [vmem:[#allocation5 + $0x12b8] sm:$0xff] }
 0xc39   :  { %5244 = vmatpush1.bf16.msra.mxu0 %v3999_v49  ;;  %v4167_v49 = vld [vmem:[#allocation5 + $0x12b0] sm:$0xff] }
 0xc3a   :  { %5245 = vmatprep.subr.bf16.mxu0 %v4006_v24  ;;  %v4174_v24 = vld [vmem:[#allocation5 + $0x12e8] sm:$0xff] }
 0xc3d   :  { %5246 = vmatpush1.bf16.msra.mxu0 %v4005_v22  ;;  %v4173_v22 = vld [vmem:[#allocation5 + $0x12e0] sm:$0xff] }
 0xc3e   :  { %5247 = vmatprep.subr.bf16.mxu0 %v4012_v33  ;;  %v4180_v33 = vld [vmem:[#allocation5 + $0x1318] sm:$0xff] }
 0xc41   :  { %5248 = vmatpush1.bf16.msra.mxu0 %v4011_v25  ;;  %v4186_v25 = vld [vmem:[#allocation5 + $0x1348] sm:$0xff] }
 0xc42   :  { %5249 = vmatprep.subr.bf16.mxu0 %v4018_v57  ;;  %v4192_v57 = vld [vmem:[#allocation5 + $0x1378] sm:$0xff] }
 0xc45   :  { %5250 = vmatpush1.bf16.msra.mxu0 %v4017_v46  ;;  %v4191_v46 = vld [vmem:[#allocation5 + $0x1370] sm:$0xff] }
 0xc46   :  { %5251 = vmatprep.subr.bf16.mxu0 %v4024_v27  ;;  %v4198_v27 = vld [vmem:[#allocation5 + $0x13a8] sm:$0xff] }
 0xc49   :  { %5252 = vmatpush1.bf16.msra.mxu0 %v4023_v55  ;;  %v4197_v55 = vld [vmem:[#allocation5 + $0x13a0] sm:$0xff] }
 0xc4a   :  { %5253 = vmatprep.subr.bf16.mxu0 %v4030_v50  ;;  %v4204_v50 = vld [vmem:[#allocation5 + $0x13d8] sm:$0xff] }
 0xc4d   :  { %5254 = vmatpush1.bf16.msra.mxu0 %v4029_v11  ;;  %v4203_v11 = vld [vmem:[#allocation5 + $0x13d0] sm:$0xff] }
 0xc4e   :  { %5255 = vmatprep.subr.bf16.mxu0 %v4036_v56  ;;  %v4210_v56 = vld [vmem:[#allocation5 + $0x1408] sm:$0xff] }
 0xc51   :  { %5256 = vmatpush1.bf16.msra.mxu0 %v4035_v20  ;;  %v4209_v20 = vld [vmem:[#allocation5 + $0x1400] sm:$0xff] }
 0xc52   :  { %5257 = vmatprep.subr.bf16.mxu0 %v4042_v10  ;;  %v4216_v10 = vld [vmem:[#allocation5 + $0x1438] sm:$0xff] }
 0xc55   :  { %5258 = vmatpush1.bf16.msra.mxu0 %v4041_v30  ;;  %v4215_v30 = vld [vmem:[#allocation5 + $0x1430] sm:$0xff] }
 0xc56   :  { %5259 = vmatprep.subr.bf16.mxu0 %v4048_v36  ;;  %v4222_v36 = vld [vmem:[#allocation5 + $0x1468] sm:$0xff] }
 0xc59   :  { %5260 = vmatpush1.bf16.msra.mxu0 %v4047_v29  ;;  %v4221_v29 = vld [vmem:[#allocation5 + $0x1460] sm:$0xff] }
 0xc5a   :  { %5272 = vmatprep.subr.bf16.mxu0 %v4054_v51  ;;  %v4228_v51 = vld [vmem:[#allocation5 + $0x1498] sm:$0xff] }
 0xc5c   :  { %5262 = vmatmul.mubr.bf16.vlgmr.msra.gmra.mrb[24].mxu0 %v6519_v59  ;;  %v4083_v59 = vld [vmem:[#allocation5 + $0x1010] sm:$0xff] }
 0xc5d   :  { %5273 = vmatpush1.bf16.msra.mxu0 %v4053_v9  ;;  %5304 = vmatprep.mubr.bf16.mxu0 %v6525_v37  ;;  %v4089_v37 = vld [vmem:[#allocation5 + $0x1040] sm:$0xff]  ;;  %v4227_v9 = vld [vmem:[#allocation5 + $0x1490] sm:$0xff] }
 0xc5e   :  { %5274 = vmatprep.subr.bf16.mxu0 %v4060_v23  ;;  %v4234_v23 = vld [vmem:[#allocation5 + $0x14c8] sm:$0xff] }
 0xc61   :  { %5275 = vmatpush1.bf16.msra.mxu0 %v4059_v26  ;;  %v4233_v26 = vld [vmem:[#allocation5 + $0x14c0] sm:$0xff] }
 0xc62   :  { %5276 = vmatprep.subr.bf16.mxu0 %v4066_v47  ;;  %v4240_v47 = vld [vmem:[#allocation5 + $0x14f8] sm:$0xff] }
 0xc65   :  { %5277 = vmatpush1.bf16.msra.mxu0 %v4065_v34  ;;  %v4239_v34 = vld [vmem:[#allocation5 + $0x14f0] sm:$0xff] }
 0xc66   :  { %5278 = vmatprep.subr.bf16.mxu0 %v4072_v48  ;;  %v4246_v48 = vld [vmem:[#allocation5 + $0x1528] sm:$0xff] }
 0xc69   :  { %5279 = vmatpush1.bf16.msra.mxu0 %v4071_v0  ;;  %v4245_v0 = vld [vmem:[#allocation5 + $0x1520] sm:$0xff] }
 0xc6a   :  { %5280 = vmatprep.subr.bf16.mxu0 %v4078_v61  ;;  %v4252_v61 = vld [vmem:[#allocation5 + $0x1558] sm:$0xff] }
 0xc6d   :  { %5281 = vmatpush1.bf16.msra.mxu0 %v4077_v63  ;;  %v4251_v63 = vld [vmem:[#allocation5 + $0x1550] sm:$0xff] }
 0xc6e   :  { %5282 = vmatprep.subr.bf16.mxu0 %v4084_v38  ;;  %v4258_v38 = vld [vmem:[#allocation5 + $0x1588] sm:$0xff] }
 0xc71   :  { %5283 = vmatpush1.bf16.msra.mxu0 %v4083_v59  ;;  %v4257_v59 = vld [vmem:[#allocation5 + $0x1580] sm:$0xff] }
 0xc72   :  { %5284 = vmatprep.subr.bf16.mxu0 %v4090_v3  ;;  %v4264_v3 = vld [vmem:[#allocation5 + $0x15b8] sm:$0xff] }
 0xc75   :  { %5285 = vmatpush1.bf16.msra.mxu0 %v4089_v37  ;;  %v4263_v37 = vld [vmem:[#allocation5 + $0x15b0] sm:$0xff] }
 0xc76   :  { %5286 = vmatprep.subr.bf16.mxu0 %v4096_v35  ;;  %v4270_v35 = vld [vmem:[#allocation5 + $0x15e8] sm:$0xff] }
 0xc79   :  { %5287 = vmatpush1.bf16.msra.mxu0 %v4095_v39  ;;  %v4269_v39 = vld [vmem:[#allocation5 + $0x15e0] sm:$0xff] }
 0xc7a   :  { %5288 = vmatprep.subr.bf16.mxu0 %v4102_v58  ;;  %v4276_v58 = vld [vmem:[#allocation5 + $0x1618] sm:$0xff] }
 0xc7d   :  { %5289 = vmatpush1.bf16.msra.mxu0 %v4101_v8  ;;  %v4282_v8 = vld [vmem:[#allocation5 + $0x1648] sm:$0xff] }
 0xc7e   :  { %5290 = vmatprep.subr.bf16.mxu0 %v4108_v40  ;;  %v4288_v40 = vld [vmem:[#allocation5 + $0x1678] sm:$0xff] }
 0xc81   :  { %5291 = vmatpush1.bf16.msra.mxu0 %v4107_v54  ;;  %v4287_v54 = vld [vmem:[#allocation5 + $0x1670] sm:$0xff] }
 0xc82   :  { %5292 = vmatprep.subr.bf16.mxu0 %v4114_v13  ;;  %v4294_v13 = vld [vmem:[#allocation5 + $0x16a8] sm:$0xff] }
 0xc85   :  { %5293 = vmatpush1.bf16.msra.mxu0 %v4113_v62  ;;  %v4293_v62 = vld [vmem:[#allocation5 + $0x16a0] sm:$0xff] }
 0xc86   :  { %5294 = vmatprep.subr.bf16.mxu0 %v4120_v4  ;;  %v4300_v4 = vld [vmem:[#allocation5 + $0x16d8] sm:$0xff] }
 0xc89   :  { %5295 = vmatpush1.bf16.msra.mxu0 %v4119_v31  ;;  %v4299_v31 = vld [vmem:[#allocation5 + $0x16d0] sm:$0xff] }
 0xc8a   :  { %5296 = vmatprep.subr.bf16.mxu0 %v4126_v32  ;;  %v4306_v32 = vld [vmem:[#allocation5 + $0x1708] sm:$0xff] }
 0xc8d   :  { %5297 = vmatpush1.bf16.msra.mxu0 %v4125_v12  ;;  %v4305_v12 = vld [vmem:[#allocation5 + $0x1700] sm:$0xff] }
 0xc8e   :  { %5298 = vmatprep.subr.bf16.mxu0 %v4132_v19  ;;  %v4312_v19 = vld [vmem:[#allocation5 + $0x1738] sm:$0xff] }
 0xc91   :  { %5299 = vmatpush1.bf16.msra.mxu0 %v4131_v1  ;;  %v4311_v1 = vld [vmem:[#allocation5 + $0x1730] sm:$0xff] }
 0xc92   :  { %5300 = vmatprep.subr.bf16.mxu0 %v4138_v43  ;;  %v4318_v43 = vld [vmem:[#allocation5 + $0x1768] sm:$0xff] }
 0xc95   :  { %5301 = vmatpush1.bf16.msra.mxu0 %v4137_v45  ;;  %v4317_v45 = vld [vmem:[#allocation5 + $0x1760] sm:$0xff] }
 0xc96   :  { %5302 = vmatprep.subr.bf16.mxu0 %v4144_v21  ;;  %v4324_v21 = vld [vmem:[#allocation5 + $0x1798] sm:$0xff] }
 0xc99   :  { %5303 = vmatpush1.bf16.msra.mxu0 %v4143_v6  ;;  %v4323_v6 = vld [vmem:[#allocation5 + $0x1790] sm:$0xff] }
 0xc9a   :  { %5315 = vmatprep.subr.bf16.mxu0 %v4150_v18  ;;  %v4330_v18 = vld [vmem:[#allocation5 + $0x17c8] sm:$0xff] }
 0xc9c   :  { %5305 = vmatmul.mubr.bf16.vlgmr.msra.gmra.mrb[24].mxu0 %v6535_v60  ;;  %v4179_v60 = vld [vmem:[#allocation5 + $0x1310] sm:$0xff] }
 0xc9d   :  { %5316 = vmatpush1.bf16.msra.mxu0 %v4149_v15  ;;  %5347 = vmatprep.mubr.bf16.mxu0 %v6541_v2  ;;  %v4185_v2 = vld [vmem:[#allocation5 + $0x1340] sm:$0xff] }
 0xc9e   :  { %5317 = vmatprep.subr.bf16.mxu0 %v4156_v42  ;;  %v4329_v15 = vld [vmem:[#allocation5 + $0x17c0] sm:$0xff]  ;;  %v4336_v42 = vld [vmem:[#allocation5 + $0x17f8] sm:$0xff] }
 0xca1   :  { %5318 = vmatpush1.bf16.msra.mxu0 %v4155_v53  ;;  %v4335_v53 = vld [vmem:[#allocation5 + $0x17f0] sm:$0xff] }
 0xca2   :  { %5319 = vmatprep.subr.bf16.mxu0 %v4162_v7  ;;  %v4358_v7 = vrot.slane %v6578_v52, %v6166_v14 }
 0xca5   :  { %5320 = vmatpush1.bf16.msra.mxu0 %v4161_v5  ;;  %v4362_v5 = vrot.slane %v6578_v52, %v6169_v17 }
 0xca6   :  { %5321 = vmatprep.subr.bf16.mxu0 %v4168_v16 }
 0xca9   :  { %5322 = vmatpush1.bf16.msra.mxu0 %v4167_v49 }
 0xcaa   :  { %5323 = vmatprep.subr.bf16.mxu0 %v4174_v24 }
 0xcad   :  { %5324 = vmatpush1.bf16.msra.mxu0 %v4173_v22 }
 0xcae   :  { %5325 = vmatprep.subr.bf16.mxu0 %v4180_v33 }
 0xcb1   :  { %5326 = vmatpush1.bf16.msra.mxu0 %v4179_v60 }
 0xcb2   :  { %5327 = vmatprep.subr.bf16.mxu0 %v4186_v25 }
 0xcb5   :  { %5328 = vmatpush1.bf16.msra.mxu0 %v4185_v2 }
 0xcb6   :  { %5329 = vmatprep.subr.bf16.mxu0 %v4192_v57 }
 0xcb9   :  { %5330 = vmatpush1.bf16.msra.mxu0 %v4191_v46 }
 0xcba   :  { %5331 = vmatprep.subr.bf16.mxu0 %v4198_v27 }
 0xcbd   :  { %5332 = vmatpush1.bf16.msra.mxu0 %v4197_v55 }
 0xcbe   :  { %5333 = vmatprep.subr.bf16.mxu0 %v4204_v50 }
 0xcc1   :  { %5334 = vmatpush1.bf16.msra.mxu0 %v4203_v11 }
 0xcc2   :  { %5335 = vmatprep.subr.bf16.mxu0 %v4210_v56 }
 0xcc5   :  { %5336 = vmatpush1.bf16.msra.mxu0 %v4209_v20 }
 0xcc6   :  { %5337 = vmatprep.subr.bf16.mxu0 %v4216_v10 }
 0xcc9   :  { %5338 = vmatpush1.bf16.msra.mxu0 %v4215_v30 }
 0xcca   :  { %5339 = vmatprep.subr.bf16.mxu0 %v4222_v36 }
 0xccd   :  { %5340 = vmatpush1.bf16.msra.mxu0 %v4221_v29 }
 0xcce   :  { %5341 = vmatprep.subr.bf16.mxu0 %v4228_v51 }
 0xcd1   :  { %5342 = vmatpush1.bf16.msra.mxu0 %v4227_v9 }
 0xcd2   :  { %5343 = vmatprep.subr.bf16.mxu0 %v4234_v23 }
 0xcd5   :  { %5344 = vmatpush1.bf16.msra.mxu0 %v4233_v26 }
 0xcd6   :  { %5345 = vmatprep.subr.bf16.mxu0 %v4240_v47 }
 0xcd9   :  { %5346 = vmatpush1.bf16.msra.mxu0 %v4239_v34 }
 0xcda   :  { %5358 = vmatprep.subr.bf16.mxu0 %v4246_v48 }
 0xcdc   :  { %5348 = vmatmul.mubr.bf16.vlgmr.msra.gmra.mrb[24].mxu0 %v6551_v44  ;;  %v4275_v44 = vld [vmem:[#allocation5 + $0x1610] sm:$0xff] }
 0xcdd   :  { %5359 = vmatpush1.bf16.msra.mxu0 %v4245_v0  ;;  %5390 = vmatprep.mubr.bf16.mxu0 %v6557_v28  ;;  %v4281_v28 = vld [vmem:[#allocation5 + $0x1640] sm:$0xff] }
 0xcde   :  { %5360 = vmatprep.subr.bf16.mxu0 %v4252_v61 }
 0xce1   :  { %5361 = vmatpush1.bf16.msra.mxu0 %v4251_v63 }
 0xce2   :  { %5362 = vmatprep.subr.bf16.mxu0 %v4258_v38 }
 0xce5   :  { %5363 = vmatpush1.bf16.msra.mxu0 %v4257_v59 }
 0xce6   :  { %5364 = vmatprep.subr.bf16.mxu0 %v4264_v3 }
 0xce9   :  { %5365 = vmatpush1.bf16.msra.mxu0 %v4263_v37 }
 0xcea   :  { %5366 = vmatprep.subr.bf16.mxu0 %v4270_v35 }
 0xced   :  { %5367 = vmatpush1.bf16.msra.mxu0 %v4269_v39 }
 0xcee   :  { %5368 = vmatprep.subr.bf16.mxu0 %v4276_v58 }
 0xcf1   :  { %5369 = vmatpush1.bf16.msra.mxu0 %v4275_v44 }
 0xcf2   :  { %5370 = vmatprep.subr.bf16.mxu0 %v4282_v8 }
 0xcf5   :  { %5371 = vmatpush1.bf16.msra.mxu0 %v4281_v28 }
 0xcf6   :  { %5372 = vmatprep.subr.bf16.mxu0 %v4288_v40 }
 0xcf9   :  { %5373 = vmatpush1.bf16.msra.mxu0 %v4287_v54 }
 0xcfa   :  { %5374 = vmatprep.subr.bf16.mxu0 %v4294_v13 }
 0xcfd   :  { %5375 = vmatpush1.bf16.msra.mxu0 %v4293_v62 }
 0xcfe   :  { %5376 = vmatprep.subr.bf16.mxu0 %v4300_v4 }
 0xd01   :  { %5377 = vmatpush1.bf16.msra.mxu0 %v4299_v31 }
 0xd02   :  { %5378 = vmatprep.subr.bf16.mxu0 %v4306_v32 }
 0xd05   :  { %5379 = vmatpush1.bf16.msra.mxu0 %v4305_v12 }
 0xd06   :  { %5380 = vmatprep.subr.bf16.mxu0 %v4312_v19 }
 0xd09   :  { %5381 = vmatpush1.bf16.msra.mxu0 %v4311_v1 }
 0xd0a   :  { %5382 = vmatprep.subr.bf16.mxu0 %v4318_v43 }
 0xd0d   :  { %5383 = vmatpush1.bf16.msra.mxu0 %v4317_v45 }
 0xd0e   :  { %5384 = vmatprep.subr.bf16.mxu0 %v4324_v21 }
 0xd11   :  { %5385 = vmatpush1.bf16.msra.mxu0 %v4323_v6 }
 0xd12   :  { %5386 = vmatprep.subr.bf16.mxu0 %v4330_v18 }
 0xd15   :  { %5387 = vmatpush1.bf16.msra.mxu0 %v4329_v15 }
 0xd16   :  { %5388 = vmatprep.subr.bf16.mxu0 %v4336_v42 }
 0xd19   :  { %5389 = vmatpush1.bf16.msra.mxu0 %v4335_v53 }
 0xd1c   :  { %5391 = vmatmul.mubr.bf16.vlgmr.msra.gmra.mrb[24].mxu0 %v6567_v41 }
 0xdef   :  { %v5392_v16 = vpop.f32.mrb[24].mxu0 }
 0xdf0   :  { %v5529_v49 = vadd.f32 %v5392_v16, %v4358_v7  ;;  %v5394_v24 = vpop.f32.mrb[25].mxu0 }
 0xdf1   :  { %v5530_v22 = vadd.f32 %v5394_v24, %v4362_v5  ;;  %v5396_v33 = vpop.f32.mrb[26].mxu0 }
 0xdf2   :  { %5776 = vtanh.f32 %v5529_v49  ;;  %v5531_v60 = vadd.f32 %v5396_v33, %v4358_v7  ;;  %v5398_v25 = vpop.f32.mrb[27].mxu0 }
 0xdf3   :  { %5778 = vtanh.f32 %v5530_v22  ;;  %v5532_v2 = vadd.f32 %v5398_v25, %v4362_v5 }
 0xdf4   :  { %5780 = vtanh.f32 %v5531_v60 }
 0xdf5   :  { %5782 = vtanh.f32 %v5532_v2 }
 0xdfc   :  { %v5777_v57 = vpop.eup %5776 }
 0xdfd   :  { %v5779_v41 = vpop.eup %5778  ;;  %5417 = vst [vmem:[%s6646_s9 + $0x20] sm:$0xff] %v5777_v57 }
 0xdfe   :  { %v5781_v14 = vpop.eup %5780  ;;  %5418 = vst [vmem:[%s6646_s9 + $0x28] sm:$0xff] %v5779_v41 }
 0xdff   :  { %v5783_v17 = vpop.eup %5782  ;;  %5423 = vst [vmem:[%s6646_s9 + $0x50] sm:$0xff] %v5781_v14 }
 0xe00   :  { %5424 = vst [vmem:[%s6646_s9 + $0x58] sm:$0xff] %v5783_v17 }
 0xe01   :  { %5429 = vsyncpa [#allocation8], 1 }
 0xe02   :  { %5430 = vsyncpa [#allocation10], 1 }
 0xe03   :  { %5431 = vsyncpa [#allocation13], 1 }
 0xe04   :  { %5432 = vsyncmov [#allocation6] }
 0xe07   :  { %s5433_s24 = vpop.sfrf %5432 }
 0xe08   :  { %p5469_p4 = scmp.ne.s32.totalorder %s5433_s24, 0 }
 0xe0a   :  { %5437 = shalt.err (%p5469_p4)  }
 0xe0b   :  { %5439 = vsyncmov [#allocation6 + $0x1] }
 0xe0e   :  { %s5440_s25 = vpop.sfrf %5439 }
 0xe0f   :  { %p5470_p5 = scmp.ne.s32.totalorder %s5440_s25, 0 }
 0xe11   :  { %5444 = shalt.err (%p5470_p5)  }
 0xe12   :  { %5446 = vsyncmov [#allocation6 + $0x2] }
 0xe15   :  { %s5447_s26 = vpop.sfrf %5446 }
 0xe16   :  { %p5471_p6 = scmp.ne.s32.totalorder %s5447_s26, 0 }
 0xe18   :  { %5451 = shalt.err (%p5471_p6)  }
 0xe19   :  { %5453 = vsyncmov [#allocation6 + $0x3] }
 0xe1c   :  { %s5454_s27 = vpop.sfrf %5453 }
 0xe1d   :  { %p5472_p7 = scmp.ne.s32.totalorder %s5454_s27, 0 }
 0xe1f   :  { %5458 = shalt.err (%p5472_p7)  }

</bundles_post_ra>
